<compile_context>
chip_gen: v5e
topology: v5e:2x2
jax: 0.10.0
libtpu: 0.0.40
codegen_flags: <defaults>
</compile_context>

<pallas_src>
import functools

import jax
import jax.numpy as jnp
from jax.experimental import pallas as pl
from jax.experimental.pallas import tpu as pltpu

_LEFT = 16  # tile-aligned interior column offset inside the bf16 conv2 halo scratch


def _round_up(v, m):
    return (v + m - 1) // m * m


def _pick_row_tile(h):
    best = 1
    for t in range(1, min(h, 32) + 1):
        if h % t == 0:
            best = t
    return best


def _vmem_limit_bytes(th, wp, cp):
    m1 = (th + 2) * wp
    est = (2 * (th + 4) * (wp + 2) * cp * 4          # double-buffered input window
           + m1 * 9 * cp * 2                          # im2col scratch (bf16)
           + (th + 2) * (_LEFT + wp + 8) * cp * 2     # halo mid scratch (bf16)
           + m1 * cp * 4                              # f32 accumulator
           + 2 * 2 * 9 * cp * cp * 2                  # weights (2 buffers, worst case)
           + 2 * th * wp * cp * 4                     # output double buffer
           + 4 * m1 * cp * 4)                         # matmul / epilogue temporaries
    return int(min(max(2 * est, 32 << 20), 96 << 20))


@functools.partial(jax.jit, static_argnames=("row_tile",))
def resnet_basic_block(x_nchw, w1p, w2p, s1p, b1p, s2p, b2p, row_tile=None):
    """Eval-mode _ResnetBasicBlock forward (stride=1, no downsample).

    x_nchw: (N, C, H, W) f32.  w*p / s*p / b*p come from `prepare_params`
    (channels padded to Cp, weights repacked to (9*Cp, Cp) bf16).
    """
    N, C, H, W = x_nchw.shape
    Cp = w1p.shape[-1]
    assert w1p.shape == (9 * Cp, Cp) and w2p.shape == (9 * Cp, Cp)
    assert C <= Cp, "input channels exceed padded channel width"

    TH = row_tile if row_tile is not None else _pick_row_tile(H)
    assert H % TH == 0, "row_tile must divide H"
    R = H // TH                      # number of row tiles per image
    Wp = _round_up(W, 8)             # sublane-aligned staged width
    M1 = (TH + 2) * Wp               # conv1 matmul M (includes 1-row halo each side)
    M2 = TH * Wp                     # conv2 matmul M

    # NCHW -> NHWC; rows padded by 2 (conv1 halo for conv2's halo rows), cols by
    # 1 each side + width alignment, channels padded to Cp.
    x_nhwc = jnp.transpose(x_nchw, (0, 2, 3, 1))
    x_p = jnp.pad(x_nhwc, ((0, 0), (2, 2), (1, Wp - W + 1), (0, Cp - C)))

    def kernel(x_hbm, w1_ref, w2_ref, s1_ref, b1_ref, s2_ref, b2_ref,
               o_ref, xbuf, sem, col_ref, mid_ref, acc_ref):
        # x_hbm  : (N, H+4, Wp+2, Cp) f32 in HBM (manual DMA)
        # w1/w2  : (9*Cp, Cp) bf16   conv taps stacked along K (row = tap*Cp+cin)
        # s*/b*  : (1, Cp) f32       folded BN scale / bias
        # o_ref  : (1, TH, Wp, Cp) f32
        # xbuf   : (2, TH+4, Wp+2, Cp) f32   double-buffered input row window
        # col_ref: (M1, 9*Cp) bf16   im2col scratch (shared by both convs)
        # mid_ref: (TH+2, _LEFT+Wp+8, Cp) bf16   conv1 output staged with halo
        # acc_ref: (M1, Cp) f32      matmul accumulator
        n = pl.program_id(0)
        ri = pl.program_id(1)
        nrt = pl.num_programs(1)
        slot = ri % 2

        # ---- manual double-buffered fetch of the (TH+4)-row input window ----
        def in_copy(tile_idx, s):
            return pltpu.make_async_copy(
                x_hbm.at[n, pl.ds(tile_idx * TH, TH + 4)],
                xbuf.at[s], sem.at[s])

        @pl.when(ri == 0)
        def _():                       # first tile of this image: no overlap
            in_copy(ri, slot).start()

        in_copy(ri, slot).wait()

        @pl.when(ri + 1 < nrt)
        def _():                       # prefetch next row tile of the SAME image
            in_copy(ri + 1, 1 - slot).start()

        # ---- conv1: im2col interleaved with per-dy (K=3*Cp) MXU partial dots
        # conv1 is computed for TH+2 output rows (1-row halo each side) so conv2
        # has real values at interior tile boundaries.
        for dy in range(3):
            for dx in range(3):
                k = dy * 3 + dx
                patch = xbuf[slot, dy:dy + TH + 2, dx:dx + Wp, :]
                col_ref[:, k * Cp:(k + 1) * Cp] = (
                    patch.reshape(M1, Cp).astype(col_ref.dtype))
            part = jnp.dot(col_ref[:, dy * 3 * Cp:(dy + 1) * 3 * Cp],
                           w1_ref[dy * 3 * Cp:(dy + 1) * 3 * Cp, :],
                           preferred_element_type=jnp.float32)
            if dy == 0:
                acc_ref[...] = part
            else:
                acc_ref[...] += part

        # bn1 (folded) + relu; dropout(p=0.2, training=False) is the identity
        h = jnp.maximum(acc_ref[...] * s1_ref[0] + b1_ref[0], 0.0)

        # ---- stage conv1 output (bf16, single cast) with a zero halo ---------
        mid_ref[0:TH + 2, _LEFT:_LEFT + Wp, :] = (
            h.reshape(TH + 2, Wp, Cp).astype(mid_ref.dtype))
        # column halo (plus the >=W width-padding strip) is always zero
        mid_ref[:, _LEFT - 1:_LEFT, :] = jnp.zeros((TH + 2, 1, Cp), mid_ref.dtype)
        mid_ref[:, _LEFT + W:_LEFT + Wp + 1, :] = (
            jnp.zeros((TH + 2, Wp - W + 1, Cp), mid_ref.dtype))
        # row halo is zero only at the image boundary (first / last row tile);
        # interior tiles keep the real conv1 halo rows computed above.
        zrow = jnp.zeros((1, Wp + 2, Cp), mid_ref.dtype)

        @pl.when(ri == 0)
        def _():
            mid_ref[0:1, _LEFT - 1:_LEFT + Wp + 1, :] = zrow

        @pl.when(ri == nrt - 1)
        def _():
            mid_ref[TH + 1:TH + 2, _LEFT - 1:_LEFT + Wp + 1, :] = zrow

        # ---- conv2: im2col from bf16 mid (no casts) + per-dy partial dots ----
        for dy in range(3):
            for dx in range(3):
                k = dy * 3 + dx
                patch = mid_ref[dy:dy + TH,
                                _LEFT - 1 + dx:_LEFT - 1 + dx + Wp, :]
                col_ref[0:M2, k * Cp:(k + 1) * Cp] = patch.reshape(M2, Cp)
            part = jnp.dot(col_ref[0:M2, dy * 3 * Cp:(dy + 1) * 3 * Cp],
                           w2_ref[dy * 3 * Cp:(dy + 1) * 3 * Cp, :],
                           preferred_element_type=jnp.float32)
            if dy == 0:
                acc_ref[0:M2, :] = part
            else:
                acc_ref[0:M2, :] += part

        # bn2 (folded) + residual (re-read from the VMEM input buffer instead of
        # keeping it live across both convs) + relu
        identity = xbuf[slot, 2:2 + TH, 1:1 + Wp, :].reshape(M2, Cp)
        out = jnp.maximum(acc_ref[0:M2, :] * s2_ref[0] + b2_ref[0] + identity, 0.0)
        o_ref[...] = out.reshape(1, TH, Wp, Cp).astype(o_ref.dtype)

    const = lambda n, r: (0, 0)
    out_nhwc = pl.pallas_call(
        kernel,
        out_shape=jax.ShapeDtypeStruct((N, H, Wp, Cp), x_nchw.dtype),
        grid_spec=pltpu.PrefetchScalarGridSpec(
            num_scalar_prefetch=0,
            grid=(N, R),
            in_specs=[
                pl.BlockSpec(memory_space=pl.ANY),                # x: manual DMA
                pl.BlockSpec((9 * Cp, Cp), const, pipeline_mode=pl.Buffered(1)),
                pl.BlockSpec((9 * Cp, Cp), const, pipeline_mode=pl.Buffered(1)),
                pl.BlockSpec((1, Cp), const, pipeline_mode=pl.Buffered(1)),
                pl.BlockSpec((1, Cp), const, pipeline_mode=pl.Buffered(1)),
                pl.BlockSpec((1, Cp), const, pipeline_mode=pl.Buffered(1)),
                pl.BlockSpec((1, Cp), const, pipeline_mode=pl.Buffered(1)),
            ],
            out_specs=pl.BlockSpec((1, TH, Wp, Cp), lambda n, r: (n, r, 0, 0)),
            scratch_shapes=[
                pltpu.VMEM((2, TH + 4, Wp + 2, Cp), jnp.float32),       # input
                pltpu.SemaphoreType.DMA((2,)),
                pltpu.VMEM((M1, 9 * Cp), jnp.bfloat16),                 # im2col
                pltpu.VMEM((TH + 2, _LEFT + Wp + 8, Cp), jnp.bfloat16), # halo mid
                pltpu.VMEM((M1, Cp), jnp.float32),                      # acc
            ],
        ),
        compiler_params=pltpu.CompilerParams(
            dimension_semantics=("parallel", "arbitrary"),
            vmem_limit_bytes=_vmem_limit_bytes(TH, Wp, Cp)),
    )(x_p, w1p, w2p, s1p, b1p, s2p, b2p)

    # drop width/channel padding, back to NCHW
    return jnp.transpose(out_nhwc[:, :, :W, :C], (0, 3, 1, 2))


def prepare_params(w1_oihw, w2_oihw, scale1, bias1, scale2, bias2, cp=None):
    """Repack PyTorch-layout conv weights + folded BN params for the kernel.

    w*_oihw: (Cout, Cin, 3, 3) f32 (nn.Conv2d layout).  scale*/bias*: (C,).
    Returns lane-dense, MXU-friendly arrays:
      w*p: (9*Cp, Cp) bf16,   s*/b*: (1, Cp) f32.
    """
    cout, cin, kh, kw = w1_oihw.shape
    assert (kh, kw) == (3, 3)
    assert w2_oihw.shape == (cout, cout, 3, 3)
    # residual add requires inplanes == planes (and stride == 1)
    assert cin == cout, "_ResnetBasicBlock residual path needs inplanes == planes"
    if cp is None:
        cp = _round_up(cout, 128)          # lane-dense channel width

    def pack(w):
        k = jnp.transpose(w, (2, 3, 1, 0))                       # (3,3,Cin,Cout)
        k = jnp.pad(k, ((0, 0), (0, 0),
                        (0, cp - w.shape[1]), (0, cp - w.shape[0])))
        return k.reshape(9 * cp, cp).astype(jnp.bfloat16)        # row = tap*Cp+cin

    def padvec(v):
        return jnp.pad(v, (0, cp - v.shape[0])).reshape(1, cp).astype(jnp.float32)

    return (pack(w1_oihw), pack(w2_oihw),
            padvec(scale1), padvec(bias1), padvec(scale2), padvec(bias2))


def fold_bn(gamma, beta, running_mean, running_var, eps=1e-5):
    scale = gamma / jnp.sqrt(running_var + eps)
    return scale, beta - running_mean * scale


def _xavier_uniform_conv(key, cout, cin, kh, kw):
    # matches nn.init.xavier_uniform_ fan computation for Conv2d weights
    fan_in, fan_out = cin * kh * kw, cout * kh * kw
    bound = float(jnp.sqrt(6.0 / (fan_in + fan_out)))
    return jax.random.uniform(key, (cout, cin, kh, kw), jnp.float32,
                              minval=-bound, maxval=bound)


def _reference(x, w1, w2, s1, b1, s2, b2):
    """Pure-JAX f32 reference of the eval-mode block (stride=1, no downsample)."""
    dn = ("NCHW", "OIHW", "NCHW")
    hi = jax.lax.Precision.HIGHEST
    y = jax.lax.conv_general_dilated(x, w1, (1, 1), ((1, 1), (1, 1)),
                                     dimension_numbers=dn, precision=hi)
    y = jnp.maximum(y * s1[None, :, None, None] + b1[None, :, None, None], 0.0)
    y = jax.lax.conv_general_dilated(y, w2, (1, 1), ((1, 1), (1, 1)),
                                     dimension_numbers=dn, precision=hi)
    y = y * s2[None, :, None, None] + b2[None, :, None, None]
    return jnp.maximum(y + x, 0.0)


if __name__ == "__main__":
    key = jax.random.PRNGKey(0)
    k_x, k_w1, k_w2, k_bn, k_x2 = jax.random.split(key, 5)

    N, C, H, W = 2, 4, 16, 16            # inplanes == planes == 4 (residual add)
    x = jax.random.normal(k_x, (N, C, H, W), jnp.float32)
    w1 = _xavier_uniform_conv(k_w1, C, C, 3, 3)   # conv1, no bias
    w2 = _xavier_uniform_conv(k_w2, C, C, 3, 3)   # conv2, no bias

    ones = jnp.ones((C,), jnp.float32)
    zeros = jnp.zeros((C,), jnp.float32)

    # 1) module-faithful init: bn1 w=1 b=0, bn2 w=0 b=0, running stats (0, 1);
    #    row_tile=8 exercises the row-tiled halo / prefetch path (2 tiles/image)
    s1, b1 = fold_bn(ones, zeros, zeros, ones)
    s2, b2 = fold_bn(zeros, zeros, zeros, ones)   # nn.init.constant_(bn2.weight, 0)
    p = prepare_params(w1, w2, s1, b1, s2, b2)
    ref = _reference(x, w1, w2, s1, b1, s2, b2)
    out = resnet_basic_block(x, *p, row_tile=8)
    jax.block_until_ready(out)
    assert out.shape == (N, C, H, W)
    assert jnp.allclose(out, ref, rtol=5e-2, atol=5e-2)

    # single-row-tile path (auto row_tile == H)
    out_single = resnet_basic_block(x, *p)
    jax.block_until_ready(out_single)
    assert jnp.allclose(out_single, ref, rtol=5e-2, atol=5e-2)

    # 2) "trained-like" BN stats so conv2/bn2 are numerically exercised too
    kg1, kg2, km, kv = jax.random.split(k_bn, 4)
    g1 = jax.random.uniform(kg1, (C,), minval=0.5, maxval=1.5)
    g2 = jax.random.uniform(kg2, (C,), minval=0.5, maxval=1.5)
    rm = 0.1 * jax.random.normal(km, (C,), jnp.float32)
    rv = jax.random.uniform(kv, (C,), minval=0.5, maxval=1.5)
    s1, b1 = fold_bn(g1, 0.1 * ones, rm, rv)
    s2, b2 = fold_bn(g2, -0.1 * ones, rm, rv)
    p2 = prepare_params(w1, w2, s1, b1, s2, b2)
    out2 = resnet_basic_block(x, *p2, row_tile=8)
    jax.block_until_ready(out2)
    assert jnp.allclose(out2, _reference(x, w1, w2, s1, b1, s2, b2),
                        rtol=5e-2, atol=5e-2)

    # 3) non-multiple-of-8 spatial size exercises width padding (Wp) and an odd
    #    row-tile size
    x3 = jax.random.normal(k_x2, (1, C, 12, 12), jnp.float32)
    out3 = resnet_basic_block(x3, *p2, row_tile=6)
    jax.block_until_ready(out3)
    assert out3.shape == (1, C, 12, 12)
    assert jnp.allclose(out3, _reference(x3, w1, w2, s1, b1, s2, b2),
                        rtol=5e-2, atol=5e-2)

    print("KERNEL_OK")
</pallas_src>

<mosaic_0001>
module attributes {stable_mosaic.version = 11 : i64} {
  func.func @kernel(%arg0: i32, %arg1: i32, %arg2: memref<2x20x18x128xf32, #tpu.memory_space<any>>, %arg3: memref<1152x128xbf16, #tpu.memory_space<vmem>>, %arg4: memref<1152x128xbf16, #tpu.memory_space<vmem>>, %arg5: memref<1x128xf32, #tpu.memory_space<vmem>>, %arg6: memref<1x128xf32, #tpu.memory_space<vmem>>, %arg7: memref<1x128xf32, #tpu.memory_space<vmem>>, %arg8: memref<1x128xf32, #tpu.memory_space<vmem>>, %arg9: memref<1x8x16x128xf32, #tpu.memory_space<vmem>>, %arg10: memref<2x12x18x128xf32, #tpu.memory_space<vmem>>, %arg11: memref<2x!tpu.dma_semaphore, #tpu.memory_space<semaphore_mem>>, %arg12: memref<160x1152xbf16, #tpu.memory_space<vmem>>, %arg13: memref<10x40x128xbf16, #tpu.memory_space<vmem>>, %arg14: memref<160x128xf32, #tpu.memory_space<vmem>>) attributes {dimension_semantics = [#tpu.dimension_semantics<parallel>, #tpu.dimension_semantics<arbitrary>], iteration_bounds = array<i64: 2, 2>, scalar_prefetch = 0 : i64, scratch_operands = 5 : i64, tpu.core_type = #tpu.core_type<tc>, window_params = [{}, {pipeline_mode = #tpu.pipeline_mode<synchronous>, transform_indices = @transform_1, window_bounds = array<i64: 1152, 128>}, {pipeline_mode = #tpu.pipeline_mode<synchronous>, transform_indices = @transform_2, window_bounds = array<i64: 1152, 128>}, {pipeline_mode = #tpu.pipeline_mode<synchronous>, transform_indices = @transform_3, window_bounds = array<i64: 1, 128>}, {pipeline_mode = #tpu.pipeline_mode<synchronous>, transform_indices = @transform_4, window_bounds = array<i64: 1, 128>}, {pipeline_mode = #tpu.pipeline_mode<synchronous>, transform_indices = @transform_5, window_bounds = array<i64: 1, 128>}, {pipeline_mode = #tpu.pipeline_mode<synchronous>, transform_indices = @transform_6, window_bounds = array<i64: 1, 128>}, {transform_indices = @transform_7, window_bounds = array<i64: 1, 8, 16, 128>}]} {
    %c2_i32 = arith.constant 2 : i32
    %c0_i32 = arith.constant 0 : i32
    %0 = arith.cmpi eq, %c2_i32, %c0_i32 : i32
    %c1_i32 = arith.constant 1 : i32
    %1 = arith.select %0, %c1_i32, %c2_i32 : i32
    %2 = arith.remsi %arg1, %1 : i32
    %c0_i32_0 = arith.constant 0 : i32
    %3 = arith.cmpi ne, %2, %c0_i32_0 : i32
    %c0_i32_1 = arith.constant 0 : i32
    %4 = arith.cmpi slt, %2, %c0_i32_1 : i32
    %c0_i32_2 = arith.constant 0 : i32
    %5 = arith.cmpi slt, %1, %c0_i32_2 : i32
    %6 = arith.xori %4, %5 : i1
    %7 = arith.andi %6, %3 : i1
    %8 = arith.addi %2, %1 : i32
    %9 = arith.select %7, %8, %2 : i32
    %c0_i32_3 = arith.constant 0 : i32
    %10 = arith.cmpi eq, %arg1, %c0_i32_3 : i32
    %11 = arith.extui %10 : i1 to i32
    %c0_i32_4 = arith.constant 0 : i32
    %12 = arith.cmpi ne, %11, %c0_i32_4 : i32
    scf.if %12 {
      %c8_i32_174 = arith.constant 8 : i32
      %184 = arith.muli %arg1, %c8_i32_174 : i32
      %c0_i32_175 = arith.constant 0 : i32
      %c0_i32_176 = arith.constant 0 : i32
      %185 = tpu.memref_slice %arg2[%arg0, %184, %c0_i32_175, %c0_i32_176] : memref<2x20x18x128xf32, #tpu.memory_space<any>> -> memref<1x12x18x128xf32, #tpu.memory_space<any>>
      %186 = tpu.memref_squeeze %185 : memref<1x12x18x128xf32, #tpu.memory_space<any>> -> memref<12x18x128xf32, #tpu.memory_space<any>>
      %c0_i32_177 = arith.constant 0 : i32
      %c0_i32_178 = arith.constant 0 : i32
      %c0_i32_179 = arith.constant 0 : i32
      %187 = tpu.memref_slice %arg10[%9, %c0_i32_177, %c0_i32_178, %c0_i32_179] : memref<2x12x18x128xf32, #tpu.memory_space<vmem>> -> memref<1x12x18x128xf32, #tpu.memory_space<vmem>>
      %188 = tpu.memref_squeeze %187 : memref<1x12x18x128xf32, #tpu.memory_space<vmem>> -> memref<12x18x128xf32, #tpu.memory_space<vmem>>
      %189 = tpu.memref_slice %arg11[%9] : memref<2x!tpu.dma_semaphore, #tpu.memory_space<semaphore_mem>> -> memref<1x!tpu.dma_semaphore, #tpu.memory_space<semaphore_mem>>
      %190 = tpu.memref_squeeze %189 : memref<1x!tpu.dma_semaphore, #tpu.memory_space<semaphore_mem>> -> memref<!tpu.dma_semaphore, #tpu.memory_space<semaphore_mem>>
      tpu.enqueue_dma source(%186 : memref<12x18x128xf32, #tpu.memory_space<any>>) target(%188 : memref<12x18x128xf32, #tpu.memory_space<vmem>>) target_semaphore(%190 : memref<!tpu.dma_semaphore, #tpu.memory_space<semaphore_mem>>)
    } else {
    }
    %c8_i32 = arith.constant 8 : i32
    %13 = arith.muli %arg1, %c8_i32 : i32
    %c0_i32_5 = arith.constant 0 : i32
    %c0_i32_6 = arith.constant 0 : i32
    %14 = tpu.memref_slice %arg2[%arg0, %13, %c0_i32_5, %c0_i32_6] : memref<2x20x18x128xf32, #tpu.memory_space<any>> -> memref<1x12x18x128xf32, #tpu.memory_space<any>>
    %15 = tpu.memref_squeeze %14 : memref<1x12x18x128xf32, #tpu.memory_space<any>> -> memref<12x18x128xf32, #tpu.memory_space<any>>
    %c0_i32_7 = arith.constant 0 : i32
    %c0_i32_8 = arith.constant 0 : i32
    %c0_i32_9 = arith.constant 0 : i32
    %16 = tpu.memref_slice %arg10[%9, %c0_i32_7, %c0_i32_8, %c0_i32_9] : memref<2x12x18x128xf32, #tpu.memory_space<vmem>> -> memref<1x12x18x128xf32, #tpu.memory_space<vmem>>
    %17 = tpu.memref_squeeze %16 : memref<1x12x18x128xf32, #tpu.memory_space<vmem>> -> memref<12x18x128xf32, #tpu.memory_space<vmem>>
    %18 = tpu.memref_slice %arg11[%9] : memref<2x!tpu.dma_semaphore, #tpu.memory_space<semaphore_mem>> -> memref<1x!tpu.dma_semaphore, #tpu.memory_space<semaphore_mem>>
    %19 = tpu.memref_squeeze %18 : memref<1x!tpu.dma_semaphore, #tpu.memory_space<semaphore_mem>> -> memref<!tpu.dma_semaphore, #tpu.memory_space<semaphore_mem>>
    tpu.wait_dma2 semaphore(%19 : memref<!tpu.dma_semaphore, #tpu.memory_space<semaphore_mem>>) src(%15 : memref<12x18x128xf32, #tpu.memory_space<any>>) dst(%17 : memref<12x18x128xf32, #tpu.memory_space<vmem>>)
    %c1_i32_10 = arith.constant 1 : i32
    %20 = arith.addi %arg1, %c1_i32_10 : i32
    %c2_i32_11 = arith.constant 2 : i32
    %21 = arith.cmpi slt, %20, %c2_i32_11 : i32
    %22 = arith.extui %21 : i1 to i32
    %c0_i32_12 = arith.constant 0 : i32
    %23 = arith.cmpi ne, %22, %c0_i32_12 : i32
    scf.if %23 {
      %c1_i32_174 = arith.constant 1 : i32
      %184 = arith.addi %arg1, %c1_i32_174 : i32
      %c1_i32_175 = arith.constant 1 : i32
      %185 = arith.subi %c1_i32_175, %9 : i32
      %c8_i32_176 = arith.constant 8 : i32
      %186 = arith.muli %184, %c8_i32_176 : i32
      %c0_i32_177 = arith.constant 0 : i32
      %c0_i32_178 = arith.constant 0 : i32
      %187 = tpu.memref_slice %arg2[%arg0, %186, %c0_i32_177, %c0_i32_178] : memref<2x20x18x128xf32, #tpu.memory_space<any>> -> memref<1x12x18x128xf32, #tpu.memory_space<any>>
      %188 = tpu.memref_squeeze %187 : memref<1x12x18x128xf32, #tpu.memory_space<any>> -> memref<12x18x128xf32, #tpu.memory_space<any>>
      %c0_i32_179 = arith.constant 0 : i32
      %c0_i32_180 = arith.constant 0 : i32
      %c0_i32_181 = arith.constant 0 : i32
      %189 = tpu.memref_slice %arg10[%185, %c0_i32_179, %c0_i32_180, %c0_i32_181] : memref<2x12x18x128xf32, #tpu.memory_space<vmem>> -> memref<1x12x18x128xf32, #tpu.memory_space<vmem>>
      %190 = tpu.memref_squeeze %189 : memref<1x12x18x128xf32, #tpu.memory_space<vmem>> -> memref<12x18x128xf32, #tpu.memory_space<vmem>>
      %191 = tpu.memref_slice %arg11[%185] : memref<2x!tpu.dma_semaphore, #tpu.memory_space<semaphore_mem>> -> memref<1x!tpu.dma_semaphore, #tpu.memory_space<semaphore_mem>>
      %192 = tpu.memref_squeeze %191 : memref<1x!tpu.dma_semaphore, #tpu.memory_space<semaphore_mem>> -> memref<!tpu.dma_semaphore, #tpu.memory_space<semaphore_mem>>
      tpu.enqueue_dma source(%188 : memref<12x18x128xf32, #tpu.memory_space<any>>) target(%190 : memref<12x18x128xf32, #tpu.memory_space<vmem>>) target_semaphore(%192 : memref<!tpu.dma_semaphore, #tpu.memory_space<semaphore_mem>>)
    } else {
    }
    %24 = arith.index_cast %9 : i32 to index
    %c0 = arith.constant 0 : index
    %c0_13 = arith.constant 0 : index
    %c0_14 = arith.constant 0 : index
    %25 = vector.load %arg10[%24, %c0, %c0_13, %c0_14] : memref<2x12x18x128xf32, #tpu.memory_space<vmem>>, vector<1x10x16x128xf32>
    %26 = vector.shape_cast %25 : vector<1x10x16x128xf32> to vector<10x16x128xf32>
    %27 = vector.shape_cast %26 : vector<10x16x128xf32> to vector<160x128xf32>
    %28 = arith.truncf %27 : vector<160x128xf32> to vector<160x128xbf16>
    %c0_15 = arith.constant 0 : index
    %c0_16 = arith.constant 0 : index
    %29 = vector.load %arg12[%c0_15, %c0_16] : memref<160x1152xbf16, #tpu.memory_space<vmem>>, vector<160x128xbf16>
    tpu.vector_store %arg12[%c0_15, %c0_16], %28 {strides = array<i32>} : memref<160x1152xbf16, #tpu.memory_space<vmem>>, vector<160x128xbf16>,
    %30 = arith.index_cast %9 : i32 to index
    %c0_17 = arith.constant 0 : index
    %c1 = arith.constant 1 : index
    %c0_18 = arith.constant 0 : index
    %31 = vector.load %arg10[%30, %c0_17, %c1, %c0_18] : memref<2x12x18x128xf32, #tpu.memory_space<vmem>>, vector<1x10x16x128xf32>
    %32 = vector.shape_cast %31 : vector<1x10x16x128xf32> to vector<10x16x128xf32>
    %33 = vector.shape_cast %32 : vector<10x16x128xf32> to vector<160x128xf32>
    %34 = arith.truncf %33 : vector<160x128xf32> to vector<160x128xbf16>
    %c0_19 = arith.constant 0 : index
    %c128 = arith.constant 128 : index
    %35 = vector.load %arg12[%c0_19, %c128] : memref<160x1152xbf16, #tpu.memory_space<vmem>>, vector<160x128xbf16>
    tpu.vector_store %arg12[%c0_19, %c128], %34 {strides = array<i32>} : memref<160x1152xbf16, #tpu.memory_space<vmem>>, vector<160x128xbf16>,
    %36 = arith.index_cast %9 : i32 to index
    %c0_20 = arith.constant 0 : index
    %c2 = arith.constant 2 : index
    %c0_21 = arith.constant 0 : index
    %37 = vector.load %arg10[%36, %c0_20, %c2, %c0_21] : memref<2x12x18x128xf32, #tpu.memory_space<vmem>>, vector<1x10x16x128xf32>
    %38 = vector.shape_cast %37 : vector<1x10x16x128xf32> to vector<10x16x128xf32>
    %39 = vector.shape_cast %38 : vector<10x16x128xf32> to vector<160x128xf32>
    %40 = arith.truncf %39 : vector<160x128xf32> to vector<160x128xbf16>
    %c0_22 = arith.constant 0 : index
    %c256 = arith.constant 256 : index
    %41 = vector.load %arg12[%c0_22, %c256] : memref<160x1152xbf16, #tpu.memory_space<vmem>>, vector<160x128xbf16>
    tpu.vector_store %arg12[%c0_22, %c256], %40 {strides = array<i32>} : memref<160x1152xbf16, #tpu.memory_space<vmem>>, vector<160x128xbf16>,
    %c0_23 = arith.constant 0 : index
    %c0_24 = arith.constant 0 : index
    %42 = vector.load %arg12[%c0_23, %c0_24] : memref<160x1152xbf16, #tpu.memory_space<vmem>>, vector<160x384xbf16>
    %c0_25 = arith.constant 0 : index
    %c0_26 = arith.constant 0 : index
    %43 = vector.load %arg3[%c0_25, %c0_26] : memref<1152x128xbf16, #tpu.memory_space<vmem>>, vector<384x128xbf16>
    %cst = arith.constant dense<0.000000e+00> : vector<160x128xf32>
    %44 = tpu.matmul %42, %43, %cst {dimension_numbers = #tpu.dot_dimension_numbers<[1], [0], [0], [1], [0, 0, 1, 1], [], []>} : vector<160x384xbf16>, vector<384x128xbf16>, vector<160x128xf32> -> vector<160x128xf32>
    %c0_27 = arith.constant 0 : index
    %c0_28 = arith.constant 0 : index
    %45 = vector.load %arg14[%c0_27, %c0_28] : memref<160x128xf32, #tpu.memory_space<vmem>>, vector<160x128xf32>
    tpu.vector_store %arg14[%c0_27, %c0_28], %44 {strides = array<i32>} : memref<160x128xf32, #tpu.memory_space<vmem>>, vector<160x128xf32>,
    %46 = arith.index_cast %9 : i32 to index
    %c1_29 = arith.constant 1 : index
    %c0_30 = arith.constant 0 : index
    %c0_31 = arith.constant 0 : index
    %47 = vector.load %arg10[%46, %c1_29, %c0_30, %c0_31] : memref<2x12x18x128xf32, #tpu.memory_space<vmem>>, vector<1x10x16x128xf32>
    %48 = vector.shape_cast %47 : vector<1x10x16x128xf32> to vector<10x16x128xf32>
    %49 = vector.shape_cast %48 : vector<10x16x128xf32> to vector<160x128xf32>
    %50 = arith.truncf %49 : vector<160x128xf32> to vector<160x128xbf16>
    %c0_32 = arith.constant 0 : index
    %c384 = arith.constant 384 : index
    %51 = vector.load %arg12[%c0_32, %c384] : memref<160x1152xbf16, #tpu.memory_space<vmem>>, vector<160x128xbf16>
    tpu.vector_store %arg12[%c0_32, %c384], %50 {strides = array<i32>} : memref<160x1152xbf16, #tpu.memory_space<vmem>>, vector<160x128xbf16>,
    %52 = arith.index_cast %9 : i32 to index
    %c1_33 = arith.constant 1 : index
    %c1_34 = arith.constant 1 : index
    %c0_35 = arith.constant 0 : index
    %53 = vector.load %arg10[%52, %c1_33, %c1_34, %c0_35] : memref<2x12x18x128xf32, #tpu.memory_space<vmem>>, vector<1x10x16x128xf32>
    %54 = vector.shape_cast %53 : vector<1x10x16x128xf32> to vector<10x16x128xf32>
    %55 = vector.shape_cast %54 : vector<10x16x128xf32> to vector<160x128xf32>
    %56 = arith.truncf %55 : vector<160x128xf32> to vector<160x128xbf16>
    %c0_36 = arith.constant 0 : index
    %c512 = arith.constant 512 : index
    %57 = vector.load %arg12[%c0_36, %c512] : memref<160x1152xbf16, #tpu.memory_space<vmem>>, vector<160x128xbf16>
    tpu.vector_store %arg12[%c0_36, %c512], %56 {strides = array<i32>} : memref<160x1152xbf16, #tpu.memory_space<vmem>>, vector<160x128xbf16>,
    %58 = arith.index_cast %9 : i32 to index
    %c1_37 = arith.constant 1 : index
    %c2_38 = arith.constant 2 : index
    %c0_39 = arith.constant 0 : index
    %59 = vector.load %arg10[%58, %c1_37, %c2_38, %c0_39] : memref<2x12x18x128xf32, #tpu.memory_space<vmem>>, vector<1x10x16x128xf32>
    %60 = vector.shape_cast %59 : vector<1x10x16x128xf32> to vector<10x16x128xf32>
    %61 = vector.shape_cast %60 : vector<10x16x128xf32> to vector<160x128xf32>
    %62 = arith.truncf %61 : vector<160x128xf32> to vector<160x128xbf16>
    %c0_40 = arith.constant 0 : index
    %c640 = arith.constant 640 : index
    %63 = vector.load %arg12[%c0_40, %c640] : memref<160x1152xbf16, #tpu.memory_space<vmem>>, vector<160x128xbf16>
    tpu.vector_store %arg12[%c0_40, %c640], %62 {strides = array<i32>} : memref<160x1152xbf16, #tpu.memory_space<vmem>>, vector<160x128xbf16>,
    %c0_41 = arith.constant 0 : index
    %c384_42 = arith.constant 384 : index
    %64 = vector.load %arg12[%c0_41, %c384_42] : memref<160x1152xbf16, #tpu.memory_space<vmem>>, vector<160x384xbf16>
    %c384_43 = arith.constant 384 : index
    %c0_44 = arith.constant 0 : index
    %65 = vector.load %arg3[%c384_43, %c0_44] : memref<1152x128xbf16, #tpu.memory_space<vmem>>, vector<384x128xbf16>
    %cst_45 = arith.constant dense<0.000000e+00> : vector<160x128xf32>
    %66 = tpu.matmul %64, %65, %cst_45 {dimension_numbers = #tpu.dot_dimension_numbers<[1], [0], [0], [1], [0, 0, 1, 1], [], []>} : vector<160x384xbf16>, vector<384x128xbf16>, vector<160x128xf32> -> vector<160x128xf32>
    %c0_46 = arith.constant 0 : index
    %c0_47 = arith.constant 0 : index
    %67 = vector.load %arg14[%c0_46, %c0_47] : memref<160x128xf32, #tpu.memory_space<vmem>>, vector<160x128xf32>
    %68 = arith.addf %67, %66 : vector<160x128xf32>
    %c0_48 = arith.constant 0 : index
    %c0_49 = arith.constant 0 : index
    %69 = vector.load %arg14[%c0_48, %c0_49] : memref<160x128xf32, #tpu.memory_space<vmem>>, vector<160x128xf32>
    tpu.vector_store %arg14[%c0_48, %c0_49], %68 {strides = array<i32>} : memref<160x128xf32, #tpu.memory_space<vmem>>, vector<160x128xf32>,
    %70 = arith.index_cast %9 : i32 to index
    %c2_50 = arith.constant 2 : index
    %c0_51 = arith.constant 0 : index
    %c0_52 = arith.constant 0 : index
    %71 = vector.load %arg10[%70, %c2_50, %c0_51, %c0_52] : memref<2x12x18x128xf32, #tpu.memory_space<vmem>>, vector<1x10x16x128xf32>
    %72 = vector.shape_cast %71 : vector<1x10x16x128xf32> to vector<10x16x128xf32>
    %73 = vector.shape_cast %72 : vector<10x16x128xf32> to vector<160x128xf32>
    %74 = arith.truncf %73 : vector<160x128xf32> to vector<160x128xbf16>
    %c0_53 = arith.constant 0 : index
    %c768 = arith.constant 768 : index
    %75 = vector.load %arg12[%c0_53, %c768] : memref<160x1152xbf16, #tpu.memory_space<vmem>>, vector<160x128xbf16>
    tpu.vector_store %arg12[%c0_53, %c768], %74 {strides = array<i32>} : memref<160x1152xbf16, #tpu.memory_space<vmem>>, vector<160x128xbf16>,
    %76 = arith.index_cast %9 : i32 to index
    %c2_54 = arith.constant 2 : index
    %c1_55 = arith.constant 1 : index
    %c0_56 = arith.constant 0 : index
    %77 = vector.load %arg10[%76, %c2_54, %c1_55, %c0_56] : memref<2x12x18x128xf32, #tpu.memory_space<vmem>>, vector<1x10x16x128xf32>
    %78 = vector.shape_cast %77 : vector<1x10x16x128xf32> to vector<10x16x128xf32>
    %79 = vector.shape_cast %78 : vector<10x16x128xf32> to vector<160x128xf32>
    %80 = arith.truncf %79 : vector<160x128xf32> to vector<160x128xbf16>
    %c0_57 = arith.constant 0 : index
    %c896 = arith.constant 896 : index
    %81 = vector.load %arg12[%c0_57, %c896] : memref<160x1152xbf16, #tpu.memory_space<vmem>>, vector<160x128xbf16>
    tpu.vector_store %arg12[%c0_57, %c896], %80 {strides = array<i32>} : memref<160x1152xbf16, #tpu.memory_space<vmem>>, vector<160x128xbf16>,
    %82 = arith.index_cast %9 : i32 to index
    %c2_58 = arith.constant 2 : index
    %c2_59 = arith.constant 2 : index
    %c0_60 = arith.constant 0 : index
    %83 = vector.load %arg10[%82, %c2_58, %c2_59, %c0_60] : memref<2x12x18x128xf32, #tpu.memory_space<vmem>>, vector<1x10x16x128xf32>
    %84 = vector.shape_cast %83 : vector<1x10x16x128xf32> to vector<10x16x128xf32>
    %85 = vector.shape_cast %84 : vector<10x16x128xf32> to vector<160x128xf32>
    %86 = arith.truncf %85 : vector<160x128xf32> to vector<160x128xbf16>
    %c0_61 = arith.constant 0 : index
    %c1024 = arith.constant 1024 : index
    %87 = vector.load %arg12[%c0_61, %c1024] : memref<160x1152xbf16, #tpu.memory_space<vmem>>, vector<160x128xbf16>
    tpu.vector_store %arg12[%c0_61, %c1024], %86 {strides = array<i32>} : memref<160x1152xbf16, #tpu.memory_space<vmem>>, vector<160x128xbf16>,
    %c0_62 = arith.constant 0 : index
    %c768_63 = arith.constant 768 : index
    %88 = vector.load %arg12[%c0_62, %c768_63] : memref<160x1152xbf16, #tpu.memory_space<vmem>>, vector<160x384xbf16>
    %c768_64 = arith.constant 768 : index
    %c0_65 = arith.constant 0 : index
    %89 = vector.load %arg3[%c768_64, %c0_65] : memref<1152x128xbf16, #tpu.memory_space<vmem>>, vector<384x128xbf16>
    %cst_66 = arith.constant dense<0.000000e+00> : vector<160x128xf32>
    %90 = tpu.matmul %88, %89, %cst_66 {dimension_numbers = #tpu.dot_dimension_numbers<[1], [0], [0], [1], [0, 0, 1, 1], [], []>} : vector<160x384xbf16>, vector<384x128xbf16>, vector<160x128xf32> -> vector<160x128xf32>
    %c0_67 = arith.constant 0 : index
    %c0_68 = arith.constant 0 : index
    %91 = vector.load %arg14[%c0_67, %c0_68] : memref<160x128xf32, #tpu.memory_space<vmem>>, vector<160x128xf32>
    %92 = arith.addf %91, %90 : vector<160x128xf32>
    %c0_69 = arith.constant 0 : index
    %c0_70 = arith.constant 0 : index
    %93 = vector.load %arg14[%c0_69, %c0_70] : memref<160x128xf32, #tpu.memory_space<vmem>>, vector<160x128xf32>
    tpu.vector_store %arg14[%c0_69, %c0_70], %92 {strides = array<i32>} : memref<160x128xf32, #tpu.memory_space<vmem>>, vector<160x128xf32>,
    %c0_71 = arith.constant 0 : index
    %c0_72 = arith.constant 0 : index
    %94 = vector.load %arg14[%c0_71, %c0_72] : memref<160x128xf32, #tpu.memory_space<vmem>>, vector<160x128xf32>
    %c0_73 = arith.constant 0 : index
    %c0_74 = arith.constant 0 : index
    %95 = vector.load %arg5[%c0_73, %c0_74] : memref<1x128xf32, #tpu.memory_space<vmem>>, vector<1x128xf32>
    %96 = vector.shape_cast %95 : vector<1x128xf32> to vector<128xf32>
    %97 = vector.shape_cast %96 : vector<128xf32> to vector<1x128xf32>
    %98 = vector.broadcast %97 : vector<1x128xf32> to vector<160x128xf32>
    %99 = arith.mulf %94, %98 : vector<160x128xf32>
    %c0_75 = arith.constant 0 : index
    %c0_76 = arith.constant 0 : index
    %100 = vector.load %arg6[%c0_75, %c0_76] : memref<1x128xf32, #tpu.memory_space<vmem>>, vector<1x128xf32>
    %101 = vector.shape_cast %100 : vector<1x128xf32> to vector<128xf32>
    %102 = vector.shape_cast %101 : vector<128xf32> to vector<1x128xf32>
    %103 = vector.broadcast %102 : vector<1x128xf32> to vector<160x128xf32>
    %104 = arith.addf %99, %103 : vector<160x128xf32>
    %cst_77 = arith.constant 0.000000e+00 : f32
    %105 = vector.broadcast %cst_77 : f32 to vector<160x128xf32>
    %106 = arith.maximumf %104, %105 : vector<160x128xf32>
    %107 = vector.shape_cast %106 : vector<160x128xf32> to vector<10x16x128xf32>
    %108 = arith.truncf %107 : vector<10x16x128xf32> to vector<10x16x128xbf16>
    %c0_78 = arith.constant 0 : index
    %c16 = arith.constant 16 : index
    %c0_79 = arith.constant 0 : index
    %109 = vector.load %arg13[%c0_78, %c16, %c0_79] : memref<10x40x128xbf16, #tpu.memory_space<vmem>>, vector<10x16x128xbf16>
    tpu.vector_store %arg13[%c0_78, %c16, %c0_79], %108 {strides = array<i32>} : memref<10x40x128xbf16, #tpu.memory_space<vmem>>, vector<10x16x128xbf16>,
    %cst_80 = arith.constant 0.000000e+00 : bf16
    %110 = vector.broadcast %cst_80 : bf16 to vector<10x1x128xbf16>
    %c0_81 = arith.constant 0 : index
    %c15 = arith.constant 15 : index
    %c0_82 = arith.constant 0 : index
    %111 = vector.load %arg13[%c0_81, %c15, %c0_82] : memref<10x40x128xbf16, #tpu.memory_space<vmem>>, vector<10x1x128xbf16>
    tpu.vector_store %arg13[%c0_81, %c15, %c0_82], %110 {strides = array<i32>} : memref<10x40x128xbf16, #tpu.memory_space<vmem>>, vector<10x1x128xbf16>,
    %cst_83 = arith.constant 0.000000e+00 : bf16
    %112 = vector.broadcast %cst_83 : bf16 to vector<10x1x128xbf16>
    %c0_84 = arith.constant 0 : index
    %c32 = arith.constant 32 : index
    %c0_85 = arith.constant 0 : index
    %113 = vector.load %arg13[%c0_84, %c32, %c0_85] : memref<10x40x128xbf16, #tpu.memory_space<vmem>>, vector<10x1x128xbf16>
    tpu.vector_store %arg13[%c0_84, %c32, %c0_85], %112 {strides = array<i32>} : memref<10x40x128xbf16, #tpu.memory_space<vmem>>, vector<10x1x128xbf16>,
    %cst_86 = arith.constant 0.000000e+00 : bf16
    %114 = vector.broadcast %cst_86 : bf16 to vector<1x18x128xbf16>
    %c0_i32_87 = arith.constant 0 : i32
    %115 = arith.cmpi eq, %arg1, %c0_i32_87 : i32
    %116 = arith.extui %115 : i1 to i32
    %c0_i32_88 = arith.constant 0 : i32
    %117 = arith.cmpi ne, %116, %c0_i32_88 : i32
    scf.if %117 {
      %c0_174 = arith.constant 0 : index
      %c15_175 = arith.constant 15 : index
      %c0_176 = arith.constant 0 : index
      %184 = vector.load %arg13[%c0_174, %c15_175, %c0_176] : memref<10x40x128xbf16, #tpu.memory_space<vmem>>, vector<1x18x128xbf16>
      tpu.vector_store %arg13[%c0_174, %c15_175, %c0_176], %114 {strides = array<i32>} : memref<10x40x128xbf16, #tpu.memory_space<vmem>>, vector<1x18x128xbf16>,
    } else {
    }
    %c1_i32_89 = arith.constant 1 : i32
    %118 = arith.cmpi eq, %arg1, %c1_i32_89 : i32
    %119 = arith.extui %118 : i1 to i32
    %c0_i32_90 = arith.constant 0 : i32
    %120 = arith.cmpi ne, %119, %c0_i32_90 : i32
    scf.if %120 {
      %c9 = arith.constant 9 : index
      %c15_174 = arith.constant 15 : index
      %c0_175 = arith.constant 0 : index
      %184 = vector.load %arg13[%c9, %c15_174, %c0_175] : memref<10x40x128xbf16, #tpu.memory_space<vmem>>, vector<1x18x128xbf16>
      tpu.vector_store %arg13[%c9, %c15_174, %c0_175], %114 {strides = array<i32>} : memref<10x40x128xbf16, #tpu.memory_space<vmem>>, vector<1x18x128xbf16>,
    } else {
    }
    %c0_91 = arith.constant 0 : index
    %c15_92 = arith.constant 15 : index
    %c0_93 = arith.constant 0 : index
    %121 = vector.load %arg13[%c0_91, %c15_92, %c0_93] : memref<10x40x128xbf16, #tpu.memory_space<vmem>>, vector<8x16x128xbf16>
    %122 = vector.shape_cast %121 : vector<8x16x128xbf16> to vector<128x128xbf16>
    %c0_94 = arith.constant 0 : index
    %c0_95 = arith.constant 0 : index
    %123 = vector.load %arg12[%c0_94, %c0_95] : memref<160x1152xbf16, #tpu.memory_space<vmem>>, vector<128x128xbf16>
    tpu.vector_store %arg12[%c0_94, %c0_95], %122 {strides = array<i32>} : memref<160x1152xbf16, #tpu.memory_space<vmem>>, vector<128x128xbf16>,
    %c0_96 = arith.constant 0 : index
    %c16_97 = arith.constant 16 : index
    %c0_98 = arith.constant 0 : index
    %124 = vector.load %arg13[%c0_96, %c16_97, %c0_98] : memref<10x40x128xbf16, #tpu.memory_space<vmem>>, vector<8x16x128xbf16>
    %125 = vector.shape_cast %124 : vector<8x16x128xbf16> to vector<128x128xbf16>
    %c0_99 = arith.constant 0 : index
    %c128_100 = arith.constant 128 : index
    %126 = vector.load %arg12[%c0_99, %c128_100] : memref<160x1152xbf16, #tpu.memory_space<vmem>>, vector<128x128xbf16>
    tpu.vector_store %arg12[%c0_99, %c128_100], %125 {strides = array<i32>} : memref<160x1152xbf16, #tpu.memory_space<vmem>>, vector<128x128xbf16>,
    %c0_101 = arith.constant 0 : index
    %c17 = arith.constant 17 : index
    %c0_102 = arith.constant 0 : index
    %127 = vector.load %arg13[%c0_101, %c17, %c0_102] : memref<10x40x128xbf16, #tpu.memory_space<vmem>>, vector<8x16x128xbf16>
    %128 = vector.shape_cast %127 : vector<8x16x128xbf16> to vector<128x128xbf16>
    %c0_103 = arith.constant 0 : index
    %c256_104 = arith.constant 256 : index
    %129 = vector.load %arg12[%c0_103, %c256_104] : memref<160x1152xbf16, #tpu.memory_space<vmem>>, vector<128x128xbf16>
    tpu.vector_store %arg12[%c0_103, %c256_104], %128 {strides = array<i32>} : memref<160x1152xbf16, #tpu.memory_space<vmem>>, vector<128x128xbf16>,
    %c0_105 = arith.constant 0 : index
    %c0_106 = arith.constant 0 : index
    %130 = vector.load %arg12[%c0_105, %c0_106] : memref<160x1152xbf16, #tpu.memory_space<vmem>>, vector<128x384xbf16>
    %c0_107 = arith.constant 0 : index
    %c0_108 = arith.constant 0 : index
    %131 = vector.load %arg4[%c0_107, %c0_108] : memref<1152x128xbf16, #tpu.memory_space<vmem>>, vector<384x128xbf16>
    %cst_109 = arith.constant dense<0.000000e+00> : vector<128x128xf32>
    %132 = tpu.matmul %130, %131, %cst_109 {dimension_numbers = #tpu.dot_dimension_numbers<[1], [0], [0], [1], [0, 0, 1, 1], [], []>} : vector<128x384xbf16>, vector<384x128xbf16>, vector<128x128xf32> -> vector<128x128xf32>
    %c0_110 = arith.constant 0 : index
    %c0_111 = arith.constant 0 : index
    %133 = vector.load %arg14[%c0_110, %c0_111] : memref<160x128xf32, #tpu.memory_space<vmem>>, vector<128x128xf32>
    tpu.vector_store %arg14[%c0_110, %c0_111], %132 {strides = array<i32>} : memref<160x128xf32, #tpu.memory_space<vmem>>, vector<128x128xf32>,
    %c1_112 = arith.constant 1 : index
    %c15_113 = arith.constant 15 : index
    %c0_114 = arith.constant 0 : index
    %134 = vector.load %arg13[%c1_112, %c15_113, %c0_114] : memref<10x40x128xbf16, #tpu.memory_space<vmem>>, vector<8x16x128xbf16>
    %135 = vector.shape_cast %134 : vector<8x16x128xbf16> to vector<128x128xbf16>
    %c0_115 = arith.constant 0 : index
    %c384_116 = arith.constant 384 : index
    %136 = vector.load %arg12[%c0_115, %c384_116] : memref<160x1152xbf16, #tpu.memory_space<vmem>>, vector<128x128xbf16>
    tpu.vector_store %arg12[%c0_115, %c384_116], %135 {strides = array<i32>} : memref<160x1152xbf16, #tpu.memory_space<vmem>>, vector<128x128xbf16>,
    %c1_117 = arith.constant 1 : index
    %c16_118 = arith.constant 16 : index
    %c0_119 = arith.constant 0 : index
    %137 = vector.load %arg13[%c1_117, %c16_118, %c0_119] : memref<10x40x128xbf16, #tpu.memory_space<vmem>>, vector<8x16x128xbf16>
    %138 = vector.shape_cast %137 : vector<8x16x128xbf16> to vector<128x128xbf16>
    %c0_120 = arith.constant 0 : index
    %c512_121 = arith.constant 512 : index
    %139 = vector.load %arg12[%c0_120, %c512_121] : memref<160x1152xbf16, #tpu.memory_space<vmem>>, vector<128x128xbf16>
    tpu.vector_store %arg12[%c0_120, %c512_121], %138 {strides = array<i32>} : memref<160x1152xbf16, #tpu.memory_space<vmem>>, vector<128x128xbf16>,
    %c1_122 = arith.constant 1 : index
    %c17_123 = arith.constant 17 : index
    %c0_124 = arith.constant 0 : index
    %140 = vector.load %arg13[%c1_122, %c17_123, %c0_124] : memref<10x40x128xbf16, #tpu.memory_space<vmem>>, vector<8x16x128xbf16>
    %141 = vector.shape_cast %140 : vector<8x16x128xbf16> to vector<128x128xbf16>
    %c0_125 = arith.constant 0 : index
    %c640_126 = arith.constant 640 : index
    %142 = vector.load %arg12[%c0_125, %c640_126] : memref<160x1152xbf16, #tpu.memory_space<vmem>>, vector<128x128xbf16>
    tpu.vector_store %arg12[%c0_125, %c640_126], %141 {strides = array<i32>} : memref<160x1152xbf16, #tpu.memory_space<vmem>>, vector<128x128xbf16>,
    %c0_127 = arith.constant 0 : index
    %c384_128 = arith.constant 384 : index
    %143 = vector.load %arg12[%c0_127, %c384_128] : memref<160x1152xbf16, #tpu.memory_space<vmem>>, vector<128x384xbf16>
    %c384_129 = arith.constant 384 : index
    %c0_130 = arith.constant 0 : index
    %144 = vector.load %arg4[%c384_129, %c0_130] : memref<1152x128xbf16, #tpu.memory_space<vmem>>, vector<384x128xbf16>
    %cst_131 = arith.constant dense<0.000000e+00> : vector<128x128xf32>
    %145 = tpu.matmul %143, %144, %cst_131 {dimension_numbers = #tpu.dot_dimension_numbers<[1], [0], [0], [1], [0, 0, 1, 1], [], []>} : vector<128x384xbf16>, vector<384x128xbf16>, vector<128x128xf32> -> vector<128x128xf32>
    %c0_132 = arith.constant 0 : index
    %c0_133 = arith.constant 0 : index
    %146 = vector.load %arg14[%c0_132, %c0_133] : memref<160x128xf32, #tpu.memory_space<vmem>>, vector<128x128xf32>
    %147 = arith.addf %146, %145 : vector<128x128xf32>
    %c0_134 = arith.constant 0 : index
    %c0_135 = arith.constant 0 : index
    %148 = vector.load %arg14[%c0_134, %c0_135] : memref<160x128xf32, #tpu.memory_space<vmem>>, vector<128x128xf32>
    tpu.vector_store %arg14[%c0_134, %c0_135], %147 {strides = array<i32>} : memref<160x128xf32, #tpu.memory_space<vmem>>, vector<128x128xf32>,
    %c2_136 = arith.constant 2 : index
    %c15_137 = arith.constant 15 : index
    %c0_138 = arith.constant 0 : index
    %149 = vector.load %arg13[%c2_136, %c15_137, %c0_138] : memref<10x40x128xbf16, #tpu.memory_space<vmem>>, vector<8x16x128xbf16>
    %150 = vector.shape_cast %149 : vector<8x16x128xbf16> to vector<128x128xbf16>
    %c0_139 = arith.constant 0 : index
    %c768_140 = arith.constant 768 : index
    %151 = vector.load %arg12[%c0_139, %c768_140] : memref<160x1152xbf16, #tpu.memory_space<vmem>>, vector<128x128xbf16>
    tpu.vector_store %arg12[%c0_139, %c768_140], %150 {strides = array<i32>} : memref<160x1152xbf16, #tpu.memory_space<vmem>>, vector<128x128xbf16>,
    %c2_141 = arith.constant 2 : index
    %c16_142 = arith.constant 16 : index
    %c0_143 = arith.constant 0 : index
    %152 = vector.load %arg13[%c2_141, %c16_142, %c0_143] : memref<10x40x128xbf16, #tpu.memory_space<vmem>>, vector<8x16x128xbf16>
    %153 = vector.shape_cast %152 : vector<8x16x128xbf16> to vector<128x128xbf16>
    %c0_144 = arith.constant 0 : index
    %c896_145 = arith.constant 896 : index
    %154 = vector.load %arg12[%c0_144, %c896_145] : memref<160x1152xbf16, #tpu.memory_space<vmem>>, vector<128x128xbf16>
    tpu.vector_store %arg12[%c0_144, %c896_145], %153 {strides = array<i32>} : memref<160x1152xbf16, #tpu.memory_space<vmem>>, vector<128x128xbf16>,
    %c2_146 = arith.constant 2 : index
    %c17_147 = arith.constant 17 : index
    %c0_148 = arith.constant 0 : index
    %155 = vector.load %arg13[%c2_146, %c17_147, %c0_148] : memref<10x40x128xbf16, #tpu.memory_space<vmem>>, vector<8x16x128xbf16>
    %156 = vector.shape_cast %155 : vector<8x16x128xbf16> to vector<128x128xbf16>
    %c0_149 = arith.constant 0 : index
    %c1024_150 = arith.constant 1024 : index
    %157 = vector.load %arg12[%c0_149, %c1024_150] : memref<160x1152xbf16, #tpu.memory_space<vmem>>, vector<128x128xbf16>
    tpu.vector_store %arg12[%c0_149, %c1024_150], %156 {strides = array<i32>} : memref<160x1152xbf16, #tpu.memory_space<vmem>>, vector<128x128xbf16>,
    %c0_151 = arith.constant 0 : index
    %c768_152 = arith.constant 768 : index
    %158 = vector.load %arg12[%c0_151, %c768_152] : memref<160x1152xbf16, #tpu.memory_space<vmem>>, vector<128x384xbf16>
    %c768_153 = arith.constant 768 : index
    %c0_154 = arith.constant 0 : index
    %159 = vector.load %arg4[%c768_153, %c0_154] : memref<1152x128xbf16, #tpu.memory_space<vmem>>, vector<384x128xbf16>
    %cst_155 = arith.constant dense<0.000000e+00> : vector<128x128xf32>
    %160 = tpu.matmul %158, %159, %cst_155 {dimension_numbers = #tpu.dot_dimension_numbers<[1], [0], [0], [1], [0, 0, 1, 1], [], []>} : vector<128x384xbf16>, vector<384x128xbf16>, vector<128x128xf32> -> vector<128x128xf32>
    %c0_156 = arith.constant 0 : index
    %c0_157 = arith.constant 0 : index
    %161 = vector.load %arg14[%c0_156, %c0_157] : memref<160x128xf32, #tpu.memory_space<vmem>>, vector<128x128xf32>
    %162 = arith.addf %161, %160 : vector<128x128xf32>
    %c0_158 = arith.constant 0 : index
    %c0_159 = arith.constant 0 : index
    %163 = vector.load %arg14[%c0_158, %c0_159] : memref<160x128xf32, #tpu.memory_space<vmem>>, vector<128x128xf32>
    tpu.vector_store %arg14[%c0_158, %c0_159], %162 {strides = array<i32>} : memref<160x128xf32, #tpu.memory_space<vmem>>, vector<128x128xf32>,
    %164 = arith.index_cast %9 : i32 to index
    %c2_160 = arith.constant 2 : index
    %c1_161 = arith.constant 1 : index
    %c0_162 = arith.constant 0 : index
    %165 = vector.load %arg10[%164, %c2_160, %c1_161, %c0_162] : memref<2x12x18x128xf32, #tpu.memory_space<vmem>>, vector<1x8x16x128xf32>
    %166 = vector.shape_cast %165 : vector<1x8x16x128xf32> to vector<8x16x128xf32>
    %167 = vector.shape_cast %166 : vector<8x16x128xf32> to vector<128x128xf32>
    %c0_163 = arith.constant 0 : index
    %c0_164 = arith.constant 0 : index
    %168 = vector.load %arg14[%c0_163, %c0_164] : memref<160x128xf32, #tpu.memory_space<vmem>>, vector<128x128xf32>
    %c0_165 = arith.constant 0 : index
    %c0_166 = arith.constant 0 : index
    %169 = vector.load %arg7[%c0_165, %c0_166] : memref<1x128xf32, #tpu.memory_space<vmem>>, vector<1x128xf32>
    %170 = vector.shape_cast %169 : vector<1x128xf32> to vector<128xf32>
    %171 = vector.shape_cast %170 : vector<128xf32> to vector<1x128xf32>
    %172 = vector.broadcast %171 : vector<1x128xf32> to vector<128x128xf32>
    %173 = arith.mulf %168, %172 : vector<128x128xf32>
    %c0_167 = arith.constant 0 : index
    %c0_168 = arith.constant 0 : index
    %174 = vector.load %arg8[%c0_167, %c0_168] : memref<1x128xf32, #tpu.memory_space<vmem>>, vector<1x128xf32>
    %175 = vector.shape_cast %174 : vector<1x128xf32> to vector<128xf32>
    %176 = vector.shape_cast %175 : vector<128xf32> to vector<1x128xf32>
    %177 = vector.broadcast %176 : vector<1x128xf32> to vector<128x128xf32>
    %178 = arith.addf %173, %177 : vector<128x128xf32>
    %179 = arith.addf %178, %167 : vector<128x128xf32>
    %cst_169 = arith.constant 0.000000e+00 : f32
    %180 = vector.broadcast %cst_169 : f32 to vector<128x128xf32>
    %181 = arith.maximumf %179, %180 : vector<128x128xf32>
    %182 = vector.shape_cast %181 : vector<128x128xf32> to vector<1x8x16x128xf32>
    %c0_170 = arith.constant 0 : index
    %c0_171 = arith.constant 0 : index
    %c0_172 = arith.constant 0 : index
    %c0_173 = arith.constant 0 : index
    %183 = vector.load %arg9[%c0_170, %c0_171, %c0_172, %c0_173] : memref<1x8x16x128xf32, #tpu.memory_space<vmem>>, vector<1x8x16x128xf32>
    tpu.vector_store %arg9[%c0_170, %c0_171, %c0_172, %c0_173], %182 {strides = array<i32>} : memref<1x8x16x128xf32, #tpu.memory_space<vmem>>, vector<1x8x16x128xf32>,
    return
  }
  func.func @transform_1(%arg0: i32, %arg1: i32) -> (i32, i32) {
    %c0_i32 = arith.constant 0 : i32
    %c0_i32_0 = arith.constant 0 : i32
    %c0_i32_1 = arith.constant 0 : i32
    return %c0_i32, %c0_i32_0 : i32, i32
  }
  func.func @transform_2(%arg0: i32, %arg1: i32) -> (i32, i32) {
    %c0_i32 = arith.constant 0 : i32
    %c0_i32_0 = arith.constant 0 : i32
    %c0_i32_1 = arith.constant 0 : i32
    return %c0_i32, %c0_i32_0 : i32, i32
  }
  func.func @transform_3(%arg0: i32, %arg1: i32) -> (i32, i32) {
    %c0_i32 = arith.constant 0 : i32
    %c0_i32_0 = arith.constant 0 : i32
    %c0_i32_1 = arith.constant 0 : i32
    return %c0_i32, %c0_i32_0 : i32, i32
  }
  func.func @transform_4(%arg0: i32, %arg1: i32) -> (i32, i32) {
    %c0_i32 = arith.constant 0 : i32
    %c0_i32_0 = arith.constant 0 : i32
    %c0_i32_1 = arith.constant 0 : i32
    return %c0_i32, %c0_i32_0 : i32, i32
  }
  func.func @transform_5(%arg0: i32, %arg1: i32) -> (i32, i32) {
    %c0_i32 = arith.constant 0 : i32
    %c0_i32_0 = arith.constant 0 : i32
    %c0_i32_1 = arith.constant 0 : i32
    return %c0_i32, %c0_i32_0 : i32, i32
  }
  func.func @transform_6(%arg0: i32, %arg1: i32) -> (i32, i32) {
    %c0_i32 = arith.constant 0 : i32
    %c0_i32_0 = arith.constant 0 : i32
    %c0_i32_1 = arith.constant 0 : i32
    return %c0_i32, %c0_i32_0 : i32, i32
  }
  func.func @transform_7(%arg0: i32, %arg1: i32) -> (i32, i32, i32, i32) {
    %c0_i32 = arith.constant 0 : i32
    %c0_i32_0 = arith.constant 0 : i32
    %c0_i32_1 = arith.constant 0 : i32
    return %arg0, %arg1, %c0_i32, %c0_i32_0 : i32, i32, i32, i32
  }
}

</mosaic_0001>

<bundles_post_ra>
// kernel: resnet_basic_block.1
= control target key start
LH: loop header
LB: loop body
LE: loop exit
PB: predicated region body
PF: predicated region fallthrough
CT: control target
= control target key end

     0   :  { %s8472_s24 = smov 0   ;;  %s8474_s25 = smov 0   ;;  %s9855_s0 = inlined_call_operand.vmem [shape: f32[2,20,18,128], index: 0, kind: input, shape index: {}]   ;;  %s9856_s1 = inlined_call_operand.vmem [shape: bf16[1152,128], index: 1, kind: input, shape index: {}]   ;;  %s9857_s2 = inlined_call_operand.vmem [shape: bf16[1152,128], index: 2, kind: input, shape index: {}]   ;;  %s9858_s3 = inlined_call_operand.vmem [shape: f32[1,128], index: 3, kind: input, shape index: {}]   ;;  %s9859_s4 = inlined_call_operand.vmem [shape: f32[1,128], index: 4, kind: input, shape index: {}]   ;;  %s9860_s5 = inlined_call_operand.vmem [shape: f32[1,128], index: 5, kind: input, shape index: {}]   ;;  %s9861_s6 = inlined_call_operand.vmem [shape: f32[1,128], index: 6, kind: input, shape index: {}]   ;;  %s9862_s7 = inlined_call_operand.vmem [shape: f32[2,16,16,128], index: 7, kind: output, shape index: {}]  }
   0x1   :  { %s8476_s26 = smov 0   ;;  %s8478_s27 = smov 0  }
   0x2   :  { %s8480_s28 = smov 0  }
   0x3 LB: > { %s26_s29 = sadd.s32 1, %s8420_s26  ;;  %s29_s30 = sadd.s32 1, %s8424_s27  ;;  %s8428_s28 = sphi %s8480_s28, %s17_s28   ;;  %s8424_s27 = sphi %s8478_s27, %s9874_s27   ;;  %s8420_s26 = sphi %s8476_s26, %s9873_s26   ;;  %s8416_s25 = sphi %s8474_s25, %s9872_s25   ;;  %s8412_s24 = sphi %s8472_s24, %s9871_s24  }
   0x4   : > { %p27_p0 = scmp.ge.s32.totalorder %s26_s29, 2  ;;  %p6516_p1 = scmp.ge.s32.totalorder %s8428_s28, 1 }
   0x5   : > { %p217_p2 = scmp.lt.s32.totalorder %s8428_s28, 5 }
   0x6   : > { %s9876_s29 = smov (%p27_p0, %s26_s29), 0  ;;  %s9878_s30 = smov (!%p27_p0, %s29_s30), %s8424_s27 }
   0x7   : > { %p218_p3 = pnand %p6516_p1, %p217_p2  ;;  %p31_p4 = scmp.ge.s32.totalorder %s9878_s30, 2 }
   0x8   : > { %s6517_s8 = sshll.u32 (!%p218_p3), %s8412_s24, 3  ;;  %p248_p5 = scmp.lt.s32.totalorder (!%p218_p3), %s8416_s25, 1 }
   0x9   : > { %s9880_s30 = smov (%p31_p4, %s9878_s30), 0  ;;  %221 = sbr.rel (%p218_p3) target bundleno = 1374 (0x55e), region = 44 }
   0xa   : > { %p250_p6 = scmp.lt.s32.totalorder (!%p218_p3), %s6517_s8, 15  ;;  %p259_p7 = scmp.lt.s32.totalorder (!%p218_p3), %s8412_s24, 0 }
   0xb   : > { %s260_s11 = ssub.s32 (!%p218_p3), 0, %s8412_s24  ;;  %p6524_p9 = scmp.ne.s32.totalorder (!%p218_p3), %s8412_s24, 0 }
   0xc   : > { %s6521_s13 = smin.u32 (!%p218_p3), %s8412_s24, %s260_s11 }
   0xd   : > { %s262_s15 = sand.u32 (!%p218_p3), 1, %s6521_s13  }
   0xe   : > { %s249_s9 = scalar_select %p248_p5, %s8416_s25, 1 }
   0xf   : > { %s9882_s8 = smov (!%p250_p6, %s6517_s8), 15  ;;  %s263_s17 = ssub.s32 0, %s262_s15 }
  0x10   : > { %s6519_s10 = sshll.u32 %s249_s9, 5  ;;  %s6518_s12 = sshll.u32 %s9882_s8, 1 }
  0x11   : > { %s254_s14 = sadd.s32 %s6519_s10, %s6518_s12  ;;  %s9884_s17 = smov (!%p259_p7, %s263_s17), %s262_s15 }
  0x12   : > { %s6520_s16 = sshll.u32 %s254_s14, 3  ;;  %p6523_p8 = scmp.lt.s32.totalorder %s9884_s17, 0 }
  0x13   : > { %s8515_s20 = scalar_lea.vmem %s9862_s7, %s6520_s16  ;;  %s269_s21 = sadd.s32 2, %s9884_s17 }
  0x14   : > { %s9886_s21 = smov (!%p6523_p8, %s269_s21), %s9884_s17  ;;  %274 = sbr.rel (%p6524_p9) target bundleno = 64 (0x40), region = 48 }
  0x15   : > { %s6526_s22 = smul.u32 (!%p6524_p9), 192, %s8412_s24  ;;  %s282_s14 = scalar_lea.sflag (!%p6524_p9), [#allocation3], %s9886_s21 }
  0x16   : > { %s277_s23 = smul.u32 (!%p6524_p9), 480, %s8416_s25 }
  0x17   : > { %s280_s8 = smul.u32 (!%p6524_p9), 288, %s9886_s21 }
  0x18   : > { %s278_s9 = sadd.s32 (!%p6524_p9), %s6526_s22, %s277_s23 }
  0x19   : > { %s8528_s12 = scalar_lea.vmem %s9855_s0, %s278_s9  ;;  %s8533_s13 = scalar_lea.vmem [#allocation2], %s280_s8 }
  0x1a   : > { %v295_v0 = vld [vmem:[%s8528_s12] sm:$0xff]  ;;  %v297_v1 = vld [vmem:[%s8528_s12 + $0x8] sm:$0xff]  ;;  %v299_v2 = vld [vmem:[%s8528_s12 + $0x18] sm:$0xff] }
  0x1b   : > { %296 = vst [vmem:[%s8533_s13] sm:$0xff] %v295_v0  ;;  %v301_v3 = vld [vmem:[%s8528_s12 + $0x20] sm:$0xff]  ;;  %v303_v4 = vld [vmem:[%s8528_s12 + $0x30] sm:$0xff]  ;;  %v305_v5 = vld [vmem:[%s8528_s12 + $0x38] sm:$0xff] }
  0x1c   : > { %298 = vst [vmem:[%s8533_s13 + $0x8] sm:$0xff] %v297_v1  ;;  %v307_v6 = vld [vmem:[%s8528_s12 + $0x48] sm:$0xff]  ;;  %v309_v7 = vld [vmem:[%s8528_s12 + $0x50] sm:$0xff]  ;;  %v311_v8 = vld [vmem:[%s8528_s12 + $0x60] sm:$0xff] }
  0x1d   : > { %300 = vst [vmem:[%s8533_s13 + $0x18] sm:$0xff] %v299_v2  ;;  %v313_v9 = vld [vmem:[%s8528_s12 + $0x68] sm:$0xff]  ;;  %v315_v10 = vld [vmem:[%s8528_s12 + $0x78] sm:$0xff]  ;;  %v317_v11 = vld [vmem:[%s8528_s12 + $0x80] sm:$0xff] }
  0x1e   : > { %302 = vst [vmem:[%s8533_s13 + $0x20] sm:$0xff] %v301_v3  ;;  %v319_v12 = vld [vmem:[%s8528_s12 + $0x90] sm:$0xff]  ;;  %v321_v13 = vld [vmem:[%s8528_s12 + $0x98] sm:$0xff]  ;;  %v323_v14 = vld [vmem:[%s8528_s12 + $0xa8] sm:$0xff] }
  0x1f   : > { %304 = vst [vmem:[%s8533_s13 + $0x30] sm:$0xff] %v303_v4  ;;  %v325_v15 = vld [vmem:[%s8528_s12 + $0xb0] sm:$0xff]  ;;  %v327_v16 = vld [vmem:[%s8528_s12 + $0xc0] sm:$0xff]  ;;  %v329_v17 = vld [vmem:[%s8528_s12 + $0xc8] sm:$0xff] }
  0x20   : > { %306 = vst [vmem:[%s8533_s13 + $0x38] sm:$0xff] %v305_v5  ;;  %v331_v18 = vld [vmem:[%s8528_s12 + $0xd8] sm:$0xff]  ;;  %v333_v19 = vld [vmem:[%s8528_s12 + $0xe0] sm:$0xff]  ;;  %v335_v20 = vld [vmem:[%s8528_s12 + $0xf0] sm:$0xff] }
  0x21   : > { %308 = vst [vmem:[%s8533_s13 + $0x48] sm:$0xff] %v307_v6  ;;  %v337_v21 = vld [vmem:[%s8528_s12 + $0xf8] sm:$0xff]  ;;  %v339_v22 = vld [vmem:[%s8528_s12 + $0x108] sm:$0xff]  ;;  %v341_v23 = vld [vmem:[%s8528_s12 + $0x110] sm:$0xff] }
  0x22   : > { %310 = vst [vmem:[%s8533_s13 + $0x50] sm:$0xff] %v309_v7  ;;  %v6527_v24 = vld [vmem:[%s8528_s12 + $0x10] sm:$0x3]  ;;  %v6529_v25 = vld [vmem:[%s8528_s12 + $0x28] sm:$0x3] }
  0x23   : > { %312 = vst [vmem:[%s8533_s13 + $0x60] sm:$0xff] %v311_v8  ;;  %v6531_v26 = vld [vmem:[%s8528_s12 + $0x40] sm:$0x3]  ;;  %v6533_v27 = vld [vmem:[%s8528_s12 + $0x58] sm:$0x3] }
  0x24   : > { %314 = vst [vmem:[%s8533_s13 + $0x68] sm:$0xff] %v313_v9  ;;  %v6535_v28 = vld [vmem:[%s8528_s12 + $0x70] sm:$0x3]  ;;  %v6537_v29 = vld [vmem:[%s8528_s12 + $0x88] sm:$0x3] }
  0x25   : > { %316 = vst [vmem:[%s8533_s13 + $0x78] sm:$0xff] %v315_v10  ;;  %v6539_v30 = vld [vmem:[%s8528_s12 + $0xa0] sm:$0x3]  ;;  %v6541_v31 = vld [vmem:[%s8528_s12 + $0xb8] sm:$0x3] }
  0x26   : > { %318 = vst [vmem:[%s8533_s13 + $0x80] sm:$0xff] %v317_v11  ;;  %v6543_v32 = vld [vmem:[%s8528_s12 + $0xd0] sm:$0x3]  ;;  %v6545_v33 = vld [vmem:[%s8528_s12 + $0xe8] sm:$0x3] }
  0x27   : > { %320 = vst [vmem:[%s8533_s13 + $0x90] sm:$0xff] %v319_v12  ;;  %v6547_v34 = vld [vmem:[%s8528_s12 + $0x100] sm:$0x3]  ;;  %v6549_v35 = vld [vmem:[%s8528_s12 + $0x118] sm:$0x3] }
  0x28   : > { %322 = vst [vmem:[%s8533_s13 + $0x98] sm:$0xff] %v321_v13 }
  0x29   : > { %324 = vst [vmem:[%s8533_s13 + $0xa8] sm:$0xff] %v323_v14 }
  0x2a   : > { %326 = vst [vmem:[%s8533_s13 + $0xb0] sm:$0xff] %v325_v15 }
  0x2b   : > { %328 = vst [vmem:[%s8533_s13 + $0xc0] sm:$0xff] %v327_v16 }
  0x2c   : > { %330 = vst [vmem:[%s8533_s13 + $0xc8] sm:$0xff] %v329_v17 }
  0x2d   : > { %332 = vst [vmem:[%s8533_s13 + $0xd8] sm:$0xff] %v331_v18 }
  0x2e   : > { %334 = vst [vmem:[%s8533_s13 + $0xe0] sm:$0xff] %v333_v19 }
  0x2f   : > { %336 = vst [vmem:[%s8533_s13 + $0xf0] sm:$0xff] %v335_v20 }
  0x30   : > { %338 = vst [vmem:[%s8533_s13 + $0xf8] sm:$0xff] %v337_v21 }
  0x31   : > { %340 = vst [vmem:[%s8533_s13 + $0x108] sm:$0xff] %v339_v22 }
  0x32   : > { %342 = vst [vmem:[%s8533_s13 + $0x110] sm:$0xff] %v341_v23 }
  0x33   : > { %6528 = vst [vmem:[%s8533_s13 + $0x10] sm:$0x3] %v6527_v24 }
  0x34   : > { %6530 = vst [vmem:[%s8533_s13 + $0x28] sm:$0x3] %v6529_v25 }
  0x35   : > { %6532 = vst [vmem:[%s8533_s13 + $0x40] sm:$0x3] %v6531_v26 }
  0x36   : > { %6534 = vst [vmem:[%s8533_s13 + $0x58] sm:$0x3] %v6533_v27 }
  0x37   : > { %6536 = vst [vmem:[%s8533_s13 + $0x70] sm:$0x3] %v6535_v28 }
  0x38   : > { %6538 = vst [vmem:[%s8533_s13 + $0x88] sm:$0x3] %v6537_v29 }
  0x39   : > { %6540 = vst [vmem:[%s8533_s13 + $0xa0] sm:$0x3] %v6539_v30 }
  0x3a   : > { %6542 = vst [vmem:[%s8533_s13 + $0xb8] sm:$0x3] %v6541_v31 }
  0x3b   : > { %6544 = vst [vmem:[%s8533_s13 + $0xd0] sm:$0x3] %v6543_v32 }
  0x3c   : > { %6546 = vst [vmem:[%s8533_s13 + $0xe8] sm:$0x3] %v6545_v33 }
  0x3d   : > { %6548 = vst [vmem:[%s8533_s13 + $0x100] sm:$0x3] %v6547_v34 }
  0x3e   : > { %6550 = vst [vmem:[%s8533_s13 + $0x118] sm:$0x3] %v6549_v35 }
  0x3f   : > { %380 = vsyncadd %s282_s14, 3456 }
  0x40 PF: > { %s381_s15 = scalar_lea.sflag [#allocation3], %s9886_s21 }
  0x41   : > { %8408 = dma.done.wait %s381_s15, 3456 }
  0x42   : > { %8409 = vsyncadd %s381_s15, 4294963840  ;;  %s386_s16 = sadd.s32 1, %s8412_s24 }
  0x43   : > { %p6551_p10 = scmp.ge.s32.totalorder %s386_s16, 2 }
  0x44   : > { %s391_s17 = ssub.s32 (!%p6551_p10), 1, %s9886_s21  ;;  %s6444_s18 = smul.u32 (!%p6551_p10), 192, %s8412_s24 }
  0x45   : > { %390 = sbr.rel (%p6551_p10) target bundleno = 112 (0x70), region = 74  ;;  %s399_s11 = scalar_lea.sflag (!%p6551_p10), [#allocation3], %s391_s17 }
  0x46   : > { %s6445_s19 = smul.u32 (!%p6551_p10), 480, %s8416_s25 }
  0x47   : > { %s397_s22 = smul.u32 (!%p6551_p10), 288, %s391_s17 }
  0x48   : > { %s6446_s23 = sadd.s32 (!%p6551_p10), %s6445_s19, %s6444_s18 }
  0x49   : > { %s8615_s10 = scalar_lea.vmem (!%p6551_p10), %s9855_s0, %s6446_s23  ;;  %s8620_s25 = scalar_lea.vmem (!%p6551_p10), [#allocation2], %s397_s22 }
  0x4a   : > { %v6552_v36 = vld [vmem:[%s8615_s10 + $0xc0] sm:$0xff]  ;;  %v6553_v37 = vld [vmem:[%s8615_s10 + $0xc8] sm:$0xff]  ;;  %v6554_v38 = vld [vmem:[%s8615_s10 + $0xd8] sm:$0xff] }
  0x4b   : > { %413 = vst [vmem:[%s8620_s25] sm:$0xff] %v6552_v36  ;;  %v6555_v39 = vld [vmem:[%s8615_s10 + $0xe0] sm:$0xff]  ;;  %v6556_v40 = vld [vmem:[%s8615_s10 + $0xf0] sm:$0xff]  ;;  %v6557_v41 = vld [vmem:[%s8615_s10 + $0xf8] sm:$0xff] }
  0x4c   : > { %415 = vst [vmem:[%s8620_s25 + $0x8] sm:$0xff] %v6553_v37  ;;  %v6558_v42 = vld [vmem:[%s8615_s10 + $0x108] sm:$0xff]  ;;  %v6559_v43 = vld [vmem:[%s8615_s10 + $0x110] sm:$0xff]  ;;  %v6560_v44 = vld [vmem:[%s8615_s10 + $0x120] sm:$0xff] }
  0x4d   : > { %417 = vst [vmem:[%s8620_s25 + $0x18] sm:$0xff] %v6554_v38  ;;  %v6561_v45 = vld [vmem:[%s8615_s10 + $0x128] sm:$0xff]  ;;  %v6562_v46 = vld [vmem:[%s8615_s10 + $0x138] sm:$0xff]  ;;  %v6563_v47 = vld [vmem:[%s8615_s10 + $0x140] sm:$0xff] }
  0x4e   : > { %419 = vst [vmem:[%s8620_s25 + $0x20] sm:$0xff] %v6555_v39  ;;  %v6564_v48 = vld [vmem:[%s8615_s10 + $0x150] sm:$0xff]  ;;  %v6565_v49 = vld [vmem:[%s8615_s10 + $0x158] sm:$0xff]  ;;  %v6566_v50 = vld [vmem:[%s8615_s10 + $0x168] sm:$0xff] }
  0x4f   : > { %421 = vst [vmem:[%s8620_s25 + $0x30] sm:$0xff] %v6556_v40  ;;  %v6567_v51 = vld [vmem:[%s8615_s10 + $0x170] sm:$0xff]  ;;  %v6568_v52 = vld [vmem:[%s8615_s10 + $0x180] sm:$0xff]  ;;  %v6569_v53 = vld [vmem:[%s8615_s10 + $0x188] sm:$0xff] }
  0x50   : > { %423 = vst [vmem:[%s8620_s25 + $0x38] sm:$0xff] %v6557_v41  ;;  %v6570_v54 = vld [vmem:[%s8615_s10 + $0x198] sm:$0xff]  ;;  %v6571_v55 = vld [vmem:[%s8615_s10 + $0x1a0] sm:$0xff]  ;;  %v6572_v56 = vld [vmem:[%s8615_s10 + $0x1b0] sm:$0xff] }
  0x51   : > { %425 = vst [vmem:[%s8620_s25 + $0x48] sm:$0xff] %v6558_v42  ;;  %v6573_v57 = vld [vmem:[%s8615_s10 + $0x1b8] sm:$0xff]  ;;  %v6574_v58 = vld [vmem:[%s8615_s10 + $0x1c8] sm:$0xff]  ;;  %v6575_v59 = vld [vmem:[%s8615_s10 + $0x1d0] sm:$0xff] }
  0x52   : > { %427 = vst [vmem:[%s8620_s25 + $0x50] sm:$0xff] %v6559_v43  ;;  %v6576_v60 = vld [vmem:[%s8615_s10 + $0xd0] sm:$0x3]  ;;  %v6578_v61 = vld [vmem:[%s8615_s10 + $0xe8] sm:$0x3] }
  0x53   : > { %429 = vst [vmem:[%s8620_s25 + $0x60] sm:$0xff] %v6560_v44  ;;  %v6580_v62 = vld [vmem:[%s8615_s10 + $0x100] sm:$0x3]  ;;  %v6582_v63 = vld [vmem:[%s8615_s10 + $0x118] sm:$0x3] }
  0x54   : > { %431 = vst [vmem:[%s8620_s25 + $0x68] sm:$0xff] %v6561_v45  ;;  %v6584_v0 = vld [vmem:[%s8615_s10 + $0x130] sm:$0x3]  ;;  %v6586_v1 = vld [vmem:[%s8615_s10 + $0x148] sm:$0x3] }
  0x55   : > { %433 = vst [vmem:[%s8620_s25 + $0x78] sm:$0xff] %v6562_v46  ;;  %v6588_v2 = vld [vmem:[%s8615_s10 + $0x160] sm:$0x3]  ;;  %v6590_v3 = vld [vmem:[%s8615_s10 + $0x178] sm:$0x3] }
  0x56   : > { %435 = vst [vmem:[%s8620_s25 + $0x80] sm:$0xff] %v6563_v47  ;;  %v6592_v4 = vld [vmem:[%s8615_s10 + $0x190] sm:$0x3]  ;;  %v6594_v5 = vld [vmem:[%s8615_s10 + $0x1a8] sm:$0x3] }
  0x57   : > { %437 = vst [vmem:[%s8620_s25 + $0x90] sm:$0xff] %v6564_v48  ;;  %v6596_v6 = vld [vmem:[%s8615_s10 + $0x1c0] sm:$0x3]  ;;  %v6598_v7 = vld [vmem:[%s8615_s10 + $0x1d8] sm:$0x3] }
  0x58   : > { %439 = vst [vmem:[%s8620_s25 + $0x98] sm:$0xff] %v6565_v49 }
  0x59   : > { %441 = vst [vmem:[%s8620_s25 + $0xa8] sm:$0xff] %v6566_v50 }
  0x5a   : > { %443 = vst [vmem:[%s8620_s25 + $0xb0] sm:$0xff] %v6567_v51 }
  0x5b   : > { %445 = vst [vmem:[%s8620_s25 + $0xc0] sm:$0xff] %v6568_v52 }
  0x5c   : > { %447 = vst [vmem:[%s8620_s25 + $0xc8] sm:$0xff] %v6569_v53 }
  0x5d   : > { %449 = vst [vmem:[%s8620_s25 + $0xd8] sm:$0xff] %v6570_v54 }
  0x5e   : > { %451 = vst [vmem:[%s8620_s25 + $0xe0] sm:$0xff] %v6571_v55 }
  0x5f   : > { %453 = vst [vmem:[%s8620_s25 + $0xf0] sm:$0xff] %v6572_v56 }
  0x60   : > { %455 = vst [vmem:[%s8620_s25 + $0xf8] sm:$0xff] %v6573_v57 }
  0x61   : > { %457 = vst [vmem:[%s8620_s25 + $0x108] sm:$0xff] %v6574_v58 }
  0x62   : > { %459 = vst [vmem:[%s8620_s25 + $0x110] sm:$0xff] %v6575_v59 }
  0x63   : > { %6577 = vst [vmem:[%s8620_s25 + $0x10] sm:$0x3] %v6576_v60 }
  0x64   : > { %6579 = vst [vmem:[%s8620_s25 + $0x28] sm:$0x3] %v6578_v61 }
  0x65   : > { %6581 = vst [vmem:[%s8620_s25 + $0x40] sm:$0x3] %v6580_v62 }
  0x66   : > { %6583 = vst [vmem:[%s8620_s25 + $0x58] sm:$0x3] %v6582_v63 }
  0x67   : > { %6585 = vst [vmem:[%s8620_s25 + $0x70] sm:$0x3] %v6584_v0 }
  0x68   : > { %6587 = vst [vmem:[%s8620_s25 + $0x88] sm:$0x3] %v6586_v1 }
  0x69   : > { %6589 = vst [vmem:[%s8620_s25 + $0xa0] sm:$0x3] %v6588_v2 }
  0x6a   : > { %6591 = vst [vmem:[%s8620_s25 + $0xb8] sm:$0x3] %v6590_v3 }
  0x6b   : > { %6593 = vst [vmem:[%s8620_s25 + $0xd0] sm:$0x3] %v6592_v4 }
  0x6c   : > { %6595 = vst [vmem:[%s8620_s25 + $0xe8] sm:$0x3] %v6594_v5 }
  0x6d   : > { %6597 = vst [vmem:[%s8620_s25 + $0x100] sm:$0x3] %v6596_v6 }
  0x6e   : > { %6599 = vst [vmem:[%s8620_s25 + $0x118] sm:$0x3] %v6598_v7 }
  0x6f   : > { %497 = vsyncadd %s399_s11, 3456 }
  0x70 PF: > { %v8027_v8 = vld [vmem:[%s9856_s1 + $0x38] sm:$0xff]  ;;  %s498_s16 = smul.u32 288, %s9886_s21  ;;  %v8026_v10 = vld [vmem:[%s9856_s1 + $0x30] sm:$0xff]  ;;  %v8025_v12 = vld [vmem:[%s9856_s1 + $0x28] sm:$0xff]  ;;  %vm3019_vm0 = vcmask 1043459   ;;  %vm3052_vm3 = vcmask 1040384  }
  0x71   : > { %v8035_v9 = vld [vmem:[%s9856_s1 + $0x78] sm:$0xff]  ;;  %1072 = vmatpush.bf16.msra.mxu0 %v8027_v8  ;;  %v8034_v11 = vld [vmem:[%s9856_s1 + $0x70] sm:$0xff]  ;;  %v8033_v13 = vld [vmem:[%s9856_s1 + $0x68] sm:$0xff]  ;;  %vm3020_vm1 = vsmask.f32 7950 }
  0x72   : > { %1131 = vmatpush.bf16.msra.mxu1 %v8035_v9  ;;  %8326 = vmatpush.bf16.msra.mxu3 %v8035_v9  ;;  %s8712_s21 = scalar_lea.vmem [#allocation2], %s498_s16  ;;  %v8721_v20 = vld [vmem:[%s9856_s1 + $0xb8] sm:$0xff]  ;;  %v8024_v29 = vld [vmem:[%s9856_s1 + $0x20] sm:$0xff]  ;;  %v8743_v35 = vld [vmem:[%s9856_s1 + $0xb0] sm:$0xff]  ;;  %vm3053_vm4 = vsmask.f32 256 }
  0x73   : > { %8334 = vmatpush.bf16.msra.mxu2 %v8721_v20  ;;  %v8032_v30 = vld [vmem:[%s9856_s1 + $0x60] sm:$0xff]  ;;  %v8023_v33 = vld [vmem:[%s9856_s1 + $0x18] sm:$0xff]  ;;  %v8022_v36 = vld [vmem:[%s9856_s1 + $0x10] sm:$0xff] }
  0x74   : > { %v8031_v34 = vld [vmem:[%s9856_s1 + $0x58] sm:$0xff]  ;;  %v8030_v37 = vld [vmem:[%s9856_s1 + $0x50] sm:$0xff]  ;;  %v8756_v39 = vld [vmem:[%s9856_s1 + $0xa8] sm:$0xff] }
  0x75   : > { %v500_v14 = vld [vmem:[%s8712_s21] sm:$0xff]  ;;  %v501_v15 = vld [vmem:[%s8712_s21 + $0x8] sm:$0xff]  ;;  %1073 = vmatpush.bf16.msra.mxu0 %v8026_v10  ;;  %v502_v23 = vld [vmem:[%s8712_s21 + $0x18] sm:$0xff] }
  0x76   : > { %1132 = vmatpush.bf16.msra.mxu1 %v8034_v11  ;;  %v520_v16 = vpack.c.bf16 %v500_v14, %v500_v14  ;;  %v521_v17 = vpack.c.bf16 %v501_v15, %v501_v15  ;;  %v560_v18 = vld [vmem:[%s8712_s21 + $0x1] sm:$0xff]  ;;  %v561_v19 = vld [vmem:[%s8712_s21 + $0x9] sm:$0xff]  ;;  %v562_v25 = vld [vmem:[%s8712_s21 + $0x19] sm:$0xff]  ;;  %8327 = vmatpush.bf16.msra.mxu3 %v8034_v11  ;;  %v522_v26 = vpack.c.bf16 %v502_v23, %v502_v23 }
  0x77   : > { %v580_v21 = vpack.c.bf16 %v560_v18, %v560_v18  ;;  %v581_v22 = vpack.c.bf16 %v561_v19, %v561_v19  ;;  %v503_v24 = vld [vmem:[%s8712_s21 + $0x20] sm:$0xff]  ;;  %v582_v31 = vpack.c.bf16 %v562_v25, %v562_v25  ;;  %v504_v38 = vld [vmem:[%s8712_s21 + $0x30] sm:$0xff]  ;;  %8335 = vmatpush.bf16.msra.mxu2 %v8743_v35  ;;  %v505_v40 = vld [vmem:[%s8712_s21 + $0x38] sm:$0xff] }
  0x78   : > { %540 = vst [vmem:[#allocation4] sm:$0xf] %v520_v16  ;;  %v563_v27 = vld [vmem:[%s8712_s21 + $0x21] sm:$0xff]  ;;  %v523_v28 = vpack.c.bf16 %v503_v24, %v503_v24  ;;  %v524_v41 = vpack.c.bf16 %v504_v38, %v504_v38  ;;  %v525_v42 = vpack.c.bf16 %v505_v40, %v505_v40  ;;  %v564_v43 = vld [vmem:[%s8712_s21 + $0x31] sm:$0xff]  ;;  %v565_v44 = vld [vmem:[%s8712_s21 + $0x39] sm:$0xff] }
  0x79   : > { %541 = vst [vmem:[#allocation4 + $0x24] sm:$0xf] %v521_v17  ;;  %1074 = vmatpush.bf16.msra.mxu0 %v8025_v12  ;;  %v583_v32 = vpack.c.bf16 %v563_v27, %v563_v27  ;;  %v584_v45 = vpack.c.bf16 %v564_v43, %v564_v43  ;;  %v585_v46 = vpack.c.bf16 %v565_v44, %v565_v44  ;;  %v8021_v47 = vld [vmem:[%s9856_s1 + $0x8] sm:$0xff]  ;;  %v8040_v49 = vld [vmem:[%s9856_s1 + $0xa0] sm:$0xff]  ;;  %v8039_v56 = vld [vmem:[%s9856_s1 + $0x98] sm:$0xff] }
  0x7a   : > { %1133 = vmatpush.bf16.msra.mxu1 %v8033_v13  ;;  %600 = vst [vmem:[#allocation4 + $0x4] sm:$0xf] %v580_v21  ;;  %8328 = vmatpush.bf16.msra.mxu3 %v8033_v13  ;;  %v8029_v48 = vld [vmem:[%s9856_s1 + $0x48] sm:$0xff]  ;;  %v8020_v50 = vld [vmem:[%s9856_s1] sm:$0xff]  ;;  %v8038_v59 = vld [vmem:[%s9856_s1 + $0x90] sm:$0xff] }
  0x7b   : > { %601 = vst [vmem:[#allocation4 + $0x28] sm:$0xf] %v581_v22  ;;  %8336 = vmatpush.bf16.msra.mxu2 %v8756_v39  ;;  %v8028_v51 = vld [vmem:[%s9856_s1 + $0x40] sm:$0xff]  ;;  %v626_v60 = vld [vmem:[%s8712_s21 + $0x4a] sm:$0xff]  ;;  %v627_v61 = vld [vmem:[%s8712_s21 + $0x52] sm:$0xff] }
  0x7c   : > { %542 = vst [vmem:[#allocation4 + $0x48] sm:$0xf] %v522_v26  ;;  %v646_v62 = vpack.c.bf16 %v626_v60, %v626_v60  ;;  %v647_v63 = vpack.c.bf16 %v627_v61, %v627_v61  ;;  %v506_v0 = vld [vmem:[%s8712_s21 + $0x48] sm:$0xff]  ;;  %v507_v1 = vld [vmem:[%s8712_s21 + $0x50] sm:$0xff]  ;;  %v8036_v9 = vld [vmem:[%s9856_s1 + $0x80] sm:$0xff] }
  0x7d   : > { %543 = vst [vmem:[#allocation4 + $0x6c] sm:$0xf] %v523_v28  ;;  %1075 = vmatpush.bf16.msra.mxu0 %v8024_v29  ;;  %v526_v2 = vpack.c.bf16 %v506_v0, %v506_v0  ;;  %v8037_v3 = vld [vmem:[%s9856_s1 + $0x88] sm:$0xff]  ;;  %v527_v4 = vpack.c.bf16 %v507_v1, %v507_v1  ;;  %v567_v6 = vld [vmem:[%s8712_s21 + $0x51] sm:$0xff]  ;;  %v508_v23 = vld [vmem:[%s8712_s21 + $0x60] sm:$0xff] }
  0x7e   : > { %1134 = vmatpush.bf16.msra.mxu1 %v8032_v30  ;;  %602 = vst [vmem:[#allocation4 + $0x4c] sm:$0xf] %v582_v31  ;;  %8329 = vmatpush.bf16.msra.mxu3 %v8032_v30  ;;  %v566_v5 = vld [vmem:[%s8712_s21 + $0x49] sm:$0xff]  ;;  %v587_v8 = vpack.c.bf16 %v567_v6, %v567_v6  ;;  %v528_v25 = vpack.c.bf16 %v508_v23, %v508_v23  ;;  %v568_v27 = vld [vmem:[%s8712_s21 + $0x61] sm:$0xff]  ;;  %v510_v44 = vld [vmem:[%s8712_s21 + $0x78] sm:$0xff] }
  0x7f   : > { %603 = vst [vmem:[#allocation4 + $0x70] sm:$0xf] %v583_v32  ;;  %v6602_v52 = vld [vmem:[#allocation4] sm:$0xf]  ;;  %8337 = vmatpush.bf16.msra.mxu2 %v8040_v49  ;;  %v586_v7 = vpack.c.bf16 %v566_v5, %v566_v5  ;;  %v509_v24 = vld [vmem:[%s8712_s21 + $0x68] sm:$0xff]  ;;  %v588_v29 = vpack.c.bf16 %v568_v27, %v568_v27  ;;  %v632_v61 = vld [vmem:[%s8712_s21 + $0x92] sm:$0xff] }
  0x80   : > { %1311 = vst [vmem:[#allocation4 + $0xc] sm:$0xf] %v522_v26  ;;  %v7991_v53 = vld [vmem:[#allocation4 + $0x20] sm:$0xf0]  ;;  %v529_v26 = vpack.c.bf16 %v509_v24, %v509_v24  ;;  %v630_v40 = vld [vmem:[%s8712_s21 + $0x7a] sm:$0xff]  ;;  %v512_v1 = vld [vmem:[%s8712_s21 + $0x90] sm:$0xff] }
  0x81   : > { %1312 = vst [vmem:[#allocation4 + $0x30] sm:$0xf] %v523_v28  ;;  %1076 = vmatpush.bf16.msra.mxu0 %v8023_v33  ;;  %v7990_v54 = vld [vmem:[#allocation4 + $0x4] sm:$0xf]  ;;  %v6603_v57 = vor.u32 %v7991_v53, %v6602_v52  ;;  %v569_v28 = vld [vmem:[%s8712_s21 + $0x69] sm:$0xff]  ;;  %v572_v5 = vld [vmem:[%s8712_s21 + $0x91] sm:$0xff] }
  0x82   : > { %1135 = vmatpush.bf16.msra.mxu1 %v8031_v34  ;;  %1371 = vst [vmem:[#allocation4 + $0x10] sm:$0xf] %v582_v31  ;;  %8330 = vmatpush.bf16.msra.mxu3 %v8031_v34  ;;  %v6604_v55 = vld [vmem:[#allocation4 + $0x24] sm:$0xf0]  ;;  %v589_v30 = vpack.c.bf16 %v569_v28, %v569_v28  ;;  %v573_v6 = vld [vmem:[%s8712_s21 + $0x99] sm:$0xff]  ;;  %v515_v27 = vld [vmem:[%s8712_s21 + $0xb0] sm:$0xff] }
  0x83   : > { %1372 = vst [vmem:[#allocation4 + $0x34] sm:$0xf] %v583_v32  ;;  %v6607_v58 = vor.u32 %v7990_v54, %v6604_v55  ;;  %8338 = vmatpush.bf16.msra.mxu2 %v8039_v56  ;;  %v6614_v10 = vld [vmem:[#allocation4 + $0x48] sm:$0xf]  ;;  %v635_v23 = vld [vmem:[%s8712_s21 + $0xb2] sm:$0xff]  ;;  %vm9227_vm2 = vmand %vm3019_vm0, %vm3020_vm1 }
  0x84   : > { %544 = vst [vmem:[#allocation4 + $0x90] sm:$0xf] %v524_v41  ;;  %v7994_v11 = vld [vmem:[#allocation4 + $0x68] sm:$0xf0]  ;;  %v628_v19 = vld [vmem:[%s8712_s21 + $0x62] sm:$0xff]  ;;  %vm9255_vm5 = vmand %vm3052_vm3, %vm3053_vm4 }
  0x85   : > { %1077 = vmatpush.bf16.msra.mxu0 %v8022_v36  ;;  %545 = vst [vmem:[#allocation4 + $0xb4] sm:$0xf] %v525_v42  ;;  %v7993_v12 = vld [vmem:[#allocation4 + $0x4c] sm:$0xf]  ;;  %v6615_v17 = vor.u32 %v7994_v11, %v6614_v10  ;;  %v648_v21 = vpack.c.bf16 %v628_v19, %v628_v19  ;;  %v575_v19 = vld [vmem:[%s8712_s21 + $0xb1] sm:$0xff] }
  0x86   : > { %1136 = vmatpush.bf16.msra.mxu1 %v8030_v37  ;;  %604 = vst [vmem:[#allocation4 + $0x94] sm:$0xf] %v584_v45  ;;  %8331 = vmatpush.bf16.msra.mxu3 %v8030_v37  ;;  %v6616_v13 = vld [vmem:[#allocation4 + $0x6c] sm:$0xf0] }
  0x87   : > { %605 = vst [vmem:[#allocation4 + $0xb8] sm:$0xf] %v585_v46  ;;  %8339 = vmatpush.bf16.msra.mxu2 %v8038_v59  ;;  %v6619_v18 = vor.u32 %v7993_v12, %v6616_v13 }
  0x88   : > { %1313 = vst [vmem:[#allocation4 + $0x54] sm:$0xf] %v524_v41  ;;  %v631_v41 = vld [vmem:[%s8712_s21 + $0x82] sm:$0xff] }
  0x89   : > { %1078 = vmatpush.bf16.msra.mxu0 %v8021_v47  ;;  %1314 = vst [vmem:[#allocation4 + $0x78] sm:$0xf] %v525_v42  ;;  %v650_v42 = vpack.c.bf16 %v630_v40, %v630_v40  ;;  %v651_v43 = vpack.c.bf16 %v631_v41, %v631_v41 }
  0x8a   : > { %1137 = vmatpush.bf16.msra.mxu1 %v8029_v48  ;;  %8332 = vmatpush.bf16.msra.mxu3 %v8029_v48  ;;  %1373 = vst [vmem:[#allocation4 + $0x58] sm:$0xf] %v584_v45  ;;  %v511_v45 = vld [vmem:[%s8712_s21 + $0x80] sm:$0xff] }
  0x8b   : > { %1374 = vst [vmem:[#allocation4 + $0x7c] sm:$0xf] %v585_v46  ;;  %8340 = vmatpush.bf16.msra.mxu2 %v8037_v3  ;;  %v6626_v31 = vld [vmem:[#allocation4 + $0x90] sm:$0xf]  ;;  %v530_v46 = vpack.c.bf16 %v510_v44, %v510_v44  ;;  %v531_v47 = vpack.c.bf16 %v511_v45, %v511_v45  ;;  %v570_v48 = vld [vmem:[%s8712_s21 + $0x79] sm:$0xff] }
  0x8c   : > { %666 = vst [vmem:[#allocation4 + $0xe0] sm:$0xf] %v646_v62  ;;  %v7997_v32 = vld [vmem:[#allocation4 + $0xb0] sm:$0xf0]  ;;  %v633_v62 = vld [vmem:[%s8712_s21 + $0x9a] sm:$0xff] }
  0x8d   : > { %1079 = vmatpush.bf16.msra.mxu0 %v8020_v50  ;;  %667 = vst [vmem:[#allocation4 + $0x104] sm:$0xf] %v647_v63  ;;  %v7996_v33 = vld [vmem:[#allocation4 + $0x94] sm:$0xf]  ;;  %v6627_v38 = vor.u32 %v7997_v32, %v6626_v31  ;;  %v590_v50 = vpack.c.bf16 %v570_v48, %v570_v48  ;;  %v652_v63 = vpack.c.bf16 %v632_v61, %v632_v61 }
  0x8e   : > { %1138 = vmatpush.bf16.msra.mxu1 %v8028_v51  ;;  %8333 = vmatpush.bf16.msra.mxu3 %v8028_v51  ;;  %546 = vst [vmem:[#allocation4 + $0xd8] sm:$0xf] %v526_v2  ;;  %v6628_v34 = vld [vmem:[#allocation4 + $0xb4] sm:$0xf0]  ;;  %v653_v0 = vpack.c.bf16 %v633_v62, %v633_v62 }
  0x8f   : > { %547 = vst [vmem:[#allocation4 + $0xfc] sm:$0xf] %v527_v4  ;;  %8341 = vmatpush.bf16.msra.mxu2 %v8036_v9 }
  0x90   : > { %1080 = vmatmul.bf16.vlgmr.msra.gmra.mxu0 %v6603_v57  ;;  %606 = vst [vmem:[#allocation4 + $0xdc] sm:$0xf] %v586_v7 }
  0x91   : > { %1190 = vmatpush.bf16.msrb.mxu0 %v8721_v20  ;;  %1139 = vmatmul.bf16.vlgmr.msra.gmra.mxu1 %v6607_v58  ;;  %607 = vst [vmem:[#allocation4 + $0x100] sm:$0xf] %v587_v8  ;;  %v629_v20 = vld [vmem:[%s8712_s21 + $0x6a] sm:$0xff] }
  0x92   : > { %1315 = vst [vmem:[#allocation4 + $0x9c] sm:$0xf] %v526_v2  ;;  %v649_v22 = vpack.c.bf16 %v629_v20, %v629_v20  ;;  %v513_v2 = vld [vmem:[%s8712_s21 + $0x98] sm:$0xff] }
  0x93   : > { %v6646_v14 = vld [vmem:[#allocation4 + $0xe0] sm:$0xf]  ;;  %1316 = vst [vmem:[#allocation4 + $0xc0] sm:$0xf] %v527_v4  ;;  %v533_v4 = vpack.c.bf16 %v513_v2, %v513_v2 }
  0x94   : > { %v8001_v15 = vld [vmem:[#allocation4 + $0x100] sm:$0xf0]  ;;  %1375 = vst [vmem:[#allocation4 + $0xa0] sm:$0xf] %v586_v7  ;;  %v592_v7 = vpack.c.bf16 %v572_v5, %v572_v5  ;;  %v578_v2 = vld [vmem:[%s8712_s21 + $0xd9] sm:$0xff] }
  0x95   : > { %1191 = vmatpush.bf16.msrb.mxu0 %v8743_v35  ;;  %v6647_v16 = vor.u32 %v8001_v15, %v6646_v14  ;;  %1376 = vst [vmem:[#allocation4 + $0xc4] sm:$0xf] %v587_v8  ;;  %v6638_v52 = vld [vmem:[#allocation4 + $0xd8] sm:$0xf]  ;;  %v593_v8 = vpack.c.bf16 %v573_v6, %v573_v6 }
  0x96   : > { %668 = vst [vmem:[#allocation4 + $0x128] sm:$0xf] %v648_v21  ;;  %v8000_v53 = vld [vmem:[#allocation4 + $0xf8] sm:$0xf0]  ;;  %v595_v21 = vpack.c.bf16 %v575_v19, %v575_v19 }
  0x97   : > { %1213 = vmatmul.bf16.vlgmr.msra.gmra.mxu2 %v6647_v16  ;;  %669 = vst [vmem:[#allocation4 + $0x14c] sm:$0xf] %v649_v22  ;;  %v7999_v54 = vld [vmem:[#allocation4 + $0xdc] sm:$0xf]  ;;  %v634_v22 = vld [vmem:[%s8712_s21 + $0xaa] sm:$0xff] }
  0x98   : > { %548 = vst [vmem:[#allocation4 + $0x120] sm:$0xf] %v528_v25  ;;  %v6640_v55 = vld [vmem:[#allocation4 + $0xfc] sm:$0xf0]  ;;  %v654_v24 = vpack.c.bf16 %v634_v22, %v634_v22 }
  0x99   : > { %1192 = vmatpush.bf16.msrb.mxu0 %v8756_v39  ;;  %549 = vst [vmem:[#allocation4 + $0x144] sm:$0xf] %v529_v26  ;;  %v6631_v39 = vor.u32 %v7996_v33, %v6628_v34  ;;  %v6643_v60 = vor.u32 %v7999_v54, %v6640_v55  ;;  %v638_v6 = vld [vmem:[%s8712_s21 + $0xda] sm:$0xff] }
  0x9a   : > { %608 = vst [vmem:[#allocation4 + $0x124] sm:$0xf] %v588_v29  ;;  %v535_v29 = vpack.c.bf16 %v515_v27, %v515_v27  ;;  %v8081_v27 = vld [vmem:[%s9856_s1 + $0xf8] sm:$0xff] }
  0x9b   : > { %609 = vst [vmem:[#allocation4 + $0x148] sm:$0xf] %v589_v30  ;;  %1843 = vmatpush.bf16.msrb.mxu3 %v8081_v27 }
  0x9c   : > { %1317 = vst [vmem:[#allocation4 + $0xe4] sm:$0xf] %v528_v25  ;;  %v655_v25 = vpack.c.bf16 %v635_v23, %v635_v23  ;;  %v620_v23 = vld [vmem:[%s8712_s21 + $0x2] sm:$0xff] }
  0x9d   : > { %1193 = vmatpush.bf16.msrb.mxu0 %v8040_v49  ;;  %v6658_v35 = vld [vmem:[#allocation4 + $0x128] sm:$0xf]  ;;  %1318 = vst [vmem:[#allocation4 + $0x108] sm:$0xf] %v529_v26 }
  0x9e   : > { %v8004_v36 = vld [vmem:[#allocation4 + $0x148] sm:$0xf0]  ;;  %670 = vst [vmem:[#allocation4 + $0x170] sm:$0xf] %v650_v42  ;;  %v571_v49 = vld [vmem:[%s8712_s21 + $0x81] sm:$0xff] }
  0x9f   : > { %v6659_v37 = vor.u32 %v8004_v36, %v6658_v35  ;;  %671 = vst [vmem:[#allocation4 + $0x194] sm:$0xf] %v651_v43  ;;  %v591_v51 = vpack.c.bf16 %v571_v49, %v571_v49  ;;  %v514_v26 = vld [vmem:[%s8712_s21 + $0xa8] sm:$0xff] }
  0xa0   : > { %1085 = vmatmul.bf16.gmra.mxu0 %v6615_v17  ;;  %550 = vst [vmem:[#allocation4 + $0x168] sm:$0xf] %v530_v46  ;;  %v8003_v10 = vld [vmem:[#allocation4 + $0x140] sm:$0xf0]  ;;  %v534_v28 = vpack.c.bf16 %v514_v26, %v514_v26  ;;  %v577_v43 = vld [vmem:[%s8712_s21 + $0xc9] sm:$0xff] }
  0xa1   : > { %1194 = vmatpush.bf16.msrb.mxu0 %v8039_v56  ;;  %1144 = vmatmul.bf16.gmra.mxu1 %v6619_v18  ;;  %551 = vst [vmem:[#allocation4 + $0x18c] sm:$0xf] %v531_v47  ;;  %v8002_v11 = vld [vmem:[#allocation4 + $0x124] sm:$0xf]  ;;  %v574_v18 = vld [vmem:[%s8712_s21 + $0xa9] sm:$0xff]  ;;  %v597_v45 = vpack.c.bf16 %v577_v43, %v577_v43 }
  0xa2   : > { %610 = vst [vmem:[#allocation4 + $0x16c] sm:$0xf] %v590_v50  ;;  %v6652_v12 = vld [vmem:[#allocation4 + $0x144] sm:$0xf0]  ;;  %v594_v20 = vpack.c.bf16 %v574_v18, %v574_v18  ;;  %v516_v50 = vld [vmem:[%s8712_s21 + $0xc0] sm:$0xff]  ;;  %v8088_v43 = vld [vmem:[%s9856_s1 + $0x130] sm:$0xff] }
  0xa3   : > { %611 = vst [vmem:[#allocation4 + $0x190] sm:$0xf] %v591_v51  ;;  %v6655_v17 = vor.u32 %v8002_v11, %v6652_v12  ;;  %v576_v42 = vld [vmem:[%s8712_s21 + $0xc1] sm:$0xff] }
  0xa4   : > { %1319 = vst [vmem:[#allocation4 + $0x12c] sm:$0xf] %v530_v46  ;;  %v596_v44 = vpack.c.bf16 %v576_v42, %v576_v42  ;;  %v636_v46 = vld [vmem:[%s8712_s21 + $0xc2] sm:$0xff] }
  0xa5   : > { %1195 = vmatpush.bf16.msrb.mxu0 %v8038_v59  ;;  %v6670_v56 = vld [vmem:[#allocation4 + $0x170] sm:$0xf]  ;;  %1320 = vst [vmem:[#allocation4 + $0x150] sm:$0xf] %v531_v47  ;;  %v6639_v59 = vor.u32 %v8000_v53, %v6638_v52  ;;  %v656_v48 = vpack.c.bf16 %v636_v46, %v636_v46  ;;  %v517_v51 = vld [vmem:[%s8712_s21 + $0xc8] sm:$0xff]  ;;  %v536_v52 = vpack.c.bf16 %v516_v50, %v516_v50  ;;  %v519_v11 = vld [vmem:[%s8712_s21 + $0xe0] sm:$0xff] }
  0xa6   : > { %v8007_v57 = vld [vmem:[#allocation4 + $0x190] sm:$0xf0]  ;;  %672 = vst [vmem:[#allocation4 + $0x1b8] sm:$0xf] %v652_v63  ;;  %v637_v47 = vld [vmem:[%s8712_s21 + $0xca] sm:$0xff]  ;;  %v537_v53 = vpack.c.bf16 %v517_v51, %v517_v51 }
  0xa7   : > { %1218 = vmatmul.bf16.gmra.mxu2 %v6659_v37  ;;  %v6671_v58 = vor.u32 %v8007_v57, %v6670_v56  ;;  %673 = vst [vmem:[#allocation4 + $0x1dc] sm:$0xf] %v653_v0  ;;  %v6662_v31 = vld [vmem:[#allocation4 + $0x168] sm:$0xf]  ;;  %v657_v49 = vpack.c.bf16 %v637_v47, %v637_v47 }
  0xa8   : > { %553 = vst [vmem:[#allocation4 + $0x1d4] sm:$0xf] %v533_v4  ;;  %v8006_v32 = vld [vmem:[#allocation4 + $0x188] sm:$0xf0] }
  0xa9   : > { %1196 = vmatpush.bf16.msrb.mxu0 %v8037_v3  ;;  %v532_v3 = vpack.c.bf16 %v512_v1, %v512_v1  ;;  %612 = vst [vmem:[#allocation4 + $0x1b4] sm:$0xf] %v592_v7  ;;  %v8005_v34 = vld [vmem:[#allocation4 + $0x16c] sm:$0xf]  ;;  %v6663_v40 = vor.u32 %v8006_v32, %v6662_v31  ;;  %v639_v7 = vld [vmem:[%s8712_s21 + $0xe2] sm:$0xff] }
  0xaa   : > { %613 = vst [vmem:[#allocation4 + $0x1d8] sm:$0xf] %v593_v8  ;;  %v6664_v35 = vld [vmem:[#allocation4 + $0x18c] sm:$0xf0]  ;;  %v658_v8 = vpack.c.bf16 %v638_v6, %v638_v6 }
  0xab   : > { %552 = vst [vmem:[#allocation4 + $0x1b0] sm:$0xf] %v532_v3  ;;  %v6667_v41 = vor.u32 %v8005_v34, %v6664_v35  ;;  %v8080_v34 = vld [vmem:[%s9856_s1 + $0xf0] sm:$0xff]  ;;  %v8089_v35 = vld [vmem:[%s9856_s1 + $0x138] sm:$0xff] }
  0xac   : > { %1321 = vst [vmem:[#allocation4 + $0x174] sm:$0xf] %v532_v3  ;;  %v579_v3 = vld [vmem:[%s8712_s21 + $0xe1] sm:$0xff]  ;;  %1844 = vmatpush.bf16.msrb.mxu3 %v8080_v34 }
  0xad   : > { %1197 = vmatpush.bf16.msrb.mxu0 %v8036_v9  ;;  %v6650_v9 = vld [vmem:[#allocation4 + $0x120] sm:$0xf]  ;;  %v6682_v13 = vld [vmem:[#allocation4 + $0x1b8] sm:$0xf]  ;;  %1322 = vst [vmem:[#allocation4 + $0x198] sm:$0xf] %v533_v4  ;;  %v598_v4 = vpack.c.bf16 %v578_v2, %v578_v2  ;;  %v599_v5 = vpack.c.bf16 %v579_v3, %v579_v3 }
  0xae   : > { %v8010_v14 = vld [vmem:[#allocation4 + $0x1d8] sm:$0xf0]  ;;  %v6651_v16 = vor.u32 %v8003_v10, %v6650_v9  ;;  %614 = vst [vmem:[#allocation4 + $0x1fc] sm:$0xf] %v594_v20  ;;  %v659_v9 = vpack.c.bf16 %v639_v7, %v639_v7  ;;  %v8095_v3 = vld [vmem:[%s9856_s1 + $0x168] sm:$0xff] }
  0xaf   : > { %v6683_v15 = vor.u32 %v8010_v14, %v6682_v13  ;;  %615 = vst [vmem:[#allocation4 + $0x220] sm:$0xf] %v595_v21  ;;  %v8009_v56 = vld [vmem:[#allocation4 + $0x1d0] sm:$0xf0]  ;;  %v518_v10 = vld [vmem:[%s8712_s21 + $0xd8] sm:$0xff]  ;;  %v539_v13 = vpack.c.bf16 %v519_v11, %v519_v11 }
  0xb0   : > { %1090 = vmatmul.bf16.gmra.mxu0 %v6627_v38  ;;  %674 = vst [vmem:[#allocation4 + $0x200] sm:$0xf] %v654_v24  ;;  %v538_v12 = vpack.c.bf16 %v518_v10, %v518_v10  ;;  %v621_v24 = vld [vmem:[%s8712_s21 + $0xa] sm:$0xff]  ;;  %v8094_v10 = vld [vmem:[%s9856_s1 + $0x160] sm:$0xff] }
  0xb1   : > { %1149 = vmatmul.bf16.gmra.mxu1 %v6631_v39  ;;  %675 = vst [vmem:[#allocation4 + $0x224] sm:$0xf] %v655_v25  ;;  %v640_v25 = vpack.c.bf16 %v620_v23, %v620_v23  ;;  %v641_v26 = vpack.c.bf16 %v621_v24, %v621_v24  ;;  %1902 = vmatpush.bf16.msra.mxu0 %v8089_v35  ;;  %v6878_v11 = vld [vmem:[#allocation4 + $0xc] sm:$0xf] }
  0xb2   : > { %554 = vst [vmem:[#allocation4 + $0x1f8] sm:$0xf] %v534_v28  ;;  %v6674_v55 = vld [vmem:[#allocation4 + $0x1b0] sm:$0xf]  ;;  %v8091_v24 = vld [vmem:[%s9856_s1 + $0x148] sm:$0xff] }
  0xb3   : > { %555 = vst [vmem:[#allocation4 + $0x21c] sm:$0xf] %v535_v29  ;;  %v6675_v0 = vor.u32 %v8009_v56, %v6674_v55  ;;  %v8086_v55 = vld [vmem:[%s9856_s1 + $0x120] sm:$0xff]  ;;  %v8076_v56 = vld [vmem:[%s9856_s1 + $0xd0] sm:$0xff] }
  0xb4   : > { %1323 = vst [vmem:[#allocation4 + $0x1bc] sm:$0xf] %v534_v28 }
  0xb5   : > { %v8011_v30 = vld [vmem:[#allocation4 + $0x1fc] sm:$0xf]  ;;  %1324 = vst [vmem:[#allocation4 + $0x1e0] sm:$0xf] %v535_v29  ;;  %1903 = vmatpush.bf16.msra.mxu0 %v8088_v43 }
  0xb6   : > { %v6688_v33 = vld [vmem:[#allocation4 + $0x21c] sm:$0xf0]  ;;  %616 = vst [vmem:[#allocation4 + $0x244] sm:$0xf] %v596_v44  ;;  %v8151_v43 = vld [vmem:[%s9856_s1 + $0x238] sm:$0xff] }
  0xb7   : > { %1223 = vmatmul.bf16.gmra.mxu2 %v6671_v58  ;;  %v6691_v36 = vor.u32 %v8011_v30, %v6688_v33  ;;  %v6694_v37 = vld [vmem:[#allocation4 + $0x200] sm:$0xf]  ;;  %617 = vst [vmem:[#allocation4 + $0x268] sm:$0xf] %v597_v45  ;;  %v8008_v58 = vld [vmem:[#allocation4 + $0x1b4] sm:$0xf] }
  0xb8   : > { %v8013_v38 = vld [vmem:[#allocation4 + $0x220] sm:$0xf0]  ;;  %676 = vst [vmem:[#allocation4 + $0x248] sm:$0xf] %v656_v48  ;;  %v8087_v45 = vld [vmem:[%s9856_s1 + $0x128] sm:$0xff] }
  0xb9   : > { %1174 = vmatmul.bf16.vlgmr.msra.gmra.mxu3 %v6691_v36  ;;  %v6695_v39 = vor.u32 %v8013_v38, %v6694_v37  ;;  %677 = vst [vmem:[#allocation4 + $0x26c] sm:$0xf] %v657_v49  ;;  %v8079_v36 = vld [vmem:[%s9856_s1 + $0xe8] sm:$0xff]  ;;  %v622_v37 = vld [vmem:[%s8712_s21 + $0x1a] sm:$0xff]  ;;  %1904 = vmatpush.bf16.msra.mxu0 %v8087_v45 }
  0xba   : > { %556 = vst [vmem:[#allocation4 + $0x240] sm:$0xf] %v536_v52  ;;  %v623_v38 = vld [vmem:[%s8712_s21 + $0x22] sm:$0xff]  ;;  %1845 = vmatpush.bf16.msrb.mxu3 %v8079_v36  ;;  %v8077_v52 = vld [vmem:[%s9856_s1 + $0xd8] sm:$0xff] }
  0xbb   : > { %557 = vst [vmem:[#allocation4 + $0x264] sm:$0xf] %v537_v53  ;;  %v8078_v44 = vld [vmem:[%s9856_s1 + $0xe0] sm:$0xff]  ;;  %v8097_v53 = vld [vmem:[%s9856_s1 + $0x178] sm:$0xff] }
  0xbc   : > { %618 = vst [vmem:[#allocation4 + $0x28c] sm:$0xf] %v598_v4  ;;  %1961 = vmatpush.bf16.msrb.mxu1 %v8097_v53  ;;  %v8085_v4 = vld [vmem:[%s9856_s1 + $0x118] sm:$0xff] }
  0xbd   : > { %v8014_v54 = vld [vmem:[#allocation4 + $0x244] sm:$0xf]  ;;  %619 = vst [vmem:[#allocation4 + $0x2b0] sm:$0xf] %v599_v5  ;;  %1905 = vmatpush.bf16.msra.mxu0 %v8086_v55 }
  0xbe   : > { %v6700_v57 = vld [vmem:[#allocation4 + $0x264] sm:$0xf0]  ;;  %678 = vst [vmem:[#allocation4 + $0x290] sm:$0xf] %v658_v8  ;;  %1846 = vmatpush.bf16.msrb.mxu3 %v8078_v44  ;;  %v8074_v5 = vld [vmem:[%s9856_s1 + $0xc0] sm:$0xff] }
  0xbf   : > { %v6706_v61 = vld [vmem:[#allocation4 + $0x248] sm:$0xf]  ;;  %679 = vst [vmem:[#allocation4 + $0x2b4] sm:$0xf] %v659_v9 }
  0xc0   : > { %1095 = vmatmul.bf16.gmra.mxu0 %v6639_v59  ;;  %v6676_v59 = vld [vmem:[#allocation4 + $0x1d4] sm:$0xf0]  ;;  %v8016_v62 = vld [vmem:[#allocation4 + $0x268] sm:$0xf0]  ;;  %558 = vst [vmem:[#allocation4 + $0x288] sm:$0xf] %v538_v12 }
  0xc1   : > { %1154 = vmatmul.bf16.gmra.mxu1 %v6643_v60  ;;  %v6703_v60 = vor.u32 %v8014_v54, %v6700_v57  ;;  %v6707_v63 = vor.u32 %v8016_v62, %v6706_v61  ;;  %v6679_v1 = vor.u32 %v8008_v58, %v6676_v59  ;;  %559 = vst [vmem:[#allocation4 + $0x2ac] sm:$0xf] %v539_v13  ;;  %v6698_v28 = vld [vmem:[#allocation4 + $0x240] sm:$0xf]  ;;  %v624_v57 = vld [vmem:[%s8712_s21 + $0x32] sm:$0xff] }
  0xc2   : > { %660 = vst [vmem:[#allocation4 + $0x8] sm:$0xf] %v640_v25  ;;  %v8015_v29 = vld [vmem:[#allocation4 + $0x260] sm:$0xf0]  ;;  %1847 = vmatpush.bf16.msrb.mxu3 %v8077_v52  ;;  %v625_v58 = vld [vmem:[%s8712_s21 + $0x3a] sm:$0xff]  ;;  %v644_v59 = vpack.c.bf16 %v624_v57, %v624_v57  ;;  %1906 = vmatpush.bf16.msra.mxu0 %v8085_v4  ;;  %v8084_v13 = vld [vmem:[%s9856_s1 + $0x110] sm:$0xff] }
  0xc3   : > { %v8017_v14 = vld [vmem:[#allocation4 + $0x28c] sm:$0xf]  ;;  %661 = vst [vmem:[#allocation4 + $0x2c] sm:$0xf] %v641_v26  ;;  %v6699_v30 = vor.u32 %v8015_v29, %v6698_v28  ;;  %v8143_v25 = vld [vmem:[%s9856_s1 + $0x1f8] sm:$0xff]  ;;  %v8082_v26 = vld [vmem:[%s9856_s1 + $0x100] sm:$0xff] }
  0xc4   : > { %664 = vst [vmem:[#allocation4 + $0x98] sm:$0xf] %v644_v59  ;;  %v8142_v52 = vld [vmem:[%s9856_s1 + $0x1f0] sm:$0xff]  ;;  %v8051_v57 = vld [vmem:[#allocation4 + $0xbc] sm:$0xf0] }
  0xc5   : > { %v6718_v19 = vld [vmem:[#allocation4 + $0x290] sm:$0xf]  ;;  %1433 = vst [vmem:[#allocation4 + $0x5c] sm:$0xf] %v644_v59 }
  0xc6   : > { %v8019_v20 = vld [vmem:[#allocation4 + $0x2b0] sm:$0xf0]  ;;  %1848 = vmatpush.bf16.msrb.mxu3 %v8076_v56  ;;  %1907 = vmatpush.bf16.msra.mxu0 %v8084_v13  ;;  %v6902_v56 = vld [vmem:[#allocation4 + $0x9c] sm:$0xf]  ;;  %v8044_v13 = vld [vmem:[#allocation4 + $0x10] sm:$0xf] }
  0xc7   : > { %1228 = vmatmul.bf16.gmra.mxu2 %v6683_v15  ;;  %v6712_v15 = vld [vmem:[#allocation4 + $0x2ac] sm:$0xf0]  ;;  %v6719_v21 = vor.u32 %v8019_v20, %v6718_v19  ;;  %v6710_v46 = vld [vmem:[#allocation4 + $0x288] sm:$0xf]  ;;  %v6903_v59 = vor.u32 %v8051_v57, %v6902_v56 }
  0xc8   : > { %v6715_v18 = vor.u32 %v8017_v14, %v6712_v15  ;;  %v8018_v47 = vld [vmem:[#allocation4 + $0x2a8] sm:$0xf0]  ;;  %v8045_v14 = vld [vmem:[#allocation4 + $0x2c] sm:$0xf0] }
  0xc9   : > { %1179 = vmatmul.bf16.gmra.mxu3 %v6703_v60  ;;  %v6711_v48 = vor.u32 %v8018_v47, %v6710_v46  ;;  %v645_v60 = vpack.c.bf16 %v625_v58, %v625_v58  ;;  %v6879_v15 = vor.u32 %v8045_v14, %v6878_v11  ;;  %v8092_v20 = vld [vmem:[%s9856_s1 + $0x150] sm:$0xff] }
  0xca   : > { %v7992_v2 = vld [vmem:[#allocation4 + $0x28] sm:$0xf0]  ;;  %v6880_v14 = vld [vmem:[#allocation4 + $0x30] sm:$0xf0] }
  0xcb   : > { %665 = vst [vmem:[#allocation4 + $0xbc] sm:$0xf] %v645_v60 }
  0xcc   : > { %1434 = vst [vmem:[#allocation4 + $0x80] sm:$0xf] %v645_v60  ;;  %v6898_v60 = vld [vmem:[#allocation4 + $0x5c] sm:$0xf] }
  0xd0   : > { %1100 = vmatmul.bf16.gmra.mxu0 %v6651_v16  ;;  %v6686_v16 = vld [vmem:[#allocation4 + $0x1f8] sm:$0xf] }
  0xd1   : > { %1159 = vmatmul.bf16.gmra.mxu1 %v6655_v17  ;;  %v8012_v17 = vld [vmem:[#allocation4 + $0x218] sm:$0xf0] }
  0xd2   : > { %v6687_v22 = vor.u32 %v8012_v17, %v6686_v16  ;;  %v8093_v16 = vld [vmem:[%s9856_s1 + $0x158] sm:$0xff]  ;;  %v8083_v17 = vld [vmem:[%s9856_s1 + $0x108] sm:$0xff] }
  0xd3   : > { %1908 = vmatpush.bf16.msra.mxu0 %v8083_v17 }
  0xd7   : > { %1233 = vmatmul.bf16.gmra.mxu2 %v6695_v39  ;;  %v642_v39 = vpack.c.bf16 %v622_v37, %v622_v37  ;;  %1909 = vmatpush.bf16.msra.mxu0 %v8082_v26 }
  0xd9   : > { %1184 = vmatmul.bf16.gmra.mxu3 %v6715_v18  ;;  %662 = vst [vmem:[#allocation4 + $0x50] sm:$0xf] %v642_v39 }
  0xda   : > { %1431 = vst [vmem:[#allocation4 + $0x14] sm:$0xf] %v642_v39 }
  0xe0   : > { %1105 = vmatmul.bf16.gmra.mxu0 %v6663_v40  ;;  %v643_v40 = vpack.c.bf16 %v623_v38, %v623_v38 }
  0xe1   : > { %1164 = vmatmul.bf16.gmra.mxu1 %v6667_v41  ;;  %v6886_v36 = vld [vmem:[#allocation4 + $0x14] sm:$0xf] }
  0xe2   : > { %663 = vst [vmem:[#allocation4 + $0x74] sm:$0xf] %v643_v40 }
  0xe3   : > { %1432 = vst [vmem:[#allocation4 + $0x38] sm:$0xf] %v643_v40 }
  0xe7   : > { %1238 = vmatmul.bf16.gmra.mxu2 %v6707_v63  ;;  %v8096_v63 = vld [vmem:[%s9856_s1 + $0x170] sm:$0xff] }
  0xe8   : > { %1962 = vmatpush.bf16.msrb.mxu1 %v8096_v63  ;;  %v8049_v63 = vld [vmem:[#allocation4 + $0x7c] sm:$0xf0] }
  0xe9   : > { %v7995_v23 = vld [vmem:[#allocation4 + $0x70] sm:$0xf0] }
  0xea   : > { %v8046_v37 = vld [vmem:[#allocation4 + $0x34] sm:$0xf0] }
  0xeb   : > { %v6887_v40 = vor.u32 %v8046_v37, %v6886_v36  ;;  %v6862_v37 = vld [vmem:[%s8712_s21 + $0x62] sm:$0xff] }
  0xec   : > { %1963 = vmatpush.bf16.msrb.mxu1 %v8095_v3 }
  0xf0   : > { %1110 = vmatmul.bf16.gmra.mxu0 %v6675_v0  ;;  %v8075_v0 = vld [vmem:[%s9856_s1 + $0xc8] sm:$0xff]  ;;  %1964 = vmatpush.bf16.msrb.mxu1 %v8094_v10 }
  0xf1   : > { %1169 = vmatmul.bf16.gmra.mxu1 %v6679_v1  ;;  %v6610_v1 = vld [vmem:[#allocation4 + $0x8] sm:$0xf]  ;;  %1849 = vmatpush.bf16.msrb.mxu3 %v8075_v0 }
  0xf2   : > { %v6611_v6 = vor.u32 %v7992_v2, %v6610_v1  ;;  %v6899_v1 = vor.u32 %v8049_v63, %v6898_v60  ;;  %v8150_v2 = vld [vmem:[%s9856_s1 + $0x230] sm:$0xff] }
  0xf4   : > { %1965 = vmatpush.bf16.msrb.mxu1 %v8093_v16 }
  0xf5   : > { %1850 = vmatpush.bf16.msrb.mxu3 %v8074_v5 }
  0xf7   : > { %1243 = vmatmul.bf16.gmra.mxu2 %v6719_v21 }
  0xf8   : > { %1851 = vmatmul.bf16.vlgmr.msrb.gmra.mxu3 %v6879_v15  ;;  %1966 = vmatpush.bf16.msrb.mxu1 %v8092_v20  ;;  %v6883_v15 = vor.u32 %v8044_v13, %v6880_v14  ;;  %v6914_v20 = vld [vmem:[#allocation4 + $0xe4] sm:$0xf]  ;;  %v8134_v13 = vld [vmem:[%s9856_s1 + $0x1b0] sm:$0xff] }
  0xf9   : > { %2713 = vmatpush.bf16.msra.mxu3 %v8143_v25 }
  0xfc   : > { %1967 = vmatpush.bf16.msrb.mxu1 %v8091_v24 }
  0xfd   : > { %2714 = vmatpush.bf16.msra.mxu3 %v8142_v52 }
 0x100   : > { %1115 = vmatmul.bf16.gmra.mxu0 %v6687_v22  ;;  %v6622_v22 = vld [vmem:[#allocation4 + $0x50] sm:$0xf] }
 0x101   : > { %v6623_v27 = vor.u32 %v7995_v23, %v6622_v22 }
 0x10d   : > { %v1081_v31 = vpop.f32.mrf.mxu0 }
 0x10e   : > { %v1140_v32 = vpop.f32.mrf.mxu1 }
 0x10f   : > { %v8839_v33 = vadd.f32 %v1140_v32, %v1081_v31  ;;  %v6890_v31 = vld [vmem:[#allocation4 + $0x54] sm:$0xf]  ;;  %v8048_v32 = vld [vmem:[#allocation4 + $0x74] sm:$0xf0] }
 0x110   : > { %1120 = vmatmul.bf16.gmra.mxu0 %v6699_v30  ;;  %v8090_v30 = vld [vmem:[%s9856_s1 + $0x140] sm:$0xff]  ;;  %v6891_v35 = vor.u32 %v8048_v32, %v6890_v31  ;;  %v6843_v31 = vld [vmem:[%s8712_s21 + $0x69] sm:$0xff] }
 0x111   : > { %1968 = vmatpush.bf16.msrb.mxu1 %v8090_v30  ;;  %v6842_v30 = vld [vmem:[%s8712_s21 + $0x61] sm:$0xff] }
 0x112   : > { %1856 = vmatmul.bf16.gmra.mxu3 %v6891_v35  ;;  %v1357_v32 = vpack.c.bf16 %v6842_v30, %v6842_v30 }
 0x114   : > { %1969 = vmatmul.bf16.vlgmr.msrb.gmra.mxu1 %v6887_v40  ;;  %1377 = vst [vmem:[#allocation4 + $0xe8] sm:$0xf] %v1357_v32  ;;  %v1417_v40 = vpack.c.bf16 %v6862_v37, %v6862_v37  ;;  %v6847_v37 = vld [vmem:[%s8712_s21 + $0x99] sm:$0xff] }
 0x115   : > { %v8852_v41 = vpop.f32.mrf.mxu0  ;;  %2186 = vst [vmem:[#allocation4 + $0xac] sm:$0xf] %v1357_v32 }
 0x116   : > { %v8854_v42 = vpop.f32.mrf.mxu1  ;;  %1437 = vst [vmem:[#allocation4 + $0xec] sm:$0xf] %v1417_v40 }
 0x117   : > { %2246 = vst [vmem:[#allocation4 + $0xb0] sm:$0xf] %v1417_v40 }
 0x11a   : > { %v8873_v54 = vpop.f32.mrf.mxu2 }
 0x11d   : > { %v1086_v49 = vpop.f32.mrf.mxu0 }
 0x11e   : > { %v1145_v50 = vpop.f32.mrf.mxu1 }
 0x11f   : > { %v8865_v51 = vadd.f32 %v1145_v50, %v1086_v49  ;;  %v7998_v49 = vld [vmem:[#allocation4 + $0xb8] sm:$0xf0] }
 0x120   : > { %1125 = vmatmul.bf16.gmra.mxu0 %v6711_v48  ;;  %v6634_v48 = vld [vmem:[#allocation4 + $0x98] sm:$0xf] }
 0x121   : > { %v6635_v53 = vor.u32 %v7998_v49, %v6634_v48  ;;  %v8135_v48 = vld [vmem:[%s9856_s1 + $0x1b8] sm:$0xff]  ;;  %v8149_v49 = vld [vmem:[%s9856_s1 + $0x228] sm:$0xff] }
 0x122   : > { %v1216_v7 = vpop.f32.mrf.mxu2  ;;  %1861 = vmatmul.bf16.gmra.mxu3 %v6903_v59  ;;  %2654 = vmatpush.bf16.msrb.mxu2 %v8135_v48 }
 0x124   : > { %1974 = vmatmul.bf16.gmra.mxu1 %v6899_v1  ;;  %v8140_v1 = vld [vmem:[%s9856_s1 + $0x1e0] sm:$0xff] }
 0x125   : > { %v8883_v61 = vpop.f32.mrf.mxu0 }
 0x126   : > { %v8885_v62 = vpop.f32.mrf.mxu1  ;;  %2655 = vmatpush.bf16.msrb.mxu2 %v8134_v13  ;;  %v6849_v13 = vld [vmem:[%s8712_s21 + $0xb1] sm:$0xff] }
 0x12a   : > { %v1219_v21 = vpop.f32.mrf.mxu2 }
 0x12d   : > { %v1091_v8 = vpop.f32.mrf.mxu0 }
 0x12e   : > { %v1150_v9 = vpop.f32.mrf.mxu1 }
 0x12f   : > { %v8905_v12 = vadd.f32 %v1150_v9, %v1091_v8 }
 0x130   : > { %1198 = vmatmul.bf16.vlgmr.msrb.gmra.mxu0 %v6611_v6  ;;  %v6860_v6 = vld [vmem:[%s8712_s21 + $0x4a] sm:$0xff] }
 0x131   : > { %2772 = vmatpush.bf16.msrb.mxu0 %v8151_v43  ;;  %v1415_v9 = vpack.c.bf16 %v6860_v6, %v6860_v6 }
 0x132   : > { %v1221_v39 = vpop.f32.mrf.mxu2 }
 0x133   : > { %1435 = vst [vmem:[#allocation4 + $0xa4] sm:$0xf] %v1415_v9 }
 0x134   : > { %2244 = vst [vmem:[#allocation4 + $0x68] sm:$0xf] %v1415_v9  ;;  %v6864_v9 = vld [vmem:[%s8712_s21 + $0x7a] sm:$0xff] }
 0x135   : > { %v8916_v18 = vpop.f32.mrf.mxu0  ;;  %2773 = vmatpush.bf16.msrb.mxu0 %v8150_v2  ;;  %v1419_v14 = vpack.c.bf16 %v6864_v9, %v6864_v9  ;;  %v6848_v9 = vld [vmem:[%s8712_s21 + $0xa9] sm:$0xff] }
 0x136   : > { %v8918_v19 = vpop.f32.mrf.mxu1 }
 0x137   : > { %1439 = vst [vmem:[#allocation4 + $0x134] sm:$0xf] %v1419_v14 }
 0x138   : > { %2248 = vst [vmem:[#allocation4 + $0xf8] sm:$0xf] %v1419_v14  ;;  %v1363_v14 = vpack.c.bf16 %v6848_v9, %v6848_v9 }
 0x139   : > { %2774 = vmatpush.bf16.msrb.mxu0 %v8149_v49 }
 0x13a   : > { %v1224_v50 = vpop.f32.mrf.mxu2  ;;  %v6910_v25 = vld [vmem:[#allocation4 + $0xa4] sm:$0xf]  ;;  %1383 = vst [vmem:[#allocation4 + $0x1c0] sm:$0xf] %v1363_v14 }
 0x13b   : > { %2192 = vst [vmem:[#allocation4 + $0x184] sm:$0xf] %v1363_v14  ;;  %v6835_v14 = vld [vmem:[%s8712_s21 + $0xf8] sm:$0xff] }
 0x13c   : > { %v1175_v63 = vpop.f32.mrf.mxu3 }
 0x13d   : > { %v1096_v28 = vpop.f32.mrf.mxu0 }
 0x13e   : > { %v1155_v29 = vpop.f32.mrf.mxu1  ;;  %v6934_v30 = vld [vmem:[#allocation4 + $0x134] sm:$0xf] }
 0x13f   : > { %v1156_v34 = vadd.f32 %v1155_v29, %v1096_v28  ;;  %v8141_v29 = vld [vmem:[%s9856_s1 + $0x1e8] sm:$0xff] }
 0x140   : > { %1203 = vmatmul.bf16.gmra.mxu0 %v6623_v27  ;;  %2715 = vmatpush.bf16.msra.mxu3 %v8141_v29 }
 0x141   : > { %v1215_v38 = vadd.f32 %v8873_v54, %v1156_v34  ;;  %v1358_v34 = vpack.c.bf16 %v6843_v31, %v6843_v31 }
 0x142   : > { %v1226_v3 = vpop.f32.mrf.mxu2 }
 0x143   : > { %1255 = vst [vmem:[#allocation6 + $0x78] sm:$0xff] %v1215_v38  ;;  %v6863_v38 = vld [vmem:[%s8712_s21 + $0x6a] sm:$0xff] }
 0x144   : > { %v1418_v43 = vpack.c.bf16 %v6863_v38, %v6863_v38  ;;  %1378 = vst [vmem:[#allocation4 + $0x10c] sm:$0xf] %v1358_v34  ;;  %2716 = vmatpush.bf16.msra.mxu3 %v8140_v1 }
 0x145   : > { %v1098_v44 = vpop.f32.mrf.mxu0  ;;  %2187 = vst [vmem:[#allocation4 + $0xd0] sm:$0xf] %v1358_v34 }
 0x146   : > { %v1157_v45 = vpop.f32.mrf.mxu1  ;;  %1438 = vst [vmem:[#allocation4 + $0x110] sm:$0xf] %v1418_v43 }
 0x147   : > { %v1158_v46 = vadd.f32 %v1157_v45, %v1098_v44  ;;  %v8047_v45 = vld [vmem:[#allocation4 + $0x58] sm:$0xf]  ;;  %2247 = vst [vmem:[#allocation4 + $0xd4] sm:$0xf] %v1418_v43 }
 0x149   : > { %v1217_v47 = vadd.f32 %v1216_v7, %v1158_v46  ;;  %v6861_v7 = vld [vmem:[%s8712_s21 + $0x52] sm:$0xff]  ;;  %v6892_v46 = vld [vmem:[#allocation4 + $0x78] sm:$0xf0] }
 0x14a   : > { %v1416_v10 = vpack.c.bf16 %v6861_v7, %v6861_v7  ;;  %v1229_v24 = vpop.f32.mrf.mxu2 }
 0x14b   : > { %1256 = vst [vmem:[#allocation6 + $0x80] sm:$0xff] %v1217_v47 }
 0x14c   : > { %1436 = vst [vmem:[#allocation4 + $0xc8] sm:$0xf] %v1416_v10 }
 0x14d   : > { %v1101_v54 = vpop.f32.mrf.mxu0  ;;  %2245 = vst [vmem:[#allocation4 + $0x8c] sm:$0xf] %v1416_v10  ;;  %v8055_v60 = vld [vmem:[#allocation4 + $0x10c] sm:$0xf0]  ;;  %v6865_v10 = vld [vmem:[%s8712_s21 + $0x82] sm:$0xff] }
 0x14e   : > { %v1160_v55 = vpop.f32.mrf.mxu1 }
 0x14f   : > { %v1161_v58 = vadd.f32 %v1160_v55, %v1101_v54  ;;  %v6926_v54 = vld [vmem:[#allocation4 + $0x12c] sm:$0xf]  ;;  %v8057_v55 = vld [vmem:[#allocation4 + $0x14c] sm:$0xf0] }
 0x150   : > { %1208 = vmatmul.bf16.gmra.mxu0 %v6635_v53  ;;  %v6927_v57 = vor.u32 %v8057_v55, %v6926_v54  ;;  %v8139_v54 = vld [vmem:[%s9856_s1 + $0x1d8] sm:$0xff] }
 0x151   : > { %v1220_v0 = vadd.f32 %v1219_v21, %v1161_v58  ;;  %v8054_v21 = vld [vmem:[#allocation4 + $0x104] sm:$0xf0]  ;;  %v6922_v58 = vld [vmem:[#allocation4 + $0xec] sm:$0xf]  ;;  %2717 = vmatpush.bf16.msra.mxu3 %v8139_v54 }
 0x152   : > { %v6915_v23 = vor.u32 %v8054_v21, %v6914_v20  ;;  %v1231_v47 = vpop.f32.mrf.mxu2  ;;  %v6904_v20 = vld [vmem:[#allocation4 + $0xc0] sm:$0xf0] }
 0x153   : > { %1257 = vst [vmem:[#allocation6 + $0x8] sm:$0xff] %v1220_v0  ;;  %v8052_v27 = vld [vmem:[#allocation4 + $0xc4] sm:$0xf0]  ;;  %v6923_v0 = vor.u32 %v8055_v60, %v6922_v58  ;;  %v8148_v21 = vld [vmem:[%s9856_s1 + $0x220] sm:$0xff] }
 0x154   : > { %1866 = vmatmul.bf16.gmra.mxu3 %v6915_v23  ;;  %v6911_v28 = vor.u32 %v8052_v27, %v6910_v25  ;;  %2775 = vmatpush.bf16.msrb.mxu0 %v8148_v21  ;;  %v8060_v27 = vld [vmem:[#allocation4 + $0x194] sm:$0xf0]  ;;  %v8063_v58 = vld [vmem:[#allocation4 + $0x1dc] sm:$0xf0] }
 0x155   : > { %v1103_v4 = vpop.f32.mrf.mxu0 }
 0x156   : > { %v1162_v5 = vpop.f32.mrf.mxu1  ;;  %1979 = vmatmul.bf16.gmra.mxu1 %v6911_v28 }
 0x157   : > { %v1163_v8 = vadd.f32 %v1162_v5, %v1103_v4  ;;  %v6845_v4 = vld [vmem:[%s8712_s21 + $0x81] sm:$0xff] }
 0x158   : > { %v1360_v6 = vpack.c.bf16 %v6845_v4, %v6845_v4  ;;  %v8132_v4 = vld [vmem:[%s9856_s1 + $0x1a0] sm:$0xff] }
 0x159   : > { %v1222_v11 = vadd.f32 %v1221_v39, %v1163_v8 }
 0x15a   : > { %v1234_v2 = vpop.f32.mrf.mxu2  ;;  %1380 = vst [vmem:[#allocation4 + $0x154] sm:$0xf] %v1360_v6 }
 0x15b   : > { %1258 = vst [vmem:[#allocation6 + $0x88] sm:$0xff] %v1222_v11 }
 0x15c   : > { %2189 = vst [vmem:[#allocation4 + $0x118] sm:$0xf] %v1360_v6 }
 0x15d   : > { %v1106_v16 = vpop.f32.mrf.mxu0 }
 0x15e   : > { %v1165_v17 = vpop.f32.mrf.mxu1 }
 0x15f   : > { %v1166_v22 = vadd.f32 %v1165_v17, %v1106_v16  ;;  %v8050_v17 = vld [vmem:[#allocation4 + $0xa0] sm:$0xf] }
 0x160   : > { %1910 = vmatmul.bf16.vlgmr.msra.gmra.mxu0 %v6883_v15  ;;  %v1420_v15 = vpack.c.bf16 %v6865_v10, %v6865_v10  ;;  %v6907_v23 = vor.u32 %v8050_v17, %v6904_v20  ;;  %v6868_v17 = vld [vmem:[%s8712_s21 + $0xaa] sm:$0xff]  ;;  %v6869_v20 = vld [vmem:[%s8712_s21 + $0xb2] sm:$0xff] }
 0x161   : > { %v1225_v26 = vadd.f32 %v1224_v50, %v1166_v22  ;;  %v6895_v50 = vor.u32 %v8047_v45, %v6892_v46  ;;  %v1177_v22 = vpop.f32.mrf.mxu3  ;;  %v6867_v45 = vld [vmem:[%s8712_s21 + $0x9a] sm:$0xff] }
 0x162   : > { %1440 = vst [vmem:[#allocation4 + $0x158] sm:$0xf] %v1420_v15  ;;  %v1236_v25 = vpop.f32.mrf.mxu2  ;;  %v1422_v48 = vpack.c.bf16 %v6867_v45, %v6867_v45  ;;  %v6832_v45 = vld [vmem:[%s8712_s21 + $0xd8] sm:$0xff] }
 0x163   : > { %1259 = vst [vmem:[#allocation6 + $0x28] sm:$0xff] %v1225_v26  ;;  %v6938_v26 = vld [vmem:[#allocation4 + $0x174] sm:$0xf] }
 0x164   : > { %1871 = vmatmul.bf16.gmra.mxu3 %v6927_v57  ;;  %v6939_v29 = vor.u32 %v8060_v27, %v6938_v26  ;;  %2249 = vst [vmem:[#allocation4 + $0x11c] sm:$0xf] %v1420_v15  ;;  %v6950_v57 = vld [vmem:[#allocation4 + $0x1bc] sm:$0xf] }
 0x165   : > { %v1108_v35 = vpop.f32.mrf.mxu0  ;;  %1442 = vst [vmem:[#allocation4 + $0x1a0] sm:$0xf] %v1422_v48  ;;  %v6951_v60 = vor.u32 %v8063_v58, %v6950_v57  ;;  %v6870_v57 = vld [vmem:[%s8712_s21 + $0xc2] sm:$0xff]  ;;  %v6871_v58 = vld [vmem:[%s8712_s21 + $0xca] sm:$0xff] }
 0x166   : > { %v1167_v36 = vpop.f32.mrf.mxu1  ;;  %1984 = vmatmul.bf16.gmra.mxu1 %v6923_v0  ;;  %2251 = vst [vmem:[#allocation4 + $0x164] sm:$0xf] %v1422_v48  ;;  %v1307_v48 = vpack.c.bf16 %v6832_v45, %v6832_v45 }
 0x167   : > { %v1168_v39 = vadd.f32 %v1167_v36, %v1108_v35  ;;  %v8133_v35 = vld [vmem:[%s9856_s1 + $0x1a8] sm:$0xff]  ;;  %v6846_v36 = vld [vmem:[%s8712_s21 + $0x91] sm:$0xff] }
 0x168   : > { %2656 = vmatpush.bf16.msrb.mxu2 %v8133_v35  ;;  %v1361_v38 = vpack.c.bf16 %v6846_v36, %v6846_v36  ;;  %1327 = vst [vmem:[#allocation4 + $0x24c] sm:$0xf] %v1307_v48 }
 0x169   : > { %v1227_v44 = vadd.f32 %v1226_v3, %v1168_v39  ;;  %v6844_v3 = vld [vmem:[%s8712_s21 + $0x79] sm:$0xff]  ;;  %v1362_v39 = vpack.c.bf16 %v6847_v37, %v6847_v37  ;;  %v1180_v43 = vpop.f32.mrf.mxu3  ;;  %2136 = vst [vmem:[#allocation4 + $0x210] sm:$0xf] %v1307_v48 }
 0x16a   : > { %v1359_v5 = vpack.c.bf16 %v6844_v3, %v6844_v3  ;;  %v8058_v32 = vld [vmem:[#allocation4 + $0x154] sm:$0xf0]  ;;  %1381 = vst [vmem:[#allocation4 + $0x178] sm:$0xf] %v1361_v38  ;;  %v1239_v49 = vpop.f32.mrf.mxu2 }
 0x16b   : > { %1260 = vst [vmem:[#allocation6 + $0x40] sm:$0xff] %v1227_v44  ;;  %v6935_v34 = vor.u32 %v8058_v32, %v6934_v30  ;;  %v6866_v44 = vld [vmem:[%s8712_s21 + $0x92] sm:$0xff] }
 0x16c   : > { %1379 = vst [vmem:[#allocation4 + $0x130] sm:$0xf] %v1359_v5  ;;  %v8061_v3 = vld [vmem:[#allocation4 + $0x19c] sm:$0xf0]  ;;  %2657 = vmatpush.bf16.msrb.mxu2 %v8132_v4 }
 0x16d   : > { %v1111_v52 = vpop.f32.mrf.mxu0  ;;  %2188 = vst [vmem:[#allocation4 + $0xf4] sm:$0xf] %v1359_v5  ;;  %v6855_v48 = vld [vmem:[%s8712_s21 + $0xf9] sm:$0xff] }
 0x16e   : > { %v1170_v53 = vpop.f32.mrf.mxu1  ;;  %1382 = vst [vmem:[#allocation4 + $0x19c] sm:$0xf] %v1362_v39 }
 0x16f   : > { %v1171_v56 = vadd.f32 %v1170_v53, %v1111_v52  ;;  %v8053_v52 = vld [vmem:[#allocation4 + $0xe8] sm:$0xf]  ;;  %v6916_v53 = vld [vmem:[#allocation4 + $0x108] sm:$0xf0]  ;;  %2190 = vst [vmem:[#allocation4 + $0x13c] sm:$0xf] %v1361_v38 }
 0x170   : > { %1915 = vmatmul.bf16.gmra.mxu0 %v6895_v50  ;;  %v6919_v55 = vor.u32 %v8053_v52, %v6916_v53  ;;  %2191 = vst [vmem:[#allocation4 + $0x160] sm:$0xf] %v1362_v39  ;;  %v8131_v38 = vld [vmem:[%s9856_s1 + $0x198] sm:$0xff]  ;;  %v8146_v39 = vld [vmem:[%s9856_s1 + $0x210] sm:$0xff] }
 0x171   : > { %v1230_v59 = vadd.f32 %v1229_v24, %v1171_v56  ;;  %2658 = vmatpush.bf16.msrb.mxu2 %v8131_v38  ;;  %v6851_v52 = vld [vmem:[%s8712_s21 + $0xc9] sm:$0xff] }
 0x172   : > { %v1241_v5 = vpop.f32.mrf.mxu2 }
 0x173   : > { %1261 = vst [vmem:[#allocation6 + $0x58] sm:$0xff] %v1230_v59  ;;  %v8056_v27 = vld [vmem:[#allocation4 + $0x130] sm:$0xf] }
 0x174   : > { %1876 = vmatmul.bf16.gmra.mxu3 %v6939_v29 }
 0x175   : > { %v1113_v7 = vpop.f32.mrf.mxu0 }
 0x176   : > { %v1172_v8 = vpop.f32.mrf.mxu1  ;;  %1989 = vmatmul.bf16.gmra.mxu1 %v6935_v34 }
 0x177   : > { %v1173_v11 = vadd.f32 %v1172_v8, %v1113_v7  ;;  %v6830_v7 = vld [vmem:[%s8712_s21 + $0xc0] sm:$0xff]  ;;  %v6831_v8 = vld [vmem:[%s8712_s21 + $0xc8] sm:$0xff] }
 0x178   : > { %v1305_v10 = vpack.c.bf16 %v6830_v7, %v6830_v7  ;;  %v8130_v7 = vld [vmem:[%s9856_s1 + $0x190] sm:$0xff] }
 0x179   : > { %v1232_v16 = vadd.f32 %v1231_v47, %v1173_v11  ;;  %v1421_v47 = vpack.c.bf16 %v6866_v44, %v6866_v44  ;;  %v1306_v11 = vpack.c.bf16 %v6831_v8, %v6831_v8  ;;  %2659 = vmatpush.bf16.msrb.mxu2 %v8130_v7  ;;  %v8128_v7 = vld [vmem:[%s9856_s1 + $0x180] sm:$0xff] }
 0x17a   : > { %1325 = vst [vmem:[#allocation4 + $0x204] sm:$0xf] %v1305_v10  ;;  %v1244_v29 = vpop.f32.mrf.mxu2 }
 0x17b   : > { %1262 = vst [vmem:[#allocation6 + $0x10] sm:$0xff] %v1232_v16  ;;  %v1364_v16 = vpack.c.bf16 %v6849_v13, %v6849_v13  ;;  %v6834_v13 = vld [vmem:[%s8712_s21 + $0xf0] sm:$0xff] }
 0x17c   : > { %1441 = vst [vmem:[#allocation4 + $0x17c] sm:$0xf] %v1421_v47 }
 0x17d   : > { %v1116_v24 = vpop.f32.mrf.mxu0  ;;  %2250 = vst [vmem:[#allocation4 + $0x140] sm:$0xf] %v1421_v47 }
 0x17e   : > { %v1176_v28 = vadd.f32 %v1175_v63, %v1116_v24  ;;  %v1182_v63 = vpop.f32.mrf.mxu3  ;;  %1326 = vst [vmem:[#allocation4 + $0x228] sm:$0xf] %v1306_v11 }
 0x17f   : > { %1384 = vst [vmem:[#allocation4 + $0x1e4] sm:$0xf] %v1364_v16 }
 0x180   : > { %v1235_v31 = vadd.f32 %v1234_v2, %v1176_v28  ;;  %1920 = vmatmul.bf16.gmra.mxu0 %v6907_v23  ;;  %v8147_v2 = vld [vmem:[%s9856_s1 + $0x218] sm:$0xff]  ;;  %v1423_v23 = vpack.c.bf16 %v6868_v17, %v6868_v17  ;;  %v6928_v28 = vld [vmem:[#allocation4 + $0x150] sm:$0xf0]  ;;  %2193 = vst [vmem:[#allocation4 + $0x1a8] sm:$0xf] %v1364_v16 }
 0x181   : > { %2776 = vmatpush.bf16.msrb.mxu0 %v8147_v2  ;;  %v6931_v30 = vor.u32 %v8056_v27, %v6928_v28  ;;  %v6962_v32 = vld [vmem:[#allocation4 + $0x204] sm:$0xf]  ;;  %2134 = vst [vmem:[#allocation4 + $0x1c8] sm:$0xf] %v1305_v10  ;;  %v6940_v2 = vld [vmem:[#allocation4 + $0x198] sm:$0xf0] }
 0x182   : > { %1263 = vst [vmem:[#allocation6 + $0x98] sm:$0xff] %v1235_v31  ;;  %v1246_v54 = vpop.f32.mrf.mxu2  ;;  %v8137_v10 = vld [vmem:[%s9856_s1 + $0x1c8] sm:$0xff]  ;;  %v6872_v27 = vld [vmem:[%s8712_s21 + $0xda] sm:$0xff] }
 0x183   : > { %v6946_v0 = vld [vmem:[#allocation4 + $0x17c] sm:$0xf]  ;;  %1443 = vst [vmem:[#allocation4 + $0x1c4] sm:$0xf] %v1423_v23  ;;  %v6873_v28 = vld [vmem:[%s8712_s21 + $0xe2] sm:$0xff] }
 0x184   : > { %1881 = vmatmul.bf16.gmra.mxu3 %v6951_v60  ;;  %v6947_v6 = vor.u32 %v8061_v3, %v6946_v0  ;;  %2135 = vst [vmem:[#allocation4 + $0x1ec] sm:$0xf] %v1306_v11  ;;  %v1425_v60 = vpack.c.bf16 %v6870_v57, %v6870_v57  ;;  %v1426_v0 = vpack.c.bf16 %v6871_v58, %v6871_v58  ;;  %v7112_v57 = vld [vmem:[%s8712_s21 + $0x31] sm:$0xff]  ;;  %v7113_v58 = vld [vmem:[%s8712_s21 + $0x39] sm:$0xff] }
 0x185   : > { %v1118_v40 = vpop.f32.mrf.mxu0  ;;  %v8066_v35 = vld [vmem:[#allocation4 + $0x224] sm:$0xf0]  ;;  %2252 = vst [vmem:[#allocation4 + $0x188] sm:$0xf] %v1423_v23  ;;  %2777 = vmatpush.bf16.msrb.mxu0 %v8146_v39 }
 0x186   : > { %v1178_v46 = vadd.f32 %v1177_v22, %v1118_v40  ;;  %1994 = vmatmul.bf16.gmra.mxu1 %v6947_v6  ;;  %v8138_v22 = vld [vmem:[%s9856_s1 + $0x1d0] sm:$0xff]  ;;  %v1185_v26 = vpop.f32.mrf.mxu3  ;;  %v6963_v36 = vor.u32 %v8066_v35, %v6962_v32  ;;  %1445 = vst [vmem:[#allocation4 + $0x20c] sm:$0xf] %v1425_v60  ;;  %v6853_v23 = vld [vmem:[%s8712_s21 + $0xe1] sm:$0xff] }
 0x187   : > { %2718 = vmatpush.bf16.msra.mxu3 %v8138_v22  ;;  %1446 = vst [vmem:[#allocation4 + $0x230] sm:$0xf] %v1426_v0  ;;  %v6852_v22 = vld [vmem:[%s8712_s21 + $0xd9] sm:$0xff] }
 0x188   : > { %v1237_v50 = vadd.f32 %v1236_v25, %v1178_v46  ;;  %v1424_v25 = vpack.c.bf16 %v6869_v20, %v6869_v20  ;;  %v6833_v46 = vld [vmem:[%s8712_s21 + $0xe0] sm:$0xff]  ;;  %2254 = vst [vmem:[#allocation4 + $0x1d0] sm:$0xf] %v1425_v60  ;;  %v1309_v20 = vpack.c.bf16 %v6834_v13, %v6834_v13 }
 0x189   : > { %2255 = vst [vmem:[#allocation4 + $0x1f4] sm:$0xf] %v1426_v0  ;;  %v8062_v32 = vld [vmem:[#allocation4 + $0x1c0] sm:$0xf] }
 0x18a   : > { %1264 = vst [vmem:[#allocation6 + $0x60] sm:$0xff] %v1237_v50  ;;  %v6958_v40 = vld [vmem:[#allocation4 + $0x1c4] sm:$0xf] }
 0x18b   : > { %1444 = vst [vmem:[#allocation4 + $0x1e8] sm:$0xf] %v1424_v25  ;;  %v6850_v50 = vld [vmem:[%s8712_s21 + $0xc1] sm:$0xff]  ;;  %2719 = vmatpush.bf16.msra.mxu3 %v8137_v10 }
 0x18c   : > { %2253 = vst [vmem:[#allocation4 + $0x1ac] sm:$0xf] %v1424_v25  ;;  %v1367_v25 = vpack.c.bf16 %v6852_v22, %v6852_v22 }
 0x18d   : > { %v1121_v56 = vpop.f32.mrf.mxu0  ;;  %1329 = vst [vmem:[#allocation4 + $0x294] sm:$0xf] %v1309_v20 }
 0x18e   : > { %v1181_v59 = vadd.f32 %v1180_v43, %v1121_v56  ;;  %v1187_v43 = vpop.f32.mrf.mxu3  ;;  %v1366_v56 = vpack.c.bf16 %v6851_v52, %v6851_v52  ;;  %v8067_v11 = vld [vmem:[#allocation4 + $0x22c] sm:$0xf0]  ;;  %1387 = vst [vmem:[#allocation4 + $0x250] sm:$0xf] %v1367_v25 }
 0x18f   : > { %2196 = vst [vmem:[#allocation4 + $0x214] sm:$0xf] %v1367_v25  ;;  %v1153_v25 = vadd.f32 %v8918_v19, %v8916_v18 }
 0x190   : > { %v1240_v1 = vadd.f32 %v1239_v49, %v1181_v59  ;;  %1925 = vmatmul.bf16.gmra.mxu0 %v6919_v55  ;;  %v1308_v49 = vpack.c.bf16 %v6833_v46, %v6833_v46  ;;  %v1365_v55 = vpack.c.bf16 %v6850_v50, %v6850_v50  ;;  %1386 = vst [vmem:[#allocation4 + $0x22c] sm:$0xf] %v1366_v56  ;;  %v8136_v46 = vld [vmem:[%s9856_s1 + $0x1c0] sm:$0xff] }
 0x191   : > { %2195 = vst [vmem:[#allocation4 + $0x1f0] sm:$0xf] %v1366_v56  ;;  %v1148_v50 = vadd.f32 %v8885_v62, %v8883_v61  ;;  %2720 = vmatpush.bf16.msra.mxu3 %v8136_v46  ;;  %v2163_v61 = vpack.c.bf16 %v7113_v58, %v7113_v58 }
 0x192   : > { %1265 = vst [vmem:[#allocation6 + $0x20] sm:$0xff] %v1240_v1  ;;  %v8064_v44 = vld [vmem:[#allocation4 + $0x1e4] sm:$0xf0]  ;;  %v8059_v1 = vld [vmem:[#allocation4 + $0x178] sm:$0xf] }
 0x193   : > { %v6959_v47 = vor.u32 %v8064_v44, %v6958_v40  ;;  %1328 = vst [vmem:[#allocation4 + $0x270] sm:$0xf] %v1308_v49  ;;  %v6943_v3 = vor.u32 %v8059_v1, %v6940_v2  ;;  %v2162_v1 = vpack.c.bf16 %v7112_v57, %v7112_v57  ;;  %v6875_v2 = vld [vmem:[%s8712_s21 + $0xfa] sm:$0xff] }
 0x194   : > { %1886 = vmatmul.bf16.gmra.mxu3 %v6963_v36  ;;  %1385 = vst [vmem:[#allocation4 + $0x208] sm:$0xf] %v1365_v55  ;;  %v6986_v38 = vld [vmem:[#allocation4 + $0x294] sm:$0xf] }
 0x195   : > { %v1123_v15 = vpop.f32.mrf.mxu0  ;;  %2194 = vst [vmem:[#allocation4 + $0x1cc] sm:$0xf] %v1365_v55  ;;  %v7093_v55 = vld [vmem:[%s8712_s21 + $0x38] sm:$0xff]  ;;  %v8068_v19 = vld [vmem:[#allocation4 + $0x250] sm:$0xf] }
 0x196   : > { %v1183_v21 = vadd.f32 %v1182_v63, %v1123_v15  ;;  %1999 = vmatmul.bf16.gmra.mxu1 %v6959_v47  ;;  %2137 = vst [vmem:[#allocation4 + $0x234] sm:$0xf] %v1308_v49  ;;  %v1143_v15 = vadd.f32 %v8854_v42, %v8852_v41  ;;  %v9023_v17 = vpop.f32.mrf.mxu3  ;;  %v8129_v41 = vld [vmem:[%s9856_s1 + $0x188] sm:$0xff]  ;;  %v1427_v42 = vpack.c.bf16 %v6872_v27, %v6872_v27  ;;  %v6854_v47 = vld [vmem:[%s8712_s21 + $0xf1] sm:$0xff] }
 0x197   : > { %2660 = vmatpush.bf16.msrb.mxu2 %v8129_v41  ;;  %2138 = vst [vmem:[#allocation4 + $0x258] sm:$0xf] %v1309_v20  ;;  %v7092_v49 = vld [vmem:[%s8712_s21 + $0x30] sm:$0xff]  ;;  %v2103_v60 = vpack.c.bf16 %v7093_v55, %v7093_v55 }
 0x198   : > { %v1242_v24 = vadd.f32 %v1241_v5, %v1183_v21  ;;  %v6974_v5 = vld [vmem:[#allocation4 + $0x24c] sm:$0xf]  ;;  %v1310_v21 = vpack.c.bf16 %v6835_v14, %v6835_v14  ;;  %1447 = vst [vmem:[#allocation4 + $0x254] sm:$0xf] %v1427_v42  ;;  %v2102_v56 = vpack.c.bf16 %v7092_v49, %v7092_v49 }
 0x199   : > { %2256 = vst [vmem:[#allocation4 + $0x218] sm:$0xf] %v1427_v42  ;;  %v7114_v41 = vld [vmem:[%s8712_s21 + $0x49] sm:$0xff]  ;;  %v7115_v42 = vld [vmem:[%s8712_s21 + $0x51] sm:$0xff] }
 0x19a   : > { %1266 = vst [vmem:[#allocation6 + $0x48] sm:$0xff] %v1242_v24  ;;  %v8069_v8 = vld [vmem:[#allocation4 + $0x26c] sm:$0xf0] }
 0x19b   : > { %v6975_v9 = vor.u32 %v8069_v8, %v6974_v5  ;;  %1330 = vst [vmem:[#allocation4 + $0x2b8] sm:$0xf] %v1310_v21  ;;  %v1430_v5 = vpack.c.bf16 %v6875_v2, %v6875_v2  ;;  %v8144_v8 = vld [vmem:[%s9856_s1 + $0x200] sm:$0xff]  ;;  %2661 = vmatpush.bf16.msrb.mxu2 %v8128_v7 }
 0x19c   : > { %2139 = vst [vmem:[#allocation4 + $0x27c] sm:$0xf] %v1310_v21  ;;  %v1970_v21 = vpop.f32.mrf.mxu1 }
 0x19d   : > { %v1126_v31 = vpop.f32.mrf.mxu0  ;;  %2122 = vst [vmem:[#allocation4 + $0x18] sm:$0xf] %v2102_v56 }
 0x19e   : > { %v1186_v34 = vadd.f32 %v1185_v26, %v1126_v31  ;;  %v1368_v26 = vpack.c.bf16 %v6853_v23, %v6853_v23  ;;  %v1428_v31 = vpack.c.bf16 %v6873_v28, %v6873_v28  ;;  %v9037_v36 = vpop.f32.mrf.mxu3  ;;  %2123 = vst [vmem:[#allocation4 + $0x3c] sm:$0xf] %v2103_v60  ;;  %v7097_v60 = vld [vmem:[%s8712_s21 + $0x68] sm:$0xff] }
 0x19f   : > { %v6982_v44 = vld [vmem:[#allocation4 + $0x254] sm:$0xf]  ;;  %2182 = vst [vmem:[#allocation4 + $0x1c] sm:$0xf] %v2162_v1  ;;  %v2107_v2 = vpack.c.bf16 %v7097_v60, %v7097_v60 }
 0x1a0   : > { %v1245_v37 = vadd.f32 %v1244_v29, %v1186_v34  ;;  %1930 = vmatmul.bf16.gmra.mxu0 %v6931_v30  ;;  %v8145_v30 = vld [vmem:[%s9856_s1 + $0x208] sm:$0xff]  ;;  %v6952_v34 = vld [vmem:[#allocation4 + $0x1e0] sm:$0xf0]  ;;  %1388 = vst [vmem:[#allocation4 + $0x274] sm:$0xf] %v1368_v26 }
 0x1a1   : > { %2778 = vmatpush.bf16.msrb.mxu0 %v8145_v30  ;;  %1448 = vst [vmem:[#allocation4 + $0x278] sm:$0xf] %v1428_v31  ;;  %v6955_v35 = vor.u32 %v8062_v32, %v6952_v34  ;;  %v2164_v34 = vpack.c.bf16 %v7114_v41, %v7114_v41 }
 0x1a2   : > { %1267 = vst [vmem:[#allocation6 + $0x70] sm:$0xff] %v1245_v37  ;;  %v8072_v40 = vld [vmem:[#allocation4 + $0x2b4] sm:$0xf0] }
 0x1a3   : > { %2197 = vst [vmem:[#allocation4 + $0x238] sm:$0xf] %v1368_v26 }
 0x1a4   : > { %1891 = vmatmul.bf16.gmra.mxu3 %v6975_v9  ;;  %2257 = vst [vmem:[#allocation4 + $0x23c] sm:$0xf] %v1428_v31  ;;  %v7154_v13 = vld [vmem:[#allocation4 + $0x18] sm:$0xf] }
 0x1a5   : > { %v1128_v53 = vpop.f32.mrf.mxu0  ;;  %2183 = vst [vmem:[#allocation4 + $0x40] sm:$0xf] %v2163_v61  ;;  %2779 = vmatpush.bf16.msrb.mxu0 %v8144_v8  ;;  %v8099_v14 = vld [vmem:[#allocation4 + $0x38] sm:$0xf0] }
 0x1a6   : > { %v1188_v59 = vadd.f32 %v1187_v43, %v1128_v53  ;;  %v6987_v43 = vor.u32 %v8072_v40, %v6986_v38  ;;  %v9050_v52 = vpop.f32.mrf.mxu3  ;;  %v1369_v53 = vpack.c.bf16 %v6854_v47, %v6854_v47  ;;  %1450 = vst [vmem:[#allocation4 + $0x2c0] sm:$0xf] %v1430_v5  ;;  %v7133_v38 = vld [vmem:[%s8712_s21 + $0x3a] sm:$0xff]  ;;  %v1972_v47 = vpop.f32.mrf.mxu1 }
 0x1a7   : > { %2259 = vst [vmem:[#allocation4 + $0x284] sm:$0xf] %v1430_v5  ;;  %v2223_v18 = vpack.c.bf16 %v7133_v38, %v7133_v38 }
 0x1a8   : > { %v1247_v63 = vadd.f32 %v1246_v54, %v1188_v59  ;;  %v8070_v45 = vld [vmem:[#allocation4 + $0x274] sm:$0xf0]  ;;  %v1370_v54 = vpack.c.bf16 %v6855_v48, %v6855_v48  ;;  %1389 = vst [vmem:[#allocation4 + $0x298] sm:$0xf] %v1369_v53 }
 0x1a9   : > { %2198 = vst [vmem:[#allocation4 + $0x25c] sm:$0xf] %v1369_v53 }
 0x1aa   : > { %1268 = vst [vmem:[#allocation6 + $0x90] sm:$0xff] %v1247_v63  ;;  %v6874_v63 = vld [vmem:[%s8712_s21 + $0xf2] sm:$0xff] }
 0x1ab   : > { %1390 = vst [vmem:[#allocation4 + $0x2bc] sm:$0xf] %v1370_v54  ;;  %v1429_v62 = vpack.c.bf16 %v6874_v63, %v6874_v63 }
 0x1ac   : > { %2199 = vst [vmem:[#allocation4 + $0x280] sm:$0xf] %v1370_v54  ;;  %v7156_v20 = vld [vmem:[#allocation4 + $0x3c] sm:$0xf0] }
 0x1ad   : > { %v1199_v4 = vpop.f32.mrf.mxu0  ;;  %1449 = vst [vmem:[#allocation4 + $0x29c] sm:$0xf] %v1429_v62  ;;  %v8073_v26 = vld [vmem:[#allocation4 + $0x2bc] sm:$0xf0] }
 0x1ae   : > { %v9011_v6 = vadd.f32 %v1199_v4, %v8839_v33  ;;  %v6970_v33 = vld [vmem:[#allocation4 + $0x20c] sm:$0xf]  ;;  %v9065_v10 = vpop.f32.mrf.mxu3  ;;  %2258 = vst [vmem:[#allocation4 + $0x260] sm:$0xf] %v1429_v62  ;;  %v1975_v62 = vpop.f32.mrf.mxu1 }
 0x1af   : > { %v6971_v16 = vor.u32 %v8067_v11, %v6970_v33  ;;  %v6964_v4 = vld [vmem:[#allocation4 + $0x228] sm:$0xf0]  ;;  %2184 = vst [vmem:[#allocation4 + $0x64] sm:$0xf] %v2164_v34 }
 0x1b0   : > { %1935 = vmatmul.bf16.gmra.mxu0 %v6943_v3  ;;  %v8065_v3 = vld [vmem:[#allocation4 + $0x208] sm:$0xf]  ;;  %2243 = vst [vmem:[#allocation4 + $0x44] sm:$0xf] %v2223_v18  ;;  %v7192_v18 = vld [vmem:[#allocation4 + $0x114] sm:$0xf0] }
 0x1b1   : > { %2004 = vmatmul.bf16.gmra.mxu1 %v6971_v16  ;;  %v6967_v9 = vor.u32 %v8065_v3, %v6964_v4  ;;  %v8098_v16 = vld [vmem:[#allocation4 + $0x1c] sm:$0xf]  ;;  %2127 = vst [vmem:[#allocation4 + $0xcc] sm:$0xf] %v2107_v2  ;;  %v8071_v4 = vld [vmem:[#allocation4 + $0x298] sm:$0xf] }
 0x1b2   : > { %v7159_v22 = vor.u32 %v8098_v16, %v7156_v20  ;;  %v6988_v5 = vld [vmem:[#allocation4 + $0x2b8] sm:$0xf0] }
 0x1b3   : > { %v6991_v7 = vor.u32 %v8071_v4, %v6988_v5  ;;  %v7102_v5 = vld [vmem:[%s8712_s21 + $0xa8] sm:$0xff] }
 0x1b4   : > { %1896 = vmatmul.bf16.gmra.mxu3 %v6987_v43  ;;  %v6994_v23 = vld [vmem:[#allocation4 + $0x29c] sm:$0xf] }
 0x1b5   : > { %v1201_v24 = vpop.f32.mrf.mxu0  ;;  %v6995_v32 = vor.u32 %v8073_v26, %v6994_v23  ;;  %v7098_v23 = vld [vmem:[%s8712_s21 + $0x78] sm:$0xff] }
 0x1b6   : > { %v9029_v29 = vadd.f32 %v1201_v24, %v1143_v15  ;;  %v7155_v15 = vor.u32 %v8099_v14, %v7154_v13  ;;  %v7095_v24 = vld [vmem:[%s8712_s21 + $0x50] sm:$0xff]  ;;  %v9074_v27 = vpop.f32.mrf.mxu3  ;;  %v8101_v54 = vld [vmem:[#allocation4 + $0x64] sm:$0xf] }
 0x1b7   : > { %v2105_v30 = vpack.c.bf16 %v7095_v24, %v7095_v24 }
 0x1b8   : > { %2662 = vmatmul.bf16.vlgmr.msrb.gmra.mxu2 %v7155_v15  ;;  %v8105_v14 = vld [vmem:[#allocation4 + $0xc8] sm:$0xf0]  ;;  %v7180_v15 = vld [vmem:[#allocation4 + $0xcc] sm:$0xf0] }
 0x1b9   : > { %2125 = vst [vmem:[#allocation4 + $0x84] sm:$0xf] %v2105_v30 }
 0x1bd   : > { %v1204_v37 = vpop.f32.mrf.mxu0 }
 0x1be   : > { %v9040_v39 = vadd.f32 %v1204_v37, %v8865_v51  ;;  %v6983_v51 = vor.u32 %v8070_v45, %v6982_v44  ;;  %v7132_v37 = vld [vmem:[%s8712_s21 + $0x32] sm:$0xff]  ;;  %v9082_v46 = vpop.f32.mrf.mxu3 }
 0x1bf   : > { %v2222_v43 = vpack.c.bf16 %v7132_v37, %v7132_v37  ;;  %v6976_v44 = vld [vmem:[#allocation4 + $0x270] sm:$0xf0] }
 0x1c0   : > { %1940 = vmatmul.bf16.gmra.mxu0 %v6955_v35  ;;  %v2165_v35 = vpack.c.bf16 %v7115_v42, %v7115_v42  ;;  %v6979_v45 = vor.u32 %v8068_v19, %v6976_v44  ;;  %v8100_v42 = vld [vmem:[#allocation4 + $0x40] sm:$0xf0] }
 0x1c1   : > { %2009 = vmatmul.bf16.gmra.mxu1 %v6983_v51  ;;  %2242 = vst [vmem:[#allocation4 + $0x20] sm:$0xf] %v2222_v43 }
 0x1c2   : > { %2185 = vst [vmem:[#allocation4 + $0x88] sm:$0xf] %v2165_v35 }
 0x1c4   : > { %2721 = vmatmul.bf16.vlgmr.msra.gmra.mxu3 %v7159_v22 }
 0x1c5   : > { %v1206_v59 = vpop.f32.mrf.mxu0 }
 0x1c6   : > { %v9056_v0 = vadd.f32 %v1206_v59, %v1148_v50  ;;  %v8102_v50 = vld [vmem:[#allocation4 + $0x80] sm:$0xf0] }
 0x1c7   : > { %v7096_v59 = vld [vmem:[%s8712_s21 + $0x60] sm:$0xff] }
 0x1c8   : > { %v2106_v1 = vpack.c.bf16 %v7096_v59, %v7096_v59  ;;  %v7162_v41 = vld [vmem:[#allocation4 + $0x20] sm:$0xf] }
 0x1c9   : > { %v7168_v56 = vld [vmem:[#allocation4 + $0x84] sm:$0xf0] }
 0x1ca   : > { %v7171_v57 = vor.u32 %v8101_v54, %v7168_v56  ;;  %2126 = vst [vmem:[#allocation4 + $0xa8] sm:$0xf] %v2106_v1  ;;  %v7174_v56 = vld [vmem:[#allocation4 + $0x68] sm:$0xf] }
 0x1cd   : > { %v1209_v33 = vpop.f32.mrf.mxu0 }
 0x1ce   : > { %v9068_v11 = vadd.f32 %v1209_v33, %v8905_v12  ;;  %v7094_v12 = vld [vmem:[%s8712_s21 + $0x48] sm:$0xff] }
 0x1cf   : > { %v2104_v28 = vpack.c.bf16 %v7094_v12, %v7094_v12  ;;  %v7099_v12 = vld [vmem:[%s8712_s21 + $0x80] sm:$0xff] }
 0x1d0   : > { %1945 = vmatmul.bf16.gmra.mxu0 %v6967_v9  ;;  %v2109_v26 = vpack.c.bf16 %v7099_v12, %v7099_v12  ;;  %v8113_v12 = vld [vmem:[#allocation4 + $0x184] sm:$0xf] }
 0x1d1   : > { %2124 = vst [vmem:[#allocation4 + $0x60] sm:$0xf] %v2104_v28  ;;  %2014 = vmatmul.bf16.gmra.mxu1 %v6995_v32  ;;  %v7178_v33 = vld [vmem:[#allocation4 + $0xa8] sm:$0xf]  ;;  %v7163_v32 = vor.u32 %v8100_v42, %v7162_v41  ;;  %v7198_v41 = vld [vmem:[#allocation4 + $0xf8] sm:$0xf] }
 0x1d2   : > { %v7179_v16 = vor.u32 %v8105_v14, %v7178_v33  ;;  %2129 = vst [vmem:[#allocation4 + $0x114] sm:$0xf] %v2109_v26  ;;  %v2112_v33 = vpack.c.bf16 %v7102_v5, %v7102_v5  ;;  %v8109_v42 = vld [vmem:[#allocation4 + $0x118] sm:$0xf0] }
 0x1d3   : > { %v8123_v5 = vld [vmem:[#allocation4 + $0x278] sm:$0xf0] }
 0x1d4   : > { %2726 = vmatmul.bf16.gmra.mxu3 %v7171_v57  ;;  %v8103_v57 = vld [vmem:[#allocation4 + $0x88] sm:$0xf0]  ;;  %2132 = vst [vmem:[#allocation4 + $0x180] sm:$0xf] %v2112_v33  ;;  %v8122_v33 = vld [vmem:[#allocation4 + $0x25c] sm:$0xf] }
 0x1d5   : > { %v1211_v31 = vpop.f32.mrf.mxu0  ;;  %v7175_v59 = vor.u32 %v8103_v57, %v7174_v56  ;;  %v7240_v56 = vld [vmem:[#allocation4 + $0x234] sm:$0xf0] }
 0x1d6   : > { %v9080_v40 = vadd.f32 %v1211_v31, %v1153_v25  ;;  %v2108_v25 = vpack.c.bf16 %v7098_v23, %v7098_v23 }
 0x1d7   : > { %v9090_v63 = vpop.f32.mrf.mxu3 }
 0x1d8   : > { %v7166_v48 = vld [vmem:[#allocation4 + $0x60] sm:$0xf]  ;;  %2128 = vst [vmem:[#allocation4 + $0xf0] sm:$0xf] %v2108_v25  ;;  %v7216_v25 = vld [vmem:[#allocation4 + $0x1a4] sm:$0xf0] }
 0x1d9   : > { %v7167_v53 = vor.u32 %v8102_v50, %v7166_v48  ;;  %v8108_v43 = vld [vmem:[#allocation4 + $0x110] sm:$0xf0] }
 0x1db   : > { %2667 = vmatmul.bf16.gmra.mxu2 %v7167_v53 }
 0x1dd   : > { %v1911_v51 = vpop.f32.mrf.mxu0 }
 0x1de   : > { %v1912_v49 = vadd.f32 %v1911_v51, %v9023_v17  ;;  %v7100_v51 = vld [vmem:[%s8712_s21 + $0x90] sm:$0xff] }
 0x1df   : > { %v9096_v8 = vpop.f32.mrf.mxu3  ;;  %v7190_v37 = vld [vmem:[#allocation4 + $0xf0] sm:$0xf] }
 0x1e0   : > { %v1971_v55 = vadd.f32 %v1970_v21, %v1912_v49  ;;  %1950 = vmatmul.bf16.gmra.mxu0 %v6979_v45  ;;  %v1977_v21 = vpop.f32.mrf.mxu1  ;;  %v7191_v19 = vor.u32 %v8108_v43, %v7190_v37  ;;  %v2110_v49 = vpack.c.bf16 %v7100_v51, %v7100_v51  ;;  %v8117_v37 = vld [vmem:[#allocation4 + $0x1e8] sm:$0xf0]  ;;  %v7210_v51 = vld [vmem:[#allocation4 + $0x140] sm:$0xf] }
 0x1e1   : > { %v8116_v43 = vld [vmem:[#allocation4 + $0x1cc] sm:$0xf] }
 0x1e2   : > { %v9086_v58 = vadd.f32 %v1971_v55, %v9011_v6  ;;  %2130 = vst [vmem:[#allocation4 + $0x138] sm:$0xf] %v2110_v49 }
 0x1e5   : > { %v1913_v61 = vpop.f32.mrf.mxu0 }
 0x1e6   : > { %v1914_v17 = vadd.f32 %v1913_v61, %v9037_v36  ;;  %v8104_v36 = vld [vmem:[#allocation4 + $0xac] sm:$0xf] }
 0x1e7   : > { %v7183_v22 = vor.u32 %v8104_v36, %v7180_v15  ;;  %v9104_v24 = vpop.f32.mrf.mxu3  ;;  %v8106_v36 = vld [vmem:[#allocation4 + $0xd0] sm:$0xf0] }
 0x1e8   : > { %v1973_v3 = vadd.f32 %v1972_v47, %v1914_v17  ;;  %v7101_v47 = vld [vmem:[%s8712_s21 + $0x98] sm:$0xff] }
 0x1e9   : > { %2731 = vmatmul.bf16.gmra.mxu3 %v7183_v22  ;;  %v2111_v50 = vpack.c.bf16 %v7101_v47, %v7101_v47  ;;  %v7202_v2 = vld [vmem:[#allocation4 + $0x138] sm:$0xf]  ;;  %v8112_v47 = vld [vmem:[#allocation4 + $0x160] sm:$0xf0] }
 0x1ea   : > { %v9094_v6 = vadd.f32 %v1973_v3, %v9029_v29  ;;  %v7211_v49 = vor.u32 %v8112_v47, %v7210_v51  ;;  %v7150_v47 = vld [vmem:[%s8712_s21 + $0x10a] sm:$0xff] }
 0x1eb   : > { %2672 = vmatmul.bf16.gmra.mxu2 %v7179_v16  ;;  %2131 = vst [vmem:[#allocation4 + $0x15c] sm:$0xf] %v2111_v50 }
 0x1ed   : > { %v1916_v9 = vpop.f32.mrf.mxu0 }
 0x1ee   : > { %v1917_v13 = vadd.f32 %v1916_v9, %v9050_v52 }
 0x1ef   : > { %v9110_v34 = vpop.f32.mrf.mxu3 }
 0x1f0   : > { %v1976_v20 = vadd.f32 %v1975_v62, %v1917_v13  ;;  %1955 = vmatmul.bf16.gmra.mxu0 %v6991_v7  ;;  %v8110_v62 = vld [vmem:[#allocation4 + $0x13c] sm:$0xf]  ;;  %v7103_v7 = vld [vmem:[%s8712_s21 + $0xb0] sm:$0xff] }
 0x1f2   : > { %v9100_v29 = vadd.f32 %v1976_v20, %v9040_v39  ;;  %v1980_v39 = vpop.f32.mrf.mxu1  ;;  %v8111_v17 = vld [vmem:[#allocation4 + $0x158] sm:$0xf0] }
 0x1f3   : > { %v7203_v3 = vor.u32 %v8111_v17, %v7202_v2  ;;  %v7222_v17 = vld [vmem:[#allocation4 + $0x188] sm:$0xf] }
 0x1f5   : > { %v1918_v28 = vpop.f32.mrf.mxu0 }
 0x1f6   : > { %v1919_v52 = vadd.f32 %v1918_v28, %v9065_v10  ;;  %v8107_v10 = vld [vmem:[#allocation4 + $0xf4] sm:$0xf]  ;;  %v7219_v28 = vor.u32 %v8113_v12, %v7216_v25 }
 0x1f7   : > { %v7195_v45 = vor.u32 %v8107_v10, %v7192_v18  ;;  %v1877_v48 = vpop.f32.mrf.mxu3  ;;  %v7228_v10 = vld [vmem:[#allocation4 + $0x1ec] sm:$0xf0] }
 0x1f8   : > { %v1978_v30 = vadd.f32 %v1977_v21, %v1919_v52  ;;  %v7214_v21 = vld [vmem:[#allocation4 + $0x180] sm:$0xf] }
 0x1f9   : > { %2736 = vmatmul.bf16.gmra.mxu3 %v7195_v45 }
 0x1fa   : > { %v9108_v31 = vadd.f32 %v1978_v30, %v9056_v0  ;;  %v1982_v54 = vpop.f32.mrf.mxu1 }
 0x1fb   : > { %2677 = vmatmul.bf16.gmra.mxu2 %v7191_v19  ;;  %v7231_v19 = vor.u32 %v8116_v43, %v7228_v10 }
 0x1fd   : > { %v1921_v35 = vpop.f32.mrf.mxu0 }
 0x1fe   : > { %v1922_v38 = vadd.f32 %v1921_v35, %v9074_v27 }
 0x1ff   : > { %v1879_v60 = vpop.f32.mrf.mxu3 }
 0x200   : > { %v1981_v44 = vadd.f32 %v1980_v39, %v1922_v38  ;;  %2780 = vmatmul.bf16.vlgmr.msrb.gmra.mxu0 %v7163_v32  ;;  %v7199_v39 = vor.u32 %v8109_v42, %v7198_v41  ;;  %v7234_v41 = vld [vmem:[#allocation4 + $0x1d0] sm:$0xf]  ;;  %v8118_v42 = vld [vmem:[#allocation4 + $0x1f0] sm:$0xf0] }
 0x202   : > { %v9114_v0 = vadd.f32 %v1981_v44, %v9068_v11 }
 0x205   : > { %v1923_v53 = vpop.f32.mrf.mxu0 }
 0x206   : > { %v1924_v27 = vadd.f32 %v1923_v53, %v9082_v46  ;;  %v7204_v46 = vld [vmem:[#allocation4 + $0x15c] sm:$0xf0] }
 0x207   : > { %v7207_v4 = vor.u32 %v8110_v62, %v7204_v46  ;;  %v1882_v9 = vpop.f32.mrf.mxu3  ;;  %v8115_v62 = vld [vmem:[#allocation4 + $0x1a8] sm:$0xf0] }
 0x208   : > { %v1983_v55 = vadd.f32 %v1982_v54, %v1924_v27  ;;  %v7238_v54 = vld [vmem:[#allocation4 + $0x210] sm:$0xf]  ;;  %v7223_v46 = vor.u32 %v8115_v62, %v7222_v17 }
 0x209   : > { %2741 = vmatmul.bf16.gmra.mxu3 %v7207_v4  ;;  %v7250_v4 = vld [vmem:[#allocation4 + $0x258] sm:$0xf] }
 0x20a   : > { %v9120_v11 = vadd.f32 %v1983_v55, %v9080_v40  ;;  %v2113_v40 = vpack.c.bf16 %v7103_v7, %v7103_v7  ;;  %v8119_v55 = vld [vmem:[#allocation4 + $0x214] sm:$0xf] }
 0x20b   : > { %2682 = vmatmul.bf16.gmra.mxu2 %v7203_v3 }
 0x20c   : > { %2133 = vst [vmem:[#allocation4 + $0x1a4] sm:$0xf] %v2113_v40  ;;  %v7252_v40 = vld [vmem:[#allocation4 + $0x27c] sm:$0xf0] }
 0x20d   : > { %v1926_v1 = vpop.f32.mrf.mxu0 }
 0x20e   : > { %v9123_v61 = vadd.f32 %v1926_v1, %v9090_v63  ;;  %v7186_v63 = vld [vmem:[#allocation4 + $0xb0] sm:$0xf] }
 0x20f   : > { %v7187_v15 = vor.u32 %v8106_v36, %v7186_v63  ;;  %v1884_v16 = vpop.f32.mrf.mxu3  ;;  %v7255_v63 = vor.u32 %v8122_v33, %v7252_v40  ;;  %v7110_v36 = vld [vmem:[%s8712_s21 + $0x108] sm:$0xff]  ;;  %v7258_v33 = vld [vmem:[#allocation4 + $0x260] sm:$0xf] }
 0x210   : > { %2785 = vmatmul.bf16.gmra.mxu0 %v7175_v59  ;;  %v7243_v59 = vor.u32 %v8119_v55, %v7240_v56 }
 0x213   : > { %v8114_v23 = vld [vmem:[#allocation4 + $0x1a0] sm:$0xf0] }
 0x214   : > { %v7215_v26 = vor.u32 %v8114_v23, %v7214_v21  ;;  %v7131_v23 = vld [vmem:[%s8712_s21 + $0x111] sm:$0xff] }
 0x215   : > { %v1928_v13 = vpop.f32.mrf.mxu0 }
 0x216   : > { %v9128_v14 = vadd.f32 %v1928_v13, %v9096_v8  ;;  %v7251_v13 = vor.u32 %v8123_v5, %v7250_v4 }
 0x217   : > { %v1887_v8 = vpop.f32.mrf.mxu3 }
 0x219   : > { %2746 = vmatmul.bf16.gmra.mxu3 %v7219_v28 }
 0x21b   : > { %2687 = vmatmul.bf16.gmra.mxu2 %v7215_v26  ;;  %v2181_v26 = vpack.c.bf16 %v7131_v23, %v7131_v23 }
 0x21d   : > { %v1931_v20 = vpop.f32.mrf.mxu0  ;;  %2201 = vst [vmem:[#allocation4 + $0x2c8] sm:$0xf] %v2181_v26  ;;  %v9178_v26 = vld [vmem:[%s9859_s4] ss:$0 sm:$0xff] }
 0x21e   : > { %v9131_v22 = vadd.f32 %v1931_v20, %v9104_v24  ;;  %v7226_v24 = vld [vmem:[#allocation4 + $0x1c8] sm:$0xf]  ;;  %v2120_v20 = vpack.c.bf16 %v7110_v36, %v7110_v36 }
 0x21f   : > { %v1889_v32 = vpop.f32.mrf.mxu3  ;;  %v7227_v18 = vor.u32 %v8117_v37, %v7226_v24 }
 0x220   : > { %2790 = vmatmul.bf16.gmra.mxu0 %v7187_v15  ;;  %v7111_v15 = vld [vmem:[%s8712_s21 + $0x110] sm:$0xff]  ;;  %2140 = vst [vmem:[#allocation4 + $0x2a0] sm:$0xf] %v2120_v20 }
 0x221   : > { %v2121_v21 = vpack.c.bf16 %v7111_v15, %v7111_v15 }
 0x223   : > { %2141 = vst [vmem:[#allocation4 + $0x2c4] sm:$0xf] %v2121_v21 }
 0x225   : > { %v1933_v52 = vpop.f32.mrf.mxu0 }
 0x226   : > { %v9134_v30 = vadd.f32 %v1933_v52, %v9110_v34 }
 0x227   : > { %v1892_v44 = vpop.f32.mrf.mxu3  ;;  %v7262_v24 = vld [vmem:[#allocation4 + $0x2a0] sm:$0xf] }
 0x229   : > { %2751 = vmatmul.bf16.gmra.mxu3 %v7231_v19 }
 0x22a   : > { %v8126_v10 = vld [vmem:[#allocation4 + $0x2c0] sm:$0xf0] }
 0x22b   : > { %2692 = vmatmul.bf16.gmra.mxu2 %v7227_v18  ;;  %v7263_v18 = vor.u32 %v8126_v10, %v7262_v24  ;;  %v1985_v10 = vpop.f32.mrf.mxu1 }
 0x22d   : > { %v1936_v35 = vpop.f32.mrf.mxu0 }
 0x22e   : > { %v9136_v38 = vadd.f32 %v1936_v35, %v1877_v48  ;;  %v8120_v48 = vld [vmem:[#allocation4 + $0x230] sm:$0xf0] }
 0x22f   : > { %v9140_v50 = vpop.f32.mrf.mxu3  ;;  %v7239_v57 = vor.u32 %v8120_v48, %v7238_v54  ;;  %v2240_v54 = vpack.c.bf16 %v7150_v47, %v7150_v47 }
 0x230   : > { %2795 = vmatmul.bf16.gmra.mxu0 %v7199_v39  ;;  %v7235_v39 = vor.u32 %v8118_v42, %v7234_v41 }
 0x231   : > { %2260 = vst [vmem:[#allocation4 + $0x2a8] sm:$0xf] %v2240_v54 }
 0x235   : > { %v1938_v45 = vpop.f32.mrf.mxu0 }
 0x236   : > { %v9138_v34 = vadd.f32 %v1938_v45, %v1879_v60  ;;  %v7264_v45 = vld [vmem:[#allocation4 + $0x2c4] sm:$0xf0] }
 0x237   : > { %v9144_v1 = vpop.f32.mrf.mxu3 }
 0x239   : > { %2756 = vmatmul.bf16.gmra.mxu3 %v7243_v59  ;;  %v8121_v59 = vld [vmem:[#allocation4 + $0x238] sm:$0xf0] }
 0x23b   : > { %2697 = vmatmul.bf16.gmra.mxu2 %v7239_v57  ;;  %v7246_v57 = vld [vmem:[#allocation4 + $0x218] sm:$0xf] }
 0x23d   : > { %v1941_v53 = vpop.f32.mrf.mxu0 }
 0x23e   : > { %v9142_v27 = vadd.f32 %v1941_v53, %v1882_v9 }
 0x23f   : > { %v1899_v9 = vpop.f32.mrf.mxu3 }
 0x240   : > { %2800 = vmatmul.bf16.gmra.mxu0 %v7211_v49  ;;  %v7151_v49 = vld [vmem:[%s8712_s21 + $0x112] sm:$0xff] }
 0x241   : > { %v2241_v48 = vpack.c.bf16 %v7151_v49, %v7151_v49 }
 0x243   : > { %2261 = vst [vmem:[#allocation4 + $0x2cc] sm:$0xf] %v2241_v48 }
 0x245   : > { %v1943_v60 = vpop.f32.mrf.mxu0 }
 0x246   : > { %v9146_v2 = vadd.f32 %v1943_v60, %v1884_v16  ;;  %v7130_v16 = vld [vmem:[%s8712_s21 + $0x109] sm:$0xff]  ;;  %v7247_v60 = vor.u32 %v8121_v59, %v7246_v57  ;;  %v1987_v59 = vpop.f32.mrf.mxu1 }
 0x247   : > { %v2180_v12 = vpack.c.bf16 %v7130_v16, %v7130_v16  ;;  %v2722_v52 = vpop.f32.mrf.mxu3 }
 0x249   : > { %2761 = vmatmul.bf16.gmra.mxu3 %v7255_v63  ;;  %2200 = vst [vmem:[#allocation4 + $0x2a4] sm:$0xf] %v2180_v12 }
 0x24a   : > { %v8127_v41 = vld [vmem:[#allocation4 + $0x2c8] sm:$0xf0] }
 0x24b   : > { %2702 = vmatmul.bf16.gmra.mxu2 %v7251_v13 }
 0x24d   : > { %v1946_v3 = vpop.f32.mrf.mxu0 }
 0x24e   : > { %v9148_v7 = vadd.f32 %v1946_v3, %v1887_v8  ;;  %v2663_v8 = vpop.f32.mrf.mxu2 }
 0x24f   : > { %v2724_v19 = vpop.f32.mrf.mxu3  ;;  %v2723_v40 = vadd.f32 %v2722_v52, %v2663_v8  ;;  %v7270_v52 = vld [vmem:[#allocation4 + $0x2a8] sm:$0xf] }
 0x250   : > { %2805 = vmatmul.bf16.gmra.mxu0 %v7223_v46 }
 0x255   : > { %v1948_v25 = vpop.f32.mrf.mxu0 }
 0x256   : > { %v9154_v28 = vadd.f32 %v1948_v25, %v1889_v32  ;;  %v2665_v43 = vpop.f32.mrf.mxu2  ;;  %v8125_v32 = vld [vmem:[#allocation4 + $0x2a4] sm:$0xf] }
 0x257   : > { %v7267_v51 = vor.u32 %v8125_v32, %v7264_v45  ;;  %v2727_v56 = vpop.f32.mrf.mxu3  ;;  %v2725_v21 = vadd.f32 %v2724_v19, %v2665_v43  ;;  %v7271_v43 = vor.u32 %v8127_v41, %v7270_v52 }
 0x259   : > { %2766 = vmatmul.bf16.gmra.mxu3 %v7267_v51 }
 0x25b   : > { %2707 = vmatmul.bf16.gmra.mxu2 %v7263_v18 }
 0x25d   : > { %v1951_v35 = vpop.f32.mrf.mxu0 }
 0x25e   : > { %v9156_v37 = vadd.f32 %v1951_v35, %v1892_v44  ;;  %v2668_v44 = vpop.f32.mrf.mxu2 }
 0x25f   : > { %v2729_v3 = vpop.f32.mrf.mxu3 }
 0x260   : > { %2810 = vmatmul.bf16.gmra.mxu0 %v7235_v39  ;;  %v2728_v39 = vadd.f32 %v2727_v56, %v2668_v44 }
 0x265   : > { %v1953_v53 = vpop.f32.mrf.mxu0 }
 0x266   : > { %v9161_v55 = vadd.f32 %v1953_v53, %v9140_v50  ;;  %v2670_v46 = vpop.f32.mrf.mxu2  ;;  %v8124_v50 = vld [vmem:[#allocation4 + $0x280] sm:$0xf0] }
 0x267   : > { %v7259_v36 = vor.u32 %v8124_v50, %v7258_v33  ;;  %v2730_v54 = vadd.f32 %v2729_v3, %v2670_v46 }
 0x26c   : > { %v2732_v63 = vpop.f32.mrf.mxu3 }
 0x26d   : > { %v1956_v17 = vpop.f32.mrf.mxu0 }
 0x26e   : > { %v9164_v62 = vadd.f32 %v1956_v17, %v9144_v1  ;;  %v2673_v13 = vpop.f32.mrf.mxu2  ;;  %v9172_v1 = vld [vmem:[%s9858_s3] ss:$0 sm:$0xff] }
 0x26f   : > { %v2733_v50 = vadd.f32 %v2732_v63, %v2673_v13 }
 0x270   : > { %2815 = vmatmul.bf16.gmra.mxu0 %v7247_v60 }
 0x274   : > { %v2734_v12 = vpop.f32.mrf.mxu3 }
 0x275   : > { %v1958_v4 = vpop.f32.mrf.mxu0 }
 0x276   : > { %v9166_v5 = vadd.f32 %v1958_v4, %v1899_v9  ;;  %v2675_v9 = vpop.f32.mrf.mxu2 }
 0x27c   : > { %v2737_v47 = vpop.f32.mrf.mxu3 }
 0x27d   : > { %v2781_v15 = vpop.f32.mrf.mxu0 }
 0x27e   : > { %v2782_v16 = vadd.f32 %v2781_v15, %v2723_v40  ;;  %v2678_v51 = vpop.f32.mrf.mxu2 }
 0x27f   : > { %v2738_v41 = vadd.f32 %v2737_v47, %v2678_v51 }
 0x280   : > { %v2851_v20 = vadd.f32 %v2782_v16, %v9086_v58  ;;  %2820 = vmatmul.bf16.gmra.mxu0 %v7259_v36 }
 0x282   : > { %2871 = vst [vmem:[#allocation6] sm:$0xff] %v2851_v20  ;;  %v2915_v25 = vmul.f32 %v9172_v1, %v2851_v20  ;;  %v1990_v20 = vpop.f32.mrf.mxu1 }
 0x284   : > { %v2939_v42 = vadd.f32 %v9178_v26, %v2915_v25  ;;  %v2739_v33 = vpop.f32.mrf.mxu3 }
 0x285   : > { %v2783_v23 = vpop.f32.mrf.mxu0 }
 0x286   : > { %v2784_v8 = vadd.f32 %v2783_v23, %v2725_v21  ;;  %v2959_v32 = vmax.f32 %v2939_v42, 0.0  ;;  %v2680_v4 = vpop.f32.mrf.mxu2  ;;  %v2735_v23 = vadd.f32 %v2734_v12, %v2675_v9 }
 0x287   : > { %v2740_v51 = vadd.f32 %v2739_v33, %v2680_v4  ;;  %v2028_v33 = vld [vmem:[#allocation6 + $0x8] sm:$0xff] }
 0x288   : > { %v2852_v58 = vadd.f32 %v2784_v8, %v9094_v6 }
 0x28a   : > { %2872 = vst [vmem:[#allocation6 + $0x38] sm:$0xff] %v2852_v58  ;;  %v2916_v35 = vmul.f32 %v9172_v1, %v2852_v58  ;;  %v1986_v58 = vadd.f32 %v1985_v10, %v9123_v61  ;;  %v1992_v42 = vpop.f32.mrf.mxu1  ;;  %v1988_v61 = vadd.f32 %v1987_v59, %v9128_v14 }
 0x28c   : > { %v2940_v24 = vadd.f32 %v9178_v26, %v2916_v35 }
 0x28d   : > { %v2786_v18 = vpop.f32.mrf.mxu0 }
 0x28e   : > { %v2960_v19 = vmax.f32 %v2940_v24, 0.0  ;;  %v2787_v45 = vadd.f32 %v2786_v18, %v2728_v39  ;;  %v2683_v21 = vpop.f32.mrf.mxu2  ;;  %v2026_v24 = vld [vmem:[#allocation6 + $0x78] sm:$0xff] }
 0x290   : > { %v8299_v49 = vpack.c.bf16 %v2960_v19, %v2959_v32  ;;  %v2853_v6 = vadd.f32 %v2787_v45, %v9100_v29  ;;  %2825 = vmatmul.bf16.gmra.mxu0 %v7271_v43  ;;  %v2046_v43 = vadd.f32 %v2026_v24, %v1986_v58 }
 0x292   : > { %8321 = vst [vmem:[#allocation5 + $0x8] sm:$0xff] %v8299_v49   ;;  %v2917_v53 = vmul.f32 %v9172_v1, %v2853_v6  ;;  %v2027_v49 = vld [vmem:[#allocation6 + $0x80] sm:$0xff] }
 0x293   : > { %2873 = vst [vmem:[#allocation6 + $0x50] sm:$0xff] %v2853_v6  ;;  %v1995_v6 = vpop.f32.mrf.mxu1 }
 0x294   : > { %v2941_v48 = vadd.f32 %v9178_v26, %v2917_v53 }
 0x295   : > { %v2788_v44 = vpop.f32.mrf.mxu0 }
 0x296   : > { %v2961_v56 = vmax.f32 %v2941_v48, 0.0  ;;  %v2789_v57 = vadd.f32 %v2788_v44, %v2730_v54  ;;  %v2685_v35 = vpop.f32.mrf.mxu2  ;;  %v2047_v54 = vadd.f32 %v2027_v49, %v1988_v61 }
 0x298   : > { %v2981_v60 = vpack.c.bf16 %v2961_v56, %v2961_v56  ;;  %v2854_v17 = vadd.f32 %v2789_v57, %v9108_v31  ;;  %v2742_v31 = vpop.f32.mrf.mxu3 }
 0x299   : > { %v2743_v14 = vadd.f32 %v2742_v31, %v2683_v21 }
 0x29a   : > { %3001 = vst [vmem:[#allocation5 + $0x1c] sm:$0xf] %v2981_v60  ;;  %v2918_v29 = vmul.f32 %v9172_v1, %v2854_v17 }
 0x29b   : > { %2874 = vst [vmem:[#allocation6 + $0x18] sm:$0xff] %v2854_v17 }
 0x29c   : > { %v2942_v40 = vadd.f32 %v9178_v26, %v2918_v29 }
 0x29d   : > { %v2791_v36 = vpop.f32.mrf.mxu0 }
 0x29e   : > { %v2962_v46 = vmax.f32 %v2942_v40, 0.0  ;;  %v2792_v3 = vadd.f32 %v2791_v36, %v2733_v50  ;;  %v2688_v56 = vpop.f32.mrf.mxu2  ;;  %v1991_v50 = vadd.f32 %v1990_v20, %v9131_v22  ;;  %v2029_v20 = vld [vmem:[#allocation6 + $0x88] sm:$0xff] }
 0x2a0   : > { %v2982_v15 = vpack.c.bf16 %v2962_v46, %v2962_v46  ;;  %v2855_v16 = vadd.f32 %v2792_v3, %v9114_v0  ;;  %v2744_v12 = vpop.f32.mrf.mxu3  ;;  %v2048_v40 = vadd.f32 %v2028_v33, %v1991_v50  ;;  %v1997_v3 = vpop.f32.mrf.mxu1 }
 0x2a1   : > { %v2745_v22 = vadd.f32 %v2744_v12, %v2685_v35 }
 0x2a2   : > { %3002 = vst [vmem:[#allocation5 + $0x20] sm:$0xf] %v2982_v15  ;;  %v2919_v13 = vmul.f32 %v9172_v1, %v2855_v16 }
 0x2a3   : > { %2875 = vst [vmem:[#allocation6 + $0x30] sm:$0xff] %v2855_v16 }
 0x2a4   : > { %v2943_v52 = vadd.f32 %v9178_v26, %v2919_v13  ;;  %v1993_v13 = vadd.f32 %v1992_v42, %v9134_v30 }
 0x2a5   : > { %v2793_v25 = vpop.f32.mrf.mxu0 }
 0x2a6   : > { %v2794_v63 = vadd.f32 %v2793_v25, %v2735_v23  ;;  %v2963_v18 = vmax.f32 %v2943_v52, 0.0  ;;  %v2690_v23 = vpop.f32.mrf.mxu2  ;;  %v2049_v31 = vadd.f32 %v2029_v20, %v1993_v13 }
 0x2a8   : > { %v2856_v8 = vadd.f32 %v2794_v63, %v9120_v11  ;;  %v2747_v57 = vpop.f32.mrf.mxu3  ;;  %v2000_v52 = vpop.f32.mrf.mxu1 }
 0x2aa   : > { %2876 = vst [vmem:[#allocation6 + $0x68] sm:$0xff] %v2856_v8  ;;  %v2920_v0 = vmul.f32 %v9172_v1, %v2856_v8 }
 0x2ac   : > { %v2944_v39 = vadd.f32 %v9178_v26, %v2920_v0 }
 0x2ad   : > { %v2796_v9 = vpop.f32.mrf.mxu0 }
 0x2ae   : > { %v2964_v32 = vmax.f32 %v2944_v39, 0.0  ;;  %v2797_v19 = vadd.f32 %v2796_v9, %v2738_v41  ;;  %v1996_v41 = vadd.f32 %v1995_v6, %v9136_v38  ;;  %v2748_v39 = vadd.f32 %v2747_v57, %v2688_v56  ;;  %v2693_v30 = vpop.f32.mrf.mxu2  ;;  %v2030_v9 = vld [vmem:[#allocation6 + $0x28] sm:$0xff]  ;;  %v2031_v6 = vld [vmem:[#allocation6 + $0x40] sm:$0xff] }
 0x2af   : > { %v1998_v38 = vadd.f32 %v1997_v3, %v9138_v34 }
 0x2b0   : > { %v8304_v11 = vpack.c.bf16 %v2964_v32, %v2963_v18  ;;  %v2857_v45 = vadd.f32 %v2797_v19, %v2046_v43  ;;  %v2749_v25 = vpop.f32.mrf.mxu3  ;;  %v2050_v43 = vadd.f32 %v2030_v9, %v1996_v41 }
 0x2b2   : > { %8322 = vst [vmem:[#allocation5 + $0x30] sm:$0xff] %v8304_v11   ;;  %v2921_v10 = vmul.f32 %v9172_v1, %v2857_v45 }
 0x2b3   : > { %2877 = vst [vmem:[#allocation6 + $0x78] sm:$0xff] %v2857_v45 }
 0x2b4   : > { %v2945_v47 = vadd.f32 %v9178_v26, %v2921_v10  ;;  %v2002_v10 = vpop.f32.mrf.mxu1 }
 0x2b5   : > { %v2798_v53 = vpop.f32.mrf.mxu0 }
 0x2b6   : > { %v2965_v48 = vmax.f32 %v2945_v47, 0.0  ;;  %v2799_v44 = vadd.f32 %v2798_v53, %v2740_v51  ;;  %v2750_v51 = vadd.f32 %v2749_v25, %v2690_v23  ;;  %v2695_v49 = vpop.f32.mrf.mxu2  ;;  %v2003_v23 = vadd.f32 %v2002_v10, %v9146_v2  ;;  %v2033_v25 = vld [vmem:[#allocation6 + $0x10] sm:$0xff]  ;;  %v2035_v10 = vld [vmem:[#allocation6 + $0x60] sm:$0xff] }
 0x2b8   : > { %v2985_v60 = vpack.c.bf16 %v2965_v48, %v2965_v48  ;;  %v2858_v17 = vadd.f32 %v2799_v44, %v2047_v54  ;;  %v2752_v42 = vpop.f32.mrf.mxu3  ;;  %v2051_v48 = vadd.f32 %v2031_v6, %v1998_v38 }
 0x2b9   : > { %v2753_v34 = vadd.f32 %v2752_v42, %v2693_v30 }
 0x2ba   : > { %3005 = vst [vmem:[#allocation5 + $0x44] sm:$0xf] %v2985_v60  ;;  %v2922_v59 = vmul.f32 %v9172_v1, %v2858_v17 }
 0x2bb   : > { %2878 = vst [vmem:[#allocation6 + $0x80] sm:$0xff] %v2858_v17  ;;  %v2001_v17 = vadd.f32 %v2000_v52, %v9142_v27 }
 0x2bc   : > { %v2946_v4 = vadd.f32 %v9178_v26, %v2922_v59  ;;  %v2032_v59 = vld [vmem:[#allocation6 + $0x58] sm:$0xff] }
 0x2bd   : > { %v2801_v29 = vpop.f32.mrf.mxu0 }
 0x2be   : > { %v2966_v36 = vmax.f32 %v2946_v4, 0.0  ;;  %v2802_v46 = vadd.f32 %v2801_v29, %v2743_v14  ;;  %v2005_v4 = vpop.f32.mrf.mxu1  ;;  %v2052_v29 = vadd.f32 %v2032_v59, %v2001_v17  ;;  %v2036_v17 = vld [vmem:[#allocation6 + $0x20] sm:$0xff] }
 0x2bf   : > { %v2006_v52 = vadd.f32 %v2005_v4, %v9148_v7 }
 0x2c0   : > { %v2986_v15 = vpack.c.bf16 %v2966_v36, %v2966_v36  ;;  %v2859_v16 = vadd.f32 %v2802_v46, %v2048_v40  ;;  %v2754_v54 = vpop.f32.mrf.mxu3  ;;  %v2698_v46 = vpop.f32.mrf.mxu2 }
 0x2c1   : > { %v2755_v27 = vadd.f32 %v2754_v54, %v2695_v49 }
 0x2c2   : > { %3006 = vst [vmem:[#allocation5 + $0x48] sm:$0xf] %v2986_v15  ;;  %v2923_v63 = vmul.f32 %v9172_v1, %v2859_v16 }
 0x2c3   : > { %2879 = vst [vmem:[#allocation6 + $0x8] sm:$0xff] %v2859_v16 }
 0x2c4   : > { %v2947_v0 = vadd.f32 %v9178_v26, %v2923_v63 }
 0x2c5   : > { %v2803_v21 = vpop.f32.mrf.mxu0 }
 0x2c6   : > { %v2804_v8 = vadd.f32 %v2803_v21, %v2745_v22  ;;  %v2967_v18 = vmax.f32 %v2947_v0, 0.0  ;;  %v2053_v22 = vadd.f32 %v2033_v25, %v2003_v23  ;;  %v3034_v25 = vld [vmem:[#allocation5 + $0x54] sm:$0x8] }
 0x2c8   : > { %v2860_v58 = vadd.f32 %v2804_v8, %v2049_v31  ;;  %v2757_v3 = vpop.f32.mrf.mxu3  ;;  %v2007_v31 = vpop.f32.mrf.mxu1 }
 0x2c9   : > { %v2700_v8 = vpop.f32.mrf.mxu2  ;;  %v2758_v0 = vadd.f32 %v2757_v3, %v2698_v46 }
 0x2ca   : > { %2880 = vst [vmem:[#allocation6 + $0x88] sm:$0xff] %v2860_v58  ;;  %v2924_v24 = vmul.f32 %v9172_v1, %v2860_v58 }
 0x2cc   : > { %v2948_v35 = vadd.f32 %v9178_v26, %v2924_v24  ;;  %v2034_v24 = vld [vmem:[#allocation6 + $0x98] sm:$0xff] }
 0x2cd   : > { %v2806_v12 = vpop.f32.mrf.mxu0  ;;  %v2054_v42 = vadd.f32 %v2034_v24, %v2006_v52 }
 0x2ce   : > { %v2968_v32 = vmax.f32 %v2948_v35, 0.0  ;;  %v2807_v19 = vadd.f32 %v2806_v12, %v2748_v39 }
 0x2d0   : > { %v8309_v11 = vpack.c.bf16 %v2968_v32, %v2967_v18  ;;  %v2861_v45 = vadd.f32 %v2807_v19, %v2050_v43  ;;  %v2759_v58 = vpop.f32.mrf.mxu3  ;;  %v2010_v32 = vpop.f32.mrf.mxu1  ;;  %v2008_v19 = vadd.f32 %v2007_v31, %v9154_v28 }
 0x2d1   : > { %v2760_v38 = vadd.f32 %v2759_v58, %v2700_v8  ;;  %v3035_v8 = vsel %vm9227_vm2, 0, %v3034_v25  ;;  %v3040_v58 = vld [vmem:[#allocation5 + $0x7c] sm:$0x8] }
 0x2d2   : > { %8323 = vst [vmem:[#allocation5 + $0x58] sm:$0xff] %v8309_v11   ;;  %v2925_v61 = vmul.f32 %v9172_v1, %v2861_v45  ;;  %v2703_v11 = vpop.f32.mrf.mxu2 }
 0x2d3   : > { %2881 = vst [vmem:[#allocation6 + $0x28] sm:$0xff] %v2861_v45 }
 0x2d4   : > { %v2949_v47 = vadd.f32 %v9178_v26, %v2925_v61  ;;  %3036 = vst [vmem:[#allocation5 + $0x54] sm:$0x8] %v3035_v8 }
 0x2d5   : > { %v2808_v53 = vpop.f32.mrf.mxu0 }
 0x2d6   : > { %v2969_v44 = vmax.f32 %v2949_v47, 0.0  ;;  %v2809_v56 = vadd.f32 %v2808_v53, %v2750_v51  ;;  %v2055_v47 = vadd.f32 %v2035_v10, %v2008_v19  ;;  %v3061_v10 = vld [vmem:[#allocation5 + $0x38] sm:$0x1] }
 0x2d8   : > { %v2989_v57 = vpack.c.bf16 %v2969_v44, %v2969_v44  ;;  %v2862_v60 = vadd.f32 %v2809_v56, %v2051_v48  ;;  %v2762_v45 = vpop.f32.mrf.mxu3  ;;  %v2011_v48 = vadd.f32 %v2010_v32, %v9156_v37  ;;  %v2012_v56 = vpop.f32.mrf.mxu1 }
 0x2d9   : > { %v2763_v28 = vadd.f32 %v2762_v45, %v2703_v11  ;;  %v2013_v46 = vadd.f32 %v2012_v56, %v9161_v55  ;;  %v3037_v55 = vld [vmem:[#allocation5 + $0x68] sm:$0x8]  ;;  %v3055_v45 = vld [vmem:[#allocation5 + $0x10] sm:$0x1]  ;;  %v3064_v56 = vld [vmem:[#allocation5 + $0x4c] sm:$0x1] }
 0x2da   : > { %3009 = vst [vmem:[#allocation5 + $0x6c] sm:$0xf] %v2989_v57  ;;  %v2926_v50 = vmul.f32 %v9172_v1, %v2862_v60 }
 0x2db   : > { %2882 = vst [vmem:[#allocation6 + $0x40] sm:$0xff] %v2862_v60  ;;  %v2705_v60 = vpop.f32.mrf.mxu2 }
 0x2dc   : > { %v2950_v14 = vadd.f32 %v9178_v26, %v2926_v50 }
 0x2dd   : > { %v2811_v33 = vpop.f32.mrf.mxu0 }
 0x2de   : > { %v2970_v40 = vmax.f32 %v2950_v14, 0.0  ;;  %v2812_v36 = vadd.f32 %v2811_v33, %v2753_v34  ;;  %v2056_v14 = vadd.f32 %v2036_v17, %v2011_v48 }
 0x2e0   : > { %v2990_v15 = vpack.c.bf16 %v2970_v40, %v2970_v40  ;;  %v2863_v16 = vadd.f32 %v2812_v36, %v2052_v29  ;;  %v2764_v34 = vpop.f32.mrf.mxu3  ;;  %v3022_v40 = vld [vmem:[#allocation5 + $0x4] sm:$0x8]  ;;  %v3025_v36 = vld [vmem:[#allocation5 + $0x18] sm:$0x8] }
 0x2e1   : > { %v3023_v3 = vsel %vm9227_vm2, 0, %v3022_v40 }
 0x2e2   : > { %3010 = vst [vmem:[#allocation5 + $0x70] sm:$0xf] %v2990_v15  ;;  %v2927_v20 = vmul.f32 %v9172_v1, %v2863_v16  ;;  %v3026_v15 = vsel %vm9227_vm2, 0, %v3025_v36 }
 0x2e3   : > { %2883 = vst [vmem:[#allocation6 + $0x58] sm:$0xff] %v2863_v16  ;;  %v3028_v16 = vld [vmem:[#allocation5 + $0x2c] sm:$0x8] }
 0x2e4   : > { %v2951_v41 = vadd.f32 %v9178_v26, %v2927_v20  ;;  %v3029_v23 = vsel %vm9227_vm2, 0, %v3028_v16  ;;  %3024 = vst [vmem:[#allocation5 + $0x4] sm:$0x8] %v3023_v3  ;;  %v2037_v20 = vld [vmem:[#allocation6 + $0x48] sm:$0xff] }
 0x2e5   : > { %v2813_v13 = vpop.f32.mrf.mxu0  ;;  %3027 = vst [vmem:[#allocation5 + $0x18] sm:$0x8] %v3026_v15  ;;  %v2057_v52 = vadd.f32 %v2037_v20, %v2013_v46  ;;  %v3076_v46 = vld [vmem:[#allocation5 + $0x9c] sm:$0x1]  ;;  %v3079_v15 = vld [vmem:[#allocation5 + $0xb0] sm:$0x1] }
 0x2e6   : > { %v2814_v21 = vadd.f32 %v2813_v13, %v2755_v27  ;;  %v2971_v35 = vmax.f32 %v2951_v41, 0.0  ;;  %v3031_v27 = vld [vmem:[#allocation5 + $0x40] sm:$0x8]  ;;  %v2765_v13 = vadd.f32 %v2764_v34, %v2705_v60  ;;  %3030 = vst [vmem:[#allocation5 + $0x2c] sm:$0x8] %v3029_v23 }
 0x2e7   : > { %v3067_v60 = vld [vmem:[#allocation5 + $0x60] sm:$0x1] }
 0x2e8   : > { %v2864_v63 = vadd.f32 %v2814_v21, %v2053_v22  ;;  %v3032_v22 = vsel %vm9227_vm2, 0, %v3031_v27  ;;  %v2015_v21 = vpop.f32.mrf.mxu1  ;;  %v2767_v24 = vpop.f32.mrf.mxu3  ;;  %v3068_v36 = vsel %vm9255_vm5, 0, %v3067_v60 }
 0x2e9   : > { %3033 = vst [vmem:[#allocation5 + $0x40] sm:$0x8] %v3032_v22 }
 0x2ea   : > { %2884 = vst [vmem:[#allocation6 + $0x10] sm:$0xff] %v2864_v63  ;;  %v2928_v2 = vmul.f32 %v9172_v1, %v2864_v63 }
 0x2eb   : > { %3069 = vst [vmem:[#allocation5 + $0x60] sm:$0x1] %v3068_v36 }
 0x2ec   : > { %v2952_v39 = vadd.f32 %v9178_v26, %v2928_v2  ;;  %v3043_v2 = vld [vmem:[#allocation5 + $0x90] sm:$0x8] }
 0x2ed   : > { %v2816_v30 = vpop.f32.mrf.mxu0 }
 0x2ee   : > { %v2972_v9 = vmax.f32 %v2952_v39, 0.0  ;;  %v2817_v12 = vadd.f32 %v2816_v30, %v2758_v0  ;;  %v3038_v0 = vsel %vm9227_vm2, 0, %v3037_v55  ;;  %v2708_v39 = vpop.f32.mrf.mxu2  ;;  %v3046_v30 = vld [vmem:[#allocation5 + $0xa4] sm:$0x8] }
 0x2ef   : > { %3039 = vst [vmem:[#allocation5 + $0x68] sm:$0x8] %v3038_v0  ;;  %v2768_v32 = vadd.f32 %v2767_v24, %v2708_v39 }
 0x2f0   : > { %v8314_v43 = vpack.c.bf16 %v2972_v9, %v2971_v35  ;;  %v2865_v18 = vadd.f32 %v2817_v12, %v2054_v42  ;;  %v3041_v35 = vsel %vm9227_vm2, 0, %v3040_v58  ;;  %v3049_v9 = vld [vmem:[#allocation5 + $0xb8] sm:$0x8] }
 0x2f1   : > { %3042 = vst [vmem:[#allocation5 + $0x7c] sm:$0x8] %v3041_v35 }
 0x2f2   : > { %8324 = vst [vmem:[#allocation5 + $0x80] sm:$0xff] %v8314_v43   ;;  %v2929_v7 = vmul.f32 %v9172_v1, %v2865_v18  ;;  %v3044_v43 = vsel %vm9227_vm2, 0, %v3043_v2 }
 0x2f3   : > { %2885 = vst [vmem:[#allocation6 + $0x98] sm:$0xff] %v2865_v18  ;;  %v2016_v18 = vadd.f32 %v2015_v21, %v9164_v62  ;;  %v3080_v21 = vsel %vm9255_vm5, 0, %v3079_v15 }
 0x2f4   : > { %v2953_v61 = vadd.f32 %v9178_v26, %v2929_v7  ;;  %v3047_v7 = vsel %vm9227_vm2, 0, %v3046_v30  ;;  %3045 = vst [vmem:[#allocation5 + $0x90] sm:$0x8] %v3044_v43 }
 0x2f5   : > { %v2818_v51 = vpop.f32.mrf.mxu0  ;;  %3048 = vst [vmem:[#allocation5 + $0xa4] sm:$0x8] %v3047_v7 }
 0x2f6   : > { %v2973_v49 = vmax.f32 %v2953_v61, 0.0  ;;  %v2819_v6 = vadd.f32 %v2818_v51, %v2760_v38  ;;  %v3058_v38 = vld [vmem:[#allocation5 + $0x24] sm:$0x1]  ;;  %v3050_v61 = vsel %vm9227_vm2, 0, %v3049_v9  ;;  %v3056_v51 = vsel %vm9255_vm5, 0, %v3055_v45 }
 0x2f7   : > { %3051 = vst [vmem:[#allocation5 + $0xb8] sm:$0x8] %v3050_v61 }
 0x2f8   : > { %v2993_v53 = vpack.c.bf16 %v2973_v49, %v2973_v49  ;;  %v2866_v54 = vadd.f32 %v2819_v6, %v2055_v47  ;;  %v2038_v47 = vld [vmem:[#allocation6 + $0x70] sm:$0xff]  ;;  %3057 = vst [vmem:[#allocation5 + $0x10] sm:$0x1] %v3056_v51 }
 0x2f9   : > { %3081 = vst [vmem:[#allocation5 + $0xb0] sm:$0x1] %v3080_v21 }
 0x2fa   : > { %3013 = vst [vmem:[#allocation5 + $0x94] sm:$0xf] %v2993_v53  ;;  %v2930_v44 = vmul.f32 %v9172_v1, %v2866_v54  ;;  %v3059_v53 = vsel %vm9255_vm5, 0, %v3058_v38 }
 0x2fb   : > { %2886 = vst [vmem:[#allocation6 + $0x60] sm:$0xff] %v2866_v54  ;;  %v2058_v54 = vadd.f32 %v2038_v47, %v2016_v18 }
 0x2fc   : > { %v2954_v57 = vadd.f32 %v9178_v26, %v2930_v44  ;;  %v3062_v44 = vsel %vm9255_vm5, 0, %v3061_v10  ;;  %3060 = vst [vmem:[#allocation5 + $0x24] sm:$0x1] %v3059_v53 }
 0x2fd   : > { %v2821_v50 = vpop.f32.mrf.mxu0  ;;  %3063 = vst [vmem:[#allocation5 + $0x38] sm:$0x1] %v3062_v44 }
 0x2fe   : > { %v2974_v59 = vmax.f32 %v2954_v57, 0.0  ;;  %v2822_v4 = vadd.f32 %v2821_v50, %v2763_v28  ;;  %v2017_v57 = vpop.f32.mrf.mxu1  ;;  %v3070_v50 = vld [vmem:[#allocation5 + $0x74] sm:$0x1] }
 0x2ff   : > { %v3071_v3 = vsel %vm9255_vm5, 0, %v3070_v50 }
 0x300   : > { %v2994_v33 = vpack.c.bf16 %v2974_v59, %v2974_v59  ;;  %v2867_v29 = vadd.f32 %v2822_v4, %v2056_v14  ;;  %v2710_v14 = vpop.f32.mrf.mxu2  ;;  %v2769_v59 = vpop.f32.mrf.mxu3  ;;  %v3065_v4 = vsel %vm9255_vm5, 0, %v3064_v56  ;;  %3072 = vst [vmem:[#allocation5 + $0x74] sm:$0x1] %v3071_v3 }
 0x301   : > { %v2770_v16 = vadd.f32 %v2769_v59, %v2710_v14  ;;  %3066 = vst [vmem:[#allocation5 + $0x4c] sm:$0x1] %v3065_v4 }
 0x302   : > { %3014 = vst [vmem:[#allocation5 + $0x98] sm:$0xf] %v2994_v33  ;;  %v2931_v31 = vmul.f32 %v9172_v1, %v2867_v29  ;;  %v3073_v33 = vld [vmem:[#allocation5 + $0x88] sm:$0x1] }
 0x303   : > { %2887 = vst [vmem:[#allocation6 + $0x20] sm:$0xff] %v2867_v29  ;;  %v2018_v29 = vadd.f32 %v2017_v57, %v9166_v5  ;;  %v3074_v27 = vsel %vm9255_vm5, 0, %v3073_v33  ;;  %v2039_v5 = vld [vmem:[#allocation6 + $0x90] sm:$0xff] }
 0x304   : > { %v2955_v12 = vadd.f32 %v9178_v26, %v2931_v31  ;;  %v3082_v31 = vld [vmem:[#allocation5 + $0xc4] sm:$0x1]  ;;  %3075 = vst [vmem:[#allocation5 + $0x88] sm:$0x1] %v3074_v27 }
 0x305   : > { %v2823_v63 = vpop.f32.mrf.mxu0  ;;  %v2059_v22 = vadd.f32 %v2039_v5, %v2018_v29  ;;  %v3083_v58 = vsel %vm9255_vm5, 0, %v3082_v31 }
 0x306   : > { %v2824_v41 = vadd.f32 %v2823_v63, %v2765_v13  ;;  %v2975_v49 = vmax.f32 %v2955_v12, 0.0  ;;  %v3077_v13 = vsel %vm9255_vm5, 0, %v3076_v46  ;;  %3084 = vst [vmem:[#allocation5 + $0xc4] sm:$0x1] %v3083_v58 }
 0x307   : > { %3078 = vst [vmem:[#allocation5 + $0x9c] sm:$0x1] %v3077_v13 }
 0x308   : > { %v2868_v42 = vadd.f32 %v2824_v41, %v2057_v52 }
 0x30a   : > { %2888 = vst [vmem:[#allocation6 + $0x48] sm:$0xff] %v2868_v42  ;;  %v2932_v19 = vmul.f32 %v9172_v1, %v2868_v42 }
 0x30c   : > { %v2956_v62 = vadd.f32 %v9178_v26, %v2932_v19 }
 0x30d   : > { %v2826_v6 = vpop.f32.mrf.mxu0 }
 0x30e   : > { %v2976_v48 = vmax.f32 %v2956_v62, 0.0  ;;  %v2827_v28 = vadd.f32 %v2826_v6, %v2768_v32 }
 0x310   : > { %v8319_v17 = vpack.c.bf16 %v2976_v48, %v2975_v49  ;;  %v2869_v34 = vadd.f32 %v2827_v28, %v2058_v54 }
 0x312   : > { %8325 = vst [vmem:[#allocation5 + $0xa8] sm:$0xff] %v8319_v17   ;;  %v2933_v40 = vmul.f32 %v9172_v1, %v2869_v34 }
 0x313   : > { %2889 = vst [vmem:[#allocation6 + $0x70] sm:$0xff] %v2869_v34 }
 0x314   : > { %v2957_v23 = vadd.f32 %v9178_v26, %v2933_v40 }
 0x315   : > { %v2828_v25 = vpop.f32.mrf.mxu0 }
 0x316   : > { %v2977_v55 = vmax.f32 %v2957_v23, 0.0  ;;  %v2829_v20 = vadd.f32 %v2828_v25, %v2770_v16 }
 0x318   : > { %v2997_v63 = vpack.c.bf16 %v2977_v55, %v2977_v55  ;;  %v2870_v8 = vadd.f32 %v2829_v20, %v2059_v22 }
 0x31a   : > { %3017 = vst [vmem:[#allocation5 + $0xbc] sm:$0xf] %v2997_v63  ;;  %v2934_v52 = vmul.f32 %v9172_v1, %v2870_v8 }
 0x31b   : > { %2890 = vst [vmem:[#allocation6 + $0x90] sm:$0xff] %v2870_v8 }
 0x31c   : > { %v2958_v41 = vadd.f32 %v9178_v26, %v2934_v52 }
 0x31e   : > { %v2978_v0 = vmax.f32 %v2958_v41, 0.0  ;;  %3087 = sbr.rel (%p6524_p9) target bundleno = 808 (0x328), region = 100 }
 0x320   : > { %v2998_v2 = vpack.c.bf16 %v2978_v0, %v2978_v0 }
 0x322   : > { %3018 = vst [vmem:[#allocation5 + $0xc0] sm:$0xf] %v2998_v2 }
 0x323   : > { %v3088_v39 = vld [vmem:[#allocation5 + $0x4] sm:$0x8]  ;;  %v3093_v24 = vld [vmem:[#allocation5 + $0x10] sm:$0x1]  ;;  %v8430_v42 = vmov 0  }
 0x324   : > { %v3089_v30 = vsel %vm9227_vm2, 0, %v3088_v39  ;;  %3091 = vst [vmem:[#allocation5 + $0x8] sm:$0xf] %v8430_v42  ;;  %v3094_v1 = vsel %vm9255_vm5, 0, %v3093_v24 }
 0x325   : > { %3090 = vst [vmem:[#allocation5 + $0x4] sm:$0x8] %v3089_v30 }
 0x326   : > { %3092 = vst [vmem:[#allocation5 + $0xc] sm:$0xf] %v8430_v42 }
 0x327   : > { %3095 = vst [vmem:[#allocation5 + $0x10] sm:$0x1] %v3094_v1 }
 0x328 PF: > { %p7369_p11 = scmp.ne.s32.totalorder %s8412_s24, 1 }
 0x32a   : > { %3099 = sbr.rel (%p7369_p11) target bundleno = 820 (0x334), region = 104 }
 0x32f   : > { %v3101_v26 = vld [vmem:[#allocation5 + $0xb8] sm:$0x8]  ;;  %v3106_v35 = vld [vmem:[#allocation5 + $0xc4] sm:$0x1]  ;;  %v8431_v12 = vmov 0  }
 0x330   : > { %v3102_v9 = vsel %vm9227_vm2, 0, %v3101_v26  ;;  %3104 = vst [vmem:[#allocation5 + $0xbc] sm:$0xf] %v8431_v12  ;;  %v3107_v43 = vsel %vm9255_vm5, 0, %v3106_v35 }
 0x331   : > { %3103 = vst [vmem:[#allocation5 + $0xb8] sm:$0x8] %v3102_v9 }
 0x332   : > { %3105 = vst [vmem:[#allocation5 + $0xc0] sm:$0xf] %v8431_v12 }
 0x333   : > { %3108 = vst [vmem:[#allocation5 + $0xc4] sm:$0x1] %v3107_v43 }
 0x334 PF: > { %v8183_v18 = vld [vmem:[%s9857_s2 + $0x38] sm:$0xff]  ;;  %v8182_v19 = vld [vmem:[%s9857_s2 + $0x30] sm:$0xff]  ;;  %v8181_v45 = vld [vmem:[%s9857_s2 + $0x28] sm:$0xff]  ;;  %vm3133_vm6 = vsmask.f32 4368 }
 0x335   : > { %v8191_v32 = vld [vmem:[%s9857_s2 + $0x78] sm:$0xff]  ;;  %3978 = vmatpush.bf16.msra.mxu1 %v8183_v18  ;;  %v8190_v7 = vld [vmem:[%s9857_s2 + $0x70] sm:$0xff]  ;;  %v8189_v38 = vld [vmem:[%s9857_s2 + $0x68] sm:$0xff]  ;;  %vm3399_vm7 = vsmask.f32 3328 }
 0x336   : > { %v8199_v37 = vld [vmem:[%s9857_s2 + $0xb8] sm:$0xff]  ;;  %4027 = vmatpush.bf16.msra.mxu2 %v8191_v32  ;;  %v8198_v11 = vld [vmem:[%s9857_s2 + $0xb0] sm:$0xff]  ;;  %v8197_v61 = vld [vmem:[%s9857_s2 + $0xa8] sm:$0xff]  ;;  %vm3400_vm8 = vsmask.f32 7440 }
 0x337   : > { %4076 = vmatpush.bf16.msrb.mxu3 %v8199_v37  ;;  %v8180_v10 = vld [vmem:[%s9857_s2 + $0x20] sm:$0xff]  ;;  %v3109_v62 = vld [vmem:[#allocation5 + $0x4] sm:$0x8]  ;;  %v3110_v51 = vld [vmem:[#allocation5 + $0x8] sm:$0xf] }
 0x338   : > { %v3111_v47 = vld [vmem:[#allocation5 + $0xc] sm:$0xf]  ;;  %v3136_v49 = vshrl.u32 %v3109_v62, 16  ;;  %v3141_v6 = vshrl.u32 %v3110_v51, 16  ;;  %v3144_v53 = vshll.u32 %v3110_v51, 16  ;;  %v8188_v28 = vld [vmem:[%s9857_s2 + $0x60] sm:$0xff]  ;;  %vm9336_vm9 = vmor %vm3053_vm4, %vm3133_vm6 }
 0x339   : > { %3979 = vmatpush.bf16.msra.mxu1 %v8182_v19  ;;  %v3150_v54 = vshrl.u32 %v3111_v47, 16  ;;  %v3343_v48 = vld [vmem:[#allocation5 + $0x8] sm:$0xf]  ;;  %v3153_v44 = vshll.u32 %v3111_v47, 16  ;;  %v3344_v56 = vld [vmem:[#allocation5 + $0xc] sm:$0xf]  ;;  %vm9364_vm10 = vmor %vm3399_vm7, %vm3400_vm8 }
 0x33a   : > { %4028 = vmatpush.bf16.msra.mxu2 %v8190_v7  ;;  %3359 = vst [vmem:[#allocation4 + $0x4] sm:$0xf] %v3343_v48  ;;  %v8196_v57 = vld [vmem:[%s9857_s2 + $0xa0] sm:$0xff]  ;;  %v7370_v17 = vrot.slane %v3136_v49, 11  ;;  %v3143_v34 = vrot.slane %v3141_v6, 7  ;;  %v8179_v14 = vld [vmem:[%s9857_s2 + $0x18] sm:$0xff] }
 0x33b   : > { %4077 = vmatpush.bf16.msrb.mxu3 %v8198_v11  ;;  %v3152_v50 = vrot.slane %v3150_v54, 7  ;;  %3360 = vst [vmem:[#allocation4 + $0x28] sm:$0xf] %v3344_v56  ;;  %v8187_v59 = vld [vmem:[%s9857_s2 + $0x58] sm:$0xff]  ;;  %v3377_v29 = vld [vmem:[#allocation5 + $0x10] sm:$0x1] }
 0x33c   : > { %v3375_v4 = vld [vmem:[#allocation5 + $0x8] sm:$0xf]  ;;  %v3376_v33 = vld [vmem:[#allocation5 + $0xc] sm:$0xf]  ;;  %v3146_v36 = vor.u32 %v3144_v53, %v3143_v34  ;;  %v3148_v46 = vrot.slane %v3143_v34, 4  ;;  %v3422_v13 = vshll.u32 %v3377_v29, 16 }
 0x33d   : > { %3980 = vmatpush.bf16.msra.mxu1 %v8181_v45  ;;  %v8195_v40 = vld [vmem:[%s9857_s2 + $0x98] sm:$0xff]  ;;  %v3155_v3 = vor.u32 %v3153_v44, %v3152_v50  ;;  %v3403_v15 = vshrl.u32 %v3375_v4, 16  ;;  %v3112_v16 = vld [vmem:[#allocation5 + $0x18] sm:$0x8]  ;;  %v3113_v23 = vld [vmem:[#allocation5 + $0x1c] sm:$0xf] }
 0x33e   : > { %4029 = vmatpush.bf16.msra.mxu2 %v8189_v38  ;;  %v3406_v27 = vshll.u32 %v3375_v4, 16  ;;  %v3412_v5 = vshll.u32 %v3376_v33, 16  ;;  %v3416_v25 = vshrl.u32 %v3376_v33, 16  ;;  %v3114_v22 = vld [vmem:[#allocation5 + $0x20] sm:$0xf]  ;;  %v3147_v55 = vsel %vm9336_vm9, %v7370_v17, %v3146_v36  ;;  %v8177_v11 = vld [vmem:[%s9857_s2 + $0x8] sm:$0xff] }
 0x33f   : > { %4078 = vmatpush.bf16.msrb.mxu3 %v8197_v61  ;;  %v3156_v20 = vsel %vm9336_vm9, %v3148_v46, %v3155_v3  ;;  %v3405_v21 = vrot.slane %v3403_v15, 4  ;;  %v3158_v31 = vshrl.u32 %v3112_v16, 16  ;;  %v3345_v63 = vld [vmem:[#allocation5 + $0x1c] sm:$0xf]  ;;  %v3346_v8 = vld [vmem:[#allocation5 + $0x20] sm:$0xf] }
 0x340   : > { %3327 = vst [vmem:[#allocation4] sm:$0xf] %v3147_v55  ;;  %v3408_v58 = vrot.slane %v3406_v27, 5  ;;  %v3414_v52 = vrot.slane %v3412_v5, 5  ;;  %v3418_v41 = vrot.slane %v3416_v25, 4  ;;  %v3424_v0 = vrot.slane %v3422_v13, 5 }
 0x341   : > { %3981 = vmatpush.bf16.msra.mxu1 %v8180_v10  ;;  %3328 = vst [vmem:[#allocation4 + $0x24] sm:$0xf] %v3156_v20  ;;  %v3163_v2 = vshrl.u32 %v3113_v23, 16  ;;  %v8178_v39 = vld [vmem:[%s9857_s2 + $0x10] sm:$0xff]  ;;  %v3166_v1 = vshll.u32 %v3113_v23, 16  ;;  %v3172_v26 = vshrl.u32 %v3114_v22, 16 }
 0x342   : > { %4030 = vmatpush.bf16.msra.mxu2 %v8188_v28  ;;  %v8186_v24 = vld [vmem:[%s9857_s2 + $0x50] sm:$0xff]  ;;  %v3409_v30 = vor.u32 %v3408_v58, %v3405_v21  ;;  %v3419_v42 = vor.u32 %v3418_v41, %v3414_v52  ;;  %3361 = vst [vmem:[#allocation4 + $0x4c] sm:$0xf] %v3345_v63  ;;  %v7371_v12 = vrot.slane %v3158_v31, 11  ;;  %v3175_v18 = vshll.u32 %v3114_v22, 16  ;;  %v8185_v62 = vld [vmem:[%s9857_s2 + $0x48] sm:$0xff] }
 0x343   : > { %4079 = vmatpush.bf16.msrb.mxu3 %v8196_v57  ;;  %v8194_v35 = vld [vmem:[%s9857_s2 + $0x90] sm:$0xff]  ;;  %v3165_v43 = vrot.slane %v3163_v2, 7  ;;  %3362 = vst [vmem:[#allocation4 + $0x70] sm:$0xf] %v3346_v8  ;;  %v3174_v19 = vrot.slane %v3172_v26, 7  ;;  %v8193_v51 = vld [vmem:[%s9857_s2 + $0x88] sm:$0xff] }
 0x344   : > { %v3410_v32 = vrot.slane %v3409_v30, 4  ;;  %v3420_v37 = vrot.slane %v3419_v42, 4  ;;  %v3378_v7 = vld [vmem:[#allocation5 + $0x1c] sm:$0xf]  ;;  %v3379_v61 = vld [vmem:[#allocation5 + $0x20] sm:$0xf] }
 0x345   : > { %3982 = vmatpush.bf16.msra.mxu1 %v8179_v14  ;;  %v3168_v45 = vor.u32 %v3166_v1, %v3165_v43  ;;  %v3170_v38 = vrot.slane %v3165_v43, 4  ;;  %v3427_v10 = vshrl.u32 %v3378_v7, 16  ;;  %v3177_v6 = vor.u32 %v3175_v18, %v3174_v19  ;;  %v3380_v53 = vld [vmem:[#allocation5 + $0x24] sm:$0x1]  ;;  %v3115_v56 = vld [vmem:[#allocation5 + $0x2c] sm:$0x8] }
 0x346   : > { %4031 = vmatpush.bf16.msra.mxu2 %v8187_v59  ;;  %v3415_v47 = vsel %vm9364_vm10, %v3410_v32, %v3414_v52  ;;  %v3425_v49 = vsel %vm9364_vm10, %v3420_v37, %v3424_v0  ;;  %v3430_v54 = vshll.u32 %v3378_v7, 16  ;;  %v3436_v44 = vshll.u32 %v3379_v61, 16  ;;  %v8176_v57 = vld [vmem:[%s9857_s2] sm:$0xff]  ;;  %v7382_v50 = vld [vmem:[#allocation4 + $0x24] sm:$0xf0]  ;;  %v8239_v27 = vld [vmem:[%s9857_s2 + $0x138] sm:$0xff] }
 0x347   : > { %4080 = vmatpush.bf16.msrb.mxu3 %v8195_v40  ;;  %3610 = vst [vmem:[#allocation4 + $0x8] sm:$0xf] %v3415_v47  ;;  %v3169_v48 = vsel %vm9336_vm9, %v7371_v12, %v3168_v45  ;;  %v3429_v28 = vrot.slane %v3427_v10, 4  ;;  %v8184_v17 = vld [vmem:[%s9857_s2 + $0x40] sm:$0xff]  ;;  %v3178_v14 = vsel %vm9336_vm9, %v3170_v38, %v3177_v6  ;;  %v3440_v4 = vshrl.u32 %v3379_v61, 16  ;;  %v8231_v55 = vld [vmem:[%s9857_s2 + $0xf8] sm:$0xff] }
 0x348   : > { %v8152_v34 = vld [vmem:[#allocation4 + $0x4] sm:$0xf]  ;;  %3611 = vst [vmem:[#allocation4 + $0x2c] sm:$0xf] %v3425_v49  ;;  %v3432_v59 = vrot.slane %v3430_v54, 5  ;;  %v3438_v36 = vrot.slane %v3436_v44, 5 }
 0x349   : > { %3983 = vmatpush.bf16.msra.mxu1 %v8178_v39  ;;  %v3116_v33 = vld [vmem:[#allocation5 + $0x30] sm:$0xf]  ;;  %3329 = vst [vmem:[#allocation4 + $0x48] sm:$0xf] %v3169_v48  ;;  %v3446_v46 = vshll.u32 %v3380_v53, 16  ;;  %v3442_v16 = vrot.slane %v3440_v4, 4  ;;  %v7385_v52 = vor.u32 %v8152_v34, %v7382_v50 }
 0x34a   : > { %4032 = vmatpush.bf16.msra.mxu2 %v8186_v24  ;;  %v8192_v29 = vld [vmem:[%s9857_s2 + $0x80] sm:$0xff]  ;;  %3330 = vst [vmem:[#allocation4 + $0x6c] sm:$0xf] %v3178_v14  ;;  %v3433_v15 = vor.u32 %v3432_v59, %v3429_v28  ;;  %v3180_v23 = vshrl.u32 %v3115_v56, 16  ;;  %v3185_v13 = vshrl.u32 %v3116_v33, 16  ;;  %v3188_v22 = vshll.u32 %v3116_v33, 16 }
 0x34b   : > { %4081 = vmatpush.bf16.msrb.mxu3 %v8194_v35  ;;  %v7380_v40 = vld [vmem:[#allocation4] sm:$0xf]  ;;  %v8153_v3 = vld [vmem:[#allocation4 + $0x20] sm:$0xf0]  ;;  %v3448_v5 = vrot.slane %v3446_v46, 5  ;;  %v3443_v21 = vor.u32 %v3442_v16, %v3438_v36  ;;  %v8238_v26 = vld [vmem:[%s9857_s2 + $0x130] sm:$0xff] }
 0x34c   : > { %v3117_v25 = vld [vmem:[#allocation5 + $0x34] sm:$0xf]  ;;  %v3434_v20 = vrot.slane %v3433_v15, 4  ;;  %v7372_v31 = vrot.slane %v3180_v23, 11  ;;  %v3347_v8 = vld [vmem:[#allocation5 + $0x30] sm:$0xf]  ;;  %v7381_v58 = vor.u32 %v8153_v3, %v7380_v40 }
 0x34d   : > { %3984 = vmatpush.bf16.msra.mxu1 %v8177_v11  ;;  %v3194_v63 = vshrl.u32 %v3117_v25, 16  ;;  %v3187_v41 = vrot.slane %v3185_v13, 7  ;;  %v3197_v0 = vshll.u32 %v3117_v25, 16  ;;  %v3348_v2 = vld [vmem:[#allocation5 + $0x34] sm:$0xf]  ;;  %v3444_v30 = vrot.slane %v3443_v21, 4 }
 0x34e   : > { %4033 = vmatpush.bf16.msra.mxu2 %v8185_v62  ;;  %3363 = vst [vmem:[#allocation4 + $0x94] sm:$0xf] %v3347_v8  ;;  %v7388_v39 = vld [vmem:[#allocation4 + $0x8] sm:$0xf]  ;;  %v3439_v24 = vsel %vm9364_vm10, %v3434_v20, %v3438_v36  ;;  %v8230_v32 = vld [vmem:[%s9857_s2 + $0xf0] sm:$0xff] }
 0x34f   : > { %4082 = vmatpush.bf16.msrb.mxu3 %v8193_v51  ;;  %v3196_v42 = vrot.slane %v3194_v63, 7  ;;  %3364 = vst [vmem:[#allocation4 + $0xb8] sm:$0xf] %v3348_v2  ;;  %v8154_v1 = vld [vmem:[#allocation4 + $0x28] sm:$0xf0]  ;;  %v3190_v35 = vor.u32 %v3188_v22, %v3187_v41  ;;  %v3192_v12 = vrot.slane %v3187_v41, 4  ;;  %v3449_v18 = vsel %vm9364_vm10, %v3444_v30, %v3448_v5 }
 0x350   : > { %3612 = vst [vmem:[#allocation4 + $0x50] sm:$0xf] %v3439_v24  ;;  %v7389_v43 = vor.u32 %v8154_v1, %v7388_v39  ;;  %v3381_v19 = vld [vmem:[#allocation5 + $0x30] sm:$0xf]  ;;  %v3382_v7 = vld [vmem:[#allocation5 + $0x34] sm:$0xf] }
 0x351   : > { %3985 = vmatpush.bf16.msra.mxu1 %v8176_v57  ;;  %v3199_v37 = vor.u32 %v3197_v0, %v3196_v42  ;;  %3613 = vst [vmem:[#allocation4 + $0x74] sm:$0xf] %v3449_v18  ;;  %v3191_v11 = vsel %vm9336_vm9, %v7372_v31, %v3190_v35  ;;  %v3451_v45 = vshrl.u32 %v3381_v19, 16  ;;  %v3383_v61 = vld [vmem:[#allocation5 + $0x38] sm:$0x1]  ;;  %v3454_v10 = vshll.u32 %v3381_v19, 16 }
 0x352   : > { %4034 = vmatpush.bf16.msra.mxu2 %v8184_v17  ;;  %3331 = vst [vmem:[#allocation4 + $0x90] sm:$0xf] %v3191_v11  ;;  %v3460_v62 = vshll.u32 %v3382_v7, 16  ;;  %v8237_v51 = vld [vmem:[%s9857_s2 + $0x128] sm:$0xff]  ;;  %v3464_v49 = vshrl.u32 %v3382_v7, 16  ;;  %v3470_v6 = vshll.u32 %v3383_v61, 16 }
 0x353   : > { %4083 = vmatpush.bf16.msrb.mxu3 %v8192_v29  ;;  %v3200_v38 = vsel %vm9336_vm9, %v3192_v12, %v3199_v37  ;;  %v3453_v47 = vrot.slane %v3451_v45, 4  ;;  %v3456_v53 = vrot.slane %v3454_v10, 5  ;;  %v8229_v48 = vld [vmem:[%s9857_s2 + $0xe8] sm:$0xff]  ;;  %v3118_v28 = vld [vmem:[#allocation5 + $0x40] sm:$0x8] }
 0x354   : > { %3986 = vmatmul.bf16.vlgmr.msra.gmra.mxu1 %v7381_v58  ;;  %3332 = vst [vmem:[#allocation4 + $0xb4] sm:$0xf] %v3200_v38  ;;  %v3462_v54 = vrot.slane %v3460_v62, 5  ;;  %v3466_v44 = vrot.slane %v3464_v49, 4  ;;  %v3119_v56 = vld [vmem:[#allocation5 + $0x44] sm:$0xf] }
 0x355   : > { %5006 = vmatpush.bf16.msrb.mxu1 %v8231_v55  ;;  %4035 = vmatmul.bf16.vlgmr.msra.gmra.mxu2 %v7385_v52  ;;  %v8155_v57 = vld [vmem:[#allocation4 + $0x4c] sm:$0xf]  ;;  %v7394_v17 = vld [vmem:[#allocation4 + $0x6c] sm:$0xf0]  ;;  %v3457_v34 = vor.u32 %v3456_v53, %v3453_v47  ;;  %v3472_v50 = vrot.slane %v3470_v6, 5  ;;  %v3202_v59 = vshrl.u32 %v3118_v28, 16 }
 0x356   : > { %5055 = vmatpush.bf16.msrb.mxu2 %v8239_v27  ;;  %4084 = vmatmul.bf16.vlgmr.msrb.gmra.mxu3 %v7389_v43  ;;  %v3120_v14 = vld [vmem:[#allocation5 + $0x48] sm:$0xf]  ;;  %v3207_v4 = vshrl.u32 %v3119_v56, 16  ;;  %v7392_v33 = vld [vmem:[#allocation4 + $0x48] sm:$0xf]  ;;  %v3467_v29 = vor.u32 %v3466_v44, %v3462_v54  ;;  %v3210_v40 = vshll.u32 %v3119_v56, 16  ;;  %v7397_v63 = vor.u32 %v8155_v57, %v7394_v17 }
 0x357   : > { %v3216_v36 = vshrl.u32 %v3120_v14, 16  ;;  %v3219_v46 = vshll.u32 %v3120_v14, 16  ;;  %v3349_v3 = vld [vmem:[#allocation5 + $0x44] sm:$0xf]  ;;  %v8156_v15 = vld [vmem:[#allocation4 + $0x68] sm:$0xf0] }
 0x358   : > { %v3458_v16 = vrot.slane %v3457_v34, 4  ;;  %v7373_v23 = vrot.slane %v3202_v59, 11  ;;  %v3209_v27 = vrot.slane %v3207_v4, 7  ;;  %v7400_v5 = vld [vmem:[#allocation4 + $0x50] sm:$0xf]  ;;  %v3468_v13 = vrot.slane %v3467_v29, 4 }
 0x359   : > { %5007 = vmatpush.bf16.msrb.mxu1 %v8230_v32  ;;  %v8157_v25 = vld [vmem:[#allocation4 + $0x70] sm:$0xf0]  ;;  %v3218_v22 = vrot.slane %v3216_v36, 7  ;;  %v3350_v31 = vld [vmem:[#allocation5 + $0x48] sm:$0xf]  ;;  %v7393_v0 = vor.u32 %v8156_v15, %v7392_v33  ;;  %v8236_v38 = vld [vmem:[%s9857_s2 + $0x120] sm:$0xff] }
 0x35a   : > { %5056 = vmatpush.bf16.msrb.mxu2 %v8238_v26  ;;  %v3463_v55 = vsel %vm9364_vm10, %v3458_v16, %v3462_v54  ;;  %v3212_v20 = vor.u32 %v3210_v40, %v3209_v27  ;;  %v3214_v21 = vrot.slane %v3209_v27, 4  ;;  %3365 = vst [vmem:[#allocation4 + $0xdc] sm:$0xf] %v3349_v3  ;;  %v3473_v8 = vsel %vm9364_vm10, %v3468_v13, %v3472_v50  ;;  %v3384_v52 = vld [vmem:[#allocation5 + $0x44] sm:$0xf]  ;;  %v8228_v49 = vld [vmem:[%s9857_s2 + $0xe0] sm:$0xff] }
 0x35b   : > { %3614 = vst [vmem:[#allocation4 + $0x98] sm:$0xf] %v3463_v55  ;;  %v3221_v58 = vor.u32 %v3219_v46, %v3218_v22  ;;  %v3385_v41 = vld [vmem:[#allocation5 + $0x48] sm:$0xf]  ;;  %v3386_v39 = vld [vmem:[#allocation5 + $0x4c] sm:$0x1]  ;;  %v7401_v12 = vor.u32 %v8157_v25, %v7400_v5 }
 0x35c   : > { %3615 = vst [vmem:[#allocation4 + $0xbc] sm:$0xf] %v3473_v8  ;;  %v3213_v2 = vsel %vm9336_vm9, %v7373_v23, %v3212_v20  ;;  %v3475_v24 = vshrl.u32 %v3384_v52, 16  ;;  %v3478_v30 = vshll.u32 %v3384_v52, 16  ;;  %v3484_v1 = vshll.u32 %v3385_v41, 16 }
 0x35d   : > { %5008 = vmatpush.bf16.msrb.mxu1 %v8229_v48  ;;  %v3222_v42 = vsel %vm9336_vm9, %v3214_v21, %v3221_v58  ;;  %3333 = vst [vmem:[#allocation4 + $0xd8] sm:$0xf] %v3213_v2  ;;  %v3488_v26 = vshrl.u32 %v3385_v41, 16  ;;  %v3494_v35 = vshll.u32 %v3386_v39, 16  ;;  %v3122_v11 = vld [vmem:[#allocation5 + $0x58] sm:$0xf] }
 0x35e   : > { %5057 = vmatpush.bf16.msrb.mxu2 %v8237_v51  ;;  %3334 = vst [vmem:[#allocation4 + $0xfc] sm:$0xf] %v3222_v42  ;;  %v3477_v43 = vrot.slane %v3475_v24, 4  ;;  %v3480_v18 = vrot.slane %v3478_v30, 5  ;;  %v3486_v32 = vrot.slane %v3484_v1, 5  ;;  %v3229_v62 = vshrl.u32 %v3122_v11, 16 }
 0x35f   : > { %3366 = vst [vmem:[#allocation4 + $0x100] sm:$0xf] %v3350_v31  ;;  %v3490_v37 = vrot.slane %v3488_v26, 4  ;;  %v3496_v7 = vrot.slane %v3494_v35, 5  ;;  %v3123_v45 = vld [vmem:[#allocation5 + $0x5c] sm:$0xf] }
 0x360   : > { %v3481_v19 = vor.u32 %v3480_v18, %v3477_v43  ;;  %v3121_v10 = vld [vmem:[#allocation5 + $0x54] sm:$0x8]  ;;  %v3387_v51 = vld [vmem:[#allocation5 + $0x58] sm:$0xf]  ;;  %v3232_v53 = vshll.u32 %v3122_v11, 16  ;;  %v3231_v48 = vrot.slane %v3229_v62, 7 }
 0x361   : > { %v3491_v61 = vor.u32 %v3490_v37, %v3486_v32  ;;  %v3224_v6 = vshrl.u32 %v3121_v10, 16  ;;  %v3238_v28 = vshrl.u32 %v3123_v45, 16  ;;  %v3241_v44 = vshll.u32 %v3123_v45, 16  ;;  %5009 = vmatpush.bf16.msrb.mxu1 %v8228_v49  ;;  %v3388_v4 = vld [vmem:[#allocation5 + $0x5c] sm:$0xf] }
 0x362   : > { %v3482_v47 = vrot.slane %v3481_v19, 4  ;;  %5058 = vmatpush.bf16.msrb.mxu2 %v8236_v38  ;;  %v3499_v17 = vshrl.u32 %v3387_v51, 16  ;;  %v3234_v50 = vor.u32 %v3232_v53, %v3231_v48  ;;  %v3236_v14 = vrot.slane %v3231_v48, 4  ;;  %v3351_v33 = vld [vmem:[#allocation5 + $0x58] sm:$0xf]  ;;  %v8227_v19 = vld [vmem:[%s9857_s2 + $0xd8] sm:$0xff] }
 0x363   : > { %v3492_v54 = vrot.slane %v3491_v61, 4  ;;  %v7374_v57 = vrot.slane %v3224_v6, 11  ;;  %v3240_v59 = vrot.slane %v3238_v28, 7  ;;  %v3352_v36 = vld [vmem:[#allocation5 + $0x5c] sm:$0xf]  ;;  %v3502_v5 = vshll.u32 %v3387_v51, 16 }
 0x364   : > { %3991 = vmatmul.bf16.gmra.mxu1 %v7393_v0  ;;  %v3487_v56 = vsel %vm9364_vm10, %v3482_v47, %v3486_v32  ;;  %3367 = vst [vmem:[#allocation4 + $0x124] sm:$0xf] %v3351_v33  ;;  %v3389_v46 = vld [vmem:[#allocation5 + $0x60] sm:$0x1]  ;;  %v8159_v15 = vld [vmem:[#allocation4 + $0xb0] sm:$0xf0] }
 0x365   : > { %4040 = vmatmul.bf16.gmra.mxu2 %v7397_v63  ;;  %v3497_v34 = vsel %vm9364_vm10, %v3492_v54, %v3496_v7  ;;  %3616 = vst [vmem:[#allocation4 + $0xe0] sm:$0xf] %v3487_v56  ;;  %v3235_v29 = vsel %vm9336_vm9, %v7374_v57, %v3234_v50  ;;  %v3243_v40 = vor.u32 %v3241_v44, %v3240_v59  ;;  %v7404_v3 = vld [vmem:[#allocation4 + $0x90] sm:$0xf]  ;;  %v8158_v16 = vld [vmem:[#allocation4 + $0x94] sm:$0xf] }
 0x366   : > { %4089 = vmatmul.bf16.gmra.mxu3 %v7401_v12  ;;  %3617 = vst [vmem:[#allocation4 + $0x104] sm:$0xf] %v3497_v34  ;;  %v7406_v23 = vld [vmem:[#allocation4 + $0xb4] sm:$0xf0]  ;;  %v3501_v27 = vrot.slane %v3499_v17, 4  ;;  %v3508_v25 = vshll.u32 %v3388_v4, 16  ;;  %v7405_v0 = vor.u32 %v8159_v15, %v7404_v3  ;;  %5010 = vmatpush.bf16.msrb.mxu1 %v8227_v19 }
 0x367   : > { %3335 = vst [vmem:[#allocation4 + $0x120] sm:$0xf] %v3235_v29  ;;  %v3512_v13 = vshrl.u32 %v3388_v4, 16  ;;  %v3244_v22 = vsel %vm9336_vm9, %v3236_v14, %v3243_v40  ;;  %v3518_v55 = vshll.u32 %v3389_v46, 16  ;;  %v3504_v20 = vrot.slane %v3502_v5, 5  ;;  %v8235_v32 = vld [vmem:[%s9857_s2 + $0x118] sm:$0xff] }
 0x368   : > { %3368 = vst [vmem:[#allocation4 + $0x148] sm:$0xf] %v3352_v36  ;;  %v3510_v21 = vrot.slane %v3508_v25, 5  ;;  %v7412_v63 = vld [vmem:[#allocation4 + $0x98] sm:$0xf]  ;;  %v7409_v2 = vor.u32 %v8158_v16, %v7406_v23  ;;  %5059 = vmatpush.bf16.msrb.mxu2 %v8235_v32 }
 0x369   : > { %3336 = vst [vmem:[#allocation4 + $0x144] sm:$0xf] %v3244_v22  ;;  %v3514_v31 = vrot.slane %v3512_v13, 4  ;;  %v8160_v8 = vld [vmem:[#allocation4 + $0xb8] sm:$0xf0]  ;;  %v3505_v58 = vor.u32 %v3504_v20, %v3501_v27  ;;  %v3520_v41 = vrot.slane %v3518_v55, 5 }
 0x36a   : > { %v7413_v39 = vor.u32 %v8160_v8, %v7412_v63  ;;  %v3125_v42 = vld [vmem:[#allocation5 + $0x6c] sm:$0xf]  ;;  %v3126_v1 = vld [vmem:[#allocation5 + $0x70] sm:$0xf]  ;;  %v3124_v7 = vld [vmem:[#allocation5 + $0x68] sm:$0x8] }
 0x36b   : > { %v3515_v52 = vor.u32 %v3514_v31, %v3510_v21  ;;  %v3506_v24 = vrot.slane %v3505_v58, 4  ;;  %v3251_v12 = vshrl.u32 %v3125_v42, 16  ;;  %v3260_v43 = vshrl.u32 %v3126_v1, 16  ;;  %v3390_v18 = vld [vmem:[#allocation5 + $0x6c] sm:$0xf] }
 0x36c   : > { %v3523_v37 = vshrl.u32 %v3390_v18, 16  ;;  %v3246_v45 = vshrl.u32 %v3124_v7, 16  ;;  %v3254_v38 = vshll.u32 %v3125_v42, 16  ;;  %v3263_v10 = vshll.u32 %v3126_v1, 16  ;;  %v3391_v62 = vld [vmem:[#allocation5 + $0x70] sm:$0xf] }
 0x36d   : > { %v3516_v30 = vrot.slane %v3515_v52, 4  ;;  %v3511_v26 = vsel %vm9364_vm10, %v3506_v24, %v3510_v21  ;;  %v3253_v11 = vrot.slane %v3251_v12, 7  ;;  %v3262_v61 = vrot.slane %v3260_v43, 7  ;;  %v3392_v47 = vld [vmem:[#allocation5 + $0x74] sm:$0x1]  ;;  %v8234_v52 = vld [vmem:[%s9857_s2 + $0x110] sm:$0xff] }
 0x36e   : > { %3618 = vst [vmem:[#allocation4 + $0x128] sm:$0xf] %v3511_v26  ;;  %v3525_v49 = vrot.slane %v3523_v37, 4  ;;  %v3526_v6 = vshll.u32 %v3390_v18, 16  ;;  %v3532_v53 = vshll.u32 %v3391_v62, 16  ;;  %v7375_v54 = vrot.slane %v3246_v45, 11  ;;  %5060 = vmatpush.bf16.msrb.mxu2 %v8234_v52 }
 0x36f   : > { %v3521_v35 = vsel %vm9364_vm10, %v3516_v30, %v3520_v41  ;;  %v3258_v51 = vrot.slane %v3253_v11, 4  ;;  %v3256_v48 = vor.u32 %v3254_v38, %v3253_v11  ;;  %v3265_v28 = vor.u32 %v3263_v10, %v3262_v61  ;;  %v3353_v56 = vld [vmem:[#allocation5 + $0x6c] sm:$0xf]  ;;  %v3354_v14 = vld [vmem:[#allocation5 + $0x70] sm:$0xf] }
 0x370   : > { %3619 = vst [vmem:[#allocation4 + $0x14c] sm:$0xf] %v3521_v35  ;;  %v3536_v44 = vshrl.u32 %v3391_v62, 16  ;;  %v3528_v57 = vrot.slane %v3526_v6, 5  ;;  %v3534_v17 = vrot.slane %v3532_v53, 5  ;;  %v3542_v4 = vshll.u32 %v3392_v47, 16 }
 0x371   : > { %v3257_v34 = vsel %vm9336_vm9, %v7375_v54, %v3256_v48  ;;  %v3266_v50 = vsel %vm9336_vm9, %v3258_v51, %v3265_v28  ;;  %3369 = vst [vmem:[#allocation4 + $0x16c] sm:$0xf] %v3353_v56  ;;  %v7416_v33 = vld [vmem:[#allocation4 + $0xd8] sm:$0xf]  ;;  %v8161_v29 = vld [vmem:[#allocation4 + $0xdc] sm:$0xf] }
 0x372   : > { %v3538_v59 = vrot.slane %v3536_v44, 4  ;;  %3337 = vst [vmem:[#allocation4 + $0x168] sm:$0xf] %v3257_v34  ;;  %v3529_v40 = vor.u32 %v3528_v57, %v3525_v49  ;;  %v8162_v36 = vld [vmem:[#allocation4 + $0xf8] sm:$0xf0]  ;;  %v3544_v3 = vrot.slane %v3542_v4, 5 }
 0x373   : > { %3338 = vst [vmem:[#allocation4 + $0x18c] sm:$0xf] %v3266_v50  ;;  %v7418_v15 = vld [vmem:[#allocation4 + $0xfc] sm:$0xf0]  ;;  %v8163_v27 = vld [vmem:[#allocation4 + $0x100] sm:$0xf0]  ;;  %v7417_v13 = vor.u32 %v8162_v36, %v7416_v33 }
 0x374   : > { %3996 = vmatmul.bf16.gmra.mxu1 %v7405_v0  ;;  %v3539_v46 = vor.u32 %v3538_v59, %v3534_v17  ;;  %3370 = vst [vmem:[#allocation4 + $0x190] sm:$0xf] %v3354_v14  ;;  %v3530_v16 = vrot.slane %v3529_v40, 4  ;;  %v7424_v23 = vld [vmem:[#allocation4 + $0xe0] sm:$0xf]  ;;  %v7421_v22 = vor.u32 %v8161_v29, %v7418_v15 }
 0x375   : > { %4045 = vmatmul.bf16.gmra.mxu2 %v7409_v2  ;;  %v7425_v20 = vor.u32 %v8163_v27, %v7424_v23  ;;  %v3128_v21 = vld [vmem:[#allocation5 + $0x80] sm:$0xf]  ;;  %v3129_v31 = vld [vmem:[#allocation5 + $0x84] sm:$0xf]  ;;  %v3127_v41 = vld [vmem:[#allocation5 + $0x7c] sm:$0x8] }
 0x376   : > { %4094 = vmatmul.bf16.gmra.mxu3 %v7413_v39  ;;  %v3540_v5 = vrot.slane %v3539_v46, 4  ;;  %v3535_v25 = vsel %vm9364_vm10, %v3530_v16, %v3534_v17  ;;  %v3273_v63 = vshrl.u32 %v3128_v21, 16  ;;  %v3282_v8 = vshrl.u32 %v3129_v31, 16  ;;  %v3393_v58 = vld [vmem:[#allocation5 + $0x80] sm:$0xf]  ;;  %v8233_v16 = vld [vmem:[%s9857_s2 + $0x108] sm:$0xff] }
 0x377   : > { %3620 = vst [vmem:[#allocation4 + $0x170] sm:$0xf] %v3535_v25  ;;  %v3547_v0 = vshrl.u32 %v3393_v58, 16  ;;  %v8226_v2 = vld [vmem:[%s9857_s2 + $0xd0] sm:$0xff]  ;;  %v3268_v39 = vshrl.u32 %v3127_v41, 16  ;;  %v3276_v30 = vshll.u32 %v3128_v21, 16  ;;  %5061 = vmatpush.bf16.msrb.mxu2 %v8233_v16 }
 0x378   : > { %v3545_v55 = vsel %vm9364_vm10, %v3540_v5, %v3544_v3  ;;  %v3275_v24 = vrot.slane %v3273_v63, 7  ;;  %v3394_v42 = vld [vmem:[#allocation5 + $0x84] sm:$0xf]  ;;  %v3284_v1 = vrot.slane %v3282_v8, 7  ;;  %v3285_v26 = vshll.u32 %v3129_v31, 16  ;;  %5011 = vmatpush.bf16.msrb.mxu1 %v8226_v2  ;;  %v8247_v5 = vld [vmem:[%s9857_s2 + $0x178] sm:$0xff] }
 0x379   : > { %3621 = vst [vmem:[#allocation4 + $0x194] sm:$0xf] %v3545_v55  ;;  %v3395_v35 = vld [vmem:[#allocation5 + $0x88] sm:$0x1]  ;;  %v3549_v12 = vrot.slane %v3547_v0, 4  ;;  %v3550_v43 = vshll.u32 %v3393_v58, 16  ;;  %5104 = vmatpush.bf16.msra.mxu3 %v8247_v5 }
 0x37a   : > { %v7376_v18 = vrot.slane %v3268_v39, 11  ;;  %v3278_v32 = vor.u32 %v3276_v30, %v3275_v24  ;;  %v3280_v37 = vrot.slane %v3275_v24, 4  ;;  %v3556_v19 = vshll.u32 %v3394_v42, 16  ;;  %v3355_v10 = vld [vmem:[#allocation5 + $0x80] sm:$0xf]  ;;  %v8225_v25 = vld [vmem:[%s9857_s2 + $0xc8] sm:$0xff] }
 0x37b   : > { %v3287_v7 = vor.u32 %v3285_v26, %v3284_v1  ;;  %v3552_v11 = vrot.slane %v3550_v43, 5  ;;  %v3560_v45 = vshrl.u32 %v3394_v42, 16  ;;  %v3566_v38 = vshll.u32 %v3395_v35, 16  ;;  %v3356_v47 = vld [vmem:[#allocation5 + $0x84] sm:$0xf] }
 0x37c   : > { %v3279_v61 = vsel %vm9336_vm9, %v7376_v18, %v3278_v32  ;;  %v3558_v62 = vrot.slane %v3556_v19, 5  ;;  %v8164_v53 = vld [vmem:[#allocation4 + $0x124] sm:$0xf]  ;;  %v7428_v54 = vld [vmem:[#allocation4 + $0x120] sm:$0xf]  ;;  %5012 = vmatpush.bf16.msrb.mxu1 %v8225_v25 }
 0x37d   : > { %v3288_v51 = vsel %vm9336_vm9, %v3280_v37, %v3287_v7  ;;  %3339 = vst [vmem:[#allocation4 + $0x1b0] sm:$0xf] %v3279_v61  ;;  %v3553_v49 = vor.u32 %v3552_v11, %v3549_v12  ;;  %v3562_v6 = vrot.slane %v3560_v45, 4  ;;  %v3568_v44 = vrot.slane %v3566_v38, 5  ;;  %v8165_v56 = vld [vmem:[#allocation4 + $0x140] sm:$0xf0] }
 0x37e   : > { %3340 = vst [vmem:[#allocation4 + $0x1d4] sm:$0xf] %v3288_v51  ;;  %v7430_v57 = vld [vmem:[#allocation4 + $0x144] sm:$0xf0]  ;;  %v8166_v34 = vld [vmem:[#allocation4 + $0x148] sm:$0xf0]  ;;  %v7429_v59 = vor.u32 %v8165_v56, %v7428_v54 }
 0x37f   : > { %3371 = vst [vmem:[#allocation4 + $0x1b4] sm:$0xf] %v3355_v10  ;;  %v3554_v48 = vrot.slane %v3553_v49, 4  ;;  %v3563_v28 = vor.u32 %v3562_v6, %v3558_v62  ;;  %v7436_v17 = vld [vmem:[#allocation4 + $0x128] sm:$0xf]  ;;  %v7433_v4 = vor.u32 %v8164_v53, %v7430_v57  ;;  %v8244_v49 = vld [vmem:[%s9857_s2 + $0x160] sm:$0xff] }
 0x380   : > { %3372 = vst [vmem:[#allocation4 + $0x1d8] sm:$0xf] %v3356_v47  ;;  %v7437_v29 = vor.u32 %v8166_v34, %v7436_v17  ;;  %v3131_v40 = vld [vmem:[#allocation5 + $0x94] sm:$0xf]  ;;  %v3132_v36 = vld [vmem:[#allocation5 + $0x98] sm:$0xf] }
 0x381   : > { %v3559_v50 = vsel %vm9364_vm10, %v3554_v48, %v3558_v62  ;;  %v3564_v14 = vrot.slane %v3563_v28, 4  ;;  %v3295_v46 = vshrl.u32 %v3131_v40, 16  ;;  %v3304_v3 = vshrl.u32 %v3132_v36, 16  ;;  %v3396_v15 = vld [vmem:[#allocation5 + $0x94] sm:$0xf]  ;;  %v8245_v37 = vld [vmem:[%s9857_s2 + $0x168] sm:$0xff] }
 0x382   : > { %3622 = vst [vmem:[#allocation4 + $0x1b8] sm:$0xf] %v3559_v50  ;;  %v3130_v23 = vld [vmem:[#allocation5 + $0x90] sm:$0x8]  ;;  %v3571_v27 = vshrl.u32 %v3396_v15, 16  ;;  %v3298_v55 = vshll.u32 %v3131_v40, 16 }
 0x383   : > { %v3569_v33 = vsel %vm9364_vm10, %v3564_v14, %v3568_v44  ;;  %v3306_v21 = vrot.slane %v3304_v3, 7  ;;  %v3307_v31 = vshll.u32 %v3132_v36, 16  ;;  %v3397_v52 = vld [vmem:[#allocation5 + $0x98] sm:$0xf]  ;;  %v3398_v41 = vld [vmem:[#allocation5 + $0x9c] sm:$0x1] }
 0x384   : > { %4001 = vmatmul.bf16.gmra.mxu1 %v7417_v13  ;;  %3623 = vst [vmem:[#allocation4 + $0x1dc] sm:$0xf] %v3569_v33  ;;  %v3290_v13 = vshrl.u32 %v3130_v23, 16  ;;  %v3573_v2 = vrot.slane %v3571_v27, 4  ;;  %v3574_v39 = vshll.u32 %v3396_v15, 16  ;;  %v3580_v24 = vshll.u32 %v3397_v52, 16 }
 0x385   : > { %4050 = vmatmul.bf16.gmra.mxu2 %v7421_v22  ;;  %v3297_v22 = vrot.slane %v3295_v46, 7  ;;  %v3309_v0 = vor.u32 %v3307_v31, %v3306_v21  ;;  %v3357_v42 = vld [vmem:[#allocation5 + $0x94] sm:$0xf]  ;;  %v3584_v1 = vshrl.u32 %v3397_v52, 16  ;;  %v3590_v26 = vshll.u32 %v3398_v41, 16  ;;  %v8242_v15 = vld [vmem:[%s9857_s2 + $0x150] sm:$0xff] }
 0x386   : > { %4099 = vmatmul.bf16.gmra.mxu3 %v7425_v20  ;;  %v8246_v20 = vld [vmem:[%s9857_s2 + $0x170] sm:$0xff]  ;;  %v7377_v63 = vrot.slane %v3290_v13, 11  ;;  %v3358_v12 = vld [vmem:[#allocation5 + $0x98] sm:$0xf]  ;;  %v3576_v43 = vrot.slane %v3574_v39, 5  ;;  %v3582_v18 = vrot.slane %v3580_v24, 5 }
 0x387   : > { %v3300_v8 = vor.u32 %v3298_v55, %v3297_v22  ;;  %v3302_v58 = vrot.slane %v3297_v22, 4  ;;  %v8167_v32 = vld [vmem:[#allocation4 + $0x16c] sm:$0xf]  ;;  %5105 = vmatpush.bf16.msra.mxu3 %v8246_v20  ;;  %v3586_v19 = vrot.slane %v3584_v1, 4  ;;  %v7440_v7 = vld [vmem:[#allocation4 + $0x168] sm:$0xf] }
 0x388   : > { %v8168_v11 = vld [vmem:[#allocation4 + $0x188] sm:$0xf0]  ;;  %3373 = vst [vmem:[#allocation4 + $0x1fc] sm:$0xf] %v3357_v42  ;;  %v3577_v45 = vor.u32 %v3576_v43, %v3573_v2  ;;  %v7442_v38 = vld [vmem:[#allocation4 + $0x18c] sm:$0xf0] }
 0x389   : > { %v3301_v30 = vsel %vm9336_vm9, %v7377_v63, %v3300_v8  ;;  %v3310_v35 = vsel %vm9336_vm9, %v3302_v58, %v3309_v0  ;;  %3374 = vst [vmem:[#allocation4 + $0x220] sm:$0xf] %v3358_v12  ;;  %v3587_v61 = vor.u32 %v3586_v19, %v3582_v18  ;;  %v3592_v10 = vrot.slane %v3590_v26, 5  ;;  %v7448_v62 = vld [vmem:[#allocation4 + $0x170] sm:$0xf]  ;;  %v8232_v34 = vld [vmem:[%s9857_s2 + $0x100] sm:$0xff] }
 0x38a   : > { %3341 = vst [vmem:[#allocation4 + $0x1f8] sm:$0xf] %v3301_v30  ;;  %v8169_v51 = vld [vmem:[#allocation4 + $0x190] sm:$0xf0]  ;;  %v3578_v47 = vrot.slane %v3577_v45, 4  ;;  %v7441_v53 = vor.u32 %v8168_v11, %v7440_v7  ;;  %v7445_v54 = vor.u32 %v8167_v32, %v7442_v38  ;;  %5062 = vmatpush.bf16.msrb.mxu2 %v8232_v34  ;;  %v8241_v0 = vld [vmem:[%s9857_s2 + $0x148] sm:$0xff] }
 0x38b   : > { %3342 = vst [vmem:[#allocation4 + $0x21c] sm:$0xf] %v3310_v35  ;;  %5106 = vmatpush.bf16.msra.mxu3 %v8245_v37  ;;  %v3588_v6 = vrot.slane %v3587_v61, 4  ;;  %v7449_v28 = vor.u32 %v8169_v51, %v7448_v62  ;;  %v4143_v56 = vld [vmem:[#allocation5 + $0x1c] sm:$0xf]  ;;  %v8240_v38 = vld [vmem:[%s9857_s2 + $0x140] sm:$0xff] }
 0x38c   : > { %v3583_v48 = vsel %vm9364_vm10, %v3578_v47, %v3582_v18  ;;  %v4144_v57 = vld [vmem:[#allocation5 + $0x20] sm:$0xf]  ;;  %v4172_v17 = vshrl.u32 %v4143_v56, 16  ;;  %v4142_v50 = vld [vmem:[#allocation5 + $0x18] sm:$0x8]  ;;  %v4175_v40 = vshll.u32 %v4143_v56, 16 }
 0x38d   : > { %v3593_v44 = vsel %vm9364_vm10, %v3588_v6, %v3592_v10  ;;  %3624 = vst [vmem:[#allocation4 + $0x200] sm:$0xf] %v3583_v48  ;;  %v4181_v14 = vshrl.u32 %v4144_v57, 16  ;;  %v4167_v33 = vshrl.u32 %v4142_v50, 16  ;;  %v4184_v46 = vshll.u32 %v4144_v57, 16 }
 0x38e   : > { %3625 = vst [vmem:[#allocation4 + $0x224] sm:$0xf] %v3593_v44  ;;  %v4406_v3 = vld [vmem:[#allocation5 + $0x1c] sm:$0xf]  ;;  %v4407_v5 = vld [vmem:[#allocation5 + $0x20] sm:$0xf] }
 0x38f   : > { %5107 = vmatpush.bf16.msra.mxu3 %v8244_v49  ;;  %v4183_v36 = vrot.slane %v4181_v14, 7  ;;  %v7570_v16 = vrot.slane %v4167_v33, 11  ;;  %v4408_v13 = vld [vmem:[#allocation5 + $0x24] sm:$0x1]  ;;  %v4431_v22 = vshrl.u32 %v4406_v3, 16  ;;  %v4434_v55 = vshll.u32 %v4406_v3, 16 }
 0x390   : > { %v4440_v20 = vshll.u32 %v4407_v5, 16  ;;  %v4374_v31 = vld [vmem:[#allocation5 + $0x1c] sm:$0xf]  ;;  %v4375_v8 = vld [vmem:[#allocation5 + $0x20] sm:$0xf]  ;;  %v4444_v39 = vshrl.u32 %v4407_v5, 16 }
 0x391   : > { %v4186_v25 = vor.u32 %v4184_v46, %v4183_v36  ;;  %v4433_v58 = vrot.slane %v4431_v22, 4  ;;  %v4436_v52 = vrot.slane %v4434_v55, 5  ;;  %v7452_v41 = vld [vmem:[#allocation4 + $0x1b0] sm:$0xf]  ;;  %v4450_v24 = vshll.u32 %v4408_v13, 16 }
 0x392   : > { %v4442_v2 = vrot.slane %v4440_v20, 5  ;;  %v8171_v30 = vld [vmem:[#allocation4 + $0x1d0] sm:$0xf0]  ;;  %4390 = vst [vmem:[#allocation4 + $0x10] sm:$0xf] %v4374_v31  ;;  %v4446_v35 = vrot.slane %v4444_v39, 4 }
 0x393   : > { %v8170_v42 = vld [vmem:[#allocation4 + $0x1b4] sm:$0xf]  ;;  %v4437_v1 = vor.u32 %v4436_v52, %v4433_v58  ;;  %v7454_v26 = vld [vmem:[#allocation4 + $0x1d4] sm:$0xf0]  ;;  %4391 = vst [vmem:[#allocation4 + $0x34] sm:$0xf] %v4375_v8  ;;  %v7453_v19 = vor.u32 %v8171_v30, %v7452_v41 }
 0x394   : > { %4006 = vmatmul.bf16.gmra.mxu1 %v7429_v59  ;;  %v8243_v59 = vld [vmem:[%s9857_s2 + $0x158] sm:$0xff]  ;;  %v4447_v32 = vor.u32 %v4446_v35, %v4442_v2  ;;  %v4452_v37 = vrot.slane %v4450_v24, 5  ;;  %v7457_v7 = vor.u32 %v8170_v42, %v7454_v26  ;;  %v4146_v10 = vld [vmem:[#allocation5 + $0x30] sm:$0xf]  ;;  %v4147_v62 = vld [vmem:[#allocation5 + $0x34] sm:$0xf] }
 0x395   : > { %4055 = vmatmul.bf16.gmra.mxu2 %v7433_v4  ;;  %v8224_v4 = vld [vmem:[%s9857_s2 + $0xc0] sm:$0xff]  ;;  %5108 = vmatpush.bf16.msra.mxu3 %v8243_v59  ;;  %v7460_v12 = vld [vmem:[#allocation4 + $0x1b8] sm:$0xf]  ;;  %v8172_v43 = vld [vmem:[#allocation4 + $0x1d8] sm:$0xf0]  ;;  %v4438_v18 = vrot.slane %v4437_v1, 4 }
 0x396   : > { %4104 = vmatmul.bf16.gmra.mxu3 %v7437_v29  ;;  %v4174_v29 = vrot.slane %v4172_v17, 7  ;;  %5013 = vmatpush.bf16.msrb.mxu1 %v8224_v4  ;;  %v7461_v45 = vor.u32 %v8172_v43, %v7460_v12  ;;  %v4448_v61 = vrot.slane %v4447_v32, 4  ;;  %v4194_v47 = vshrl.u32 %v4146_v10, 16  ;;  %v4409_v6 = vld [vmem:[#allocation5 + $0x30] sm:$0xf]  ;;  %v8294_v32 = vld [vmem:[%s9857_s2 + $0x230] sm:$0xff] }
 0x397   : > { %v4443_v11 = vsel %vm9364_vm10, %v4438_v18, %v4442_v2  ;;  %v4203_v49 = vshrl.u32 %v4147_v62, 16  ;;  %v4145_v48 = vld [vmem:[#allocation5 + $0x2c] sm:$0x8]  ;;  %v4197_v44 = vshll.u32 %v4146_v10, 16  ;;  %v4206_v17 = vshll.u32 %v4147_v62, 16 }
 0x398   : > { %v4177_v23 = vor.u32 %v4175_v40, %v4174_v29  ;;  %v4179_v27 = vrot.slane %v4174_v29, 4  ;;  %4638 = vst [vmem:[#allocation4 + $0x14] sm:$0xf] %v4443_v11  ;;  %v4453_v51 = vsel %vm9364_vm10, %v4448_v61, %v4452_v37  ;;  %v4189_v57 = vshrl.u32 %v4145_v48, 16  ;;  %v4410_v34 = vld [vmem:[#allocation5 + $0x34] sm:$0xf] }
 0x399   : > { %5109 = vmatpush.bf16.msra.mxu3 %v8242_v15  ;;  %4639 = vst [vmem:[#allocation4 + $0x38] sm:$0xf] %v4453_v51  ;;  %v4205_v56 = vrot.slane %v4203_v49, 7  ;;  %v4411_v50 = vld [vmem:[#allocation5 + $0x38] sm:$0x1]  ;;  %v4458_v33 = vshll.u32 %v4409_v6, 16 }
 0x39a   : > { %v4178_v21 = vsel %vm9336_vm9, %v7570_v16, %v4177_v23  ;;  %v4187_v63 = vsel %vm9336_vm9, %v4179_v27, %v4186_v25  ;;  %v8287_v29 = vld [vmem:[%s9857_s2 + $0x1f8] sm:$0xff]  ;;  %v7571_v40 = vrot.slane %v4189_v57, 11  ;;  %v4464_v46 = vshll.u32 %v4410_v34, 16  ;;  %v4376_v15 = vld [vmem:[#allocation5 + $0x30] sm:$0xf]  ;;  %v8286_v48 = vld [vmem:[%s9857_s2 + $0x1f0] sm:$0xff] }
 0x39b   : > { %4358 = vst [vmem:[#allocation4 + $0xc] sm:$0xf] %v4178_v21  ;;  %v4208_v36 = vor.u32 %v4206_v17, %v4205_v56  ;;  %v4468_v3 = vshrl.u32 %v4410_v34, 16  ;;  %v4460_v16 = vrot.slane %v4458_v33, 5  ;;  %v4474_v23 = vshll.u32 %v4411_v50, 16  ;;  %6115 = vmatpush.bf16.msra.mxu1 %v8287_v29 }
 0x39c   : > { %4359 = vst [vmem:[#allocation4 + $0x30] sm:$0xf] %v4187_v63  ;;  %v4377_v25 = vld [vmem:[#allocation5 + $0x34] sm:$0xf]  ;;  %v4466_v13 = vrot.slane %v4464_v46, 5 }
 0x39d   : > { %5110 = vmatpush.bf16.msra.mxu3 %v8241_v0  ;;  %4392 = vst [vmem:[#allocation4 + $0x58] sm:$0xf] %v4376_v15  ;;  %v4470_v22 = vrot.slane %v4468_v3, 4  ;;  %v7464_v55 = vld [vmem:[#allocation4 + $0x1f8] sm:$0xf]  ;;  %v4476_v8 = vrot.slane %v4474_v23, 5 }
 0x39e   : > { %v8174_v20 = vld [vmem:[#allocation4 + $0x218] sm:$0xf0]  ;;  %v7466_v58 = vld [vmem:[#allocation4 + $0x21c] sm:$0xf0]  ;;  %4393 = vst [vmem:[#allocation4 + $0x7c] sm:$0xf] %v4377_v25 }
 0x39f   : > { %v8173_v31 = vld [vmem:[#allocation4 + $0x1fc] sm:$0xf]  ;;  %v4471_v63 = vor.u32 %v4470_v22, %v4466_v13  ;;  %v7472_v41 = vld [vmem:[#allocation4 + $0x200] sm:$0xf]  ;;  %v8175_v0 = vld [vmem:[#allocation4 + $0x220] sm:$0xf0]  ;;  %v7465_v24 = vor.u32 %v8174_v20, %v7464_v55  ;;  %6116 = vmatpush.bf16.msra.mxu1 %v8286_v48 }
 0x3a0   : > { %v7469_v30 = vor.u32 %v8173_v31, %v7466_v58  ;;  %v7473_v1 = vor.u32 %v8175_v0, %v7472_v41  ;;  %v4149_v26 = vld [vmem:[#allocation5 + $0x44] sm:$0xf]  ;;  %v4150_v35 = vld [vmem:[#allocation5 + $0x48] sm:$0xf]  ;;  %v4148_v37 = vld [vmem:[#allocation5 + $0x40] sm:$0x8] }
 0x3a1   : > { %5111 = vmatpush.bf16.msra.mxu3 %v8240_v38  ;;  %v4472_v2 = vrot.slane %v4471_v63, 4  ;;  %v4216_v12 = vshrl.u32 %v4149_v26, 16  ;;  %v4225_v43 = vshrl.u32 %v4150_v35, 16  ;;  %v4412_v18 = vld [vmem:[#allocation5 + $0x44] sm:$0xf]  ;;  %v4228_v10 = vshll.u32 %v4150_v35, 16 }
 0x3a2   : > { %v4413_v38 = vld [vmem:[#allocation5 + $0x48] sm:$0xf]  ;;  %v4414_v62 = vld [vmem:[#allocation5 + $0x4c] sm:$0x1]  ;;  %v4378_v34 = vld [vmem:[#allocation5 + $0x44] sm:$0xf] }
 0x3a3   : > { %v4477_v42 = vsel %vm9364_vm10, %v4472_v2, %v4476_v8  ;;  %v4218_v11 = vrot.slane %v4216_v12, 7  ;;  %v4227_v61 = vrot.slane %v4225_v43, 7  ;;  %v4492_v56 = vshrl.u32 %v4413_v38, 16  ;;  %v7580_v29 = vld [vmem:[#allocation4 + $0xc] sm:$0xf] }
 0x3a4   : > { %4011 = vmatmul.bf16.gmra.mxu1 %v7441_v53  ;;  %v8295_v53 = vld [vmem:[%s9857_s2 + $0x238] sm:$0xff]  ;;  %4641 = vst [vmem:[#allocation4 + $0x80] sm:$0xf] %v4477_v42  ;;  %v4498_v57 = vshll.u32 %v4414_v62, 16  ;;  %v8200_v15 = vld [vmem:[#allocation4 + $0x10] sm:$0xf] }
 0x3a5   : > { %4060 = vmatmul.bf16.gmra.mxu2 %v7445_v54  ;;  %v4455_v54 = vshrl.u32 %v4409_v6, 16  ;;  %v4494_v33 = vrot.slane %v4492_v56, 4  ;;  %4394 = vst [vmem:[#allocation4 + $0xa0] sm:$0xf] %v4378_v34  ;;  %v7588_v23 = vld [vmem:[#allocation4 + $0x14] sm:$0xf] }
 0x3a6   : > { %4109 = vmatmul.bf16.gmra.mxu3 %v7449_v28  ;;  %v4196_v28 = vrot.slane %v4194_v47, 7  ;;  %6164 = vmatpush.bf16.msra.mxu2 %v8295_v53  ;;  %v4482_v47 = vshll.u32 %v4412_v18, 16  ;;  %v4223_v53 = vrot.slane %v4218_v11, 4  ;;  %v4500_v3 = vrot.slane %v4498_v57, 5  ;;  %v4152_v31 = vld [vmem:[#allocation5 + $0x58] sm:$0xf] }
 0x3a7   : > { %v4457_v4 = vrot.slane %v4455_v54, 4  ;;  %v4488_v54 = vshll.u32 %v4413_v38, 16  ;;  %v4153_v63 = vld [vmem:[#allocation5 + $0x5c] sm:$0xf]  ;;  %v4238_v8 = vshrl.u32 %v4152_v31, 16 }
 0x3a8   : > { %v4199_v14 = vor.u32 %v4197_v44, %v4196_v28  ;;  %v4201_v59 = vrot.slane %v4196_v28, 4  ;;  %v4230_v28 = vor.u32 %v4228_v10, %v4227_v61  ;;  %v4484_v44 = vrot.slane %v4482_v47, 5  ;;  %v8293_v41 = vld [vmem:[%s9857_s2 + $0x228] sm:$0xff]  ;;  %v4151_v0 = vld [vmem:[#allocation5 + $0x54] sm:$0x8] }
 0x3a9   : > { %v4461_v21 = vor.u32 %v4460_v16, %v4457_v4  ;;  %v4490_v50 = vrot.slane %v4488_v54, 5  ;;  %v7582_v16 = vld [vmem:[#allocation4 + $0x30] sm:$0xf0]  ;;  %v4247_v58 = vshrl.u32 %v4153_v63, 16  ;;  %v4416_v42 = vld [vmem:[#allocation5 + $0x5c] sm:$0xf] }
 0x3aa   : > { %v4200_v27 = vsel %vm9336_vm9, %v7571_v40, %v4199_v14  ;;  %v4209_v5 = vsel %vm9336_vm9, %v4201_v59, %v4208_v36  ;;  %6165 = vmatpush.bf16.msra.mxu2 %v8294_v32  ;;  %v4231_v14 = vsel %vm9336_vm9, %v4223_v53, %v4230_v28  ;;  %v4379_v59 = vld [vmem:[#allocation5 + $0x48] sm:$0xf]  ;;  %v8201_v40 = vld [vmem:[#allocation4 + $0x2c] sm:$0xf0]  ;;  %v7585_v22 = vor.u32 %v8200_v15, %v7582_v16  ;;  %v4380_v53 = vld [vmem:[#allocation5 + $0x58] sm:$0xf] }
 0x3ab   : > { %4360 = vst [vmem:[#allocation4 + $0x54] sm:$0xf] %v4200_v27  ;;  %v4462_v52 = vrot.slane %v4461_v21, 4  ;;  %v4495_v46 = vor.u32 %v4494_v33, %v4490_v50  ;;  %v8202_v27 = vld [vmem:[#allocation4 + $0x34] sm:$0xf0]  ;;  %v4512_v61 = vshll.u32 %v4416_v42, 16 }
 0x3ac   : > { %4361 = vst [vmem:[#allocation4 + $0x78] sm:$0xf] %v4209_v5  ;;  %v7589_v21 = vor.u32 %v8202_v27, %v7588_v23  ;;  %v4417_v35 = vld [vmem:[#allocation5 + $0x60] sm:$0x1]  ;;  %v4381_v56 = vld [vmem:[#allocation5 + $0x5c] sm:$0xf] }
 0x3ad   : > { %v4467_v39 = vsel %vm9364_vm10, %v4462_v52, %v4466_v13  ;;  %4363 = vst [vmem:[#allocation4 + $0xc0] sm:$0xf] %v4231_v14  ;;  %v4496_v25 = vrot.slane %v4495_v46, 4  ;;  %v7581_v13 = vor.u32 %v8201_v40, %v7580_v29  ;;  %v4415_v52 = vld [vmem:[#allocation5 + $0x58] sm:$0xf]  ;;  %v4522_v47 = vshll.u32 %v4417_v35, 16 }
 0x3ae   : > { %4640 = vst [vmem:[#allocation4 + $0x5c] sm:$0xf] %v4467_v39  ;;  %v4503_v2 = vshrl.u32 %v4415_v52, 16  ;;  %v4233_v39 = vshrl.u32 %v4151_v0, 16  ;;  %6166 = vmatpush.bf16.msra.mxu2 %v8293_v41  ;;  %v4506_v38 = vshll.u32 %v4415_v52, 16  ;;  %v4514_v48 = vrot.slane %v4512_v61, 5 }
 0x3af   : > { %4395 = vst [vmem:[#allocation4 + $0xc4] sm:$0xf] %v4379_v59  ;;  %v4501_v55 = vsel %vm9364_vm10, %v4496_v25, %v4500_v3  ;;  %v7594_v34 = vld [vmem:[#allocation4 + $0x78] sm:$0xf0]  ;;  %v8205_v33 = vld [vmem:[#allocation4 + $0x7c] sm:$0xf0] }
 0x3b0   : > { %4643 = vst [vmem:[#allocation4 + $0xc8] sm:$0xf] %v4501_v55  ;;  %v7573_v43 = vrot.slane %v4233_v39, 11  ;;  %v4508_v54 = vrot.slane %v4506_v38, 5  ;;  %v4156_v55 = vld [vmem:[#allocation5 + $0x70] sm:$0xf] }
 0x3b1   : > { %4396 = vst [vmem:[#allocation4 + $0xe8] sm:$0xf] %v4380_v53  ;;  %v4269_v41 = vshrl.u32 %v4156_v55, 16  ;;  %v4272_v0 = vshll.u32 %v4156_v55, 16  ;;  %v4382_v38 = vld [vmem:[#allocation5 + $0x6c] sm:$0xf] }
 0x3b2   : > { %v7592_v28 = vld [vmem:[#allocation4 + $0x54] sm:$0xf]  ;;  %4397 = vst [vmem:[#allocation4 + $0x10c] sm:$0xf] %v4381_v56  ;;  %v4157_v55 = vld [vmem:[#allocation5 + $0x7c] sm:$0x8] }
 0x3b3   : > { %4398 = vst [vmem:[#allocation4 + $0x130] sm:$0xf] %v4382_v38  ;;  %v4385_v38 = vld [vmem:[#allocation5 + $0x84] sm:$0xf] }
 0x3b4   : > { %4016 = vmatmul.bf16.gmra.mxu1 %v7453_v19  ;;  %v4479_v19 = vshrl.u32 %v4412_v18, 16  ;;  %4401 = vst [vmem:[#allocation4 + $0x19c] sm:$0xf] %v4385_v38 }
 0x3b5   : > { %4065 = vmatmul.bf16.gmra.mxu2 %v7457_v7  ;;  %v4211_v7 = vshrl.u32 %v4148_v37, 16  ;;  %v4505_v37 = vrot.slane %v4503_v2, 4  ;;  %v7600_v14 = vld [vmem:[#allocation4 + $0x5c] sm:$0xf]  ;;  %v4419_v2 = vld [vmem:[#allocation5 + $0x70] sm:$0xf] }
 0x3b6   : > { %4114 = vmatmul.bf16.gmra.mxu3 %v7461_v45  ;;  %v4219_v45 = vshll.u32 %v4149_v26, 16  ;;  %v4481_v51 = vrot.slane %v4479_v19, 4  ;;  %v4250_v26 = vshll.u32 %v4153_v63, 16  ;;  %v4154_v63 = vld [vmem:[#allocation5 + $0x68] sm:$0x8]  ;;  %v4540_v53 = vshrl.u32 %v4419_v2, 16 }
 0x3b7   : > { %v7572_v49 = vrot.slane %v4211_v7, 11 }
 0x3b8   : > { %v4221_v6 = vor.u32 %v4219_v45, %v4218_v11  ;;  %v4485_v4 = vor.u32 %v4484_v44, %v4481_v51  ;;  %v8285_v11 = vld [vmem:[%s9857_s2 + $0x1e8] sm:$0xff]  ;;  %v4516_v51 = vshrl.u32 %v4416_v42, 16  ;;  %v8203_v44 = vld [vmem:[#allocation4 + $0x58] sm:$0xf] }
 0x3b9   : > { %6117 = vmatpush.bf16.msra.mxu1 %v8285_v11  ;;  %v7597_v16 = vor.u32 %v8203_v44, %v7594_v34 }
 0x3ba   : > { %v4222_v17 = vsel %vm9336_vm9, %v7572_v49, %v4221_v6  ;;  %v4486_v36 = vrot.slane %v4485_v4, 4  ;;  %v4518_v57 = vrot.slane %v4516_v51, 4  ;;  %v4524_v4 = vrot.slane %v4522_v47, 5  ;;  %v8207_v47 = vld [vmem:[#allocation4 + $0xbc] sm:$0xf0] }
 0x3bb   : > { %4362 = vst [vmem:[#allocation4 + $0x9c] sm:$0xf] %v4222_v17  ;;  %v8204_v17 = vld [vmem:[#allocation4 + $0x74] sm:$0xf0] }
 0x3bc   : > { %v4491_v5 = vsel %vm9364_vm10, %v4486_v36, %v4490_v50  ;;  %v4509_v50 = vor.u32 %v4508_v54, %v4505_v37  ;;  %v4519_v59 = vor.u32 %v4518_v57, %v4514_v48  ;;  %v7593_v15 = vor.u32 %v8204_v17, %v7592_v28  ;;  %v7606_v28 = vld [vmem:[#allocation4 + $0xc0] sm:$0xf0]  ;;  %v8208_v17 = vld [vmem:[#allocation4 + $0xc4] sm:$0xf0] }
 0x3bd   : > { %4642 = vst [vmem:[#allocation4 + $0xa4] sm:$0xf] %v4491_v5  ;;  %v7601_v5 = vor.u32 %v8205_v33, %v7600_v14  ;;  %v4542_v57 = vrot.slane %v4540_v53, 4  ;;  %v7618_v53 = vld [vmem:[#allocation4 + $0x108] sm:$0xf0] }
 0x3be   : > { %v4510_v29 = vrot.slane %v4509_v50, 4  ;;  %v4520_v36 = vrot.slane %v4519_v59, 4 }
 0x3c0   : > { %v4515_v23 = vsel %vm9364_vm10, %v4510_v29, %v4514_v48  ;;  %v4525_v25 = vsel %vm9364_vm10, %v4520_v36, %v4524_v4  ;;  %v8206_v48 = vld [vmem:[#allocation4 + $0xa0] sm:$0xf] }
 0x3c1   : > { %4644 = vst [vmem:[#allocation4 + $0xec] sm:$0xf] %v4515_v23  ;;  %v4158_v23 = vld [vmem:[#allocation5 + $0x80] sm:$0xf] }
 0x3c2   : > { %4645 = vst [vmem:[#allocation4 + $0x110] sm:$0xf] %v4525_v25  ;;  %v7604_v51 = vld [vmem:[#allocation4 + $0x9c] sm:$0xf]  ;;  %v4282_v25 = vshrl.u32 %v4158_v23, 16 }
 0x3c3   : > { %v7605_v29 = vor.u32 %v8207_v47, %v7604_v51 }
 0x3c4   : > { %4021 = vmatmul.bf16.gmra.mxu1 %v7465_v24  ;;  %v4240_v24 = vrot.slane %v4238_v8, 7  ;;  %v4255_v8 = vshrl.u32 %v4154_v63, 16  ;;  %v7612_v56 = vld [vmem:[#allocation4 + $0xa4] sm:$0xf]  ;;  %v4422_v63 = vld [vmem:[#allocation5 + $0x84] sm:$0xf] }
 0x3c5   : > { %4070 = vmatmul.bf16.gmra.mxu2 %v7469_v30  ;;  %v4241_v30 = vshll.u32 %v4152_v31, 16  ;;  %v8292_v31 = vld [vmem:[%s9857_s2 + $0x220] sm:$0xff]  ;;  %v4564_v51 = vshrl.u32 %v4422_v63, 16 }
 0x3c6   : > { %4119 = vmatmul.bf16.gmra.mxu3 %v7473_v1  ;;  %v4249_v1 = vrot.slane %v4247_v58, 7  ;;  %v4245_v32 = vrot.slane %v4240_v24, 4  ;;  %6167 = vmatpush.bf16.msra.mxu2 %v8292_v31  ;;  %v4284_v31 = vrot.slane %v4282_v25, 7  ;;  %v4424_v25 = vld [vmem:[#allocation5 + $0x94] sm:$0xf] }
 0x3c7   : > { %v4243_v18 = vor.u32 %v4241_v30, %v4240_v24  ;;  %v7574_v30 = vrot.slane %v4255_v8, 11  ;;  %v4285_v8 = vshll.u32 %v4158_v23, 16 }
 0x3c8   : > { %v4252_v45 = vor.u32 %v4250_v26, %v4249_v1  ;;  %v4271_v26 = vrot.slane %v4269_v41, 7 }
 0x3c9   : > { %v4244_v62 = vsel %vm9336_vm9, %v7573_v43, %v4243_v18  ;;  %v8284_v43 = vld [vmem:[%s9857_s2 + $0x1e0] sm:$0xff] }
 0x3ca   : > { %v4253_v6 = vsel %vm9336_vm9, %v4245_v32, %v4252_v45  ;;  %4364 = vst [vmem:[#allocation4 + $0xe4] sm:$0xf] %v4244_v62  ;;  %v4420_v18 = vld [vmem:[#allocation5 + $0x74] sm:$0x1]  ;;  %v4274_v45 = vor.u32 %v4272_v0, %v4271_v26  ;;  %6118 = vmatpush.bf16.msra.mxu1 %v8284_v43  ;;  %v4287_v26 = vor.u32 %v4285_v8, %v4284_v31  ;;  %v4560_v43 = vshll.u32 %v4422_v63, 16 }
 0x3cb   : > { %4365 = vst [vmem:[#allocation4 + $0x108] sm:$0xf] %v4253_v6  ;;  %v4546_v54 = vshll.u32 %v4420_v18, 16 }
 0x3cd   : > { %v4548_v59 = vrot.slane %v4546_v54, 5 }
 0x3d1   : > { %v3987_v20 = vpop.f32.mrf.mxu1 }
 0x3d4   : > { %5014 = vmatmul.bf16.vlgmr.msrb.gmra.mxu1 %v7581_v13 }
 0x3d5   : > { %5063 = vmatmul.bf16.vlgmr.msrb.gmra.mxu2 %v7585_v22  ;;  %v4155_v22 = vld [vmem:[#allocation5 + $0x6c] sm:$0xf] }
 0x3d6   : > { %5112 = vmatmul.bf16.vlgmr.msra.gmra.mxu3 %v7589_v21  ;;  %v4418_v21 = vld [vmem:[#allocation5 + $0x6c] sm:$0xf]  ;;  %v4263_v52 = vshll.u32 %v4155_v22, 16 }
 0x3d7   : > { %v4527_v39 = vshrl.u32 %v4418_v21, 16  ;;  %v4530_v37 = vshll.u32 %v4418_v21, 16  ;;  %v4277_v21 = vshrl.u32 %v4157_v55, 16  ;;  %v4425_v55 = vld [vmem:[#allocation5 + $0x98] sm:$0xf] }
 0x3d8   : > { %v4036_v12 = vpop.f32.mrf.mxu2  ;;  %v4588_v38 = vshrl.u32 %v4425_v55, 16 }
 0x3d9   : > { %v4037_v19 = vadd.f32 %v4036_v12, %v3987_v20  ;;  %v4085_v7 = vpop.f32.mrf.mxu3  ;;  %v3989_v10 = vpop.f32.mrf.mxu1  ;;  %v4260_v20 = vshrl.u32 %v4155_v22, 16  ;;  %v4529_v32 = vrot.slane %v4527_v39, 4  ;;  %v4532_v62 = vrot.slane %v4530_v37, 5  ;;  %v8291_v22 = vld [vmem:[%s9857_s2 + $0x218] sm:$0xff] }
 0x3da   : > { %6168 = vmatpush.bf16.msra.mxu2 %v8291_v22  ;;  %v7575_v0 = vrot.slane %v4277_v21, 11 }
 0x3db   : > { %v4086_v49 = vadd.f32 %v4085_v7, %v4037_v19  ;;  %v4262_v58 = vrot.slane %v4260_v20, 7  ;;  %v4536_v19 = vshll.u32 %v4419_v2, 16  ;;  %v4533_v44 = vor.u32 %v4532_v62, %v4529_v32  ;;  %v4421_v20 = vld [vmem:[#allocation5 + $0x80] sm:$0xf] }
 0x3dc   : > { %v4289_v2 = vrot.slane %v4284_v31, 4  ;;  %v4551_v39 = vshrl.u32 %v4421_v20, 16  ;;  %v4384_v32 = vld [vmem:[#allocation5 + $0x80] sm:$0xf]  ;;  %v4562_v62 = vrot.slane %v4560_v43, 5 }
 0x3dd   : > { %4125 = vst [vmem:[#allocation6] sm:$0xff] %v4086_v49  ;;  %v4265_v42 = vor.u32 %v4263_v52, %v4262_v58  ;;  %v4267_v1 = vrot.slane %v4262_v58, 4  ;;  %v4538_v6 = vrot.slane %v4536_v19, 5  ;;  %v4534_v34 = vrot.slane %v4533_v44, 4  ;;  %v8211_v44 = vld [vmem:[#allocation4 + $0x10c] sm:$0xf0] }
 0x3de   : > { %v4553_v37 = vrot.slane %v4551_v39, 4  ;;  %4400 = vst [vmem:[#allocation4 + $0x178] sm:$0xf] %v4384_v32  ;;  %v8282_v39 = vld [vmem:[%s9857_s2 + $0x1d0] sm:$0xff] }
 0x3df   : > { %v4266_v11 = vsel %vm9336_vm9, %v7574_v30, %v4265_v42  ;;  %v4275_v49 = vsel %vm9336_vm9, %v4267_v1, %v4274_v45  ;;  %v4543_v14 = vor.u32 %v4542_v57, %v4538_v6  ;;  %v4539_v36 = vsel %vm9364_vm10, %v4534_v34, %v4538_v6  ;;  %v8283_v1 = vld [vmem:[%s9857_s2 + $0x1d8] sm:$0xff]  ;;  %v8209_v6 = vld [vmem:[#allocation4 + $0xe8] sm:$0xf] }
 0x3e0   : > { %v4038_v40 = vpop.f32.mrf.mxu2  ;;  %4366 = vst [vmem:[#allocation4 + $0x12c] sm:$0xf] %v4266_v11  ;;  %6119 = vmatpush.bf16.msra.mxu1 %v8283_v1  ;;  %v4288_v11 = vsel %vm9336_vm9, %v7575_v0, %v4287_v26  ;;  %v4584_v1 = vshll.u32 %v4425_v55, 16 }
 0x3e1   : > { %v4039_v46 = vadd.f32 %v4038_v40, %v3989_v10  ;;  %v4087_v3 = vpop.f32.mrf.mxu3  ;;  %v3992_v27 = vpop.f32.mrf.mxu1  ;;  %v4383_v10 = vld [vmem:[#allocation5 + $0x70] sm:$0xf]  ;;  %4367 = vst [vmem:[#allocation4 + $0x150] sm:$0xf] %v4275_v49  ;;  %v7609_v40 = vor.u32 %v8206_v48, %v7606_v28  ;;  %v8210_v49 = vld [vmem:[#allocation4 + $0x104] sm:$0xf0] }
 0x3e2   : > { %4399 = vst [vmem:[#allocation4 + $0x154] sm:$0xf] %v4383_v10  ;;  %v4566_v48 = vrot.slane %v4564_v51, 4  ;;  %v7624_v28 = vld [vmem:[#allocation4 + $0xec] sm:$0xf] }
 0x3e3   : > { %v4088_v13 = vadd.f32 %v4087_v3, %v4039_v46  ;;  %v7613_v3 = vor.u32 %v8208_v17, %v7612_v56  ;;  %4646 = vst [vmem:[#allocation4 + $0x134] sm:$0xf] %v4539_v36 }
 0x3e4   : > { %5019 = vmatmul.bf16.gmra.mxu1 %v7593_v15  ;;  %v4544_v15 = vrot.slane %v4543_v14, 4  ;;  %4368 = vst [vmem:[#allocation4 + $0x174] sm:$0xf] %v4288_v11  ;;  %v4567_v17 = vor.u32 %v4566_v48, %v4562_v62  ;;  %v8279_v48 = vld [vmem:[%s9857_s2 + $0x1b8] sm:$0xff] }
 0x3e5   : > { %4126 = vst [vmem:[#allocation6 + $0x38] sm:$0xff] %v4088_v13  ;;  %5068 = vmatmul.bf16.gmra.mxu2 %v7597_v16  ;;  %6120 = vmatpush.bf16.msra.mxu1 %v8282_v39 }
 0x3e6   : > { %5117 = vmatmul.bf16.gmra.mxu3 %v7601_v5  ;;  %v4549_v5 = vsel %vm9364_vm10, %v4544_v15, %v4548_v59  ;;  %6066 = vmatpush.bf16.msra.mxu0 %v8279_v48 }
 0x3e7   : > { %4647 = vst [vmem:[#allocation4 + $0x158] sm:$0xf] %v4549_v5  ;;  %v4160_v5 = vld [vmem:[#allocation5 + $0x90] sm:$0x8] }
 0x3e8   : > { %v4041_v24 = vpop.f32.mrf.mxu2 }
 0x3e9   : > { %v4042_v35 = vadd.f32 %v4041_v24, %v3992_v27  ;;  %v4090_v12 = vpop.f32.mrf.mxu3  ;;  %v3994_v7 = vpop.f32.mrf.mxu1  ;;  %v4159_v27 = vld [vmem:[#allocation5 + $0x84] sm:$0xf]  ;;  %v4554_v24 = vshll.u32 %v4421_v20, 16 }
 0x3ea   : > { %v4291_v13 = vshrl.u32 %v4159_v27, 16  ;;  %v4294_v52 = vshll.u32 %v4159_v27, 16  ;;  %v8290_v27 = vld [vmem:[%s9857_s2 + $0x210] sm:$0xff] }
 0x3eb   : > { %v4091_v61 = vadd.f32 %v4090_v12, %v4042_v35  ;;  %v4423_v12 = vld [vmem:[#allocation5 + $0x88] sm:$0x1]  ;;  %v4556_v19 = vrot.slane %v4554_v24, 5  ;;  %6169 = vmatpush.bf16.msra.mxu2 %v8290_v27  ;;  %v7630_v51 = vld [vmem:[#allocation4 + $0x150] sm:$0xf0] }
 0x3ec   : > { %v4293_v58 = vrot.slane %v4291_v13, 7  ;;  %v4570_v47 = vshll.u32 %v4423_v12, 16  ;;  %v4299_v13 = vshrl.u32 %v4160_v5, 16  ;;  %v4427_v27 = vld [vmem:[#allocation5 + $0xa8] sm:$0xf] }
 0x3ed   : > { %4127 = vst [vmem:[#allocation6 + $0x50] sm:$0xff] %v4091_v61  ;;  %v7616_v61 = vld [vmem:[#allocation4 + $0xe4] sm:$0xf]  ;;  %v4557_v10 = vor.u32 %v4556_v19, %v4553_v37  ;;  %v4387_v19 = vld [vmem:[#allocation5 + $0x98] sm:$0xf] }
 0x3ee   : > { %v4296_v35 = vor.u32 %v4294_v52, %v4293_v58  ;;  %v4572_v34 = vrot.slane %v4570_v47, 5  ;;  %v7617_v59 = vor.u32 %v8210_v49, %v7616_v61  ;;  %v7576_v8 = vrot.slane %v4299_v13, 11  ;;  %4403 = vst [vmem:[#allocation4 + $0x1e4] sm:$0xf] %v4387_v19  ;;  %v4389_v19 = vld [vmem:[#allocation5 + $0xac] sm:$0xf] }
 0x3ef   : > { %v4558_v54 = vrot.slane %v4557_v10, 4  ;;  %v4575_v52 = vshrl.u32 %v4424_v25, 16  ;;  %v8213_v10 = vld [vmem:[#allocation4 + $0x14c] sm:$0xf0]  ;;  %v4590_v49 = vrot.slane %v4588_v38, 4 }
 0x3f0   : > { %v4043_v50 = vpop.f32.mrf.mxu2  ;;  %v4297_v45 = vsel %vm9336_vm9, %v4289_v2, %v4296_v35  ;;  %v4386_v35 = vld [vmem:[#allocation5 + $0x94] sm:$0xf]  ;;  %4405 = vst [vmem:[#allocation4 + $0x22c] sm:$0xf] %v4389_v19  ;;  %v5434_v19 = vld [vmem:[#allocation5 + $0x30] sm:$0xf] }
 0x3f1   : > { %v4044_v4 = vadd.f32 %v4043_v50, %v3994_v7  ;;  %v4092_v33 = vpop.f32.mrf.mxu3  ;;  %v3997_v46 = vpop.f32.mrf.mxu1  ;;  %4369 = vst [vmem:[#allocation4 + $0x198] sm:$0xf] %v4297_v45  ;;  %v4563_v57 = vsel %vm9364_vm10, %v4558_v54, %v4562_v62  ;;  %v4577_v12 = vrot.slane %v4575_v52, 4  ;;  %v4586_v45 = vrot.slane %v4584_v1, 5  ;;  %v8212_v62 = vld [vmem:[#allocation4 + $0x130] sm:$0xf] }
 0x3f2   : > { %4648 = vst [vmem:[#allocation4 + $0x17c] sm:$0xf] %v4563_v57  ;;  %v4388_v1 = vld [vmem:[#allocation5 + $0xa8] sm:$0xf] }
 0x3f3   : > { %v4093_v16 = vadd.f32 %v4092_v33, %v4044_v4  ;;  %v7621_v4 = vor.u32 %v8209_v6, %v7618_v53  ;;  %4402 = vst [vmem:[#allocation4 + $0x1c0] sm:$0xf] %v4386_v35  ;;  %v7636_v6 = vld [vmem:[#allocation4 + $0x134] sm:$0xf]  ;;  %v8214_v53 = vld [vmem:[#allocation4 + $0x154] sm:$0xf0] }
 0x3f4   : > { %5024 = vmatmul.bf16.gmra.mxu1 %v7605_v29  ;;  %v7625_v29 = vor.u32 %v8211_v44, %v7624_v28  ;;  %v4591_v44 = vor.u32 %v4590_v49, %v4586_v45  ;;  %4404 = vst [vmem:[#allocation4 + $0x208] sm:$0xf] %v4388_v1 }
 0x3f5   : > { %4128 = vst [vmem:[#allocation6 + $0x18] sm:$0xff] %v4093_v16  ;;  %5073 = vmatmul.bf16.gmra.mxu2 %v7609_v40  ;;  %v4568_v40 = vrot.slane %v4567_v17, 4 }
 0x3f6   : > { %5122 = vmatmul.bf16.gmra.mxu3 %v7613_v3  ;;  %v4162_v3 = vld [vmem:[#allocation5 + $0x98] sm:$0xf]  ;;  %5450 = vst [vmem:[#allocation4 + $0x1c] sm:$0xf] %v5434_v19  ;;  %v5437_v19 = vld [vmem:[#allocation5 + $0x48] sm:$0xf] }
 0x3f7   : > { %v4573_v15 = vsel %vm9364_vm10, %v4568_v40, %v4572_v34  ;;  %v4313_v23 = vshrl.u32 %v4162_v3, 16  ;;  %v4316_v31 = vshll.u32 %v4162_v3, 16  ;;  %v4165_v40 = vld [vmem:[#allocation5 + $0xac] sm:$0xf]  ;;  %5453 = vst [vmem:[#allocation4 + $0x88] sm:$0xf] %v5437_v19 }
 0x3f8   : > { %v4046_v41 = vpop.f32.mrf.mxu2  ;;  %4649 = vst [vmem:[#allocation4 + $0x1a0] sm:$0xf] %v4573_v15  ;;  %v4335_v15 = vshrl.u32 %v4165_v40, 16  ;;  %v4338_v55 = vshll.u32 %v4165_v40, 16  ;;  %v5466_v40 = vld [vmem:[#allocation5 + $0x30] sm:$0xf] }
 0x3f9   : > { %v4047_v30 = vadd.f32 %v4046_v41, %v3997_v46  ;;  %v4095_v42 = vpop.f32.mrf.mxu3  ;;  %v3999_v18 = vpop.f32.mrf.mxu1  ;;  %v4161_v46 = vld [vmem:[#allocation5 + $0x94] sm:$0xf]  ;;  %v4315_v21 = vrot.slane %v4313_v23, 7  ;;  %v4578_v41 = vshll.u32 %v4424_v25, 16  ;;  %v4163_v23 = vld [vmem:[#allocation5 + $0xa4] sm:$0x8] }
 0x3fa   : > { %v4304_v16 = vshrl.u32 %v4161_v46, 16  ;;  %v4307_v20 = vshll.u32 %v4161_v46, 16  ;;  %v4321_v5 = vshrl.u32 %v4163_v23, 16 }
 0x3fb   : > { %v4096_v7 = vadd.f32 %v4095_v42, %v4047_v30  ;;  %v4318_v30 = vor.u32 %v4316_v31, %v4315_v21  ;;  %v4426_v42 = vld [vmem:[#allocation5 + $0x9c] sm:$0x1]  ;;  %v4580_v43 = vrot.slane %v4578_v41, 5 }
 0x3fc   : > { %v4306_v22 = vrot.slane %v4304_v16, 7  ;;  %v4594_v61 = vshll.u32 %v4426_v42, 16  ;;  %v8289_v16 = vld [vmem:[%s9857_s2 + $0x208] sm:$0xff] }
 0x3fd   : > { %4129 = vst [vmem:[#allocation6 + $0x30] sm:$0xff] %v4096_v7  ;;  %v7628_v7 = vld [vmem:[#allocation4 + $0x12c] sm:$0xf]  ;;  %v4581_v11 = vor.u32 %v4580_v43, %v4577_v12  ;;  %6170 = vmatpush.bf16.msra.mxu2 %v8289_v16  ;;  %v7640_v43 = vld [vmem:[#allocation4 + $0x174] sm:$0xf] }
 0x3fe   : > { %v4311_v58 = vrot.slane %v4306_v22, 4  ;;  %v4309_v24 = vor.u32 %v4307_v20, %v4306_v22  ;;  %v7629_v34 = vor.u32 %v8213_v10, %v7628_v7  ;;  %v4337_v22 = vrot.slane %v4335_v15, 7  ;;  %v4428_v20 = vld [vmem:[#allocation5 + $0xac] sm:$0xf]  ;;  %v8277_v31 = vld [vmem:[%s9857_s2 + $0x1a8] sm:$0xff] }
 0x3ff   : > { %v4582_v47 = vrot.slane %v4581_v11, 4  ;;  %v4608_v35 = vshll.u32 %v4428_v20, 16  ;;  %v8215_v11 = vld [vmem:[#allocation4 + $0x178] sm:$0xf]  ;;  %v8217_v49 = vld [vmem:[#allocation4 + $0x19c] sm:$0xf0] }
 0x400   : > { %v4048_v56 = vpop.f32.mrf.mxu2  ;;  %v4310_v32 = vsel %vm9336_vm9, %v7576_v8, %v4309_v24  ;;  %v4319_v37 = vsel %vm9336_vm9, %v4311_v58, %v4318_v30  ;;  %v4599_v58 = vshrl.u32 %v4427_v27, 16  ;;  %v4340_v39 = vor.u32 %v4338_v55, %v4337_v22  ;;  %v4429_v24 = vld [vmem:[#allocation5 + $0xb0] sm:$0x1] }
 0x401   : > { %v4049_v50 = vadd.f32 %v4048_v56, %v3999_v18  ;;  %v4097_v14 = vpop.f32.mrf.mxu3  ;;  %v4002_v33 = vpop.f32.mrf.mxu1  ;;  %4370 = vst [vmem:[#allocation4 + $0x1bc] sm:$0xf] %v4310_v32  ;;  %v4587_v28 = vsel %vm9364_vm10, %v4582_v47, %v4586_v45  ;;  %v4596_v56 = vrot.slane %v4594_v61, 5  ;;  %v4602_v30 = vshll.u32 %v4427_v27, 16  ;;  %v8276_v45 = vld [vmem:[%s9857_s2 + $0x1a0] sm:$0xff] }
 0x402   : > { %4371 = vst [vmem:[#allocation4 + $0x1e0] sm:$0xf] %v4319_v37  ;;  %v4610_v38 = vrot.slane %v4608_v35, 5  ;;  %v4612_v61 = vshrl.u32 %v4428_v20, 16  ;;  %v4618_v10 = vshll.u32 %v4429_v24, 16  ;;  %v5491_v20 = vshrl.u32 %v5466_v40, 16 }
 0x403   : > { %v4098_v36 = vadd.f32 %v4097_v14, %v4049_v50  ;;  %v7633_v50 = vor.u32 %v8212_v62, %v7630_v51  ;;  %4650 = vst [vmem:[#allocation4 + $0x1c4] sm:$0xf] %v4587_v28  ;;  %v4604_v7 = vrot.slane %v4602_v30, 5  ;;  %v7642_v62 = vld [vmem:[#allocation4 + $0x198] sm:$0xf0]  ;;  %v8273_v30 = vld [vmem:[%s9857_s2 + $0x188] sm:$0xff] }
 0x404   : > { %5029 = vmatmul.bf16.gmra.mxu1 %v7617_v59  ;;  %v7637_v59 = vor.u32 %v8214_v53, %v7636_v6  ;;  %v7648_v51 = vld [vmem:[#allocation4 + $0x17c] sm:$0xf]  ;;  %v4614_v6 = vrot.slane %v4612_v61, 4 }
 0x405   : > { %4130 = vst [vmem:[#allocation6 + $0x68] sm:$0xff] %v4098_v36  ;;  %5078 = vmatmul.bf16.gmra.mxu2 %v7621_v4  ;;  %v4592_v4 = vrot.slane %v4591_v44, 4  ;;  %v8278_v36 = vld [vmem:[%s9857_s2 + $0x1b0] sm:$0xff]  ;;  %v8275_v44 = vld [vmem:[%s9857_s2 + $0x198] sm:$0xff] }
 0x406   : > { %5127 = vmatmul.bf16.gmra.mxu3 %v7625_v29  ;;  %v4164_v29 = vld [vmem:[#allocation5 + $0xa8] sm:$0xf]  ;;  %6067 = vmatpush.bf16.msra.mxu0 %v8278_v36 }
 0x407   : > { %v4597_v46 = vsel %vm9364_vm10, %v4592_v4, %v4596_v56  ;;  %v4326_v3 = vshrl.u32 %v4164_v29, 16  ;;  %v4329_v13 = vshll.u32 %v4164_v29, 16  ;;  %v4615_v56 = vor.u32 %v4614_v6, %v4610_v38 }
 0x408   : > { %v4051_v63 = vpop.f32.mrf.mxu2  ;;  %4651 = vst [vmem:[#allocation4 + $0x1e8] sm:$0xf] %v4597_v46  ;;  %v7649_v46 = vor.u32 %v8217_v49, %v7648_v51  ;;  %v7652_v61 = vld [vmem:[#allocation4 + $0x1bc] sm:$0xf]  ;;  %v8218_v51 = vld [vmem:[#allocation4 + $0x1c0] sm:$0xf] }
 0x409   : > { %v4052_v0 = vadd.f32 %v4051_v63, %v4002_v33  ;;  %v4100_v2 = vpop.f32.mrf.mxu3  ;;  %v4004_v26 = vpop.f32.mrf.mxu1  ;;  %v4328_v25 = vrot.slane %v4326_v3, 7  ;;  %v7577_v63 = vrot.slane %v4321_v5, 11  ;;  %v4616_v3 = vrot.slane %v4615_v56, 4 }
 0x40a   : > { %6068 = vmatpush.bf16.msra.mxu0 %v8277_v31 }
 0x40b   : > { %v4101_v18 = vadd.f32 %v4100_v2, %v4052_v0  ;;  %v4333_v8 = vrot.slane %v4328_v25, 4  ;;  %v8281_v0 = vld [vmem:[%s9857_s2 + $0x1c8] sm:$0xff]  ;;  %v4331_v2 = vor.u32 %v4329_v13, %v4328_v25  ;;  %v8274_v25 = vld [vmem:[%s9857_s2 + $0x190] sm:$0xff] }
 0x40c   : > { %6121 = vmatpush.bf16.msra.mxu1 %v8281_v0 }
 0x40d   : > { %4131 = vst [vmem:[#allocation6 + $0x78] sm:$0xff] %v4101_v18  ;;  %v8216_v18 = vld [vmem:[#allocation4 + $0x194] sm:$0xf0]  ;;  %v4332_v32 = vsel %vm9336_vm9, %v7577_v63, %v4331_v2  ;;  %v4341_v37 = vsel %vm9336_vm9, %v4333_v8, %v4340_v39  ;;  %v5467_v8 = vld [vmem:[#allocation5 + $0x34] sm:$0xf]  ;;  %v5493_v2 = vrot.slane %v5491_v20, 4 }
 0x40e   : > { %4372 = vst [vmem:[#allocation4 + $0x204] sm:$0xf] %v4332_v32  ;;  %6069 = vmatpush.bf16.msra.mxu0 %v8276_v45  ;;  %v7641_v28 = vor.u32 %v8216_v18, %v7640_v43  ;;  %v5500_v1 = vshll.u32 %v5467_v8, 16  ;;  %v8280_v18 = vld [vmem:[%s9857_s2 + $0x1c0] sm:$0xff]  ;;  %v5470_v20 = vld [vmem:[#allocation5 + $0x48] sm:$0xf] }
 0x40f   : > { %4373 = vst [vmem:[#allocation4 + $0x228] sm:$0xf] %v4341_v37 }
 0x410   : > { %v4053_v54 = vpop.f32.mrf.mxu2  ;;  %6122 = vmatpush.bf16.msra.mxu1 %v8280_v18 }
 0x411   : > { %v4054_v57 = vadd.f32 %v4053_v54, %v4004_v26  ;;  %v4102_v17 = vpop.f32.mrf.mxu3  ;;  %v4007_v14 = vpop.f32.mrf.mxu1  ;;  %v4601_v26 = vrot.slane %v4599_v58, 4  ;;  %v5203_v54 = vld [vmem:[#allocation5 + $0x30] sm:$0xf]  ;;  %v5494_v58 = vshll.u32 %v5466_v40, 16 }
 0x412   : > { %6070 = vmatpush.bf16.msra.mxu0 %v8275_v44  ;;  %v5235_v27 = vshll.u32 %v5203_v54, 16 }
 0x413   : > { %v4103_v33 = vadd.f32 %v4102_v17, %v4054_v57  ;;  %v4605_v47 = vor.u32 %v4604_v7, %v4601_v26  ;;  %v4620_v57 = vrot.slane %v4618_v10, 5  ;;  %v5204_v17 = vld [vmem:[#allocation5 + $0x34] sm:$0xf]  ;;  %v5496_v39 = vrot.slane %v5494_v58, 5 }
 0x414   : > { %5034 = vmatmul.bf16.gmra.mxu1 %v7629_v34  ;;  %v5232_v34 = vshrl.u32 %v5203_v54, 16  ;;  %v5241_v29 = vshrl.u32 %v5204_v17, 16  ;;  %v5244_v55 = vshll.u32 %v5204_v17, 16  ;;  %v5504_v26 = vshrl.u32 %v5467_v8, 16  ;;  %v5435_v7 = vld [vmem:[#allocation5 + $0x34] sm:$0xf] }
 0x415   : > { %4132 = vst [vmem:[#allocation6 + $0x80] sm:$0xff] %v4103_v33  ;;  %5083 = vmatmul.bf16.gmra.mxu2 %v7633_v50  ;;  %v4606_v53 = vrot.slane %v4605_v47, 4  ;;  %v5202_v33 = vld [vmem:[#allocation5 + $0x2c] sm:$0x8]  ;;  %v4621_v13 = vsel %vm9364_vm10, %v4616_v3, %v4620_v57  ;;  %v5497_v32 = vor.u32 %v5496_v39, %v5493_v2  ;;  %v8272_v47 = vld [vmem:[%s9857_s2 + $0x180] sm:$0xff]  ;;  %v5524_v39 = vshll.u32 %v5470_v20, 16 }
 0x416   : > { %5132 = vmatmul.bf16.gmra.mxu3 %v7637_v59  ;;  %v7645_v59 = vor.u32 %v8215_v11, %v7642_v62  ;;  %v5227_v15 = vshrl.u32 %v5202_v33, 16  ;;  %v5234_v23 = vrot.slane %v5232_v34, 7  ;;  %v5243_v5 = vrot.slane %v5241_v29, 7  ;;  %6071 = vmatpush.bf16.msra.mxu0 %v8274_v25  ;;  %4653 = vst [vmem:[#allocation4 + $0x230] sm:$0xf] %v4621_v13 }
 0x417   : > { %v4611_v4 = vsel %vm9364_vm10, %v4606_v53, %v4610_v38  ;;  %v5502_v11 = vrot.slane %v5500_v1, 5  ;;  %v5506_v45 = vrot.slane %v5504_v26, 4  ;;  %v5498_v10 = vrot.slane %v5497_v32, 4  ;;  %v8219_v62 = vld [vmem:[#allocation4 + $0x1dc] sm:$0xf0] }
 0x418   : > { %v4056_v21 = vpop.f32.mrf.mxu2  ;;  %4652 = vst [vmem:[#allocation4 + $0x20c] sm:$0xf] %v4611_v4  ;;  %v7770_v22 = vrot.slane %v5227_v15, 11  ;;  %v5237_v31 = vor.u32 %v5235_v27, %v5234_v23  ;;  %v5239_v63 = vrot.slane %v5234_v23, 4  ;;  %v7654_v53 = vld [vmem:[#allocation4 + $0x1e0] sm:$0xf0] }
 0x419   : > { %v4057_v52 = vadd.f32 %v4056_v21, %v4007_v14  ;;  %v4105_v41 = vpop.f32.mrf.mxu3  ;;  %v4009_v42 = vpop.f32.mrf.mxu1  ;;  %v8288_v21 = vld [vmem:[%s9857_s2 + $0x200] sm:$0xff]  ;;  %5451 = vst [vmem:[#allocation4 + $0x40] sm:$0xf] %v5435_v7  ;;  %v5507_v49 = vor.u32 %v5506_v45, %v5502_v11  ;;  %v5206_v57 = vld [vmem:[#allocation5 + $0x44] sm:$0xf] }
 0x41a   : > { %6171 = vmatpush.bf16.msra.mxu2 %v8288_v21  ;;  %v5238_v0 = vsel %vm9336_vm9, %v7770_v22, %v5237_v31  ;;  %6072 = vmatpush.bf16.msra.mxu0 %v8273_v30  ;;  %v7660_v54 = vld [vmem:[#allocation4 + $0x1c4] sm:$0xf]  ;;  %v5207_v17 = vld [vmem:[#allocation5 + $0x48] sm:$0xf]  ;;  %v5254_v4 = vshrl.u32 %v5206_v57, 16  ;;  %v5257_v25 = vshll.u32 %v5206_v57, 16 }
 0x41b   : > { %v4106_v12 = vadd.f32 %v4105_v41, %v4057_v52  ;;  %v5246_v52 = vor.u32 %v5244_v55, %v5243_v5  ;;  %v5468_v41 = vld [vmem:[#allocation5 + $0x38] sm:$0x1]  ;;  %5418 = vst [vmem:[#allocation4 + $0x18] sm:$0xf] %v5238_v0  ;;  %v5508_v44 = vrot.slane %v5507_v49, 4  ;;  %v5263_v33 = vshrl.u32 %v5207_v17, 16 }
 0x41c   : > { %v5510_v35 = vshll.u32 %v5468_v41, 16  ;;  %v5205_v15 = vld [vmem:[#allocation5 + $0x40] sm:$0x8]  ;;  %v5256_v5 = vrot.slane %v5254_v4, 7  ;;  %v5266_v55 = vshll.u32 %v5207_v17, 16 }
 0x41d   : > { %4133 = vst [vmem:[#allocation6 + $0x8] sm:$0xff] %v4106_v12  ;;  %v5249_v27 = vshrl.u32 %v5205_v15, 16  ;;  %v5265_v13 = vrot.slane %v5263_v33, 7  ;;  %v7666_v49 = vld [vmem:[#allocation4 + $0x228] sm:$0xf0] }
 0x41e   : > { %v5512_v6 = vrot.slane %v5510_v35, 5  ;;  %6073 = vmatpush.bf16.msra.mxu0 %v8272_v47  ;;  %v5261_v8 = vrot.slane %v5256_v5, 4  ;;  %v5526_v35 = vrot.slane %v5524_v39, 5  ;;  %v5209_v33 = vld [vmem:[#allocation5 + $0x58] sm:$0xf] }
 0x41f   : > { %v7771_v31 = vrot.slane %v5249_v27, 11  ;;  %v5268_v58 = vor.u32 %v5266_v55, %v5265_v13  ;;  %v5472_v15 = vld [vmem:[#allocation5 + $0x58] sm:$0xf] }
 0x420   : > { %v4058_v48 = vpop.f32.mrf.mxu2  ;;  %v5542_v55 = vshll.u32 %v5472_v15, 16  ;;  %v7782_v19 = vld [vmem:[#allocation4 + $0x3c] sm:$0xf0] }
 0x421   : > { %v4059_v50 = vadd.f32 %v4058_v48, %v4009_v42  ;;  %v4107_v14 = vpop.f32.mrf.mxu3  ;;  %v4012_v36 = vpop.f32.mrf.mxu1  ;;  %v5247_v42 = vsel %vm9336_vm9, %v5239_v63, %v5246_v52  ;;  %v5503_v48 = vsel %vm9364_vm10, %v5498_v10, %v5502_v11  ;;  %v5259_v63 = vor.u32 %v5257_v25, %v5256_v5  ;;  %v5471_v52 = vld [vmem:[#allocation5 + $0x4c] sm:$0x1] }
 0x422   : > { %5419 = vst [vmem:[#allocation4 + $0x3c] sm:$0xf] %v5247_v42  ;;  %v7780_v56 = vld [vmem:[#allocation4 + $0x18] sm:$0xf]  ;;  %v5269_v30 = vsel %vm9336_vm9, %v5261_v8, %v5268_v58  ;;  %v5534_v42 = vshll.u32 %v5471_v52, 16  ;;  %v5279_v5 = vshll.u32 %v5209_v33, 16 }
 0x423   : > { %v4108_v16 = vadd.f32 %v4107_v14, %v4059_v50  ;;  %5698 = vst [vmem:[#allocation4 + $0x20] sm:$0xf] %v5503_v48  ;;  %v7653_v50 = vor.u32 %v8219_v62, %v7652_v61  ;;  %v5260_v0 = vsel %vm9336_vm9, %v7771_v31, %v5259_v63  ;;  %v8221_v61 = vld [vmem:[#allocation4 + $0x208] sm:$0xf]  ;;  %v7664_v62 = vld [vmem:[#allocation4 + $0x204] sm:$0xf] }
 0x424   : > { %5039 = vmatmul.bf16.gmra.mxu1 %v7641_v28  ;;  %v8220_v28 = vld [vmem:[#allocation4 + $0x1e4] sm:$0xf0]  ;;  %5420 = vst [vmem:[#allocation4 + $0x60] sm:$0xf] %v5260_v0  ;;  %v8223_v48 = vld [vmem:[#allocation4 + $0x22c] sm:$0xf0] }
 0x425   : > { %4134 = vst [vmem:[#allocation6 + $0x88] sm:$0xff] %v4108_v16  ;;  %5088 = vmatmul.bf16.gmra.mxu2 %v7645_v59  ;;  %v5513_v59 = vsel %vm9364_vm10, %v5508_v44, %v5512_v6  ;;  %v5469_v16 = vld [vmem:[#allocation5 + $0x44] sm:$0xf]  ;;  %v7672_v6 = vld [vmem:[#allocation4 + $0x20c] sm:$0xf] }
 0x426   : > { %5137 = vmatmul.bf16.gmra.mxu3 %v7649_v46  ;;  %v7661_v46 = vor.u32 %v8220_v28, %v7660_v54  ;;  %5699 = vst [vmem:[#allocation4 + $0x44] sm:$0xf] %v5513_v59  ;;  %v5515_v21 = vshrl.u32 %v5469_v16, 16  ;;  %v5518_v2 = vshll.u32 %v5469_v16, 16  ;;  %v7673_v4 = vor.u32 %v8223_v48, %v7672_v6  ;;  %v5473_v16 = vld [vmem:[#allocation5 + $0x5c] sm:$0xf] }
 0x427   : > { %5421 = vst [vmem:[#allocation4 + $0x84] sm:$0xf] %v5269_v30  ;;  %v5552_v8 = vshrl.u32 %v5473_v16, 16 }
 0x428   : > { %v4061_v24 = vpop.f32.mrf.mxu2  ;;  %v5517_v41 = vrot.slane %v5515_v21, 4  ;;  %v5520_v26 = vrot.slane %v5518_v2, 5  ;;  %v5544_v2 = vrot.slane %v5542_v55, 5  ;;  %v5477_v55 = vld [vmem:[#allocation5 + $0x74] sm:$0x1] }
 0x429   : > { %v4062_v12 = vadd.f32 %v4061_v24, %v4012_v36  ;;  %v4110_v43 = vpop.f32.mrf.mxu3  ;;  %v4014_v37 = vpop.f32.mrf.mxu1  ;;  %v8249_v14 = vld [vmem:[#allocation4 + $0x38] sm:$0xf0]  ;;  %v7657_v36 = vor.u32 %v8218_v51, %v7654_v53  ;;  %v5528_v24 = vshrl.u32 %v5470_v20, 16  ;;  %v8222_v51 = vld [vmem:[#allocation4 + $0x224] sm:$0xf0]  ;;  %v5548_v20 = vshll.u32 %v5473_v16, 16 }
 0x42a   : > { %v7781_v3 = vor.u32 %v8249_v14, %v7780_v56  ;;  %v5521_v7 = vor.u32 %v5520_v26, %v5517_v41  ;;  %v7669_v14 = vor.u32 %v8221_v61, %v7666_v49  ;;  %v5474_v41 = vld [vmem:[#allocation5 + $0x60] sm:$0x1] }
 0x42b   : > { %v4111_v38 = vadd.f32 %v4110_v43, %v4062_v12  ;;  %v5530_v18 = vrot.slane %v5528_v24, 4  ;;  %v7792_v53 = vld [vmem:[#allocation4 + $0x60] sm:$0xf] }
 0x42c   : > { %6074 = vmatmul.bf16.vlgmr.msra.gmra.mxu0 %v7781_v3  ;;  %v5522_v10 = vrot.slane %v5521_v7, 4  ;;  %v5208_v3 = vld [vmem:[#allocation5 + $0x54] sm:$0x8] }
 0x42d   : > { %4135 = vst [vmem:[#allocation6 + $0x28] sm:$0xff] %v4111_v38  ;;  %v5531_v45 = vor.u32 %v5530_v18, %v5526_v35  ;;  %v5536_v38 = vrot.slane %v5534_v42, 5  ;;  %v5550_v42 = vrot.slane %v5548_v20, 5 }
 0x42e   : > { %v5527_v54 = vsel %vm9364_vm10, %v5522_v10, %v5526_v35  ;;  %v8252_v28 = vld [vmem:[#allocation4 + $0x80] sm:$0xf0]  ;;  %v7788_v10 = vld [vmem:[#allocation4 + $0x20] sm:$0xf] }
 0x42f   : > { %v5532_v47 = vrot.slane %v5531_v45, 4  ;;  %5700 = vst [vmem:[#allocation4 + $0x68] sm:$0xf] %v5527_v54  ;;  %v7793_v57 = vor.u32 %v8252_v28, %v7792_v53  ;;  %v5438_v45 = vld [vmem:[#allocation5 + $0x58] sm:$0xf] }
 0x430   : > { %v4063_v34 = vpop.f32.mrf.mxu2  ;;  %5454 = vst [vmem:[#allocation4 + $0xac] sm:$0xf] %v5438_v45 }
 0x431   : > { %v4064_v29 = vadd.f32 %v4063_v34, %v4014_v37  ;;  %v4112_v40 = vpop.f32.mrf.mxu3  ;;  %v4017_v23 = vpop.f32.mrf.mxu1  ;;  %v5436_v37 = vld [vmem:[#allocation5 + $0x44] sm:$0xf]  ;;  %v5537_v44 = vsel %vm9364_vm10, %v5532_v47, %v5536_v38  ;;  %v5439_v38 = vld [vmem:[#allocation5 + $0x5c] sm:$0xf] }
 0x432   : > { %5452 = vst [vmem:[#allocation4 + $0x64] sm:$0xf] %v5436_v37  ;;  %v8248_v37 = vld [vmem:[#allocation4 + $0x1c] sm:$0xf] }
 0x433   : > { %v4113_v22 = vadd.f32 %v4112_v40, %v4064_v29  ;;  %5701 = vst [vmem:[#allocation4 + $0x8c] sm:$0xf] %v5537_v44  ;;  %v5210_v29 = vld [vmem:[#allocation5 + $0x5c] sm:$0xf]  ;;  %v7785_v54 = vor.u32 %v8248_v37, %v7782_v19 }
 0x434   : > { %5044 = vmatmul.bf16.gmra.mxu1 %v7653_v50  ;;  %v7665_v50 = vor.u32 %v8222_v51, %v7664_v62  ;;  %v5288_v13 = vshll.u32 %v5210_v29, 16  ;;  %v8250_v62 = vld [vmem:[#allocation4 + $0x40] sm:$0xf0]  ;;  %5455 = vst [vmem:[#allocation4 + $0xd0] sm:$0xf] %v5439_v38 }
 0x435   : > { %4136 = vst [vmem:[#allocation6 + $0x40] sm:$0xff] %v4113_v22  ;;  %5093 = vmatmul.bf16.gmra.mxu2 %v7657_v36  ;;  %v5276_v36 = vshrl.u32 %v5209_v33, 16  ;;  %v5539_v22 = vshrl.u32 %v5472_v15, 16  ;;  %v7789_v48 = vor.u32 %v8250_v62, %v7788_v10  ;;  %v5475_v33 = vld [vmem:[#allocation5 + $0x6c] sm:$0xf] }
 0x436   : > { %5142 = vmatmul.bf16.gmra.mxu3 %v7661_v46  ;;  %v5285_v46 = vshrl.u32 %v5210_v29, 16  ;;  %v5476_v15 = vld [vmem:[#allocation5 + $0x70] sm:$0xf]  ;;  %v5563_v16 = vshrl.u32 %v5475_v33, 16 }
 0x437   : > { %v5278_v27 = vrot.slane %v5276_v36, 7  ;;  %v5541_v0 = vrot.slane %v5539_v22, 4 }
 0x438   : > { %v4066_v1 = vpop.f32.mrf.mxu2  ;;  %v5287_v25 = vrot.slane %v5285_v46, 7  ;;  %v5565_v20 = vrot.slane %v5563_v16, 4 }
 0x439   : > { %v4067_v12 = vadd.f32 %v4066_v1, %v4017_v23  ;;  %v4115_v43 = vpop.f32.mrf.mxu3  ;;  %v4019_v32 = vpop.f32.mrf.mxu1  ;;  %v5271_v23 = vshrl.u32 %v5208_v3, 16  ;;  %v5281_v31 = vor.u32 %v5279_v5, %v5278_v27  ;;  %v5283_v63 = vrot.slane %v5278_v27, 4 }
 0x43a   : > { %v5290_v52 = vor.u32 %v5288_v13, %v5287_v25  ;;  %v5554_v1 = vrot.slane %v5552_v8, 4  ;;  %v5572_v8 = vshll.u32 %v5476_v15, 16 }
 0x43b   : > { %v4116_v11 = vadd.f32 %v4115_v43, %v4067_v12  ;;  %v7772_v21 = vrot.slane %v5271_v23, 11  ;;  %v5545_v12 = vor.u32 %v5544_v2, %v5541_v0  ;;  %v5558_v43 = vshll.u32 %v5474_v41, 16 }
 0x43c   : > { %6079 = vmatmul.bf16.gmra.mxu0 %v7793_v57  ;;  %v5291_v35 = vsel %vm9336_vm9, %v5283_v63, %v5290_v52  ;;  %v5212_v57 = vld [vmem:[#allocation5 + $0x6c] sm:$0xf]  ;;  %v5566_v23 = vshll.u32 %v5475_v33, 16  ;;  %v5576_v0 = vshrl.u32 %v5476_v15, 16  ;;  %v5582_v2 = vshll.u32 %v5477_v55, 16 }
 0x43d   : > { %4137 = vst [vmem:[#allocation6 + $0x58] sm:$0xff] %v4116_v11  ;;  %v5282_v30 = vsel %vm9336_vm9, %v7772_v21, %v5281_v31  ;;  %v5546_v7 = vrot.slane %v5545_v12, 4  ;;  %v5560_v11 = vrot.slane %v5558_v43, 5  ;;  %v5301_v36 = vshll.u32 %v5212_v57, 16  ;;  %v5441_v12 = vld [vmem:[#allocation5 + $0x70] sm:$0xf] }
 0x43e   : > { %5422 = vst [vmem:[#allocation4 + $0xa8] sm:$0xf] %v5282_v30  ;;  %v5568_v21 = vrot.slane %v5566_v23, 5  ;;  %v7794_v30 = vld [vmem:[#allocation4 + $0x84] sm:$0xf0]  ;;  %v5584_v37 = vrot.slane %v5582_v2, 5 }
 0x43f   : > { %5423 = vst [vmem:[#allocation4 + $0xcc] sm:$0xf] %v5291_v35  ;;  %v5551_v51 = vsel %vm9364_vm10, %v5546_v7, %v5550_v42  ;;  %v5440_v35 = vld [vmem:[#allocation5 + $0x6c] sm:$0xf]  ;;  %v8253_v43 = vld [vmem:[#allocation4 + $0x88] sm:$0xf0] }
 0x440   : > { %v4068_v56 = vpop.f32.mrf.mxu2  ;;  %5702 = vst [vmem:[#allocation4 + $0xb0] sm:$0xf] %v5551_v51  ;;  %v5569_v41 = vor.u32 %v5568_v21, %v5565_v20 }
 0x441   : > { %v4069_v17 = vadd.f32 %v4068_v56, %v4019_v32  ;;  %v4117_v34 = vpop.f32.mrf.mxu3  ;;  %v4022_v59 = vpop.f32.mrf.mxu1  ;;  %v5555_v32 = vor.u32 %v5554_v1, %v5550_v42  ;;  %v5578_v1 = vrot.slane %v5576_v0, 4  ;;  %5456 = vst [vmem:[#allocation4 + $0xf4] sm:$0xf] %v5440_v35 }
 0x442   : > { %v5570_v42 = vrot.slane %v5569_v41, 4  ;;  %5457 = vst [vmem:[#allocation4 + $0x118] sm:$0xf] %v5441_v12  ;;  %v5443_v41 = vld [vmem:[#allocation5 + $0x84] sm:$0xf] }
 0x443   : > { %v4118_v40 = vadd.f32 %v4117_v34, %v4069_v17  ;;  %v5556_v61 = vrot.slane %v5555_v32, 4  ;;  %v5213_v17 = vld [vmem:[#allocation5 + $0x70] sm:$0xf]  ;;  %5459 = vst [vmem:[#allocation4 + $0x160] sm:$0xf] %v5443_v41 }
 0x444   : > { %5049 = vmatmul.bf16.gmra.mxu1 %v7665_v50  ;;  %v5310_v3 = vshll.u32 %v5213_v17, 16 }
 0x445   : > { %4138 = vst [vmem:[#allocation6 + $0x10] sm:$0xff] %v4118_v40  ;;  %5098 = vmatmul.bf16.gmra.mxu2 %v7669_v14  ;;  %v5561_v47 = vsel %vm9364_vm10, %v5556_v61, %v5560_v11  ;;  %v7804_v28 = vld [vmem:[#allocation4 + $0xa8] sm:$0xf]  ;;  %v5298_v14 = vshrl.u32 %v5212_v57, 16 }
 0x446   : > { %5147 = vmatmul.bf16.gmra.mxu3 %v7673_v4  ;;  %5703 = vst [vmem:[#allocation4 + $0xd4] sm:$0xf] %v5561_v47  ;;  %v8255_v56 = vld [vmem:[#allocation4 + $0xc8] sm:$0xf0]  ;;  %v5211_v4 = vld [vmem:[#allocation5 + $0x68] sm:$0x8] }
 0x447   : > { %v7805_v50 = vor.u32 %v8255_v56, %v7804_v28  ;;  %v5293_v29 = vshrl.u32 %v5211_v4, 16  ;;  %v5300_v40 = vrot.slane %v5298_v14, 7  ;;  %v5215_v47 = vld [vmem:[#allocation5 + $0x80] sm:$0xf] }
 0x448   : > { %v4071_v58 = vpop.f32.mrf.mxu2  ;;  %v5478_v28 = vld [vmem:[#allocation5 + $0x80] sm:$0xf]  ;;  %v5323_v57 = vshll.u32 %v5215_v47, 16 }
 0x449   : > { %v4072_v39 = vadd.f32 %v4071_v58, %v4022_v59  ;;  %v4120_v24 = vpop.f32.mrf.mxu3  ;;  %v4024_v26 = vpop.f32.mrf.mxu1  ;;  %v5307_v59 = vshrl.u32 %v5213_v17, 16  ;;  %v7773_v27 = vrot.slane %v5293_v29, 11  ;;  %v5303_v5 = vor.u32 %v5301_v36, %v5300_v40  ;;  %v5479_v17 = vld [vmem:[#allocation5 + $0x84] sm:$0xf] }
 0x44a   : > { %v5305_v25 = vrot.slane %v5300_v40, 4  ;;  %v5587_v14 = vshrl.u32 %v5478_v28, 16  ;;  %v5596_v16 = vshll.u32 %v5479_v17, 16 }
 0x44b   : > { %v4121_v18 = vadd.f32 %v4120_v24, %v4072_v39  ;;  %v5309_v46 = vrot.slane %v5307_v59, 7  ;;  %v5304_v63 = vsel %vm9336_vm9, %v7773_v27, %v5303_v5  ;;  %v5574_v39 = vrot.slane %v5572_v8, 5  ;;  %v8251_v24 = vld [vmem:[#allocation4 + $0x64] sm:$0xf]  ;;  %v7806_v8 = vld [vmem:[#allocation4 + $0xcc] sm:$0xf0] }
 0x44c   : > { %6084 = vmatmul.bf16.gmra.mxu0 %v7805_v50  ;;  %5424 = vst [vmem:[#allocation4 + $0xf0] sm:$0xf] %v5304_v63  ;;  %v7797_v45 = vor.u32 %v8251_v24, %v7794_v30  ;;  %v5590_v59 = vshll.u32 %v5478_v28, 16  ;;  %v5600_v5 = vshrl.u32 %v5479_v17, 16  ;;  %v5598_v20 = vrot.slane %v5596_v16, 5 }
 0x44d   : > { %4139 = vst [vmem:[#allocation6 + $0x98] sm:$0xff] %v4121_v18  ;;  %v5312_v22 = vor.u32 %v5310_v3, %v5309_v46  ;;  %v5575_v18 = vsel %vm9364_vm10, %v5570_v42, %v5574_v39  ;;  %v5579_v32 = vor.u32 %v5578_v1, %v5574_v39  ;;  %v5480_v46 = vld [vmem:[#allocation5 + $0x88] sm:$0x1]  ;;  %v5589_v3 = vrot.slane %v5587_v14, 4  ;;  %v8254_v63 = vld [vmem:[#allocation4 + $0xac] sm:$0xf] }
 0x44e   : > { %5704 = vst [vmem:[#allocation4 + $0xf8] sm:$0xf] %v5575_v18  ;;  %v5592_v15 = vrot.slane %v5590_v59, 5  ;;  %v5602_v21 = vrot.slane %v5600_v5, 4  ;;  %v7812_v39 = vld [vmem:[#allocation4 + $0xb0] sm:$0xf]  ;;  %v7809_v35 = vor.u32 %v8254_v63, %v7806_v8 }
 0x44f   : > { %v5313_v52 = vsel %vm9336_vm9, %v5305_v25, %v5312_v22  ;;  %v5580_v7 = vrot.slane %v5579_v32, 4  ;;  %v5606_v25 = vshll.u32 %v5480_v46, 16  ;;  %v8256_v24 = vld [vmem:[#allocation4 + $0xd0] sm:$0xf0]  ;;  %v5483_v17 = vld [vmem:[#allocation5 + $0x9c] sm:$0x1] }
 0x450   : > { %v4073_v49 = vpop.f32.mrf.mxu2  ;;  %5425 = vst [vmem:[#allocation4 + $0x114] sm:$0xf] %v5313_v52  ;;  %v5593_v55 = vor.u32 %v5592_v15, %v5589_v3  ;;  %v5442_v52 = vld [vmem:[#allocation5 + $0x80] sm:$0xf]  ;;  %v5603_v0 = vor.u32 %v5602_v21, %v5598_v20  ;;  %v7813_v12 = vor.u32 %v8256_v24, %v7812_v39  ;;  %v7818_v5 = vld [vmem:[#allocation4 + $0x114] sm:$0xf0] }
 0x451   : > { %v4074_v6 = vadd.f32 %v4073_v49, %v4024_v26  ;;  %v4122_v53 = vpop.f32.mrf.mxu3  ;;  %v5015_v44 = vpop.f32.mrf.mxu1  ;;  %v7800_v26 = vld [vmem:[#allocation4 + $0x68] sm:$0xf]  ;;  %v5585_v51 = vsel %vm9364_vm10, %v5580_v7, %v5584_v37  ;;  %v5216_v49 = vld [vmem:[#allocation5 + $0x84] sm:$0xf]  ;;  %v5608_v2 = vrot.slane %v5606_v25, 5 }
 0x452   : > { %v7801_v38 = vor.u32 %v8253_v43, %v7800_v26  ;;  %5705 = vst [vmem:[#allocation4 + $0x11c] sm:$0xf] %v5585_v51  ;;  %v5332_v50 = vshll.u32 %v5216_v49, 16  ;;  %v5604_v42 = vrot.slane %v5603_v0, 4 }
 0x453   : > { %v4123_v34 = vadd.f32 %v4122_v53, %v4074_v6  ;;  %v7816_v61 = vld [vmem:[#allocation4 + $0xf0] sm:$0xf]  ;;  %v5320_v53 = vshrl.u32 %v5215_v47, 16  ;;  %5458 = vst [vmem:[#allocation4 + $0x13c] sm:$0xf] %v5442_v52 }
 0x454   : > { %6123 = vmatmul.bf16.vlgmr.msra.gmra.mxu1 %v7785_v54  ;;  %v5329_v54 = vshrl.u32 %v5216_v49, 16  ;;  %v5609_v18 = vsel %vm9364_vm10, %v5604_v42, %v5608_v2  ;;  %v5481_v49 = vld [vmem:[#allocation5 + $0x94] sm:$0xf] }
 0x455   : > { %4140 = vst [vmem:[#allocation6 + $0x60] sm:$0xff] %v4123_v34  ;;  %6172 = vmatmul.bf16.vlgmr.msra.gmra.mxu2 %v7789_v48  ;;  %v5214_v48 = vld [vmem:[#allocation5 + $0x7c] sm:$0x8]  ;;  %v5322_v56 = vrot.slane %v5320_v53, 7  ;;  %v7824_v25 = vld [vmem:[#allocation4 + $0xf8] sm:$0xf] }
 0x456   : > { %v5331_v34 = vrot.slane %v5329_v54, 7  ;;  %5707 = vst [vmem:[#allocation4 + $0x164] sm:$0xf] %v5609_v18  ;;  %v5482_v54 = vld [vmem:[#allocation5 + $0x98] sm:$0xf] }
 0x457   : > { %v8258_v62 = vld [vmem:[#allocation4 + $0x110] sm:$0xf0]  ;;  %v5325_v33 = vor.u32 %v5323_v57, %v5322_v56  ;;  %v5327_v29 = vrot.slane %v5322_v56, 4  ;;  %v5620_v14 = vshll.u32 %v5482_v54, 16 }
 0x458   : > { %v5064_v13 = vpop.f32.mrf.mxu2  ;;  %v7817_v6 = vor.u32 %v8258_v62, %v7816_v61  ;;  %v5334_v36 = vor.u32 %v5332_v50, %v5331_v34  ;;  %v5217_v61 = vld [vmem:[#allocation5 + $0x90] sm:$0x8]  ;;  %v5611_v34 = vshrl.u32 %v5481_v49, 16  ;;  %v5614_v50 = vshll.u32 %v5481_v49, 16 }
 0x459   : > { %v9678_v31 = vadd.f32 %v5064_v13, %v5015_v44  ;;  %v5017_v58 = vpop.f32.mrf.mxu1  ;;  %v5315_v44 = vshrl.u32 %v5214_v48, 16  ;;  %v5337_v62 = vshrl.u32 %v5217_v61, 16  ;;  %v5622_v15 = vrot.slane %v5620_v14, 5  ;;  %v8259_v63 = vld [vmem:[#allocation4 + $0x118] sm:$0xf0] }
 0x45a   : > { %v5335_v22 = vsel %vm9336_vm9, %v5327_v29, %v5334_v36  ;;  %v5630_v29 = vshll.u32 %v5483_v17, 16  ;;  %v5613_v46 = vrot.slane %v5611_v34, 4  ;;  %v5616_v3 = vrot.slane %v5614_v50, 5 }
 0x45b   : > { %v7774_v4 = vrot.slane %v5315_v44, 11  ;;  %5427 = vst [vmem:[#allocation4 + $0x15c] sm:$0xf] %v5335_v22  ;;  %v7775_v48 = vrot.slane %v5337_v62, 11  ;;  %v5444_v22 = vld [vmem:[#allocation5 + $0x94] sm:$0xf]  ;;  %v7825_v39 = vor.u32 %v8259_v63, %v7824_v25 }
 0x45c   : > { %6089 = vmatmul.bf16.gmra.mxu0 %v7817_v6  ;;  %v5632_v21 = vrot.slane %v5630_v29, 5  ;;  %5460 = vst [vmem:[#allocation4 + $0x184] sm:$0xf] %v5444_v22  ;;  %v5485_v62 = vld [vmem:[#allocation5 + $0xac] sm:$0xf] }
 0x45d   : > { %v5326_v27 = vsel %vm9336_vm9, %v7774_v4, %v5325_v33  ;;  %v5624_v33 = vshrl.u32 %v5482_v54, 16  ;;  %v5486_v54 = vld [vmem:[#allocation5 + $0xb0] sm:$0x1]  ;;  %v5648_v17 = vshrl.u32 %v5485_v62, 16 }
 0x45e   : > { %5426 = vst [vmem:[#allocation4 + $0x138] sm:$0xf] %v5326_v27  ;;  %v8257_v27 = vld [vmem:[#allocation4 + $0xf4] sm:$0xf] }
 0x45f   : > { %v5626_v16 = vrot.slane %v5624_v33, 4  ;;  %v7821_v2 = vor.u32 %v8257_v27, %v7818_v5  ;;  %v5650_v29 = vrot.slane %v5648_v17, 4  ;;  %v5447_v27 = vld [vmem:[#allocation5 + $0xac] sm:$0xf] }
 0x460   : > { %v5066_v19 = vpop.f32.mrf.mxu2  ;;  %5463 = vst [vmem:[#allocation4 + $0x1f0] sm:$0xf] %v5447_v27 }
 0x461   : > { %v9686_v11 = vadd.f32 %v5066_v19, %v5017_v58  ;;  %v5020_v10 = vpop.f32.mrf.mxu1  ;;  %v5594_v58 = vrot.slane %v5593_v55, 4  ;;  %v5218_v19 = vld [vmem:[#allocation5 + $0x94] sm:$0xf]  ;;  %v5445_v55 = vld [vmem:[#allocation5 + $0x98] sm:$0xf] }
 0x462   : > { %v8261_v37 = vld [vmem:[#allocation4 + $0x158] sm:$0xf0]  ;;  %v5345_v47 = vshll.u32 %v5218_v19, 16  ;;  %5461 = vst [vmem:[#allocation4 + $0x1a8] sm:$0xf] %v5445_v55 }
 0x463   : > { %v5599_v30 = vsel %vm9364_vm10, %v5594_v58, %v5598_v20  ;;  %v5627_v20 = vor.u32 %v5626_v16, %v5622_v15  ;;  %v5446_v16 = vld [vmem:[#allocation5 + $0xa8] sm:$0xf] }
 0x464   : > { %6128 = vmatmul.bf16.gmra.mxu1 %v7797_v45  ;;  %5706 = vst [vmem:[#allocation4 + $0x140] sm:$0xf] %v5599_v30  ;;  %v5219_v45 = vld [vmem:[#allocation5 + $0x98] sm:$0xf] }
 0x465   : > { %6177 = vmatmul.bf16.gmra.mxu2 %v7801_v38  ;;  %v7828_v43 = vld [vmem:[#allocation4 + $0x138] sm:$0xf]  ;;  %v5342_v38 = vshrl.u32 %v5218_v19, 16  ;;  %v5354_v53 = vshll.u32 %v5219_v45, 16  ;;  %v5628_v58 = vrot.slane %v5627_v20, 4 }
 0x466   : > { %v7829_v7 = vor.u32 %v8261_v37, %v7828_v43  ;;  %v5222_v43 = vld [vmem:[#allocation5 + $0xac] sm:$0xf]  ;;  %5462 = vst [vmem:[#allocation4 + $0x1cc] sm:$0xf] %v5446_v16 }
 0x467   : > { %v5344_v51 = vrot.slane %v5342_v38, 7  ;;  %v5633_v30 = vsel %vm9364_vm10, %v5628_v58, %v5632_v21  ;;  %v5373_v37 = vshrl.u32 %v5222_v43, 16  ;;  %v5484_v38 = vld [vmem:[#allocation5 + $0xa8] sm:$0xf] }
 0x468   : > { %v5069_v40 = vpop.f32.mrf.mxu2  ;;  %5709 = vst [vmem:[#allocation4 + $0x1ac] sm:$0xf] %v5633_v30 }
 0x469   : > { %v9690_v23 = vadd.f32 %v5069_v40, %v5020_v10  ;;  %v5022_v13 = vpop.f32.mrf.mxu1  ;;  %v5351_v10 = vshrl.u32 %v5219_v45, 16  ;;  %v5347_v28 = vor.u32 %v5345_v47, %v5344_v51  ;;  %v5349_v44 = vrot.slane %v5344_v51, 4 }
 0x46a   : > { %v5375_v61 = vrot.slane %v5373_v37, 7  ;;  %v5487_v37 = vld [vmem:[#allocation5 + $0xbc] sm:$0xf] }
 0x46b   : > { %v5353_v6 = vrot.slane %v5351_v10, 7  ;;  %v5348_v4 = vsel %vm9336_vm9, %v7775_v48, %v5347_v28  ;;  %v5376_v10 = vshll.u32 %v5222_v43, 16  ;;  %v5635_v48 = vshrl.u32 %v5484_v38, 16 }
 0x46c   : > { %6094 = vmatmul.bf16.gmra.mxu0 %v7829_v7  ;;  %5428 = vst [vmem:[#allocation4 + $0x180] sm:$0xf] %v5348_v4  ;;  %v5638_v28 = vshll.u32 %v5484_v38, 16 }
 0x46d   : > { %v5356_v57 = vor.u32 %v5354_v53, %v5353_v6  ;;  %v5378_v53 = vor.u32 %v5376_v10, %v5375_v61  ;;  %v5637_v14 = vrot.slane %v5635_v48, 4 }
 0x46e   : > { %v5640_v4 = vrot.slane %v5638_v28, 5 }
 0x46f   : > { %v5357_v36 = vsel %vm9336_vm9, %v5349_v44, %v5356_v57  ;;  %v5644_v57 = vshll.u32 %v5485_v62, 16  ;;  %v8265_v27 = vld [vmem:[#allocation4 + $0x1a8] sm:$0xf0] }
 0x470   : > { %v5071_v1 = vpop.f32.mrf.mxu2  ;;  %5429 = vst [vmem:[#allocation4 + $0x1a4] sm:$0xf] %v5357_v36  ;;  %v8260_v36 = vld [vmem:[#allocation4 + $0x13c] sm:$0xf] }
 0x471   : > { %v9698_v26 = vadd.f32 %v5071_v1, %v5022_v13  ;;  %v5025_v32 = vpop.f32.mrf.mxu1  ;;  %v5617_v13 = vor.u32 %v5616_v3, %v5613_v46  ;;  %v5646_v33 = vrot.slane %v5644_v57, 5  ;;  %v7830_v46 = vld [vmem:[#allocation4 + $0x15c] sm:$0xf0] }
 0x472   : > { %v7836_v3 = vld [vmem:[#allocation4 + $0x140] sm:$0xf] }
 0x473   : > { %v5618_v8 = vrot.slane %v5617_v13, 4  ;;  %v7840_v24 = vld [vmem:[#allocation4 + $0x180] sm:$0xf]  ;;  %v5651_v5 = vor.u32 %v5650_v29, %v5646_v33  ;;  %v8262_v13 = vld [vmem:[#allocation4 + $0x160] sm:$0xf0] }
 0x474   : > { %6133 = vmatmul.bf16.gmra.mxu1 %v7809_v35  ;;  %v5221_v35 = vld [vmem:[#allocation5 + $0xa8] sm:$0xf]  ;;  %v7837_v58 = vor.u32 %v8262_v13, %v7836_v3  ;;  %v7842_v29 = vld [vmem:[#allocation4 + $0x1a4] sm:$0xf0]  ;;  %v5449_v3 = vld [vmem:[#allocation5 + $0xc0] sm:$0xf] }
 0x475   : > { %6182 = vmatmul.bf16.gmra.mxu2 %v7813_v12  ;;  %v5623_v41 = vsel %vm9364_vm10, %v5618_v8, %v5622_v15  ;;  %v5364_v18 = vshrl.u32 %v5221_v35, 16  ;;  %v5367_v45 = vshll.u32 %v5221_v35, 16  ;;  %v5641_v15 = vor.u32 %v5640_v4, %v5637_v14  ;;  %v5223_v35 = vld [vmem:[#allocation5 + $0xb8] sm:$0x8]  ;;  %5465 = vst [vmem:[#allocation4 + $0x238] sm:$0xf] %v5449_v3 }
 0x476   : > { %5708 = vst [vmem:[#allocation4 + $0x188] sm:$0xf] %v5623_v41  ;;  %v5652_v55 = vrot.slane %v5651_v5, 4  ;;  %v7833_v8 = vor.u32 %v8260_v36, %v7830_v46  ;;  %v5381_v43 = vshrl.u32 %v5223_v35, 16  ;;  %v5448_v46 = vld [vmem:[#allocation5 + $0xbc] sm:$0xf] }
 0x477   : > { %v8264_v1 = vld [vmem:[#allocation4 + $0x1a0] sm:$0xf0]  ;;  %v5366_v7 = vrot.slane %v5364_v18, 7  ;;  %v5642_v22 = vrot.slane %v5641_v15, 4  ;;  %5464 = vst [vmem:[#allocation4 + $0x214] sm:$0xf] %v5448_v46 }
 0x478   : > { %v5074_v56 = vpop.f32.mrf.mxu2  ;;  %v7841_v12 = vor.u32 %v8264_v1, %v7840_v24  ;;  %v5224_v24 = vld [vmem:[#allocation5 + $0xbc] sm:$0xf]  ;;  %v7777_v38 = vrot.slane %v5381_v43, 11 }
 0x479   : > { %v9702_v59 = vadd.f32 %v5074_v56, %v5025_v32  ;;  %v5027_v40 = vpop.f32.mrf.mxu1  ;;  %v5220_v32 = vld [vmem:[#allocation5 + $0xa4] sm:$0x8]  ;;  %v5369_v47 = vor.u32 %v5367_v45, %v5366_v7  ;;  %v5371_v49 = vrot.slane %v5366_v7, 4  ;;  %v5647_v21 = vsel %vm9364_vm10, %v5642_v22, %v5646_v33  ;;  %v5488_v45 = vld [vmem:[#allocation5 + $0xc0] sm:$0xf] }
 0x47a   : > { %v5359_v19 = vshrl.u32 %v5220_v32, 16  ;;  %5710 = vst [vmem:[#allocation4 + $0x1d0] sm:$0xf] %v5647_v21  ;;  %v5386_v1 = vshrl.u32 %v5224_v24, 16  ;;  %v5389_v32 = vshll.u32 %v5224_v24, 16  ;;  %v5668_v48 = vshll.u32 %v5488_v45, 16 }
 0x47b   : > { %v5379_v50 = vsel %vm9336_vm9, %v5371_v49, %v5378_v53  ;;  %v5659_v49 = vshrl.u32 %v5487_v37, 16  ;;  %v5672_v28 = vshrl.u32 %v5488_v45, 16  ;;  %v8263_v33 = vld [vmem:[#allocation4 + $0x184] sm:$0xf] }
 0x47c   : > { %6099 = vmatmul.bf16.gmra.mxu0 %v7841_v12  ;;  %v7776_v51 = vrot.slane %v5359_v19, 11  ;;  %5431 = vst [vmem:[#allocation4 + $0x1ec] sm:$0xf] %v5379_v50  ;;  %v5388_v18 = vrot.slane %v5386_v1, 7  ;;  %v5670_v50 = vrot.slane %v5668_v48, 5 }
 0x47d   : > { %v5661_v17 = vrot.slane %v5659_v49, 4  ;;  %v5674_v14 = vrot.slane %v5672_v28, 4 }
 0x47e   : > { %v5370_v56 = vsel %vm9336_vm9, %v7776_v51, %v5369_v47  ;;  %v5391_v61 = vor.u32 %v5389_v32, %v5388_v18  ;;  %v5393_v10 = vrot.slane %v5388_v18, 4  ;;  %v5489_v47 = vld [vmem:[#allocation5 + $0xc4] sm:$0x1] }
 0x47f   : > { %5430 = vst [vmem:[#allocation4 + $0x1c8] sm:$0xf] %v5370_v56  ;;  %v5678_v4 = vshll.u32 %v5489_v47, 16  ;;  %v5675_v15 = vor.u32 %v5674_v14, %v5670_v50 }
 0x480   : > { %v5076_v52 = vpop.f32.mrf.mxu2 }
 0x481   : > { %v9710_v0 = vadd.f32 %v5076_v52, %v5027_v40  ;;  %v5030_v42 = vpop.f32.mrf.mxu1  ;;  %v5654_v40 = vshll.u32 %v5486_v54, 16  ;;  %v5392_v54 = vsel %vm9336_vm9, %v7777_v38, %v5391_v61  ;;  %v5680_v16 = vrot.slane %v5678_v4, 5  ;;  %v7860_v1 = vld [vmem:[#allocation4 + $0x1d0] sm:$0xf]  ;;  %v8269_v61 = vld [vmem:[#allocation4 + $0x214] sm:$0xf] }
 0x482   : > { %5432 = vst [vmem:[#allocation4 + $0x210] sm:$0xf] %v5392_v54  ;;  %v5676_v60 = vrot.slane %v5675_v15, 4  ;;  %v5153_v15 = vld [vmem:[#allocation6] sm:$0xff] }
 0x483   : > { %v5656_v25 = vrot.slane %v5654_v40, 5  ;;  %v7848_v40 = vld [vmem:[#allocation4 + $0x188] sm:$0xf] }
 0x484   : > { %6138 = vmatmul.bf16.gmra.mxu1 %v7821_v2 }
 0x485   : > { %6187 = vmatmul.bf16.gmra.mxu2 %v7825_v39  ;;  %v5657_v41 = vsel %vm9364_vm10, %v5652_v55, %v5656_v25  ;;  %v8267_v39 = vld [vmem:[#allocation4 + $0x1e8] sm:$0xf0]  ;;  %v7845_v55 = vor.u32 %v8263_v33, %v7842_v29 }
 0x486   : > { %v7852_v52 = vld [vmem:[#allocation4 + $0x1c8] sm:$0xf]  ;;  %5711 = vst [vmem:[#allocation4 + $0x1f4] sm:$0xf] %v5657_v41 }
 0x487   : > { %v7853_v30 = vor.u32 %v8267_v39, %v7852_v52 }
 0x488   : > { %v5079_v6 = vpop.f32.mrf.mxu2 }
 0x489   : > { %v9714_v44 = vadd.f32 %v5079_v6, %v5030_v42  ;;  %v5032_v34 = vpop.f32.mrf.mxu1  ;;  %v5225_v42 = vld [vmem:[#allocation5 + $0xc0] sm:$0xf]  ;;  %v5662_v6 = vshll.u32 %v5487_v37, 16  ;;  %v5113_v37 = vpop.f32.mrf.mxu3 }
 0x48a   : > { %v5395_v12 = vshrl.u32 %v5225_v42, 16  ;;  %v5398_v7 = vshll.u32 %v5225_v42, 16  ;;  %v7864_v21 = vld [vmem:[#allocation4 + $0x210] sm:$0xf] }
 0x48b   : > { %v7854_v42 = vld [vmem:[#allocation4 + $0x1ec] sm:$0xf0] }
 0x48c   : > { %6104 = vmatmul.bf16.gmra.mxu0 %v7853_v30  ;;  %v5397_v19 = vrot.slane %v5395_v12, 7  ;;  %v8266_v30 = vld [vmem:[#allocation4 + $0x1cc] sm:$0xf] }
 0x48d   : > { %v8268_v35 = vld [vmem:[#allocation4 + $0x1f0] sm:$0xf0]  ;;  %v7857_v9 = vor.u32 %v8266_v30, %v7854_v42 }
 0x48e   : > { %v5400_v51 = vor.u32 %v5398_v7, %v5397_v19  ;;  %v7861_v18 = vor.u32 %v8268_v35, %v7860_v1 }
 0x490   : > { %v5081_v20 = vpop.f32.mrf.mxu2  ;;  %v5401_v57 = vsel %vm9336_vm9, %v5393_v10, %v5400_v51 }
 0x491   : > { %v9722_v63 = vadd.f32 %v5081_v20, %v5032_v34  ;;  %v5035_v2 = vpop.f32.mrf.mxu1  ;;  %v5664_v34 = vrot.slane %v5662_v6, 5  ;;  %5433 = vst [vmem:[#allocation4 + $0x234] sm:$0xf] %v5401_v57  ;;  %v7849_v20 = vor.u32 %v8265_v27, %v7848_v40  ;;  %v5115_v10 = vpop.f32.mrf.mxu3 }
 0x493   : > { %v5665_v36 = vor.u32 %v5664_v34, %v5661_v17 }
 0x494   : > { %6143 = vmatmul.bf16.gmra.mxu1 %v7833_v8  ;;  %v5681_v8 = vsel %vm9364_vm10, %v5676_v60, %v5680_v16  ;;  %v9754_v60 = vld [vmem:[%s9860_s5] ss:$0 sm:$0xff] }
 0x495   : > { %6192 = vmatmul.bf16.gmra.mxu2 %v7837_v58  ;;  %v5666_v5 = vrot.slane %v5665_v36, 4  ;;  %5713 = vst [vmem:[#allocation4 + $0x23c] sm:$0xf] %v5681_v8  ;;  %v5114_v36 = vadd.f32 %v5113_v37, %v9678_v31  ;;  %v5116_v31 = vadd.f32 %v5115_v10, %v9686_v11  ;;  %v7970_v8 = vld [vmem:[%s8712_s21 + $0x31] sm:$0xff] }
 0x497   : > { %v5671_v13 = vsel %vm9364_vm10, %v5666_v5, %v5670_v50  ;;  %v5169_v27 = vadd.f32 %v5153_v15, %v5114_v36 }
 0x498   : > { %v5084_v62 = vpop.f32.mrf.mxu2  ;;  %5712 = vst [vmem:[#allocation4 + $0x218] sm:$0xf] %v5671_v13  ;;  %v8270_v52 = vld [vmem:[#allocation4 + $0x230] sm:$0xf0] }
 0x499   : > { %v9726_v53 = vadd.f32 %v5084_v62, %v5035_v2  ;;  %v5037_v56 = vpop.f32.mrf.mxu1  ;;  %v7865_v41 = vor.u32 %v8270_v52, %v7864_v21  ;;  %v7866_v62 = vld [vmem:[#allocation4 + $0x234] sm:$0xf0]  ;;  %v5118_v57 = vpop.f32.mrf.mxu3 }
 0x49a   : > { %v7869_v54 = vor.u32 %v8269_v61, %v7866_v62  ;;  %v5119_v11 = vadd.f32 %v5118_v57, %v9690_v23 }
 0x49c   : > { %6109 = vmatmul.bf16.gmra.mxu0 %v7865_v41  ;;  %v8271_v47 = vld [vmem:[#allocation4 + $0x238] sm:$0xf0]  ;;  %v5154_v41 = vld [vmem:[#allocation6 + $0x38] sm:$0xff] }
 0x49d   : > { %v5170_v30 = vadd.f32 %v5154_v41, %v5116_v31  ;;  %v5157_v31 = vld [vmem:[#allocation6 + $0x30] sm:$0xff] }
 0x49f   : > { %v7872_v51 = vld [vmem:[#allocation4 + $0x218] sm:$0xf] }
 0x4a0   : > { %v5086_v25 = vpop.f32.mrf.mxu2  ;;  %v7873_v48 = vor.u32 %v8271_v47, %v7872_v51 }
 0x4a1   : > { %v9734_v22 = vadd.f32 %v5086_v25, %v5037_v56  ;;  %v5040_v58 = vpop.f32.mrf.mxu1  ;;  %v5120_v29 = vpop.f32.mrf.mxu3 }
 0x4a4   : > { %6148 = vmatmul.bf16.gmra.mxu1 %v7845_v55  ;;  %v9759_v55 = vld [vmem:[%s9861_s6] ss:$0 sm:$0xff] }
 0x4a5   : > { %6197 = vmatmul.bf16.gmra.mxu2 %v7849_v20 }
 0x4a8   : > { %v5089_v2 = vpop.f32.mrf.mxu2 }
 0x4a9   : > { %v9738_v39 = vadd.f32 %v5089_v2, %v5040_v58  ;;  %v5042_v24 = vpop.f32.mrf.mxu1  ;;  %v6075_v7 = vpop.f32.mrf.mxu0 }
 0x4aa   : > { %v5123_v20 = vpop.f32.mrf.mxu3 }
 0x4b0   : > { %v5091_v12 = vpop.f32.mrf.mxu2 }
 0x4b1   : > { %v9740_v43 = vadd.f32 %v5091_v12, %v5042_v24  ;;  %v5045_v32 = vpop.f32.mrf.mxu1  ;;  %v6077_v56 = vpop.f32.mrf.mxu0 }
 0x4b2   : > { %v5125_v37 = vpop.f32.mrf.mxu3 }
 0x4b4   : > { %6153 = vmatmul.bf16.gmra.mxu1 %v7857_v9 }
 0x4b5   : > { %6202 = vmatmul.bf16.gmra.mxu2 %v7861_v18 }
 0x4b8   : > { %v5094_v19 = vpop.f32.mrf.mxu2 }
 0x4b9   : > { %v9742_v45 = vadd.f32 %v5094_v19, %v5045_v32  ;;  %v5047_v38 = vpop.f32.mrf.mxu1  ;;  %v6080_v14 = vpop.f32.mrf.mxu0  ;;  %v7971_v19 = vld [vmem:[%s8712_s21 + $0x39] sm:$0xff] }
 0x4c0   : > { %v5096_v49 = vpop.f32.mrf.mxu2 }
 0x4c1   : > { %v9744_v6 = vadd.f32 %v5096_v49, %v5047_v38  ;;  %v5050_v28 = vpop.f32.mrf.mxu1  ;;  %v6082_v3 = vpop.f32.mrf.mxu0  ;;  %v5155_v38 = vld [vmem:[#allocation6 + $0x50] sm:$0xff] }
 0x4c2   : > { %v5171_v10 = vadd.f32 %v5155_v38, %v5119_v11 }
 0x4c4   : > { %6158 = vmatmul.bf16.gmra.mxu1 %v7869_v54 }
 0x4c5   : > { %6207 = vmatmul.bf16.gmra.mxu2 %v7873_v48  ;;  %v5121_v48 = vadd.f32 %v5120_v29, %v9698_v26  ;;  %v5124_v29 = vadd.f32 %v5123_v20, %v9702_v59  ;;  %v5126_v59 = vadd.f32 %v5125_v37, %v9710_v0 }
 0x4c8   : > { %v5099_v17 = vpop.f32.mrf.mxu2 }
 0x4c9   : > { %v9746_v34 = vadd.f32 %v5099_v17, %v5050_v28  ;;  %v5052_v50 = vpop.f32.mrf.mxu1  ;;  %v6085_v24 = vpop.f32.mrf.mxu0 }
 0x4d0   : > { %v5101_v4 = vpop.f32.mrf.mxu2 }
 0x4d1   : > { %v9748_v33 = vadd.f32 %v5101_v4, %v5052_v50  ;;  %v6124_v40 = vpop.f32.mrf.mxu1  ;;  %v6087_v49 = vpop.f32.mrf.mxu0  ;;  %v5156_v50 = vld [vmem:[#allocation6 + $0x18] sm:$0xff] }
 0x4d2   : > { %v6125_v46 = vadd.f32 %v6124_v40, %v6075_v7  ;;  %v5172_v40 = vadd.f32 %v5156_v50, %v5121_v48 }
 0x4d8   : > { %v6173_v16 = vpop.f32.mrf.mxu2 }
 0x4d9   : > { %v6174_v5 = vadd.f32 %v6173_v16, %v6125_v46  ;;  %v6126_v25 = vpop.f32.mrf.mxu1  ;;  %v6090_v26 = vpop.f32.mrf.mxu0 }
 0x4da   : > { %v6127_v52 = vadd.f32 %v6126_v25, %v6077_v56  ;;  %v7972_v56 = vld [vmem:[%s8712_s21 + $0x49] sm:$0xff] }
 0x4db   : > { %v6229_v13 = vadd.f32 %v6174_v5, %v5169_v27 }
 0x4dd   : > { %6245 = vst [vmem:[#allocation6] sm:$0xff] %v6229_v13  ;;  %v6297_v21 = vmul.f32 %v9754_v60, %v6229_v13 }
 0x4df   : > { %v6317_v58 = vadd.f32 %v9759_v55, %v6297_v21 }
 0x4e0   : > { %v6175_v2 = vpop.f32.mrf.mxu2 }
 0x4e1   : > { %v6333_v42 = vadd.f32 %v7970_v8, %v6317_v58  ;;  %v6176_v1 = vadd.f32 %v6175_v2, %v6127_v52  ;;  %v6129_v35 = vpop.f32.mrf.mxu1  ;;  %v5173_v8 = vadd.f32 %v5157_v31, %v5124_v29 }
 0x4e2   : > { %v6130_v32 = vadd.f32 %v6129_v35, %v6080_v14  ;;  %v5128_v14 = vpop.f32.mrf.mxu3 }
 0x4e3   : > { %v6349_v12 = vmax.f32 %v6333_v42, 0.0  ;;  %v6230_v9 = vadd.f32 %v6176_v1, %v5170_v30  ;;  %v6092_v1 = vpop.f32.mrf.mxu0  ;;  %v5129_v37 = vadd.f32 %v5128_v14, %v9714_v44 }
 0x4e5   : > { %6365 = vst [vmem:[%s8515_s20] sm:$0xff] %v6349_v12  ;;  %v6298_v18 = vmul.f32 %v9754_v60, %v6230_v9 }
 0x4e6   : > { %6246 = vst [vmem:[#allocation6 + $0x38] sm:$0xff] %v6230_v9  ;;  %v5158_v9 = vld [vmem:[#allocation6 + $0x68] sm:$0xff] }
 0x4e7   : > { %v6318_v7 = vadd.f32 %v9759_v55, %v6298_v18  ;;  %v5174_v18 = vadd.f32 %v5158_v9, %v5126_v59  ;;  %v7978_v9 = vld [vmem:[%s8712_s21 + $0x91] sm:$0xff] }
 0x4e8   : > { %v6178_v61 = vpop.f32.mrf.mxu2 }
 0x4e9   : > { %v6334_v62 = vadd.f32 %v7971_v19, %v6318_v7  ;;  %v6179_v51 = vadd.f32 %v6178_v61, %v6130_v32  ;;  %v6131_v47 = vpop.f32.mrf.mxu1 }
 0x4ea   : > { %v6132_v17 = vadd.f32 %v6131_v47, %v6082_v3  ;;  %v7973_v3 = vld [vmem:[%s8712_s21 + $0x51] sm:$0xff]  ;;  %v5130_v41 = vpop.f32.mrf.mxu3 }
 0x4eb   : > { %v6350_v54 = vmax.f32 %v6334_v62, 0.0  ;;  %v6231_v23 = vadd.f32 %v6179_v51, %v5171_v10  ;;  %v7975_v51 = vld [vmem:[%s8712_s21 + $0x69] sm:$0xff]  ;;  %v5131_v44 = vadd.f32 %v5130_v41, %v9722_v63 }
 0x4ed   : > { %6366 = vst [vmem:[%s8515_s20 + $0x8] sm:$0xff] %v6350_v54  ;;  %v6299_v28 = vmul.f32 %v9754_v60, %v6231_v23 }
 0x4ee   : > { %6247 = vst [vmem:[#allocation6 + $0x50] sm:$0xff] %v6231_v23  ;;  %v6095_v23 = vpop.f32.mrf.mxu0 }
 0x4ef   : > { %v6319_v57 = vadd.f32 %v9759_v55, %v6299_v28 }
 0x4f0   : > { %v6180_v4 = vpop.f32.mrf.mxu2 }
 0x4f1   : > { %v6335_v36 = vadd.f32 %v7972_v56, %v6319_v57  ;;  %v6181_v46 = vadd.f32 %v6180_v4, %v6132_v17  ;;  %v6134_v15 = vpop.f32.mrf.mxu1 }
 0x4f2   : > { %v6135_v25 = vadd.f32 %v6134_v15, %v6085_v24  ;;  %v7974_v24 = vld [vmem:[%s8712_s21 + $0x61] sm:$0xff]  ;;  %v5133_v0 = vpop.f32.mrf.mxu3  ;;  %v5160_v15 = vld [vmem:[#allocation6 + $0x80] sm:$0xff] }
 0x4f3   : > { %v6351_v16 = vmax.f32 %v6335_v36, 0.0  ;;  %v6232_v27 = vadd.f32 %v6181_v46, %v5172_v40  ;;  %v7976_v40 = vld [vmem:[%s8712_s21 + $0x79] sm:$0xff] }
 0x4f5   : > { %6367 = vst [vmem:[%s8515_s20 + $0x10] sm:$0xff] %v6351_v16  ;;  %v6300_v5 = vmul.f32 %v9754_v60, %v6232_v27 }
 0x4f6   : > { %6248 = vst [vmem:[#allocation6 + $0x18] sm:$0xff] %v6232_v27  ;;  %v5176_v27 = vadd.f32 %v5160_v15, %v5131_v44 }
 0x4f7   : > { %v6320_v13 = vadd.f32 %v9759_v55, %v6300_v5 }
 0x4f8   : > { %v6183_v21 = vpop.f32.mrf.mxu2 }
 0x4f9   : > { %v6336_v58 = vadd.f32 %v7973_v3, %v6320_v13  ;;  %v6184_v52 = vadd.f32 %v6183_v21, %v6135_v25  ;;  %v6136_v2 = vpop.f32.mrf.mxu1  ;;  %v6097_v25 = vpop.f32.mrf.mxu0  ;;  %v5134_v13 = vadd.f32 %v5133_v0, %v9726_v53 }
 0x4fa   : > { %v6137_v12 = vadd.f32 %v6136_v2, %v6087_v49  ;;  %v5159_v49 = vld [vmem:[#allocation6 + $0x78] sm:$0xff]  ;;  %v5135_v4 = vpop.f32.mrf.mxu3 }
 0x4fb   : > { %v6352_v30 = vmax.f32 %v6336_v58, 0.0  ;;  %v6233_v42 = vadd.f32 %v6184_v52, %v5173_v8  ;;  %v5175_v48 = vadd.f32 %v5159_v49, %v5129_v37  ;;  %v7977_v8 = vld [vmem:[%s8712_s21 + $0x81] sm:$0xff]  ;;  %v7979_v49 = vld [vmem:[%s8712_s21 + $0x99] sm:$0xff] }
 0x4fc   : > { %v5161_v52 = vld [vmem:[#allocation6 + $0x8] sm:$0xff] }
 0x4fd   : > { %6368 = vst [vmem:[%s8515_s20 + $0x18] sm:$0xff] %v6352_v30  ;;  %v6301_v20 = vmul.f32 %v9754_v60, %v6233_v42  ;;  %v5177_v30 = vadd.f32 %v5161_v52, %v5134_v13 }
 0x4fe   : > { %6249 = vst [vmem:[#allocation6 + $0x30] sm:$0xff] %v6233_v42 }
 0x4ff   : > { %v6321_v35 = vadd.f32 %v9759_v55, %v6301_v20 }
 0x500   : > { %v6185_v11 = vpop.f32.mrf.mxu2 }
 0x501   : > { %v6337_v32 = vadd.f32 %v7974_v24, %v6321_v35  ;;  %v6186_v19 = vadd.f32 %v6185_v11, %v6137_v12  ;;  %v6139_v7 = vpop.f32.mrf.mxu1  ;;  %v6100_v53 = vpop.f32.mrf.mxu0  ;;  %v5136_v35 = vadd.f32 %v5135_v4, %v9734_v22 }
 0x502   : > { %v6140_v62 = vadd.f32 %v6139_v7, %v6090_v26  ;;  %v5138_v41 = vpop.f32.mrf.mxu3 }
 0x503   : > { %v6353_v38 = vmax.f32 %v6337_v32, 0.0  ;;  %v6234_v61 = vadd.f32 %v6186_v19, %v5174_v18  ;;  %v5162_v32 = vld [vmem:[#allocation6 + $0x88] sm:$0xff]  ;;  %v5139_v22 = vadd.f32 %v5138_v41, %v9738_v39  ;;  %v5165_v41 = vld [vmem:[#allocation6 + $0x58] sm:$0xff] }
 0x504   : > { %v5178_v7 = vadd.f32 %v5162_v32, %v5136_v35 }
 0x505   : > { %6369 = vst [vmem:[%s8515_s20 + $0x20] sm:$0xff] %v6353_v38  ;;  %v6302_v10 = vmul.f32 %v9754_v60, %v6234_v61 }
 0x506   : > { %6250 = vst [vmem:[#allocation6 + $0x68] sm:$0xff] %v6234_v61 }
 0x507   : > { %v6322_v47 = vadd.f32 %v9759_v55, %v6302_v10 }
 0x508   : > { %v6188_v54 = vpop.f32.mrf.mxu2 }
 0x509   : > { %v6338_v28 = vadd.f32 %v7975_v51, %v6322_v47  ;;  %v6189_v56 = vadd.f32 %v6188_v54, %v6140_v62  ;;  %v6141_v57 = vpop.f32.mrf.mxu1  ;;  %v6102_v54 = vpop.f32.mrf.mxu0 }
 0x50a   : > { %v6142_v46 = vadd.f32 %v6141_v57, %v6092_v1  ;;  %v5140_v0 = vpop.f32.mrf.mxu3 }
 0x50b   : > { %v6354_v17 = vmax.f32 %v6338_v28, 0.0  ;;  %v6235_v50 = vadd.f32 %v6189_v56, %v5175_v48  ;;  %v5163_v48 = vld [vmem:[#allocation6 + $0x28] sm:$0xff]  ;;  %v5141_v4 = vadd.f32 %v5140_v0, %v9740_v43 }
 0x50c   : > { %v5179_v56 = vadd.f32 %v5163_v48, %v5139_v22 }
 0x50d   : > { %6370 = vst [vmem:[%s8515_s20 + $0x28] sm:$0xff] %v6354_v17  ;;  %v6303_v14 = vmul.f32 %v9754_v60, %v6235_v50 }
 0x50e   : > { %6251 = vst [vmem:[#allocation6 + $0x78] sm:$0xff] %v6235_v50 }
 0x50f   : > { %v6323_v36 = vadd.f32 %v9759_v55, %v6303_v14 }
 0x510   : > { %v6190_v16 = vpop.f32.mrf.mxu2 }
 0x511   : > { %v6339_v26 = vadd.f32 %v7976_v40, %v6323_v36  ;;  %v6191_v29 = vadd.f32 %v6190_v16, %v6142_v46  ;;  %v6144_v5 = vpop.f32.mrf.mxu1  ;;  %v7980_v36 = vld [vmem:[%s8712_s21 + $0xa9] sm:$0xff]  ;;  %v5164_v16 = vld [vmem:[#allocation6 + $0x40] sm:$0xff] }
 0x512   : > { %v6145_v21 = vadd.f32 %v6144_v5, %v6095_v23  ;;  %v5143_v39 = vpop.f32.mrf.mxu3 }
 0x513   : > { %v6355_v3 = vmax.f32 %v6339_v26, 0.0  ;;  %v6236_v63 = vadd.f32 %v6191_v29, %v5176_v27  ;;  %v6105_v27 = vpop.f32.mrf.mxu0  ;;  %v5180_v29 = vadd.f32 %v5164_v16, %v5141_v4  ;;  %v5144_v43 = vadd.f32 %v5143_v39, %v9742_v45  ;;  %v7984_v4 = vld [vmem:[%s8712_s21 + $0xd9] sm:$0xff] }
 0x515   : > { %6371 = vst [vmem:[%s8515_s20 + $0x30] sm:$0xff] %v6355_v3  ;;  %v6304_v31 = vmul.f32 %v9754_v60, %v6236_v63 }
 0x516   : > { %6252 = vst [vmem:[#allocation6 + $0x80] sm:$0xff] %v6236_v63 }
 0x517   : > { %v6324_v58 = vadd.f32 %v9759_v55, %v6304_v31 }
 0x518   : > { %v6193_v2 = vpop.f32.mrf.mxu2 }
 0x519   : > { %v6340_v42 = vadd.f32 %v7977_v8, %v6324_v58  ;;  %v6194_v59 = vadd.f32 %v6193_v2, %v6145_v21  ;;  %v6146_v20 = vpop.f32.mrf.mxu1  ;;  %v7981_v58 = vld [vmem:[%s8712_s21 + $0xb1] sm:$0xff] }
 0x51a   : > { %v6147_v18 = vadd.f32 %v6146_v20, %v6097_v25  ;;  %v5145_v8 = vpop.f32.mrf.mxu3 }
 0x51b   : > { %v6356_v24 = vmax.f32 %v6340_v42, 0.0  ;;  %v6237_v1 = vadd.f32 %v6194_v59, %v5177_v30  ;;  %v5181_v30 = vadd.f32 %v5165_v41, %v5144_v43  ;;  %v6107_v20 = vpop.f32.mrf.mxu0 }
 0x51d   : > { %6372 = vst [vmem:[%s8515_s20 + $0x38] sm:$0xff] %v6356_v24  ;;  %v6305_v12 = vmul.f32 %v9754_v60, %v6237_v1 }
 0x51e   : > { %6253 = vst [vmem:[#allocation6 + $0x8] sm:$0xff] %v6237_v1 }
 0x51f   : > { %v6325_v11 = vadd.f32 %v9759_v55, %v6305_v12  ;;  %v7982_v12 = vld [vmem:[%s8712_s21 + $0xc1] sm:$0xff] }
 0x520   : > { %v6195_v19 = vpop.f32.mrf.mxu2 }
 0x521   : > { %v6341_v38 = vadd.f32 %v7978_v9, %v6325_v11  ;;  %v6196_v61 = vadd.f32 %v6195_v19, %v6147_v18  ;;  %v6149_v37 = vpop.f32.mrf.mxu1  ;;  %v5166_v18 = vld [vmem:[#allocation6 + $0x10] sm:$0xff] }
 0x522   : > { %v6150_v47 = vadd.f32 %v6149_v37, %v6100_v53  ;;  %v5146_v53 = vadd.f32 %v5145_v8, %v9744_v6  ;;  %v5148_v32 = vpop.f32.mrf.mxu3 }
 0x523   : > { %v6357_v10 = vmax.f32 %v6341_v38, 0.0  ;;  %v6238_v62 = vadd.f32 %v6196_v61, %v5178_v7  ;;  %v6110_v6 = vpop.f32.mrf.mxu0 }
 0x524   : > { %v5182_v7 = vadd.f32 %v5166_v18, %v5146_v53 }
 0x525   : > { %6373 = vst [vmem:[%s8515_s20 + $0x40] sm:$0xff] %v6357_v10  ;;  %v6306_v51 = vmul.f32 %v9754_v60, %v6238_v62 }
 0x526   : > { %6254 = vst [vmem:[#allocation6 + $0x88] sm:$0xff] %v6238_v62  ;;  %v5149_v62 = vadd.f32 %v5148_v32, %v9746_v34 }
 0x527   : > { %v6326_v23 = vadd.f32 %v9759_v55, %v6306_v51 }
 0x528   : > { %v6198_v28 = vpop.f32.mrf.mxu2 }
 0x529   : > { %v6342_v57 = vadd.f32 %v7979_v49, %v6326_v23  ;;  %v6199_v17 = vadd.f32 %v6198_v28, %v6150_v47  ;;  %v6151_v50 = vpop.f32.mrf.mxu1  ;;  %v7983_v47 = vld [vmem:[%s8712_s21 + $0xc9] sm:$0xff] }
 0x52a   : > { %v6152_v15 = vadd.f32 %v6151_v50, %v6102_v54  ;;  %v5167_v54 = vld [vmem:[#allocation6 + $0x98] sm:$0xff] }
 0x52b   : > { %v6358_v44 = vmax.f32 %v6342_v57, 0.0  ;;  %v6239_v14 = vadd.f32 %v6199_v17, %v5179_v56  ;;  %v5183_v48 = vadd.f32 %v5167_v54, %v5149_v62  ;;  %v5150_v57 = vpop.f32.mrf.mxu3  ;;  %v6112_v39 = vpop.f32.mrf.mxu0 }
 0x52c   : > { %v5151_v34 = vadd.f32 %v5150_v57, %v9748_v33 }
 0x52d   : > { %6374 = vst [vmem:[%s8515_s20 + $0x48] sm:$0xff] %v6358_v44  ;;  %v6307_v40 = vmul.f32 %v9754_v60, %v6239_v14 }
 0x52e   : > { %6255 = vst [vmem:[#allocation6 + $0x28] sm:$0xff] %v6239_v14 }
 0x52f   : > { %v6327_v46 = vadd.f32 %v9759_v55, %v6307_v40 }
 0x530   : > { %v6200_v26 = vpop.f32.mrf.mxu2 }
 0x531   : > { %v6343_v5 = vadd.f32 %v7980_v36, %v6327_v46  ;;  %v6201_v25 = vadd.f32 %v6200_v26, %v6152_v15  ;;  %v6154_v3 = vpop.f32.mrf.mxu1  ;;  %v5168_v46 = vld [vmem:[#allocation6 + $0x60] sm:$0xff] }
 0x532   : > { %v6155_v21 = vadd.f32 %v6154_v3, %v6105_v27  ;;  %v5184_v16 = vadd.f32 %v5168_v46, %v5151_v34 }
 0x533   : > { %v6359_v63 = vmax.f32 %v6343_v5, 0.0  ;;  %v6240_v13 = vadd.f32 %v6201_v25, %v5180_v29  ;;  %v7985_v25 = vld [vmem:[%s8712_s21 + $0xe1] sm:$0xff] }
 0x535   : > { %6375 = vst [vmem:[%s8515_s20 + $0x50] sm:$0xff] %v6359_v63  ;;  %v6308_v31 = vmul.f32 %v9754_v60, %v6240_v13 }
 0x536   : > { %6256 = vst [vmem:[#allocation6 + $0x40] sm:$0xff] %v6240_v13 }
 0x537   : > { %v6328_v52 = vadd.f32 %v9759_v55, %v6308_v31 }
 0x538   : > { %v6203_v2 = vpop.f32.mrf.mxu2 }
 0x539   : > { %v6344_v42 = vadd.f32 %v7981_v58, %v6328_v52  ;;  %v6204_v59 = vadd.f32 %v6203_v2, %v6155_v21  ;;  %v6156_v24 = vpop.f32.mrf.mxu1 }
 0x53a   : > { %v6157_v11 = vadd.f32 %v6156_v24, %v6107_v20 }
 0x53b   : > { %v6360_v1 = vmax.f32 %v6344_v42, 0.0  ;;  %v6241_v45 = vadd.f32 %v6204_v59, %v5181_v30 }
 0x53d   : > { %6376 = vst [vmem:[%s8515_s20 + $0x58] sm:$0xff] %v6360_v1  ;;  %v6309_v35 = vmul.f32 %v9754_v60, %v6241_v45 }
 0x53e   : > { %6257 = vst [vmem:[#allocation6 + $0x58] sm:$0xff] %v6241_v45 }
 0x53f   : > { %v6329_v9 = vadd.f32 %v9759_v55, %v6309_v35 }
 0x540   : > { %v6205_v19 = vpop.f32.mrf.mxu2 }
 0x541   : > { %v6345_v38 = vadd.f32 %v7982_v12, %v6329_v9  ;;  %v6206_v61 = vadd.f32 %v6205_v19, %v6157_v11  ;;  %v6159_v0 = vpop.f32.mrf.mxu1 }
 0x542   : > { %v6160_v51 = vadd.f32 %v6159_v0, %v6110_v6 }
 0x543   : > { %v6361_v37 = vmax.f32 %v6345_v38, 0.0  ;;  %v6242_v10 = vadd.f32 %v6206_v61, %v5182_v7 }
 0x545   : > { %6377 = vst [vmem:[%s8515_s20 + $0x60] sm:$0xff] %v6361_v37  ;;  %v6310_v22 = vmul.f32 %v9754_v60, %v6242_v10 }
 0x546   : > { %6258 = vst [vmem:[#allocation6 + $0x10] sm:$0xff] %v6242_v10 }
 0x547   : > { %v6330_v49 = vadd.f32 %v9759_v55, %v6310_v22 }
 0x548   : > { %v6208_v23 = vpop.f32.mrf.mxu2 }
 0x549   : > { %v6346_v28 = vadd.f32 %v7983_v47, %v6330_v49  ;;  %v6209_v56 = vadd.f32 %v6208_v23, %v6160_v51  ;;  %v6161_v44 = vpop.f32.mrf.mxu1 }
 0x54a   : > { %v6162_v36 = vadd.f32 %v6161_v44, %v6112_v39 }
 0x54b   : > { %v6362_v17 = vmax.f32 %v6346_v28, 0.0  ;;  %v6243_v50 = vadd.f32 %v6209_v56, %v5183_v48 }
 0x54d   : > { %6378 = vst [vmem:[%s8515_s20 + $0x68] sm:$0xff] %v6362_v17  ;;  %v6311_v14 = vmul.f32 %v9754_v60, %v6243_v50 }
 0x54e   : > { %6259 = vst [vmem:[#allocation6 + $0x98] sm:$0xff] %v6243_v50 }
 0x54f   : > { %v6331_v40 = vadd.f32 %v9759_v55, %v6311_v14 }
 0x550   : > { %v6210_v15 = vpop.f32.mrf.mxu2 }
 0x551   : > { %v6347_v27 = vadd.f32 %v7984_v4, %v6331_v40  ;;  %v6211_v26 = vadd.f32 %v6210_v15, %v6162_v36 }
 0x553   : > { %v6363_v29 = vmax.f32 %v6347_v27, 0.0  ;;  %v6244_v5 = vadd.f32 %v6211_v26, %v5184_v16 }
 0x555   : > { %6379 = vst [vmem:[%s8515_s20 + $0x70] sm:$0xff] %v6363_v29  ;;  %v6312_v33 = vmul.f32 %v9754_v60, %v6244_v5 }
 0x556   : > { %6260 = vst [vmem:[#allocation6 + $0x60] sm:$0xff] %v6244_v5 }
 0x557   : > { %v6332_v3 = vadd.f32 %v9759_v55, %v6312_v33 }
 0x559   : > { %v6348_v63 = vadd.f32 %v7985_v25, %v6332_v3 }
 0x55b   : > { %v6364_v13 = vmax.f32 %v6348_v63, 0.0 }
 0x55d   : > { %6380 = vst [vmem:[%s8515_s20 + $0x78] sm:$0xff] %v6364_v13 }
 0x55e PF: > { %s17_s28 = sadd.s32 1, %s8428_s28   ;;  %s9871_s24 = smov %s8420_s26 }
 0x55f   : > { %p14_p12 = scmp.ge.s32.totalorder %s17_s28, 6   ;;  %s9872_s25 = smov %s8424_s27 }
 0x560   : > { %s9873_s26 = smov %s9876_s29  ;;  %s9874_s27 = smov %s9880_s30 }
 0x561   :  { %16 = sbr.rel (!%p14_p12) target bundleno = 3 (0x3), region = 165 }
 0x566   :  { %6413 = vsyncmov [#allocation3] }
 0x569   :  { %s6414_s20 = vpop.sfrf %6413 }
 0x56a   :  { %p7988_p13 = scmp.ne.s32.totalorder %s6414_s20, 0 }
 0x56c   :  { %6418 = shalt.err (%p7988_p13)  }
 0x56d   :  { %6420 = vsyncmov [#allocation3 + $0x1] }
 0x570   :  { %s6421_s21 = vpop.sfrf %6420 }
 0x571   :  { %p7989_p0 = scmp.ne.s32.totalorder %s6421_s21, 0 }
 0x573   :  { %6425 = shalt.err (%p7989_p0)  }

</bundles_post_ra>
